<compile_context>
chip_gen: v7x
topology: tpu7x:2x2x1
jax: 0.10.0
libtpu: 0.0.40
codegen_flags: <defaults>
</compile_context>

<pallas_src>
import functools

import jax
import jax.numpy as jnp
from jax.experimental import pallas as pl
from jax.experimental.pallas import tpu as pltpu


# ------------------------------- utilities ---------------------------------

VMEM_LIMIT = 32 * 1024 * 1024     # scoped-VMEM budget valid on v5e/v6e/v7x


def _round_up(x, m):
    return ((x + m - 1) // m) * m


def _pick_tile(dim, pref, align):
    """Largest tile <= pref that divides `dim` and is `align`-aligned (else full dim)."""
    if dim <= pref:
        return dim
    t = (pref // align) * align
    while t >= align:
        if dim % t == 0:
            return t
        t -= align
    return dim


def _largest_divisor_leq(n, cap):
    for d in range(min(cap, n), 0, -1):
        if n % d == 0:
            return d
    return 1


def _pad_k(k):
    # K padding quantum: large K is padded so tk=1024 divides it exactly.
    return _round_up(k, 1024) if k > 1024 else _round_up(k, 128)


# --------------------- tiled matmul + bias + ReLU kernel --------------------

def _matmul_bias_kernel(a_ref, w_ref, b_ref, o_ref, acc_ref, *, apply_relu):
    @pl.when(pl.program_id(2) == 0)
    def _init():
        acc_ref[...] = jnp.zeros_like(acc_ref)

    acc_ref[...] += jnp.dot(a_ref[...], w_ref[...],
                            preferred_element_type=jnp.float32)

    @pl.when(pl.program_id(2) == pl.num_programs(2) - 1)
    def _finalize():
        acc = acc_ref[...] + b_ref[...]          # bias in f32
        if apply_relu:
            acc = jnp.maximum(acc, 0.0)
        o_ref[...] = acc.astype(o_ref.dtype)


def linear_pallas(a, w, b2, *, relu, out_dtype=jnp.bfloat16):
    """o = relu?(a @ w + b).  `w` (Kp, Np) and `b2` (1, Np) are pre-padded to
    lane-dense multiples of 128.  Returns the padded (M, Np) result."""
    m, ka = a.shape
    kp, np_ = w.shape

    a = a.astype(jnp.bfloat16)
    if ka < kp:                                   # zero-pad K (padded W rows are zero too)
        a = jnp.pad(a, ((0, 0), (0, kp - ka)))
    mp = _round_up(max(m, 8), 8)
    if mp != m:
        a = jnp.pad(a, ((0, mp - m), (0, 0)))

    tm = _pick_tile(mp, 256, 8)
    tn = _pick_tile(np_, 512, 128)
    tk = _pick_tile(kp, 1024, 128)
    grid = (mp // tm, np_ // tn, kp // tk)

    cost = pl.CostEstimate(
        flops=2 * mp * np_ * kp,
        transcendentals=0,
        bytes_accessed=mp * kp * 2 + kp * np_ * 2
        + mp * np_ * jnp.dtype(out_dtype).itemsize)

    out = pl.pallas_call(
        functools.partial(_matmul_bias_kernel, apply_relu=relu),
        grid=grid,
        in_specs=[
            pl.BlockSpec((tm, tk), lambda i, j, k: (i, k)),
            pl.BlockSpec((tk, tn), lambda i, j, k: (k, j)),
            pl.BlockSpec((1, tn), lambda i, j, k: (0, j)),
        ],
        out_specs=pl.BlockSpec((tm, tn), lambda i, j, k: (i, j)),
        out_shape=jax.ShapeDtypeStruct((mp, np_), out_dtype),
        scratch_shapes=[pltpu.VMEM((tm, tn), jnp.float32)],
        compiler_params=pltpu.CompilerParams(
            dimension_semantics=("parallel", "parallel", "arbitrary"),
            vmem_limit_bytes=VMEM_LIMIT),
        cost_estimate=cost,
    )(a, w, b2)
    return out[:m] if mp != m else out


# ---------------- fused Conv2d(2x2) + ReLU + 2x2 max-pool kernel ------------

def _conv2x2_relu_pool_kernel(x_ref, w_ref, b_ref, o_ref):
    """One image; each grid step on axis 1 produces TR pooled output rows.

    x_ref: (1, H, W, Cin)   whole image (stays VMEM-resident across axis 1)
    w_ref: (4, Cin, Cout)   index = 2*kh + kw
    b_ref: (1, Cout) f32
    o_ref: (1, TR, WP, Cout)
    """
    w_in = x_ref.shape[2]
    tr, wp = o_ref.shape[1], o_ref.shape[2]
    wo = w_in - 1                                 # conv output width (valid conv)

    ws = [w_ref[i] for i in range(4)]             # (Cin, Cout) bf16 each
    bias = b_ref[...]                             # (1, Cout) f32

    # Even-column selection matrix (horizontal 2:1 downsample done as an exact
    # MXU matmul -> keeps the store lane-dense, no strided vector slicing).
    qq = jax.lax.broadcasted_iota(jnp.int32, (wp, wo - 1), 0)
    ii = jax.lax.broadcasted_iota(jnp.int32, (wp, wo - 1), 1)
    sel = (ii == 2 * qq).astype(jnp.bfloat16)

    def conv_row(r):
        # Full-width conv output row r: 4 accumulated shifted (wo,Cin)@(Cin,Cout) dots.
        acc = None
        for kh in range(2):
            for kw in range(2):
                a = x_ref[0, r + kh, pl.ds(kw, wo), :]
                d = jnp.dot(a, ws[2 * kh + kw],
                            preferred_element_type=jnp.float32)
                acc = d if acc is None else acc + d
        return acc                                # (wo, Cout) f32

    for t in range(tr):
        ph = pl.program_id(1) * tr + t            # pooled output row index
        r0 = 2 * ph
        v = jnp.maximum(conv_row(r0), conv_row(r0 + 1))        # vertical window max
        pair = jnp.maximum(v[: wo - 1, :], v[1:, :])           # horizontal pair max
        # bias + ReLU commute with the window max (same bias, monotone ReLU).
        act = jnp.maximum(pair + bias, 0.0).astype(jnp.bfloat16)
        pooled = jnp.dot(sel, act, preferred_element_type=jnp.float32)
        o_ref[0, t] = pooled.astype(o_ref.dtype)


def conv2x2_relu_pool_pallas(x, w4, b2):
    """Fused Conv2d(k=2, stride=1, valid) + ReLU + max_pool2d(2,2) (floor).
    x: (N, H, W, Cin) bf16 NHWC; w4: (4, Cin, Cout) bf16; b2: (1, Cout) f32.
    Returns (N, hp, wp, Cout) bf16."""
    n, h, w, cin = x.shape
    cout = w4.shape[-1]
    hp, wp = (h - 1) // 2, (w - 1) // 2
    tr = _largest_divisor_leq(hp, 8)              # pooled rows per grid step
    grid = (n, hp // tr)

    cost = pl.CostEstimate(
        flops=2 * n * (h - 1) * (w - 1) * 4 * cin * cout,
        transcendentals=0,
        bytes_accessed=x.size * 2 + w4.size * 2 + n * hp * wp * cout * 2)

    return pl.pallas_call(
        _conv2x2_relu_pool_kernel,
        grid=grid,
        in_specs=[
            pl.BlockSpec((1, h, w, cin), lambda b, r: (b, 0, 0, 0)),  # whole image
            pl.BlockSpec((4, cin, cout), lambda b, r: (0, 0, 0)),
            pl.BlockSpec((1, cout), lambda b, r: (0, 0)),
        ],
        out_specs=pl.BlockSpec((1, tr, wp, cout), lambda b, r: (b, r, 0, 0)),
        out_shape=jax.ShapeDtypeStruct((n, hp, wp, cout), jnp.bfloat16),
        compiler_params=pltpu.CompilerParams(
            dimension_semantics=("parallel", "arbitrary"),
            vmem_limit_bytes=VMEM_LIMIT),
        cost_estimate=cost,
    )(x, w4, b2)


# ------------------------------ params / forward ----------------------------

def init_params(key, hin):
    # Mimic Lego.__init__: derive fc1's input dim from the conv stack at size hin.
    h1 = hin - 1          # conv1 (k=2, valid)
    p1 = h1 // 2          # max_pool2d 2x2
    h2 = p1 - 1           # conv2
    p2 = h2 // 2          # max_pool2d 2x2
    to_linear = 64 * p2 * p2

    ks = jax.random.split(key, 10)

    def u(k, shape, fan_in):
        lim = 1.0 / (fan_in ** 0.5)
        return jax.random.uniform(k, shape, jnp.float32, -lim, lim)

    def conv_w(k, cin, cout):
        w = u(k, (2, 2, cin, cout), 4 * cin)      # (kh, kw, cin, cout)
        return w.reshape(4, cin, cout).astype(jnp.bfloat16)

    def fc_w(k, kin, nout, kpad, npad):
        w = u(k, (kin, nout), kin)
        return jnp.pad(w, ((0, kpad - kin), (0, npad - nout))).astype(jnp.bfloat16)

    def fc_b(k, nout, npad, fan_in):
        b = u(k, (nout,), fan_in)
        return jnp.pad(b, (0, npad - nout)).reshape(1, npad).astype(jnp.float32)

    k1p = _pad_k(to_linear)                        # 3136 -> 4096 at hin=32
    params = {
        "conv1_w": conv_w(ks[0], 3, 32),
        "conv1_b": u(ks[1], (32,), 12).reshape(1, 32).astype(jnp.float32),
        "conv2_w": conv_w(ks[2], 32, 64),
        "conv2_b": u(ks[3], (64,), 128).reshape(1, 64).astype(jnp.float32),
        # fc1 rows are laid out in NHWC-flatten (h, w, c) order; loading real
        # PyTorch weights (NCHW flatten) would need a one-time row permutation.
        "fc1_w": fc_w(ks[4], to_linear, 300, k1p, 384),
        "fc1_b": fc_b(ks[5], 300, 384, to_linear),
        "fc2_w": fc_w(ks[6], 300, 100, 384, 128),
        "fc2_b": fc_b(ks[7], 100, 128, 300),
        "fc3_w": fc_w(ks[8], 100, 2, 128, 128),
        "fc3_b": fc_b(ks[9], 2, 128, 100),
    }
    return params


def lego_forward(x_nchw, params):
    n = x_nchw.shape[0]
    # NCHW -> NHWC once (channels on the TPU lane dim), cast to bf16 once.
    x = jnp.transpose(x_nchw, (0, 2, 3, 1)).astype(jnp.bfloat16)

    # convs(): conv -> relu -> maxpool, fused into one Pallas kernel per stage.
    p = conv2x2_relu_pool_pallas(x, params["conv1_w"], params["conv1_b"])
    p = conv2x2_relu_pool_pallas(p, params["conv2_w"], params["conv2_b"])

    # PyTorch flattens NCHW; fc1_w rows were initialized in NHWC-flatten order,
    # so a plain (free) reshape suffices - no runtime transpose.
    flat = p.reshape(n, -1)

    # TODO(synk): nn.Dropout(p=0.75) is stochastic in train mode; implemented as
    # the eval-mode identity here (deterministic forward).
    h = linear_pallas(flat, params["fc1_w"], params["fc1_b"], relu=True)
    h = linear_pallas(h, params["fc2_w"], params["fc2_b"], relu=True)
    out = linear_pallas(h, params["fc3_w"], params["fc3_b"], relu=False,
                        out_dtype=jnp.float32)
    return out[:, :2]                              # true logits (stores were lane-dense)


# ------------------------------ pure-JAX reference --------------------------

def _ref_forward(x_nchw, params):
    x = jnp.transpose(x_nchw, (0, 2, 3, 1)).astype(jnp.bfloat16)

    def conv_relu_pool(x, w4, b2):
        n, h, w, cin = x.shape
        ho, wo = h - 1, w - 1
        hp, wp = ho // 2, wo // 2
        wm = w4.reshape(-1, w4.shape[-1]).astype(jnp.float32)   # (4*cin, cout)
        cols = jnp.concatenate(
            [x[:, kh:kh + ho, kw:kw + wo, :] for kh in range(2) for kw in range(2)],
            axis=-1).astype(jnp.float32)
        y = jnp.einsum("nhwi,io->nhwo", cols, wm) + b2[0]
        y = jnp.maximum(y, 0.0)
        y = y[:, :2 * hp, :2 * wp, :].reshape(n, hp, 2, wp, 2, -1).max(axis=(2, 4))
        return y.astype(jnp.bfloat16)

    p = conv_relu_pool(x, params["conv1_w"], params["conv1_b"])
    p = conv_relu_pool(p, params["conv2_w"], params["conv2_b"])
    flat = p.reshape(p.shape[0], -1).astype(jnp.float32)

    def fc(a, w, b2, relu):
        kp = w.shape[0]
        a = jnp.pad(a, ((0, 0), (0, kp - a.shape[1])))
        y = a @ w.astype(jnp.float32) + b2[0]
        return jnp.maximum(y, 0.0) if relu else y

    h = fc(flat, params["fc1_w"], params["fc1_b"], True).astype(jnp.bfloat16).astype(jnp.float32)
    h = fc(h, params["fc2_w"], params["fc2_b"], True).astype(jnp.bfloat16).astype(jnp.float32)
    out = fc(h, params["fc3_w"], params["fc3_b"], False)
    return out[:, :2]


# ----------------------------------- main ------------------------------------

if __name__ == "__main__":
    key = jax.random.PRNGKey(0)
    kparam, kx = jax.random.split(key)

    HIN = 32       # small spatial size; module uses 224 - fc1 dims derived identically
    BATCH = 2
    params = init_params(kparam, HIN)
    x = jax.random.normal(kx, (BATCH, 3, HIN, HIN), jnp.float32)   # NCHW like PyTorch

    fwd = jax.jit(lego_forward)
    out = jax.block_until_ready(fwd(x, params))
    assert out.shape == (BATCH, 2), out.shape
    assert bool(jnp.all(jnp.isfinite(out)))

    ref = _ref_forward(x, params)
    assert bool(jnp.allclose(out, ref, rtol=2e-2, atol=2e-2)), (out, ref)
    print("KERNEL_OK")
</pallas_src>

<mosaic_0001>
module attributes {stable_mosaic.version = 11 : i64} {
  func.func @_conv2x2_relu_pool_kernel(%arg0: i32, %arg1: i32, %arg2: memref<1x32x32x3xbf16, #tpu.memory_space<vmem>>, %arg3: memref<4x3x32xbf16, #tpu.memory_space<vmem>>, %arg4: memref<1x32xf32, #tpu.memory_space<vmem>>, %arg5: memref<1x5x15x32xbf16, #tpu.memory_space<vmem>>) attributes {dimension_semantics = [#tpu.dimension_semantics<parallel>, #tpu.dimension_semantics<arbitrary>], iteration_bounds = array<i64: 2, 3>, scalar_prefetch = 0 : i64, scratch_operands = 0 : i64, tpu.core_type = #tpu.core_type<tc>, window_params = [{transform_indices = @transform_0, window_bounds = array<i64: 1, 32, 32, 3>}, {pipeline_mode = #tpu.pipeline_mode<synchronous>, transform_indices = @transform_1, window_bounds = array<i64: 4, 3, 32>}, {pipeline_mode = #tpu.pipeline_mode<synchronous>, transform_indices = @transform_2, window_bounds = array<i64: 1, 32>}, {transform_indices = @transform_3, window_bounds = array<i64: 1, 5, 15, 32>}]} {
    %c0 = arith.constant 0 : index
    %c0_0 = arith.constant 0 : index
    %c0_1 = arith.constant 0 : index
    %0 = vector.load %arg3[%c0, %c0_0, %c0_1] : memref<4x3x32xbf16, #tpu.memory_space<vmem>>, vector<1x3x32xbf16>
    %1 = vector.shape_cast %0 : vector<1x3x32xbf16> to vector<3x32xbf16>
    %c1 = arith.constant 1 : index
    %c0_2 = arith.constant 0 : index
    %c0_3 = arith.constant 0 : index
    %2 = vector.load %arg3[%c1, %c0_2, %c0_3] : memref<4x3x32xbf16, #tpu.memory_space<vmem>>, vector<1x3x32xbf16>
    %3 = vector.shape_cast %2 : vector<1x3x32xbf16> to vector<3x32xbf16>
    %c2 = arith.constant 2 : index
    %c0_4 = arith.constant 0 : index
    %c0_5 = arith.constant 0 : index
    %4 = vector.load %arg3[%c2, %c0_4, %c0_5] : memref<4x3x32xbf16, #tpu.memory_space<vmem>>, vector<1x3x32xbf16>
    %5 = vector.shape_cast %4 : vector<1x3x32xbf16> to vector<3x32xbf16>
    %c3 = arith.constant 3 : index
    %c0_6 = arith.constant 0 : index
    %c0_7 = arith.constant 0 : index
    %6 = vector.load %arg3[%c3, %c0_6, %c0_7] : memref<4x3x32xbf16, #tpu.memory_space<vmem>>, vector<1x3x32xbf16>
    %7 = vector.shape_cast %6 : vector<1x3x32xbf16> to vector<3x32xbf16>
    %c0_8 = arith.constant 0 : index
    %c0_9 = arith.constant 0 : index
    %8 = vector.load %arg4[%c0_8, %c0_9] : memref<1x32xf32, #tpu.memory_space<vmem>>, vector<1x32xf32>
    %9 = tpu.iota {dimensions = array<i32: 0>} : vector<15x30xi32>
    %10 = tpu.iota {dimensions = array<i32: 1>} : vector<15x30xi32>
    %c2_i32 = arith.constant 2 : i32
    %11 = vector.broadcast %c2_i32 : i32 to vector<15x30xi32>
    %12 = arith.muli %11, %9 : vector<15x30xi32>
    %13 = arith.cmpi eq, %10, %12 : vector<15x30xi32>
    %14 = arith.extui %13 : vector<15x30xi1> to vector<15x30xi32>
    %15 = arith.sitofp %14 : vector<15x30xi32> to vector<15x30xf32>
    %16 = arith.truncf %15 : vector<15x30xf32> to vector<15x30xbf16>
    %c5_i32 = arith.constant 5 : i32
    %17 = arith.muli %arg1, %c5_i32 : i32
    %c0_i32 = arith.constant 0 : i32
    %18 = arith.addi %17, %c0_i32 : i32
    %c2_i32_10 = arith.constant 2 : i32
    %19 = arith.muli %c2_i32_10, %18 : i32
    %c0_i32_11 = arith.constant 0 : i32
    %20 = arith.addi %19, %c0_i32_11 : i32
    %c0_12 = arith.constant 0 : index
    %21 = arith.index_cast %20 : i32 to index
    %c0_13 = arith.constant 0 : index
    %c0_14 = arith.constant 0 : index
    %22 = vector.load %arg2[%c0_12, %21, %c0_13, %c0_14] : memref<1x32x32x3xbf16, #tpu.memory_space<vmem>>, vector<1x1x31x3xbf16>
    %23 = vector.shape_cast %22 : vector<1x1x31x3xbf16> to vector<31x3xbf16>
    %cst = arith.constant dense<0.000000e+00> : vector<31x32xf32>
    %24 = tpu.matmul %23, %1, %cst {dimension_numbers = #tpu.dot_dimension_numbers<[1], [0], [0], [1], [0, 0, 1, 1], [], []>} : vector<31x3xbf16>, vector<3x32xbf16>, vector<31x32xf32> -> vector<31x32xf32>
    %c0_i32_15 = arith.constant 0 : i32
    %25 = arith.addi %19, %c0_i32_15 : i32
    %c0_16 = arith.constant 0 : index
    %26 = arith.index_cast %25 : i32 to index
    %c1_17 = arith.constant 1 : index
    %c0_18 = arith.constant 0 : index
    %27 = vector.load %arg2[%c0_16, %26, %c1_17, %c0_18] : memref<1x32x32x3xbf16, #tpu.memory_space<vmem>>, vector<1x1x31x3xbf16>
    %28 = vector.shape_cast %27 : vector<1x1x31x3xbf16> to vector<31x3xbf16>
    %cst_19 = arith.constant dense<0.000000e+00> : vector<31x32xf32>
    %29 = tpu.matmul %28, %3, %cst_19 {dimension_numbers = #tpu.dot_dimension_numbers<[1], [0], [0], [1], [0, 0, 1, 1], [], []>} : vector<31x3xbf16>, vector<3x32xbf16>, vector<31x32xf32> -> vector<31x32xf32>
    %30 = arith.addf %24, %29 : vector<31x32xf32>
    %c1_i32 = arith.constant 1 : i32
    %31 = arith.addi %19, %c1_i32 : i32
    %c0_20 = arith.constant 0 : index
    %32 = arith.index_cast %31 : i32 to index
    %c0_21 = arith.constant 0 : index
    %c0_22 = arith.constant 0 : index
    %33 = vector.load %arg2[%c0_20, %32, %c0_21, %c0_22] : memref<1x32x32x3xbf16, #tpu.memory_space<vmem>>, vector<1x1x31x3xbf16>
    %34 = vector.shape_cast %33 : vector<1x1x31x3xbf16> to vector<31x3xbf16>
    %cst_23 = arith.constant dense<0.000000e+00> : vector<31x32xf32>
    %35 = tpu.matmul %34, %5, %cst_23 {dimension_numbers = #tpu.dot_dimension_numbers<[1], [0], [0], [1], [0, 0, 1, 1], [], []>} : vector<31x3xbf16>, vector<3x32xbf16>, vector<31x32xf32> -> vector<31x32xf32>
    %36 = arith.addf %30, %35 : vector<31x32xf32>
    %c1_i32_24 = arith.constant 1 : i32
    %37 = arith.addi %19, %c1_i32_24 : i32
    %c0_25 = arith.constant 0 : index
    %38 = arith.index_cast %37 : i32 to index
    %c1_26 = arith.constant 1 : index
    %c0_27 = arith.constant 0 : index
    %39 = vector.load %arg2[%c0_25, %38, %c1_26, %c0_27] : memref<1x32x32x3xbf16, #tpu.memory_space<vmem>>, vector<1x1x31x3xbf16>
    %40 = vector.shape_cast %39 : vector<1x1x31x3xbf16> to vector<31x3xbf16>
    %cst_28 = arith.constant dense<0.000000e+00> : vector<31x32xf32>
    %41 = tpu.matmul %40, %7, %cst_28 {dimension_numbers = #tpu.dot_dimension_numbers<[1], [0], [0], [1], [0, 0, 1, 1], [], []>} : vector<31x3xbf16>, vector<3x32xbf16>, vector<31x32xf32> -> vector<31x32xf32>
    %42 = arith.addf %36, %41 : vector<31x32xf32>
    %c1_i32_29 = arith.constant 1 : i32
    %43 = arith.addi %19, %c1_i32_29 : i32
    %c0_i32_30 = arith.constant 0 : i32
    %44 = arith.addi %43, %c0_i32_30 : i32
    %c0_31 = arith.constant 0 : index
    %45 = arith.index_cast %44 : i32 to index
    %c0_32 = arith.constant 0 : index
    %c0_33 = arith.constant 0 : index
    %46 = vector.load %arg2[%c0_31, %45, %c0_32, %c0_33] : memref<1x32x32x3xbf16, #tpu.memory_space<vmem>>, vector<1x1x31x3xbf16>
    %47 = vector.shape_cast %46 : vector<1x1x31x3xbf16> to vector<31x3xbf16>
    %cst_34 = arith.constant dense<0.000000e+00> : vector<31x32xf32>
    %48 = tpu.matmul %47, %1, %cst_34 {dimension_numbers = #tpu.dot_dimension_numbers<[1], [0], [0], [1], [0, 0, 1, 1], [], []>} : vector<31x3xbf16>, vector<3x32xbf16>, vector<31x32xf32> -> vector<31x32xf32>
    %c0_i32_35 = arith.constant 0 : i32
    %49 = arith.addi %43, %c0_i32_35 : i32
    %c0_36 = arith.constant 0 : index
    %50 = arith.index_cast %49 : i32 to index
    %c1_37 = arith.constant 1 : index
    %c0_38 = arith.constant 0 : index
    %51 = vector.load %arg2[%c0_36, %50, %c1_37, %c0_38] : memref<1x32x32x3xbf16, #tpu.memory_space<vmem>>, vector<1x1x31x3xbf16>
    %52 = vector.shape_cast %51 : vector<1x1x31x3xbf16> to vector<31x3xbf16>
    %cst_39 = arith.constant dense<0.000000e+00> : vector<31x32xf32>
    %53 = tpu.matmul %52, %3, %cst_39 {dimension_numbers = #tpu.dot_dimension_numbers<[1], [0], [0], [1], [0, 0, 1, 1], [], []>} : vector<31x3xbf16>, vector<3x32xbf16>, vector<31x32xf32> -> vector<31x32xf32>
    %54 = arith.addf %48, %53 : vector<31x32xf32>
    %c1_i32_40 = arith.constant 1 : i32
    %55 = arith.addi %43, %c1_i32_40 : i32
    %c0_41 = arith.constant 0 : index
    %56 = arith.index_cast %55 : i32 to index
    %c0_42 = arith.constant 0 : index
    %c0_43 = arith.constant 0 : index
    %57 = vector.load %arg2[%c0_41, %56, %c0_42, %c0_43] : memref<1x32x32x3xbf16, #tpu.memory_space<vmem>>, vector<1x1x31x3xbf16>
    %58 = vector.shape_cast %57 : vector<1x1x31x3xbf16> to vector<31x3xbf16>
    %cst_44 = arith.constant dense<0.000000e+00> : vector<31x32xf32>
    %59 = tpu.matmul %58, %5, %cst_44 {dimension_numbers = #tpu.dot_dimension_numbers<[1], [0], [0], [1], [0, 0, 1, 1], [], []>} : vector<31x3xbf16>, vector<3x32xbf16>, vector<31x32xf32> -> vector<31x32xf32>
    %60 = arith.addf %54, %59 : vector<31x32xf32>
    %c1_i32_45 = arith.constant 1 : i32
    %61 = arith.addi %43, %c1_i32_45 : i32
    %c0_46 = arith.constant 0 : index
    %62 = arith.index_cast %61 : i32 to index
    %c1_47 = arith.constant 1 : index
    %c0_48 = arith.constant 0 : index
    %63 = vector.load %arg2[%c0_46, %62, %c1_47, %c0_48] : memref<1x32x32x3xbf16, #tpu.memory_space<vmem>>, vector<1x1x31x3xbf16>
    %64 = vector.shape_cast %63 : vector<1x1x31x3xbf16> to vector<31x3xbf16>
    %cst_49 = arith.constant dense<0.000000e+00> : vector<31x32xf32>
    %65 = tpu.matmul %64, %7, %cst_49 {dimension_numbers = #tpu.dot_dimension_numbers<[1], [0], [0], [1], [0, 0, 1, 1], [], []>} : vector<31x3xbf16>, vector<3x32xbf16>, vector<31x32xf32> -> vector<31x32xf32>
    %66 = arith.addf %60, %65 : vector<31x32xf32>
    %67 = arith.maximumf %42, %66 : vector<31x32xf32>
    %68 = vector.extract_strided_slice %67 {offsets = [0, 0], sizes = [30, 32], strides = [1, 1]} : vector<31x32xf32> to vector<30x32xf32>
    %69 = vector.extract_strided_slice %67 {offsets = [1, 0], sizes = [30, 32], strides = [1, 1]} : vector<31x32xf32> to vector<30x32xf32>
    %70 = arith.maximumf %68, %69 : vector<30x32xf32>
    %71 = vector.broadcast %8 : vector<1x32xf32> to vector<30x32xf32>
    %72 = arith.addf %70, %71 : vector<30x32xf32>
    %cst_50 = arith.constant 0.000000e+00 : f32
    %73 = vector.broadcast %cst_50 : f32 to vector<30x32xf32>
    %74 = arith.maximumf %72, %73 : vector<30x32xf32>
    %75 = arith.truncf %74 : vector<30x32xf32> to vector<30x32xbf16>
    %cst_51 = arith.constant dense<0.000000e+00> : vector<15x32xf32>
    %76 = tpu.matmul %16, %75, %cst_51 {dimension_numbers = #tpu.dot_dimension_numbers<[1], [0], [0], [1], [0, 0, 1, 1], [], []>} : vector<15x30xbf16>, vector<30x32xbf16>, vector<15x32xf32> -> vector<15x32xf32>
    %77 = arith.truncf %76 : vector<15x32xf32> to vector<15x32xbf16>
    %c0_52 = arith.constant 0 : index
    %c0_53 = arith.constant 0 : index
    %c0_54 = arith.constant 0 : index
    %c0_55 = arith.constant 0 : index
    %78 = vector.load %arg5[%c0_52, %c0_53, %c0_54, %c0_55] : memref<1x5x15x32xbf16, #tpu.memory_space<vmem>>, vector<1x1x15x32xbf16>
    %79 = vector.shape_cast %78 : vector<1x1x15x32xbf16> to vector<15x32xbf16>
    %80 = vector.shape_cast %77 : vector<15x32xbf16> to vector<1x1x15x32xbf16>
    tpu.vector_store %arg5[%c0_52, %c0_53, %c0_54, %c0_55], %80 {strides = array<i32>} : memref<1x5x15x32xbf16, #tpu.memory_space<vmem>>, vector<1x1x15x32xbf16>,
    %c5_i32_56 = arith.constant 5 : i32
    %81 = arith.muli %arg1, %c5_i32_56 : i32
    %c1_i32_57 = arith.constant 1 : i32
    %82 = arith.addi %81, %c1_i32_57 : i32
    %c2_i32_58 = arith.constant 2 : i32
    %83 = arith.muli %c2_i32_58, %82 : i32
    %c0_i32_59 = arith.constant 0 : i32
    %84 = arith.addi %83, %c0_i32_59 : i32
    %c0_60 = arith.constant 0 : index
    %85 = arith.index_cast %84 : i32 to index
    %c0_61 = arith.constant 0 : index
    %c0_62 = arith.constant 0 : index
    %86 = vector.load %arg2[%c0_60, %85, %c0_61, %c0_62] : memref<1x32x32x3xbf16, #tpu.memory_space<vmem>>, vector<1x1x31x3xbf16>
    %87 = vector.shape_cast %86 : vector<1x1x31x3xbf16> to vector<31x3xbf16>
    %cst_63 = arith.constant dense<0.000000e+00> : vector<31x32xf32>
    %88 = tpu.matmul %87, %1, %cst_63 {dimension_numbers = #tpu.dot_dimension_numbers<[1], [0], [0], [1], [0, 0, 1, 1], [], []>} : vector<31x3xbf16>, vector<3x32xbf16>, vector<31x32xf32> -> vector<31x32xf32>
    %c0_i32_64 = arith.constant 0 : i32
    %89 = arith.addi %83, %c0_i32_64 : i32
    %c0_65 = arith.constant 0 : index
    %90 = arith.index_cast %89 : i32 to index
    %c1_66 = arith.constant 1 : index
    %c0_67 = arith.constant 0 : index
    %91 = vector.load %arg2[%c0_65, %90, %c1_66, %c0_67] : memref<1x32x32x3xbf16, #tpu.memory_space<vmem>>, vector<1x1x31x3xbf16>
    %92 = vector.shape_cast %91 : vector<1x1x31x3xbf16> to vector<31x3xbf16>
    %cst_68 = arith.constant dense<0.000000e+00> : vector<31x32xf32>
    %93 = tpu.matmul %92, %3, %cst_68 {dimension_numbers = #tpu.dot_dimension_numbers<[1], [0], [0], [1], [0, 0, 1, 1], [], []>} : vector<31x3xbf16>, vector<3x32xbf16>, vector<31x32xf32> -> vector<31x32xf32>
    %94 = arith.addf %88, %93 : vector<31x32xf32>
    %c1_i32_69 = arith.constant 1 : i32
    %95 = arith.addi %83, %c1_i32_69 : i32
    %c0_70 = arith.constant 0 : index
    %96 = arith.index_cast %95 : i32 to index
    %c0_71 = arith.constant 0 : index
    %c0_72 = arith.constant 0 : index
    %97 = vector.load %arg2[%c0_70, %96, %c0_71, %c0_72] : memref<1x32x32x3xbf16, #tpu.memory_space<vmem>>, vector<1x1x31x3xbf16>
    %98 = vector.shape_cast %97 : vector<1x1x31x3xbf16> to vector<31x3xbf16>
    %cst_73 = arith.constant dense<0.000000e+00> : vector<31x32xf32>
    %99 = tpu.matmul %98, %5, %cst_73 {dimension_numbers = #tpu.dot_dimension_numbers<[1], [0], [0], [1], [0, 0, 1, 1], [], []>} : vector<31x3xbf16>, vector<3x32xbf16>, vector<31x32xf32> -> vector<31x32xf32>
    %100 = arith.addf %94, %99 : vector<31x32xf32>
    %c1_i32_74 = arith.constant 1 : i32
    %101 = arith.addi %83, %c1_i32_74 : i32
    %c0_75 = arith.constant 0 : index
    %102 = arith.index_cast %101 : i32 to index
    %c1_76 = arith.constant 1 : index
    %c0_77 = arith.constant 0 : index
    %103 = vector.load %arg2[%c0_75, %102, %c1_76, %c0_77] : memref<1x32x32x3xbf16, #tpu.memory_space<vmem>>, vector<1x1x31x3xbf16>
    %104 = vector.shape_cast %103 : vector<1x1x31x3xbf16> to vector<31x3xbf16>
    %cst_78 = arith.constant dense<0.000000e+00> : vector<31x32xf32>
    %105 = tpu.matmul %104, %7, %cst_78 {dimension_numbers = #tpu.dot_dimension_numbers<[1], [0], [0], [1], [0, 0, 1, 1], [], []>} : vector<31x3xbf16>, vector<3x32xbf16>, vector<31x32xf32> -> vector<31x32xf32>
    %106 = arith.addf %100, %105 : vector<31x32xf32>
    %c1_i32_79 = arith.constant 1 : i32
    %107 = arith.addi %83, %c1_i32_79 : i32
    %c0_i32_80 = arith.constant 0 : i32
    %108 = arith.addi %107, %c0_i32_80 : i32
    %c0_81 = arith.constant 0 : index
    %109 = arith.index_cast %108 : i32 to index
    %c0_82 = arith.constant 0 : index
    %c0_83 = arith.constant 0 : index
    %110 = vector.load %arg2[%c0_81, %109, %c0_82, %c0_83] : memref<1x32x32x3xbf16, #tpu.memory_space<vmem>>, vector<1x1x31x3xbf16>
    %111 = vector.shape_cast %110 : vector<1x1x31x3xbf16> to vector<31x3xbf16>
    %cst_84 = arith.constant dense<0.000000e+00> : vector<31x32xf32>
    %112 = tpu.matmul %111, %1, %cst_84 {dimension_numbers = #tpu.dot_dimension_numbers<[1], [0], [0], [1], [0, 0, 1, 1], [], []>} : vector<31x3xbf16>, vector<3x32xbf16>, vector<31x32xf32> -> vector<31x32xf32>
    %c0_i32_85 = arith.constant 0 : i32
    %113 = arith.addi %107, %c0_i32_85 : i32
    %c0_86 = arith.constant 0 : index
    %114 = arith.index_cast %113 : i32 to index
    %c1_87 = arith.constant 1 : index
    %c0_88 = arith.constant 0 : index
    %115 = vector.load %arg2[%c0_86, %114, %c1_87, %c0_88] : memref<1x32x32x3xbf16, #tpu.memory_space<vmem>>, vector<1x1x31x3xbf16>
    %116 = vector.shape_cast %115 : vector<1x1x31x3xbf16> to vector<31x3xbf16>
    %cst_89 = arith.constant dense<0.000000e+00> : vector<31x32xf32>
    %117 = tpu.matmul %116, %3, %cst_89 {dimension_numbers = #tpu.dot_dimension_numbers<[1], [0], [0], [1], [0, 0, 1, 1], [], []>} : vector<31x3xbf16>, vector<3x32xbf16>, vector<31x32xf32> -> vector<31x32xf32>
    %118 = arith.addf %112, %117 : vector<31x32xf32>
    %c1_i32_90 = arith.constant 1 : i32
    %119 = arith.addi %107, %c1_i32_90 : i32
    %c0_91 = arith.constant 0 : index
    %120 = arith.index_cast %119 : i32 to index
    %c0_92 = arith.constant 0 : index
    %c0_93 = arith.constant 0 : index
    %121 = vector.load %arg2[%c0_91, %120, %c0_92, %c0_93] : memref<1x32x32x3xbf16, #tpu.memory_space<vmem>>, vector<1x1x31x3xbf16>
    %122 = vector.shape_cast %121 : vector<1x1x31x3xbf16> to vector<31x3xbf16>
    %cst_94 = arith.constant dense<0.000000e+00> : vector<31x32xf32>
    %123 = tpu.matmul %122, %5, %cst_94 {dimension_numbers = #tpu.dot_dimension_numbers<[1], [0], [0], [1], [0, 0, 1, 1], [], []>} : vector<31x3xbf16>, vector<3x32xbf16>, vector<31x32xf32> -> vector<31x32xf32>
    %124 = arith.addf %118, %123 : vector<31x32xf32>
    %c1_i32_95 = arith.constant 1 : i32
    %125 = arith.addi %107, %c1_i32_95 : i32
    %c0_96 = arith.constant 0 : index
    %126 = arith.index_cast %125 : i32 to index
    %c1_97 = arith.constant 1 : index
    %c0_98 = arith.constant 0 : index
    %127 = vector.load %arg2[%c0_96, %126, %c1_97, %c0_98] : memref<1x32x32x3xbf16, #tpu.memory_space<vmem>>, vector<1x1x31x3xbf16>
    %128 = vector.shape_cast %127 : vector<1x1x31x3xbf16> to vector<31x3xbf16>
    %cst_99 = arith.constant dense<0.000000e+00> : vector<31x32xf32>
    %129 = tpu.matmul %128, %7, %cst_99 {dimension_numbers = #tpu.dot_dimension_numbers<[1], [0], [0], [1], [0, 0, 1, 1], [], []>} : vector<31x3xbf16>, vector<3x32xbf16>, vector<31x32xf32> -> vector<31x32xf32>
    %130 = arith.addf %124, %129 : vector<31x32xf32>
    %131 = arith.maximumf %106, %130 : vector<31x32xf32>
    %132 = vector.extract_strided_slice %131 {offsets = [0, 0], sizes = [30, 32], strides = [1, 1]} : vector<31x32xf32> to vector<30x32xf32>
    %133 = vector.extract_strided_slice %131 {offsets = [1, 0], sizes = [30, 32], strides = [1, 1]} : vector<31x32xf32> to vector<30x32xf32>
    %134 = arith.maximumf %132, %133 : vector<30x32xf32>
    %135 = vector.broadcast %8 : vector<1x32xf32> to vector<30x32xf32>
    %136 = arith.addf %134, %135 : vector<30x32xf32>
    %cst_100 = arith.constant 0.000000e+00 : f32
    %137 = vector.broadcast %cst_100 : f32 to vector<30x32xf32>
    %138 = arith.maximumf %136, %137 : vector<30x32xf32>
    %139 = arith.truncf %138 : vector<30x32xf32> to vector<30x32xbf16>
    %cst_101 = arith.constant dense<0.000000e+00> : vector<15x32xf32>
    %140 = tpu.matmul %16, %139, %cst_101 {dimension_numbers = #tpu.dot_dimension_numbers<[1], [0], [0], [1], [0, 0, 1, 1], [], []>} : vector<15x30xbf16>, vector<30x32xbf16>, vector<15x32xf32> -> vector<15x32xf32>
    %141 = arith.truncf %140 : vector<15x32xf32> to vector<15x32xbf16>
    %c0_102 = arith.constant 0 : index
    %c1_103 = arith.constant 1 : index
    %c0_104 = arith.constant 0 : index
    %c0_105 = arith.constant 0 : index
    %142 = vector.load %arg5[%c0_102, %c1_103, %c0_104, %c0_105] : memref<1x5x15x32xbf16, #tpu.memory_space<vmem>>, vector<1x1x15x32xbf16>
    %143 = vector.shape_cast %142 : vector<1x1x15x32xbf16> to vector<15x32xbf16>
    %144 = vector.shape_cast %141 : vector<15x32xbf16> to vector<1x1x15x32xbf16>
    tpu.vector_store %arg5[%c0_102, %c1_103, %c0_104, %c0_105], %144 {strides = array<i32>} : memref<1x5x15x32xbf16, #tpu.memory_space<vmem>>, vector<1x1x15x32xbf16>,
    %c5_i32_106 = arith.constant 5 : i32
    %145 = arith.muli %arg1, %c5_i32_106 : i32
    %c2_i32_107 = arith.constant 2 : i32
    %146 = arith.addi %145, %c2_i32_107 : i32
    %c2_i32_108 = arith.constant 2 : i32
    %147 = arith.muli %c2_i32_108, %146 : i32
    %c0_i32_109 = arith.constant 0 : i32
    %148 = arith.addi %147, %c0_i32_109 : i32
    %c0_110 = arith.constant 0 : index
    %149 = arith.index_cast %148 : i32 to index
    %c0_111 = arith.constant 0 : index
    %c0_112 = arith.constant 0 : index
    %150 = vector.load %arg2[%c0_110, %149, %c0_111, %c0_112] : memref<1x32x32x3xbf16, #tpu.memory_space<vmem>>, vector<1x1x31x3xbf16>
    %151 = vector.shape_cast %150 : vector<1x1x31x3xbf16> to vector<31x3xbf16>
    %cst_113 = arith.constant dense<0.000000e+00> : vector<31x32xf32>
    %152 = tpu.matmul %151, %1, %cst_113 {dimension_numbers = #tpu.dot_dimension_numbers<[1], [0], [0], [1], [0, 0, 1, 1], [], []>} : vector<31x3xbf16>, vector<3x32xbf16>, vector<31x32xf32> -> vector<31x32xf32>
    %c0_i32_114 = arith.constant 0 : i32
    %153 = arith.addi %147, %c0_i32_114 : i32
    %c0_115 = arith.constant 0 : index
    %154 = arith.index_cast %153 : i32 to index
    %c1_116 = arith.constant 1 : index
    %c0_117 = arith.constant 0 : index
    %155 = vector.load %arg2[%c0_115, %154, %c1_116, %c0_117] : memref<1x32x32x3xbf16, #tpu.memory_space<vmem>>, vector<1x1x31x3xbf16>
    %156 = vector.shape_cast %155 : vector<1x1x31x3xbf16> to vector<31x3xbf16>
    %cst_118 = arith.constant dense<0.000000e+00> : vector<31x32xf32>
    %157 = tpu.matmul %156, %3, %cst_118 {dimension_numbers = #tpu.dot_dimension_numbers<[1], [0], [0], [1], [0, 0, 1, 1], [], []>} : vector<31x3xbf16>, vector<3x32xbf16>, vector<31x32xf32> -> vector<31x32xf32>
    %158 = arith.addf %152, %157 : vector<31x32xf32>
    %c1_i32_119 = arith.constant 1 : i32
    %159 = arith.addi %147, %c1_i32_119 : i32
    %c0_120 = arith.constant 0 : index
    %160 = arith.index_cast %159 : i32 to index
    %c0_121 = arith.constant 0 : index
    %c0_122 = arith.constant 0 : index
    %161 = vector.load %arg2[%c0_120, %160, %c0_121, %c0_122] : memref<1x32x32x3xbf16, #tpu.memory_space<vmem>>, vector<1x1x31x3xbf16>
    %162 = vector.shape_cast %161 : vector<1x1x31x3xbf16> to vector<31x3xbf16>
    %cst_123 = arith.constant dense<0.000000e+00> : vector<31x32xf32>
    %163 = tpu.matmul %162, %5, %cst_123 {dimension_numbers = #tpu.dot_dimension_numbers<[1], [0], [0], [1], [0, 0, 1, 1], [], []>} : vector<31x3xbf16>, vector<3x32xbf16>, vector<31x32xf32> -> vector<31x32xf32>
    %164 = arith.addf %158, %163 : vector<31x32xf32>
    %c1_i32_124 = arith.constant 1 : i32
    %165 = arith.addi %147, %c1_i32_124 : i32
    %c0_125 = arith.constant 0 : index
    %166 = arith.index_cast %165 : i32 to index
    %c1_126 = arith.constant 1 : index
    %c0_127 = arith.constant 0 : index
    %167 = vector.load %arg2[%c0_125, %166, %c1_126, %c0_127] : memref<1x32x32x3xbf16, #tpu.memory_space<vmem>>, vector<1x1x31x3xbf16>
    %168 = vector.shape_cast %167 : vector<1x1x31x3xbf16> to vector<31x3xbf16>
    %cst_128 = arith.constant dense<0.000000e+00> : vector<31x32xf32>
    %169 = tpu.matmul %168, %7, %cst_128 {dimension_numbers = #tpu.dot_dimension_numbers<[1], [0], [0], [1], [0, 0, 1, 1], [], []>} : vector<31x3xbf16>, vector<3x32xbf16>, vector<31x32xf32> -> vector<31x32xf32>
    %170 = arith.addf %164, %169 : vector<31x32xf32>
    %c1_i32_129 = arith.constant 1 : i32
    %171 = arith.addi %147, %c1_i32_129 : i32
    %c0_i32_130 = arith.constant 0 : i32
    %172 = arith.addi %171, %c0_i32_130 : i32
    %c0_131 = arith.constant 0 : index
    %173 = arith.index_cast %172 : i32 to index
    %c0_132 = arith.constant 0 : index
    %c0_133 = arith.constant 0 : index
    %174 = vector.load %arg2[%c0_131, %173, %c0_132, %c0_133] : memref<1x32x32x3xbf16, #tpu.memory_space<vmem>>, vector<1x1x31x3xbf16>
    %175 = vector.shape_cast %174 : vector<1x1x31x3xbf16> to vector<31x3xbf16>
    %cst_134 = arith.constant dense<0.000000e+00> : vector<31x32xf32>
    %176 = tpu.matmul %175, %1, %cst_134 {dimension_numbers = #tpu.dot_dimension_numbers<[1], [0], [0], [1], [0, 0, 1, 1], [], []>} : vector<31x3xbf16>, vector<3x32xbf16>, vector<31x32xf32> -> vector<31x32xf32>
    %c0_i32_135 = arith.constant 0 : i32
    %177 = arith.addi %171, %c0_i32_135 : i32
    %c0_136 = arith.constant 0 : index
    %178 = arith.index_cast %177 : i32 to index
    %c1_137 = arith.constant 1 : index
    %c0_138 = arith.constant 0 : index
    %179 = vector.load %arg2[%c0_136, %178, %c1_137, %c0_138] : memref<1x32x32x3xbf16, #tpu.memory_space<vmem>>, vector<1x1x31x3xbf16>
    %180 = vector.shape_cast %179 : vector<1x1x31x3xbf16> to vector<31x3xbf16>
    %cst_139 = arith.constant dense<0.000000e+00> : vector<31x32xf32>
    %181 = tpu.matmul %180, %3, %cst_139 {dimension_numbers = #tpu.dot_dimension_numbers<[1], [0], [0], [1], [0, 0, 1, 1], [], []>} : vector<31x3xbf16>, vector<3x32xbf16>, vector<31x32xf32> -> vector<31x32xf32>
    %182 = arith.addf %176, %181 : vector<31x32xf32>
    %c1_i32_140 = arith.constant 1 : i32
    %183 = arith.addi %171, %c1_i32_140 : i32
    %c0_141 = arith.constant 0 : index
    %184 = arith.index_cast %183 : i32 to index
    %c0_142 = arith.constant 0 : index
    %c0_143 = arith.constant 0 : index
    %185 = vector.load %arg2[%c0_141, %184, %c0_142, %c0_143] : memref<1x32x32x3xbf16, #tpu.memory_space<vmem>>, vector<1x1x31x3xbf16>
    %186 = vector.shape_cast %185 : vector<1x1x31x3xbf16> to vector<31x3xbf16>
    %cst_144 = arith.constant dense<0.000000e+00> : vector<31x32xf32>
    %187 = tpu.matmul %186, %5, %cst_144 {dimension_numbers = #tpu.dot_dimension_numbers<[1], [0], [0], [1], [0, 0, 1, 1], [], []>} : vector<31x3xbf16>, vector<3x32xbf16>, vector<31x32xf32> -> vector<31x32xf32>
    %188 = arith.addf %182, %187 : vector<31x32xf32>
    %c1_i32_145 = arith.constant 1 : i32
    %189 = arith.addi %171, %c1_i32_145 : i32
    %c0_146 = arith.constant 0 : index
    %190 = arith.index_cast %189 : i32 to index
    %c1_147 = arith.constant 1 : index
    %c0_148 = arith.constant 0 : index
    %191 = vector.load %arg2[%c0_146, %190, %c1_147, %c0_148] : memref<1x32x32x3xbf16, #tpu.memory_space<vmem>>, vector<1x1x31x3xbf16>
    %192 = vector.shape_cast %191 : vector<1x1x31x3xbf16> to vector<31x3xbf16>
    %cst_149 = arith.constant dense<0.000000e+00> : vector<31x32xf32>
    %193 = tpu.matmul %192, %7, %cst_149 {dimension_numbers = #tpu.dot_dimension_numbers<[1], [0], [0], [1], [0, 0, 1, 1], [], []>} : vector<31x3xbf16>, vector<3x32xbf16>, vector<31x32xf32> -> vector<31x32xf32>
    %194 = arith.addf %188, %193 : vector<31x32xf32>
    %195 = arith.maximumf %170, %194 : vector<31x32xf32>
    %196 = vector.extract_strided_slice %195 {offsets = [0, 0], sizes = [30, 32], strides = [1, 1]} : vector<31x32xf32> to vector<30x32xf32>
    %197 = vector.extract_strided_slice %195 {offsets = [1, 0], sizes = [30, 32], strides = [1, 1]} : vector<31x32xf32> to vector<30x32xf32>
    %198 = arith.maximumf %196, %197 : vector<30x32xf32>
    %199 = vector.broadcast %8 : vector<1x32xf32> to vector<30x32xf32>
    %200 = arith.addf %198, %199 : vector<30x32xf32>
    %cst_150 = arith.constant 0.000000e+00 : f32
    %201 = vector.broadcast %cst_150 : f32 to vector<30x32xf32>
    %202 = arith.maximumf %200, %201 : vector<30x32xf32>
    %203 = arith.truncf %202 : vector<30x32xf32> to vector<30x32xbf16>
    %cst_151 = arith.constant dense<0.000000e+00> : vector<15x32xf32>
    %204 = tpu.matmul %16, %203, %cst_151 {dimension_numbers = #tpu.dot_dimension_numbers<[1], [0], [0], [1], [0, 0, 1, 1], [], []>} : vector<15x30xbf16>, vector<30x32xbf16>, vector<15x32xf32> -> vector<15x32xf32>
    %205 = arith.truncf %204 : vector<15x32xf32> to vector<15x32xbf16>
    %c0_152 = arith.constant 0 : index
    %c2_153 = arith.constant 2 : index
    %c0_154 = arith.constant 0 : index
    %c0_155 = arith.constant 0 : index
    %206 = vector.load %arg5[%c0_152, %c2_153, %c0_154, %c0_155] : memref<1x5x15x32xbf16, #tpu.memory_space<vmem>>, vector<1x1x15x32xbf16>
    %207 = vector.shape_cast %206 : vector<1x1x15x32xbf16> to vector<15x32xbf16>
    %208 = vector.shape_cast %205 : vector<15x32xbf16> to vector<1x1x15x32xbf16>
    tpu.vector_store %arg5[%c0_152, %c2_153, %c0_154, %c0_155], %208 {strides = array<i32>} : memref<1x5x15x32xbf16, #tpu.memory_space<vmem>>, vector<1x1x15x32xbf16>,
    %c5_i32_156 = arith.constant 5 : i32
    %209 = arith.muli %arg1, %c5_i32_156 : i32
    %c3_i32 = arith.constant 3 : i32
    %210 = arith.addi %209, %c3_i32 : i32
    %c2_i32_157 = arith.constant 2 : i32
    %211 = arith.muli %c2_i32_157, %210 : i32
    %c0_i32_158 = arith.constant 0 : i32
    %212 = arith.addi %211, %c0_i32_158 : i32
    %c0_159 = arith.constant 0 : index
    %213 = arith.index_cast %212 : i32 to index
    %c0_160 = arith.constant 0 : index
    %c0_161 = arith.constant 0 : index
    %214 = vector.load %arg2[%c0_159, %213, %c0_160, %c0_161] : memref<1x32x32x3xbf16, #tpu.memory_space<vmem>>, vector<1x1x31x3xbf16>
    %215 = vector.shape_cast %214 : vector<1x1x31x3xbf16> to vector<31x3xbf16>
    %cst_162 = arith.constant dense<0.000000e+00> : vector<31x32xf32>
    %216 = tpu.matmul %215, %1, %cst_162 {dimension_numbers = #tpu.dot_dimension_numbers<[1], [0], [0], [1], [0, 0, 1, 1], [], []>} : vector<31x3xbf16>, vector<3x32xbf16>, vector<31x32xf32> -> vector<31x32xf32>
    %c0_i32_163 = arith.constant 0 : i32
    %217 = arith.addi %211, %c0_i32_163 : i32
    %c0_164 = arith.constant 0 : index
    %218 = arith.index_cast %217 : i32 to index
    %c1_165 = arith.constant 1 : index
    %c0_166 = arith.constant 0 : index
    %219 = vector.load %arg2[%c0_164, %218, %c1_165, %c0_166] : memref<1x32x32x3xbf16, #tpu.memory_space<vmem>>, vector<1x1x31x3xbf16>
    %220 = vector.shape_cast %219 : vector<1x1x31x3xbf16> to vector<31x3xbf16>
    %cst_167 = arith.constant dense<0.000000e+00> : vector<31x32xf32>
    %221 = tpu.matmul %220, %3, %cst_167 {dimension_numbers = #tpu.dot_dimension_numbers<[1], [0], [0], [1], [0, 0, 1, 1], [], []>} : vector<31x3xbf16>, vector<3x32xbf16>, vector<31x32xf32> -> vector<31x32xf32>
    %222 = arith.addf %216, %221 : vector<31x32xf32>
    %c1_i32_168 = arith.constant 1 : i32
    %223 = arith.addi %211, %c1_i32_168 : i32
    %c0_169 = arith.constant 0 : index
    %224 = arith.index_cast %223 : i32 to index
    %c0_170 = arith.constant 0 : index
    %c0_171 = arith.constant 0 : index
    %225 = vector.load %arg2[%c0_169, %224, %c0_170, %c0_171] : memref<1x32x32x3xbf16, #tpu.memory_space<vmem>>, vector<1x1x31x3xbf16>
    %226 = vector.shape_cast %225 : vector<1x1x31x3xbf16> to vector<31x3xbf16>
    %cst_172 = arith.constant dense<0.000000e+00> : vector<31x32xf32>
    %227 = tpu.matmul %226, %5, %cst_172 {dimension_numbers = #tpu.dot_dimension_numbers<[1], [0], [0], [1], [0, 0, 1, 1], [], []>} : vector<31x3xbf16>, vector<3x32xbf16>, vector<31x32xf32> -> vector<31x32xf32>
    %228 = arith.addf %222, %227 : vector<31x32xf32>
    %c1_i32_173 = arith.constant 1 : i32
    %229 = arith.addi %211, %c1_i32_173 : i32
    %c0_174 = arith.constant 0 : index
    %230 = arith.index_cast %229 : i32 to index
    %c1_175 = arith.constant 1 : index
    %c0_176 = arith.constant 0 : index
    %231 = vector.load %arg2[%c0_174, %230, %c1_175, %c0_176] : memref<1x32x32x3xbf16, #tpu.memory_space<vmem>>, vector<1x1x31x3xbf16>
    %232 = vector.shape_cast %231 : vector<1x1x31x3xbf16> to vector<31x3xbf16>
    %cst_177 = arith.constant dense<0.000000e+00> : vector<31x32xf32>
    %233 = tpu.matmul %232, %7, %cst_177 {dimension_numbers = #tpu.dot_dimension_numbers<[1], [0], [0], [1], [0, 0, 1, 1], [], []>} : vector<31x3xbf16>, vector<3x32xbf16>, vector<31x32xf32> -> vector<31x32xf32>
    %234 = arith.addf %228, %233 : vector<31x32xf32>
    %c1_i32_178 = arith.constant 1 : i32
    %235 = arith.addi %211, %c1_i32_178 : i32
    %c0_i32_179 = arith.constant 0 : i32
    %236 = arith.addi %235, %c0_i32_179 : i32
    %c0_180 = arith.constant 0 : index
    %237 = arith.index_cast %236 : i32 to index
    %c0_181 = arith.constant 0 : index
    %c0_182 = arith.constant 0 : index
    %238 = vector.load %arg2[%c0_180, %237, %c0_181, %c0_182] : memref<1x32x32x3xbf16, #tpu.memory_space<vmem>>, vector<1x1x31x3xbf16>
    %239 = vector.shape_cast %238 : vector<1x1x31x3xbf16> to vector<31x3xbf16>
    %cst_183 = arith.constant dense<0.000000e+00> : vector<31x32xf32>
    %240 = tpu.matmul %239, %1, %cst_183 {dimension_numbers = #tpu.dot_dimension_numbers<[1], [0], [0], [1], [0, 0, 1, 1], [], []>} : vector<31x3xbf16>, vector<3x32xbf16>, vector<31x32xf32> -> vector<31x32xf32>
    %c0_i32_184 = arith.constant 0 : i32
    %241 = arith.addi %235, %c0_i32_184 : i32
    %c0_185 = arith.constant 0 : index
    %242 = arith.index_cast %241 : i32 to index
    %c1_186 = arith.constant 1 : index
    %c0_187 = arith.constant 0 : index
    %243 = vector.load %arg2[%c0_185, %242, %c1_186, %c0_187] : memref<1x32x32x3xbf16, #tpu.memory_space<vmem>>, vector<1x1x31x3xbf16>
    %244 = vector.shape_cast %243 : vector<1x1x31x3xbf16> to vector<31x3xbf16>
    %cst_188 = arith.constant dense<0.000000e+00> : vector<31x32xf32>
    %245 = tpu.matmul %244, %3, %cst_188 {dimension_numbers = #tpu.dot_dimension_numbers<[1], [0], [0], [1], [0, 0, 1, 1], [], []>} : vector<31x3xbf16>, vector<3x32xbf16>, vector<31x32xf32> -> vector<31x32xf32>
    %246 = arith.addf %240, %245 : vector<31x32xf32>
    %c1_i32_189 = arith.constant 1 : i32
    %247 = arith.addi %235, %c1_i32_189 : i32
    %c0_190 = arith.constant 0 : index
    %248 = arith.index_cast %247 : i32 to index
    %c0_191 = arith.constant 0 : index
    %c0_192 = arith.constant 0 : index
    %249 = vector.load %arg2[%c0_190, %248, %c0_191, %c0_192] : memref<1x32x32x3xbf16, #tpu.memory_space<vmem>>, vector<1x1x31x3xbf16>
    %250 = vector.shape_cast %249 : vector<1x1x31x3xbf16> to vector<31x3xbf16>
    %cst_193 = arith.constant dense<0.000000e+00> : vector<31x32xf32>
    %251 = tpu.matmul %250, %5, %cst_193 {dimension_numbers = #tpu.dot_dimension_numbers<[1], [0], [0], [1], [0, 0, 1, 1], [], []>} : vector<31x3xbf16>, vector<3x32xbf16>, vector<31x32xf32> -> vector<31x32xf32>
    %252 = arith.addf %246, %251 : vector<31x32xf32>
    %c1_i32_194 = arith.constant 1 : i32
    %253 = arith.addi %235, %c1_i32_194 : i32
    %c0_195 = arith.constant 0 : index
    %254 = arith.index_cast %253 : i32 to index
    %c1_196 = arith.constant 1 : index
    %c0_197 = arith.constant 0 : index
    %255 = vector.load %arg2[%c0_195, %254, %c1_196, %c0_197] : memref<1x32x32x3xbf16, #tpu.memory_space<vmem>>, vector<1x1x31x3xbf16>
    %256 = vector.shape_cast %255 : vector<1x1x31x3xbf16> to vector<31x3xbf16>
    %cst_198 = arith.constant dense<0.000000e+00> : vector<31x32xf32>
    %257 = tpu.matmul %256, %7, %cst_198 {dimension_numbers = #tpu.dot_dimension_numbers<[1], [0], [0], [1], [0, 0, 1, 1], [], []>} : vector<31x3xbf16>, vector<3x32xbf16>, vector<31x32xf32> -> vector<31x32xf32>
    %258 = arith.addf %252, %257 : vector<31x32xf32>
    %259 = arith.maximumf %234, %258 : vector<31x32xf32>
    %260 = vector.extract_strided_slice %259 {offsets = [0, 0], sizes = [30, 32], strides = [1, 1]} : vector<31x32xf32> to vector<30x32xf32>
    %261 = vector.extract_strided_slice %259 {offsets = [1, 0], sizes = [30, 32], strides = [1, 1]} : vector<31x32xf32> to vector<30x32xf32>
    %262 = arith.maximumf %260, %261 : vector<30x32xf32>
    %263 = vector.broadcast %8 : vector<1x32xf32> to vector<30x32xf32>
    %264 = arith.addf %262, %263 : vector<30x32xf32>
    %cst_199 = arith.constant 0.000000e+00 : f32
    %265 = vector.broadcast %cst_199 : f32 to vector<30x32xf32>
    %266 = arith.maximumf %264, %265 : vector<30x32xf32>
    %267 = arith.truncf %266 : vector<30x32xf32> to vector<30x32xbf16>
    %cst_200 = arith.constant dense<0.000000e+00> : vector<15x32xf32>
    %268 = tpu.matmul %16, %267, %cst_200 {dimension_numbers = #tpu.dot_dimension_numbers<[1], [0], [0], [1], [0, 0, 1, 1], [], []>} : vector<15x30xbf16>, vector<30x32xbf16>, vector<15x32xf32> -> vector<15x32xf32>
    %269 = arith.truncf %268 : vector<15x32xf32> to vector<15x32xbf16>
    %c0_201 = arith.constant 0 : index
    %c3_202 = arith.constant 3 : index
    %c0_203 = arith.constant 0 : index
    %c0_204 = arith.constant 0 : index
    %270 = vector.load %arg5[%c0_201, %c3_202, %c0_203, %c0_204] : memref<1x5x15x32xbf16, #tpu.memory_space<vmem>>, vector<1x1x15x32xbf16>
    %271 = vector.shape_cast %270 : vector<1x1x15x32xbf16> to vector<15x32xbf16>
    %272 = vector.shape_cast %269 : vector<15x32xbf16> to vector<1x1x15x32xbf16>
    tpu.vector_store %arg5[%c0_201, %c3_202, %c0_203, %c0_204], %272 {strides = array<i32>} : memref<1x5x15x32xbf16, #tpu.memory_space<vmem>>, vector<1x1x15x32xbf16>,
    %c5_i32_205 = arith.constant 5 : i32
    %273 = arith.muli %arg1, %c5_i32_205 : i32
    %c4_i32 = arith.constant 4 : i32
    %274 = arith.addi %273, %c4_i32 : i32
    %c2_i32_206 = arith.constant 2 : i32
    %275 = arith.muli %c2_i32_206, %274 : i32
    %c0_i32_207 = arith.constant 0 : i32
    %276 = arith.addi %275, %c0_i32_207 : i32
    %c0_208 = arith.constant 0 : index
    %277 = arith.index_cast %276 : i32 to index
    %c0_209 = arith.constant 0 : index
    %c0_210 = arith.constant 0 : index
    %278 = vector.load %arg2[%c0_208, %277, %c0_209, %c0_210] : memref<1x32x32x3xbf16, #tpu.memory_space<vmem>>, vector<1x1x31x3xbf16>
    %279 = vector.shape_cast %278 : vector<1x1x31x3xbf16> to vector<31x3xbf16>
    %cst_211 = arith.constant dense<0.000000e+00> : vector<31x32xf32>
    %280 = tpu.matmul %279, %1, %cst_211 {dimension_numbers = #tpu.dot_dimension_numbers<[1], [0], [0], [1], [0, 0, 1, 1], [], []>} : vector<31x3xbf16>, vector<3x32xbf16>, vector<31x32xf32> -> vector<31x32xf32>
    %c0_i32_212 = arith.constant 0 : i32
    %281 = arith.addi %275, %c0_i32_212 : i32
    %c0_213 = arith.constant 0 : index
    %282 = arith.index_cast %281 : i32 to index
    %c1_214 = arith.constant 1 : index
    %c0_215 = arith.constant 0 : index
    %283 = vector.load %arg2[%c0_213, %282, %c1_214, %c0_215] : memref<1x32x32x3xbf16, #tpu.memory_space<vmem>>, vector<1x1x31x3xbf16>
    %284 = vector.shape_cast %283 : vector<1x1x31x3xbf16> to vector<31x3xbf16>
    %cst_216 = arith.constant dense<0.000000e+00> : vector<31x32xf32>
    %285 = tpu.matmul %284, %3, %cst_216 {dimension_numbers = #tpu.dot_dimension_numbers<[1], [0], [0], [1], [0, 0, 1, 1], [], []>} : vector<31x3xbf16>, vector<3x32xbf16>, vector<31x32xf32> -> vector<31x32xf32>
    %286 = arith.addf %280, %285 : vector<31x32xf32>
    %c1_i32_217 = arith.constant 1 : i32
    %287 = arith.addi %275, %c1_i32_217 : i32
    %c0_218 = arith.constant 0 : index
    %288 = arith.index_cast %287 : i32 to index
    %c0_219 = arith.constant 0 : index
    %c0_220 = arith.constant 0 : index
    %289 = vector.load %arg2[%c0_218, %288, %c0_219, %c0_220] : memref<1x32x32x3xbf16, #tpu.memory_space<vmem>>, vector<1x1x31x3xbf16>
    %290 = vector.shape_cast %289 : vector<1x1x31x3xbf16> to vector<31x3xbf16>
    %cst_221 = arith.constant dense<0.000000e+00> : vector<31x32xf32>
    %291 = tpu.matmul %290, %5, %cst_221 {dimension_numbers = #tpu.dot_dimension_numbers<[1], [0], [0], [1], [0, 0, 1, 1], [], []>} : vector<31x3xbf16>, vector<3x32xbf16>, vector<31x32xf32> -> vector<31x32xf32>
    %292 = arith.addf %286, %291 : vector<31x32xf32>
    %c1_i32_222 = arith.constant 1 : i32
    %293 = arith.addi %275, %c1_i32_222 : i32
    %c0_223 = arith.constant 0 : index
    %294 = arith.index_cast %293 : i32 to index
    %c1_224 = arith.constant 1 : index
    %c0_225 = arith.constant 0 : index
    %295 = vector.load %arg2[%c0_223, %294, %c1_224, %c0_225] : memref<1x32x32x3xbf16, #tpu.memory_space<vmem>>, vector<1x1x31x3xbf16>
    %296 = vector.shape_cast %295 : vector<1x1x31x3xbf16> to vector<31x3xbf16>
    %cst_226 = arith.constant dense<0.000000e+00> : vector<31x32xf32>
    %297 = tpu.matmul %296, %7, %cst_226 {dimension_numbers = #tpu.dot_dimension_numbers<[1], [0], [0], [1], [0, 0, 1, 1], [], []>} : vector<31x3xbf16>, vector<3x32xbf16>, vector<31x32xf32> -> vector<31x32xf32>
    %298 = arith.addf %292, %297 : vector<31x32xf32>
    %c1_i32_227 = arith.constant 1 : i32
    %299 = arith.addi %275, %c1_i32_227 : i32
    %c0_i32_228 = arith.constant 0 : i32
    %300 = arith.addi %299, %c0_i32_228 : i32
    %c0_229 = arith.constant 0 : index
    %301 = arith.index_cast %300 : i32 to index
    %c0_230 = arith.constant 0 : index
    %c0_231 = arith.constant 0 : index
    %302 = vector.load %arg2[%c0_229, %301, %c0_230, %c0_231] : memref<1x32x32x3xbf16, #tpu.memory_space<vmem>>, vector<1x1x31x3xbf16>
    %303 = vector.shape_cast %302 : vector<1x1x31x3xbf16> to vector<31x3xbf16>
    %cst_232 = arith.constant dense<0.000000e+00> : vector<31x32xf32>
    %304 = tpu.matmul %303, %1, %cst_232 {dimension_numbers = #tpu.dot_dimension_numbers<[1], [0], [0], [1], [0, 0, 1, 1], [], []>} : vector<31x3xbf16>, vector<3x32xbf16>, vector<31x32xf32> -> vector<31x32xf32>
    %c0_i32_233 = arith.constant 0 : i32
    %305 = arith.addi %299, %c0_i32_233 : i32
    %c0_234 = arith.constant 0 : index
    %306 = arith.index_cast %305 : i32 to index
    %c1_235 = arith.constant 1 : index
    %c0_236 = arith.constant 0 : index
    %307 = vector.load %arg2[%c0_234, %306, %c1_235, %c0_236] : memref<1x32x32x3xbf16, #tpu.memory_space<vmem>>, vector<1x1x31x3xbf16>
    %308 = vector.shape_cast %307 : vector<1x1x31x3xbf16> to vector<31x3xbf16>
    %cst_237 = arith.constant dense<0.000000e+00> : vector<31x32xf32>
    %309 = tpu.matmul %308, %3, %cst_237 {dimension_numbers = #tpu.dot_dimension_numbers<[1], [0], [0], [1], [0, 0, 1, 1], [], []>} : vector<31x3xbf16>, vector<3x32xbf16>, vector<31x32xf32> -> vector<31x32xf32>
    %310 = arith.addf %304, %309 : vector<31x32xf32>
    %c1_i32_238 = arith.constant 1 : i32
    %311 = arith.addi %299, %c1_i32_238 : i32
    %c0_239 = arith.constant 0 : index
    %312 = arith.index_cast %311 : i32 to index
    %c0_240 = arith.constant 0 : index
    %c0_241 = arith.constant 0 : index
    %313 = vector.load %arg2[%c0_239, %312, %c0_240, %c0_241] : memref<1x32x32x3xbf16, #tpu.memory_space<vmem>>, vector<1x1x31x3xbf16>
    %314 = vector.shape_cast %313 : vector<1x1x31x3xbf16> to vector<31x3xbf16>
    %cst_242 = arith.constant dense<0.000000e+00> : vector<31x32xf32>
    %315 = tpu.matmul %314, %5, %cst_242 {dimension_numbers = #tpu.dot_dimension_numbers<[1], [0], [0], [1], [0, 0, 1, 1], [], []>} : vector<31x3xbf16>, vector<3x32xbf16>, vector<31x32xf32> -> vector<31x32xf32>
    %316 = arith.addf %310, %315 : vector<31x32xf32>
    %c1_i32_243 = arith.constant 1 : i32
    %317 = arith.addi %299, %c1_i32_243 : i32
    %c0_244 = arith.constant 0 : index
    %318 = arith.index_cast %317 : i32 to index
    %c1_245 = arith.constant 1 : index
    %c0_246 = arith.constant 0 : index
    %319 = vector.load %arg2[%c0_244, %318, %c1_245, %c0_246] : memref<1x32x32x3xbf16, #tpu.memory_space<vmem>>, vector<1x1x31x3xbf16>
    %320 = vector.shape_cast %319 : vector<1x1x31x3xbf16> to vector<31x3xbf16>
    %cst_247 = arith.constant dense<0.000000e+00> : vector<31x32xf32>
    %321 = tpu.matmul %320, %7, %cst_247 {dimension_numbers = #tpu.dot_dimension_numbers<[1], [0], [0], [1], [0, 0, 1, 1], [], []>} : vector<31x3xbf16>, vector<3x32xbf16>, vector<31x32xf32> -> vector<31x32xf32>
    %322 = arith.addf %316, %321 : vector<31x32xf32>
    %323 = arith.maximumf %298, %322 : vector<31x32xf32>
    %324 = vector.extract_strided_slice %323 {offsets = [0, 0], sizes = [30, 32], strides = [1, 1]} : vector<31x32xf32> to vector<30x32xf32>
    %325 = vector.extract_strided_slice %323 {offsets = [1, 0], sizes = [30, 32], strides = [1, 1]} : vector<31x32xf32> to vector<30x32xf32>
    %326 = arith.maximumf %324, %325 : vector<30x32xf32>
    %327 = vector.broadcast %8 : vector<1x32xf32> to vector<30x32xf32>
    %328 = arith.addf %326, %327 : vector<30x32xf32>
    %cst_248 = arith.constant 0.000000e+00 : f32
    %329 = vector.broadcast %cst_248 : f32 to vector<30x32xf32>
    %330 = arith.maximumf %328, %329 : vector<30x32xf32>
    %331 = arith.truncf %330 : vector<30x32xf32> to vector<30x32xbf16>
    %cst_249 = arith.constant dense<0.000000e+00> : vector<15x32xf32>
    %332 = tpu.matmul %16, %331, %cst_249 {dimension_numbers = #tpu.dot_dimension_numbers<[1], [0], [0], [1], [0, 0, 1, 1], [], []>} : vector<15x30xbf16>, vector<30x32xbf16>, vector<15x32xf32> -> vector<15x32xf32>
    %333 = arith.truncf %332 : vector<15x32xf32> to vector<15x32xbf16>
    %c0_250 = arith.constant 0 : index
    %c4 = arith.constant 4 : index
    %c0_251 = arith.constant 0 : index
    %c0_252 = arith.constant 0 : index
    %334 = vector.load %arg5[%c0_250, %c4, %c0_251, %c0_252] : memref<1x5x15x32xbf16, #tpu.memory_space<vmem>>, vector<1x1x15x32xbf16>
    %335 = vector.shape_cast %334 : vector<1x1x15x32xbf16> to vector<15x32xbf16>
    %336 = vector.shape_cast %333 : vector<15x32xbf16> to vector<1x1x15x32xbf16>
    tpu.vector_store %arg5[%c0_250, %c4, %c0_251, %c0_252], %336 {strides = array<i32>} : memref<1x5x15x32xbf16, #tpu.memory_space<vmem>>, vector<1x1x15x32xbf16>,
    return
  }
  func.func @transform_0(%arg0: i32, %arg1: i32) -> (i32, i32, i32, i32) {
    %c0_i32 = arith.constant 0 : i32
    %c0_i32_0 = arith.constant 0 : i32
    %c0_i32_1 = arith.constant 0 : i32
    %c0_i32_2 = arith.constant 0 : i32
    return %arg0, %c0_i32, %c0_i32_0, %c0_i32_1 : i32, i32, i32, i32
  }
  func.func @transform_1(%arg0: i32, %arg1: i32) -> (i32, i32, i32) {
    %c0_i32 = arith.constant 0 : i32
    %c0_i32_0 = arith.constant 0 : i32
    %c0_i32_1 = arith.constant 0 : i32
    %c0_i32_2 = arith.constant 0 : i32
    return %c0_i32, %c0_i32_0, %c0_i32_1 : i32, i32, i32
  }
  func.func @transform_2(%arg0: i32, %arg1: i32) -> (i32, i32) {
    %c0_i32 = arith.constant 0 : i32
    %c0_i32_0 = arith.constant 0 : i32
    %c0_i32_1 = arith.constant 0 : i32
    return %c0_i32, %c0_i32_0 : i32, i32
  }
  func.func @transform_3(%arg0: i32, %arg1: i32) -> (i32, i32, i32, i32) {
    %c0_i32 = arith.constant 0 : i32
    %c0_i32_0 = arith.constant 0 : i32
    %c0_i32_1 = arith.constant 0 : i32
    return %arg0, %arg1, %c0_i32, %c0_i32_0 : i32, i32, i32, i32
  }
}

module attributes {stable_mosaic.version = 11 : i64} {
  func.func @_conv2x2_relu_pool_kernel(%arg0: i32, %arg1: i32, %arg2: memref<1x15x15x32xbf16, #tpu.memory_space<vmem>>, %arg3: memref<4x32x64xbf16, #tpu.memory_space<vmem>>, %arg4: memref<1x64xf32, #tpu.memory_space<vmem>>, %arg5: memref<1x7x7x64xbf16, #tpu.memory_space<vmem>>) attributes {dimension_semantics = [#tpu.dimension_semantics<parallel>, #tpu.dimension_semantics<arbitrary>], iteration_bounds = array<i64: 2, 1>, scalar_prefetch = 0 : i64, scratch_operands = 0 : i64, tpu.core_type = #tpu.core_type<tc>, window_params = [{transform_indices = @transform_0, window_bounds = array<i64: 1, 15, 15, 32>}, {pipeline_mode = #tpu.pipeline_mode<synchronous>, transform_indices = @transform_1, window_bounds = array<i64: 4, 32, 64>}, {pipeline_mode = #tpu.pipeline_mode<synchronous>, transform_indices = @transform_2, window_bounds = array<i64: 1, 64>}, {transform_indices = @transform_3, window_bounds = array<i64: 1, 7, 7, 64>}]} {
    %c0 = arith.constant 0 : index
    %c0_0 = arith.constant 0 : index
    %c0_1 = arith.constant 0 : index
    %0 = vector.load %arg3[%c0, %c0_0, %c0_1] : memref<4x32x64xbf16, #tpu.memory_space<vmem>>, vector<1x32x64xbf16>
    %1 = vector.shape_cast %0 : vector<1x32x64xbf16> to vector<32x64xbf16>
    %c1 = arith.constant 1 : index
    %c0_2 = arith.constant 0 : index
    %c0_3 = arith.constant 0 : index
    %2 = vector.load %arg3[%c1, %c0_2, %c0_3] : memref<4x32x64xbf16, #tpu.memory_space<vmem>>, vector<1x32x64xbf16>
    %3 = vector.shape_cast %2 : vector<1x32x64xbf16> to vector<32x64xbf16>
    %c2 = arith.constant 2 : index
    %c0_4 = arith.constant 0 : index
    %c0_5 = arith.constant 0 : index
    %4 = vector.load %arg3[%c2, %c0_4, %c0_5] : memref<4x32x64xbf16, #tpu.memory_space<vmem>>, vector<1x32x64xbf16>
    %5 = vector.shape_cast %4 : vector<1x32x64xbf16> to vector<32x64xbf16>
    %c3 = arith.constant 3 : index
    %c0_6 = arith.constant 0 : index
    %c0_7 = arith.constant 0 : index
    %6 = vector.load %arg3[%c3, %c0_6, %c0_7] : memref<4x32x64xbf16, #tpu.memory_space<vmem>>, vector<1x32x64xbf16>
    %7 = vector.shape_cast %6 : vector<1x32x64xbf16> to vector<32x64xbf16>
    %c0_8 = arith.constant 0 : index
    %c0_9 = arith.constant 0 : index
    %8 = vector.load %arg4[%c0_8, %c0_9] : memref<1x64xf32, #tpu.memory_space<vmem>>, vector<1x64xf32>
    %9 = tpu.iota {dimensions = array<i32: 0>} : vector<7x13xi32>
    %10 = tpu.iota {dimensions = array<i32: 1>} : vector<7x13xi32>
    %c2_i32 = arith.constant 2 : i32
    %11 = vector.broadcast %c2_i32 : i32 to vector<7x13xi32>
    %12 = arith.muli %11, %9 : vector<7x13xi32>
    %13 = arith.cmpi eq, %10, %12 : vector<7x13xi32>
    %14 = arith.extui %13 : vector<7x13xi1> to vector<7x13xi32>
    %15 = arith.sitofp %14 : vector<7x13xi32> to vector<7x13xf32>
    %16 = arith.truncf %15 : vector<7x13xf32> to vector<7x13xbf16>
    %c7_i32 = arith.constant 7 : i32
    %17 = arith.muli %arg1, %c7_i32 : i32
    %c0_i32 = arith.constant 0 : i32
    %18 = arith.addi %17, %c0_i32 : i32
    %c2_i32_10 = arith.constant 2 : i32
    %19 = arith.muli %c2_i32_10, %18 : i32
    %c0_i32_11 = arith.constant 0 : i32
    %20 = arith.addi %19, %c0_i32_11 : i32
    %c0_12 = arith.constant 0 : index
    %21 = arith.index_cast %20 : i32 to index
    %c0_13 = arith.constant 0 : index
    %c0_14 = arith.constant 0 : index
    %22 = vector.load %arg2[%c0_12, %21, %c0_13, %c0_14] : memref<1x15x15x32xbf16, #tpu.memory_space<vmem>>, vector<1x1x14x32xbf16>
    %23 = vector.shape_cast %22 : vector<1x1x14x32xbf16> to vector<14x32xbf16>
    %cst = arith.constant dense<0.000000e+00> : vector<14x64xf32>
    %24 = tpu.matmul %23, %1, %cst {dimension_numbers = #tpu.dot_dimension_numbers<[1], [0], [0], [1], [0, 0, 1, 1], [], []>} : vector<14x32xbf16>, vector<32x64xbf16>, vector<14x64xf32> -> vector<14x64xf32>
    %c0_i32_15 = arith.constant 0 : i32
    %25 = arith.addi %19, %c0_i32_15 : i32
    %c0_16 = arith.constant 0 : index
    %26 = arith.index_cast %25 : i32 to index
    %c1_17 = arith.constant 1 : index
    %c0_18 = arith.constant 0 : index
    %27 = vector.load %arg2[%c0_16, %26, %c1_17, %c0_18] : memref<1x15x15x32xbf16, #tpu.memory_space<vmem>>, vector<1x1x14x32xbf16>
    %28 = vector.shape_cast %27 : vector<1x1x14x32xbf16> to vector<14x32xbf16>
    %cst_19 = arith.constant dense<0.000000e+00> : vector<14x64xf32>
    %29 = tpu.matmul %28, %3, %cst_19 {dimension_numbers = #tpu.dot_dimension_numbers<[1], [0], [0], [1], [0, 0, 1, 1], [], []>} : vector<14x32xbf16>, vector<32x64xbf16>, vector<14x64xf32> -> vector<14x64xf32>
    %30 = arith.addf %24, %29 : vector<14x64xf32>
    %c1_i32 = arith.constant 1 : i32
    %31 = arith.addi %19, %c1_i32 : i32
    %c0_20 = arith.constant 0 : index
    %32 = arith.index_cast %31 : i32 to index
    %c0_21 = arith.constant 0 : index
    %c0_22 = arith.constant 0 : index
    %33 = vector.load %arg2[%c0_20, %32, %c0_21, %c0_22] : memref<1x15x15x32xbf16, #tpu.memory_space<vmem>>, vector<1x1x14x32xbf16>
    %34 = vector.shape_cast %33 : vector<1x1x14x32xbf16> to vector<14x32xbf16>
    %cst_23 = arith.constant dense<0.000000e+00> : vector<14x64xf32>
    %35 = tpu.matmul %34, %5, %cst_23 {dimension_numbers = #tpu.dot_dimension_numbers<[1], [0], [0], [1], [0, 0, 1, 1], [], []>} : vector<14x32xbf16>, vector<32x64xbf16>, vector<14x64xf32> -> vector<14x64xf32>
    %36 = arith.addf %30, %35 : vector<14x64xf32>
    %c1_i32_24 = arith.constant 1 : i32
    %37 = arith.addi %19, %c1_i32_24 : i32
    %c0_25 = arith.constant 0 : index
    %38 = arith.index_cast %37 : i32 to index
    %c1_26 = arith.constant 1 : index
    %c0_27 = arith.constant 0 : index
    %39 = vector.load %arg2[%c0_25, %38, %c1_26, %c0_27] : memref<1x15x15x32xbf16, #tpu.memory_space<vmem>>, vector<1x1x14x32xbf16>
    %40 = vector.shape_cast %39 : vector<1x1x14x32xbf16> to vector<14x32xbf16>
    %cst_28 = arith.constant dense<0.000000e+00> : vector<14x64xf32>
    %41 = tpu.matmul %40, %7, %cst_28 {dimension_numbers = #tpu.dot_dimension_numbers<[1], [0], [0], [1], [0, 0, 1, 1], [], []>} : vector<14x32xbf16>, vector<32x64xbf16>, vector<14x64xf32> -> vector<14x64xf32>
    %42 = arith.addf %36, %41 : vector<14x64xf32>
    %c1_i32_29 = arith.constant 1 : i32
    %43 = arith.addi %19, %c1_i32_29 : i32
    %c0_i32_30 = arith.constant 0 : i32
    %44 = arith.addi %43, %c0_i32_30 : i32
    %c0_31 = arith.constant 0 : index
    %45 = arith.index_cast %44 : i32 to index
    %c0_32 = arith.constant 0 : index
    %c0_33 = arith.constant 0 : index
    %46 = vector.load %arg2[%c0_31, %45, %c0_32, %c0_33] : memref<1x15x15x32xbf16, #tpu.memory_space<vmem>>, vector<1x1x14x32xbf16>
    %47 = vector.shape_cast %46 : vector<1x1x14x32xbf16> to vector<14x32xbf16>
    %cst_34 = arith.constant dense<0.000000e+00> : vector<14x64xf32>
    %48 = tpu.matmul %47, %1, %cst_34 {dimension_numbers = #tpu.dot_dimension_numbers<[1], [0], [0], [1], [0, 0, 1, 1], [], []>} : vector<14x32xbf16>, vector<32x64xbf16>, vector<14x64xf32> -> vector<14x64xf32>
    %c0_i32_35 = arith.constant 0 : i32
    %49 = arith.addi %43, %c0_i32_35 : i32
    %c0_36 = arith.constant 0 : index
    %50 = arith.index_cast %49 : i32 to index
    %c1_37 = arith.constant 1 : index
    %c0_38 = arith.constant 0 : index
    %51 = vector.load %arg2[%c0_36, %50, %c1_37, %c0_38] : memref<1x15x15x32xbf16, #tpu.memory_space<vmem>>, vector<1x1x14x32xbf16>
    %52 = vector.shape_cast %51 : vector<1x1x14x32xbf16> to vector<14x32xbf16>
    %cst_39 = arith.constant dense<0.000000e+00> : vector<14x64xf32>
    %53 = tpu.matmul %52, %3, %cst_39 {dimension_numbers = #tpu.dot_dimension_numbers<[1], [0], [0], [1], [0, 0, 1, 1], [], []>} : vector<14x32xbf16>, vector<32x64xbf16>, vector<14x64xf32> -> vector<14x64xf32>
    %54 = arith.addf %48, %53 : vector<14x64xf32>
    %c1_i32_40 = arith.constant 1 : i32
    %55 = arith.addi %43, %c1_i32_40 : i32
    %c0_41 = arith.constant 0 : index
    %56 = arith.index_cast %55 : i32 to index
    %c0_42 = arith.constant 0 : index
    %c0_43 = arith.constant 0 : index
    %57 = vector.load %arg2[%c0_41, %56, %c0_42, %c0_43] : memref<1x15x15x32xbf16, #tpu.memory_space<vmem>>, vector<1x1x14x32xbf16>
    %58 = vector.shape_cast %57 : vector<1x1x14x32xbf16> to vector<14x32xbf16>
    %cst_44 = arith.constant dense<0.000000e+00> : vector<14x64xf32>
    %59 = tpu.matmul %58, %5, %cst_44 {dimension_numbers = #tpu.dot_dimension_numbers<[1], [0], [0], [1], [0, 0, 1, 1], [], []>} : vector<14x32xbf16>, vector<32x64xbf16>, vector<14x64xf32> -> vector<14x64xf32>
    %60 = arith.addf %54, %59 : vector<14x64xf32>
    %c1_i32_45 = arith.constant 1 : i32
    %61 = arith.addi %43, %c1_i32_45 : i32
    %c0_46 = arith.constant 0 : index
    %62 = arith.index_cast %61 : i32 to index
    %c1_47 = arith.constant 1 : index
    %c0_48 = arith.constant 0 : index
    %63 = vector.load %arg2[%c0_46, %62, %c1_47, %c0_48] : memref<1x15x15x32xbf16, #tpu.memory_space<vmem>>, vector<1x1x14x32xbf16>
    %64 = vector.shape_cast %63 : vector<1x1x14x32xbf16> to vector<14x32xbf16>
    %cst_49 = arith.constant dense<0.000000e+00> : vector<14x64xf32>
    %65 = tpu.matmul %64, %7, %cst_49 {dimension_numbers = #tpu.dot_dimension_numbers<[1], [0], [0], [1], [0, 0, 1, 1], [], []>} : vector<14x32xbf16>, vector<32x64xbf16>, vector<14x64xf32> -> vector<14x64xf32>
    %66 = arith.addf %60, %65 : vector<14x64xf32>
    %67 = arith.maximumf %42, %66 : vector<14x64xf32>
    %68 = vector.extract_strided_slice %67 {offsets = [0, 0], sizes = [13, 64], strides = [1, 1]} : vector<14x64xf32> to vector<13x64xf32>
    %69 = vector.extract_strided_slice %67 {offsets = [1, 0], sizes = [13, 64], strides = [1, 1]} : vector<14x64xf32> to vector<13x64xf32>
    %70 = arith.maximumf %68, %69 : vector<13x64xf32>
    %71 = vector.broadcast %8 : vector<1x64xf32> to vector<13x64xf32>
    %72 = arith.addf %70, %71 : vector<13x64xf32>
    %cst_50 = arith.constant 0.000000e+00 : f32
    %73 = vector.broadcast %cst_50 : f32 to vector<13x64xf32>
    %74 = arith.maximumf %72, %73 : vector<13x64xf32>
    %75 = arith.truncf %74 : vector<13x64xf32> to vector<13x64xbf16>
    %cst_51 = arith.constant dense<0.000000e+00> : vector<7x64xf32>
    %76 = tpu.matmul %16, %75, %cst_51 {dimension_numbers = #tpu.dot_dimension_numbers<[1], [0], [0], [1], [0, 0, 1, 1], [], []>} : vector<7x13xbf16>, vector<13x64xbf16>, vector<7x64xf32> -> vector<7x64xf32>
    %77 = arith.truncf %76 : vector<7x64xf32> to vector<7x64xbf16>
    %c0_52 = arith.constant 0 : index
    %c0_53 = arith.constant 0 : index
    %c0_54 = arith.constant 0 : index
    %c0_55 = arith.constant 0 : index
    %78 = vector.load %arg5[%c0_52, %c0_53, %c0_54, %c0_55] : memref<1x7x7x64xbf16, #tpu.memory_space<vmem>>, vector<1x1x7x64xbf16>
    %79 = vector.shape_cast %78 : vector<1x1x7x64xbf16> to vector<7x64xbf16>
    %80 = vector.shape_cast %77 : vector<7x64xbf16> to vector<1x1x7x64xbf16>
    tpu.vector_store %arg5[%c0_52, %c0_53, %c0_54, %c0_55], %80 {strides = array<i32>} : memref<1x7x7x64xbf16, #tpu.memory_space<vmem>>, vector<1x1x7x64xbf16>,
    %c7_i32_56 = arith.constant 7 : i32
    %81 = arith.muli %arg1, %c7_i32_56 : i32
    %c1_i32_57 = arith.constant 1 : i32
    %82 = arith.addi %81, %c1_i32_57 : i32
    %c2_i32_58 = arith.constant 2 : i32
    %83 = arith.muli %c2_i32_58, %82 : i32
    %c0_i32_59 = arith.constant 0 : i32
    %84 = arith.addi %83, %c0_i32_59 : i32
    %c0_60 = arith.constant 0 : index
    %85 = arith.index_cast %84 : i32 to index
    %c0_61 = arith.constant 0 : index
    %c0_62 = arith.constant 0 : index
    %86 = vector.load %arg2[%c0_60, %85, %c0_61, %c0_62] : memref<1x15x15x32xbf16, #tpu.memory_space<vmem>>, vector<1x1x14x32xbf16>
    %87 = vector.shape_cast %86 : vector<1x1x14x32xbf16> to vector<14x32xbf16>
    %cst_63 = arith.constant dense<0.000000e+00> : vector<14x64xf32>
    %88 = tpu.matmul %87, %1, %cst_63 {dimension_numbers = #tpu.dot_dimension_numbers<[1], [0], [0], [1], [0, 0, 1, 1], [], []>} : vector<14x32xbf16>, vector<32x64xbf16>, vector<14x64xf32> -> vector<14x64xf32>
    %c0_i32_64 = arith.constant 0 : i32
    %89 = arith.addi %83, %c0_i32_64 : i32
    %c0_65 = arith.constant 0 : index
    %90 = arith.index_cast %89 : i32 to index
    %c1_66 = arith.constant 1 : index
    %c0_67 = arith.constant 0 : index
    %91 = vector.load %arg2[%c0_65, %90, %c1_66, %c0_67] : memref<1x15x15x32xbf16, #tpu.memory_space<vmem>>, vector<1x1x14x32xbf16>
    %92 = vector.shape_cast %91 : vector<1x1x14x32xbf16> to vector<14x32xbf16>
    %cst_68 = arith.constant dense<0.000000e+00> : vector<14x64xf32>
    %93 = tpu.matmul %92, %3, %cst_68 {dimension_numbers = #tpu.dot_dimension_numbers<[1], [0], [0], [1], [0, 0, 1, 1], [], []>} : vector<14x32xbf16>, vector<32x64xbf16>, vector<14x64xf32> -> vector<14x64xf32>
    %94 = arith.addf %88, %93 : vector<14x64xf32>
    %c1_i32_69 = arith.constant 1 : i32
    %95 = arith.addi %83, %c1_i32_69 : i32
    %c0_70 = arith.constant 0 : index
    %96 = arith.index_cast %95 : i32 to index
    %c0_71 = arith.constant 0 : index
    %c0_72 = arith.constant 0 : index
    %97 = vector.load %arg2[%c0_70, %96, %c0_71, %c0_72] : memref<1x15x15x32xbf16, #tpu.memory_space<vmem>>, vector<1x1x14x32xbf16>
    %98 = vector.shape_cast %97 : vector<1x1x14x32xbf16> to vector<14x32xbf16>
    %cst_73 = arith.constant dense<0.000000e+00> : vector<14x64xf32>
    %99 = tpu.matmul %98, %5, %cst_73 {dimension_numbers = #tpu.dot_dimension_numbers<[1], [0], [0], [1], [0, 0, 1, 1], [], []>} : vector<14x32xbf16>, vector<32x64xbf16>, vector<14x64xf32> -> vector<14x64xf32>
    %100 = arith.addf %94, %99 : vector<14x64xf32>
    %c1_i32_74 = arith.constant 1 : i32
    %101 = arith.addi %83, %c1_i32_74 : i32
    %c0_75 = arith.constant 0 : index
    %102 = arith.index_cast %101 : i32 to index
    %c1_76 = arith.constant 1 : index
    %c0_77 = arith.constant 0 : index
    %103 = vector.load %arg2[%c0_75, %102, %c1_76, %c0_77] : memref<1x15x15x32xbf16, #tpu.memory_space<vmem>>, vector<1x1x14x32xbf16>
    %104 = vector.shape_cast %103 : vector<1x1x14x32xbf16> to vector<14x32xbf16>
    %cst_78 = arith.constant dense<0.000000e+00> : vector<14x64xf32>
    %105 = tpu.matmul %104, %7, %cst_78 {dimension_numbers = #tpu.dot_dimension_numbers<[1], [0], [0], [1], [0, 0, 1, 1], [], []>} : vector<14x32xbf16>, vector<32x64xbf16>, vector<14x64xf32> -> vector<14x64xf32>
    %106 = arith.addf %100, %105 : vector<14x64xf32>
    %c1_i32_79 = arith.constant 1 : i32
    %107 = arith.addi %83, %c1_i32_79 : i32
    %c0_i32_80 = arith.constant 0 : i32
    %108 = arith.addi %107, %c0_i32_80 : i32
    %c0_81 = arith.constant 0 : index
    %109 = arith.index_cast %108 : i32 to index
    %c0_82 = arith.constant 0 : index
    %c0_83 = arith.constant 0 : index
    %110 = vector.load %arg2[%c0_81, %109, %c0_82, %c0_83] : memref<1x15x15x32xbf16, #tpu.memory_space<vmem>>, vector<1x1x14x32xbf16>
    %111 = vector.shape_cast %110 : vector<1x1x14x32xbf16> to vector<14x32xbf16>
    %cst_84 = arith.constant dense<0.000000e+00> : vector<14x64xf32>
    %112 = tpu.matmul %111, %1, %cst_84 {dimension_numbers = #tpu.dot_dimension_numbers<[1], [0], [0], [1], [0, 0, 1, 1], [], []>} : vector<14x32xbf16>, vector<32x64xbf16>, vector<14x64xf32> -> vector<14x64xf32>
    %c0_i32_85 = arith.constant 0 : i32
    %113 = arith.addi %107, %c0_i32_85 : i32
    %c0_86 = arith.constant 0 : index
    %114 = arith.index_cast %113 : i32 to index
    %c1_87 = arith.constant 1 : index
    %c0_88 = arith.constant 0 : index
    %115 = vector.load %arg2[%c0_86, %114, %c1_87, %c0_88] : memref<1x15x15x32xbf16, #tpu.memory_space<vmem>>, vector<1x1x14x32xbf16>
    %116 = vector.shape_cast %115 : vector<1x1x14x32xbf16> to vector<14x32xbf16>
    %cst_89 = arith.constant dense<0.000000e+00> : vector<14x64xf32>
    %117 = tpu.matmul %116, %3, %cst_89 {dimension_numbers = #tpu.dot_dimension_numbers<[1], [0], [0], [1], [0, 0, 1, 1], [], []>} : vector<14x32xbf16>, vector<32x64xbf16>, vector<14x64xf32> -> vector<14x64xf32>
    %118 = arith.addf %112, %117 : vector<14x64xf32>
    %c1_i32_90 = arith.constant 1 : i32
    %119 = arith.addi %107, %c1_i32_90 : i32
    %c0_91 = arith.constant 0 : index
    %120 = arith.index_cast %119 : i32 to index
    %c0_92 = arith.constant 0 : index
    %c0_93 = arith.constant 0 : index
    %121 = vector.load %arg2[%c0_91, %120, %c0_92, %c0_93] : memref<1x15x15x32xbf16, #tpu.memory_space<vmem>>, vector<1x1x14x32xbf16>
    %122 = vector.shape_cast %121 : vector<1x1x14x32xbf16> to vector<14x32xbf16>
    %cst_94 = arith.constant dense<0.000000e+00> : vector<14x64xf32>
    %123 = tpu.matmul %122, %5, %cst_94 {dimension_numbers = #tpu.dot_dimension_numbers<[1], [0], [0], [1], [0, 0, 1, 1], [], []>} : vector<14x32xbf16>, vector<32x64xbf16>, vector<14x64xf32> -> vector<14x64xf32>
    %124 = arith.addf %118, %123 : vector<14x64xf32>
    %c1_i32_95 = arith.constant 1 : i32
    %125 = arith.addi %107, %c1_i32_95 : i32
    %c0_96 = arith.constant 0 : index
    %126 = arith.index_cast %125 : i32 to index
    %c1_97 = arith.constant 1 : index
    %c0_98 = arith.constant 0 : index
    %127 = vector.load %arg2[%c0_96, %126, %c1_97, %c0_98] : memref<1x15x15x32xbf16, #tpu.memory_space<vmem>>, vector<1x1x14x32xbf16>
    %128 = vector.shape_cast %127 : vector<1x1x14x32xbf16> to vector<14x32xbf16>
    %cst_99 = arith.constant dense<0.000000e+00> : vector<14x64xf32>
    %129 = tpu.matmul %128, %7, %cst_99 {dimension_numbers = #tpu.dot_dimension_numbers<[1], [0], [0], [1], [0, 0, 1, 1], [], []>} : vector<14x32xbf16>, vector<32x64xbf16>, vector<14x64xf32> -> vector<14x64xf32>
    %130 = arith.addf %124, %129 : vector<14x64xf32>
    %131 = arith.maximumf %106, %130 : vector<14x64xf32>
    %132 = vector.extract_strided_slice %131 {offsets = [0, 0], sizes = [13, 64], strides = [1, 1]} : vector<14x64xf32> to vector<13x64xf32>
    %133 = vector.extract_strided_slice %131 {offsets = [1, 0], sizes = [13, 64], strides = [1, 1]} : vector<14x64xf32> to vector<13x64xf32>
    %134 = arith.maximumf %132, %133 : vector<13x64xf32>
    %135 = vector.broadcast %8 : vector<1x64xf32> to vector<13x64xf32>
    %136 = arith.addf %134, %135 : vector<13x64xf32>
    %cst_100 = arith.constant 0.000000e+00 : f32
    %137 = vector.broadcast %cst_100 : f32 to vector<13x64xf32>
    %138 = arith.maximumf %136, %137 : vector<13x64xf32>
    %139 = arith.truncf %138 : vector<13x64xf32> to vector<13x64xbf16>
    %cst_101 = arith.constant dense<0.000000e+00> : vector<7x64xf32>
    %140 = tpu.matmul %16, %139, %cst_101 {dimension_numbers = #tpu.dot_dimension_numbers<[1], [0], [0], [1], [0, 0, 1, 1], [], []>} : vector<7x13xbf16>, vector<13x64xbf16>, vector<7x64xf32> -> vector<7x64xf32>
    %141 = arith.truncf %140 : vector<7x64xf32> to vector<7x64xbf16>
    %c0_102 = arith.constant 0 : index
    %c1_103 = arith.constant 1 : index
    %c0_104 = arith.constant 0 : index
    %c0_105 = arith.constant 0 : index
    %142 = vector.load %arg5[%c0_102, %c1_103, %c0_104, %c0_105] : memref<1x7x7x64xbf16, #tpu.memory_space<vmem>>, vector<1x1x7x64xbf16>
    %143 = vector.shape_cast %142 : vector<1x1x7x64xbf16> to vector<7x64xbf16>
    %144 = vector.shape_cast %141 : vector<7x64xbf16> to vector<1x1x7x64xbf16>
    tpu.vector_store %arg5[%c0_102, %c1_103, %c0_104, %c0_105], %144 {strides = array<i32>} : memref<1x7x7x64xbf16, #tpu.memory_space<vmem>>, vector<1x1x7x64xbf16>,
    %c7_i32_106 = arith.constant 7 : i32
    %145 = arith.muli %arg1, %c7_i32_106 : i32
    %c2_i32_107 = arith.constant 2 : i32
    %146 = arith.addi %145, %c2_i32_107 : i32
    %c2_i32_108 = arith.constant 2 : i32
    %147 = arith.muli %c2_i32_108, %146 : i32
    %c0_i32_109 = arith.constant 0 : i32
    %148 = arith.addi %147, %c0_i32_109 : i32
    %c0_110 = arith.constant 0 : index
    %149 = arith.index_cast %148 : i32 to index
    %c0_111 = arith.constant 0 : index
    %c0_112 = arith.constant 0 : index
    %150 = vector.load %arg2[%c0_110, %149, %c0_111, %c0_112] : memref<1x15x15x32xbf16, #tpu.memory_space<vmem>>, vector<1x1x14x32xbf16>
    %151 = vector.shape_cast %150 : vector<1x1x14x32xbf16> to vector<14x32xbf16>
    %cst_113 = arith.constant dense<0.000000e+00> : vector<14x64xf32>
    %152 = tpu.matmul %151, %1, %cst_113 {dimension_numbers = #tpu.dot_dimension_numbers<[1], [0], [0], [1], [0, 0, 1, 1], [], []>} : vector<14x32xbf16>, vector<32x64xbf16>, vector<14x64xf32> -> vector<14x64xf32>
    %c0_i32_114 = arith.constant 0 : i32
    %153 = arith.addi %147, %c0_i32_114 : i32
    %c0_115 = arith.constant 0 : index
    %154 = arith.index_cast %153 : i32 to index
    %c1_116 = arith.constant 1 : index
    %c0_117 = arith.constant 0 : index
    %155 = vector.load %arg2[%c0_115, %154, %c1_116, %c0_117] : memref<1x15x15x32xbf16, #tpu.memory_space<vmem>>, vector<1x1x14x32xbf16>
    %156 = vector.shape_cast %155 : vector<1x1x14x32xbf16> to vector<14x32xbf16>
    %cst_118 = arith.constant dense<0.000000e+00> : vector<14x64xf32>
    %157 = tpu.matmul %156, %3, %cst_118 {dimension_numbers = #tpu.dot_dimension_numbers<[1], [0], [0], [1], [0, 0, 1, 1], [], []>} : vector<14x32xbf16>, vector<32x64xbf16>, vector<14x64xf32> -> vector<14x64xf32>
    %158 = arith.addf %152, %157 : vector<14x64xf32>
    %c1_i32_119 = arith.constant 1 : i32
    %159 = arith.addi %147, %c1_i32_119 : i32
    %c0_120 = arith.constant 0 : index
    %160 = arith.index_cast %159 : i32 to index
    %c0_121 = arith.constant 0 : index
    %c0_122 = arith.constant 0 : index
    %161 = vector.load %arg2[%c0_120, %160, %c0_121, %c0_122] : memref<1x15x15x32xbf16, #tpu.memory_space<vmem>>, vector<1x1x14x32xbf16>
    %162 = vector.shape_cast %161 : vector<1x1x14x32xbf16> to vector<14x32xbf16>
    %cst_123 = arith.constant dense<0.000000e+00> : vector<14x64xf32>
    %163 = tpu.matmul %162, %5, %cst_123 {dimension_numbers = #tpu.dot_dimension_numbers<[1], [0], [0], [1], [0, 0, 1, 1], [], []>} : vector<14x32xbf16>, vector<32x64xbf16>, vector<14x64xf32> -> vector<14x64xf32>
    %164 = arith.addf %158, %163 : vector<14x64xf32>
    %c1_i32_124 = arith.constant 1 : i32
    %165 = arith.addi %147, %c1_i32_124 : i32
    %c0_125 = arith.constant 0 : index
    %166 = arith.index_cast %165 : i32 to index
    %c1_126 = arith.constant 1 : index
    %c0_127 = arith.constant 0 : index
    %167 = vector.load %arg2[%c0_125, %166, %c1_126, %c0_127] : memref<1x15x15x32xbf16, #tpu.memory_space<vmem>>, vector<1x1x14x32xbf16>
    %168 = vector.shape_cast %167 : vector<1x1x14x32xbf16> to vector<14x32xbf16>
    %cst_128 = arith.constant dense<0.000000e+00> : vector<14x64xf32>
    %169 = tpu.matmul %168, %7, %cst_128 {dimension_numbers = #tpu.dot_dimension_numbers<[1], [0], [0], [1], [0, 0, 1, 1], [], []>} : vector<14x32xbf16>, vector<32x64xbf16>, vector<14x64xf32> -> vector<14x64xf32>
    %170 = arith.addf %164, %169 : vector<14x64xf32>
    %c1_i32_129 = arith.constant 1 : i32
    %171 = arith.addi %147, %c1_i32_129 : i32
    %c0_i32_130 = arith.constant 0 : i32
    %172 = arith.addi %171, %c0_i32_130 : i32
    %c0_131 = arith.constant 0 : index
    %173 = arith.index_cast %172 : i32 to index
    %c0_132 = arith.constant 0 : index
    %c0_133 = arith.constant 0 : index
    %174 = vector.load %arg2[%c0_131, %173, %c0_132, %c0_133] : memref<1x15x15x32xbf16, #tpu.memory_space<vmem>>, vector<1x1x14x32xbf16>
    %175 = vector.shape_cast %174 : vector<1x1x14x32xbf16> to vector<14x32xbf16>
    %cst_134 = arith.constant dense<0.000000e+00> : vector<14x64xf32>
    %176 = tpu.matmul %175, %1, %cst_134 {dimension_numbers = #tpu.dot_dimension_numbers<[1], [0], [0], [1], [0, 0, 1, 1], [], []>} : vector<14x32xbf16>, vector<32x64xbf16>, vector<14x64xf32> -> vector<14x64xf32>
    %c0_i32_135 = arith.constant 0 : i32
    %177 = arith.addi %171, %c0_i32_135 : i32
    %c0_136 = arith.constant 0 : index
    %178 = arith.index_cast %177 : i32 to index
    %c1_137 = arith.constant 1 : index
    %c0_138 = arith.constant 0 : index
    %179 = vector.load %arg2[%c0_136, %178, %c1_137, %c0_138] : memref<1x15x15x32xbf16, #tpu.memory_space<vmem>>, vector<1x1x14x32xbf16>
    %180 = vector.shape_cast %179 : vector<1x1x14x32xbf16> to vector<14x32xbf16>
    %cst_139 = arith.constant dense<0.000000e+00> : vector<14x64xf32>
    %181 = tpu.matmul %180, %3, %cst_139 {dimension_numbers = #tpu.dot_dimension_numbers<[1], [0], [0], [1], [0, 0, 1, 1], [], []>} : vector<14x32xbf16>, vector<32x64xbf16>, vector<14x64xf32> -> vector<14x64xf32>
    %182 = arith.addf %176, %181 : vector<14x64xf32>
    %c1_i32_140 = arith.constant 1 : i32
    %183 = arith.addi %171, %c1_i32_140 : i32
    %c0_141 = arith.constant 0 : index
    %184 = arith.index_cast %183 : i32 to index
    %c0_142 = arith.constant 0 : index
    %c0_143 = arith.constant 0 : index
    %185 = vector.load %arg2[%c0_141, %184, %c0_142, %c0_143] : memref<1x15x15x32xbf16, #tpu.memory_space<vmem>>, vector<1x1x14x32xbf16>
    %186 = vector.shape_cast %185 : vector<1x1x14x32xbf16> to vector<14x32xbf16>
    %cst_144 = arith.constant dense<0.000000e+00> : vector<14x64xf32>
    %187 = tpu.matmul %186, %5, %cst_144 {dimension_numbers = #tpu.dot_dimension_numbers<[1], [0], [0], [1], [0, 0, 1, 1], [], []>} : vector<14x32xbf16>, vector<32x64xbf16>, vector<14x64xf32> -> vector<14x64xf32>
    %188 = arith.addf %182, %187 : vector<14x64xf32>
    %c1_i32_145 = arith.constant 1 : i32
    %189 = arith.addi %171, %c1_i32_145 : i32
    %c0_146 = arith.constant 0 : index
    %190 = arith.index_cast %189 : i32 to index
    %c1_147 = arith.constant 1 : index
    %c0_148 = arith.constant 0 : index
    %191 = vector.load %arg2[%c0_146, %190, %c1_147, %c0_148] : memref<1x15x15x32xbf16, #tpu.memory_space<vmem>>, vector<1x1x14x32xbf16>
    %192 = vector.shape_cast %191 : vector<1x1x14x32xbf16> to vector<14x32xbf16>
    %cst_149 = arith.constant dense<0.000000e+00> : vector<14x64xf32>
    %193 = tpu.matmul %192, %7, %cst_149 {dimension_numbers = #tpu.dot_dimension_numbers<[1], [0], [0], [1], [0, 0, 1, 1], [], []>} : vector<14x32xbf16>, vector<32x64xbf16>, vector<14x64xf32> -> vector<14x64xf32>
    %194 = arith.addf %188, %193 : vector<14x64xf32>
    %195 = arith.maximumf %170, %194 : vector<14x64xf32>
    %196 = vector.extract_strided_slice %195 {offsets = [0, 0], sizes = [13, 64], strides = [1, 1]} : vector<14x64xf32> to vector<13x64xf32>
    %197 = vector.extract_strided_slice %195 {offsets = [1, 0], sizes = [13, 64], strides = [1, 1]} : vector<14x64xf32> to vector<13x64xf32>
    %198 = arith.maximumf %196, %197 : vector<13x64xf32>
    %199 = vector.broadcast %8 : vector<1x64xf32> to vector<13x64xf32>
    %200 = arith.addf %198, %199 : vector<13x64xf32>
    %cst_150 = arith.constant 0.000000e+00 : f32
    %201 = vector.broadcast %cst_150 : f32 to vector<13x64xf32>
    %202 = arith.maximumf %200, %201 : vector<13x64xf32>
    %203 = arith.truncf %202 : vector<13x64xf32> to vector<13x64xbf16>
    %cst_151 = arith.constant dense<0.000000e+00> : vector<7x64xf32>
    %204 = tpu.matmul %16, %203, %cst_151 {dimension_numbers = #tpu.dot_dimension_numbers<[1], [0], [0], [1], [0, 0, 1, 1], [], []>} : vector<7x13xbf16>, vector<13x64xbf16>, vector<7x64xf32> -> vector<7x64xf32>
    %205 = arith.truncf %204 : vector<7x64xf32> to vector<7x64xbf16>
    %c0_152 = arith.constant 0 : index
    %c2_153 = arith.constant 2 : index
    %c0_154 = arith.constant 0 : index
    %c0_155 = arith.constant 0 : index
    %206 = vector.load %arg5[%c0_152, %c2_153, %c0_154, %c0_155] : memref<1x7x7x64xbf16, #tpu.memory_space<vmem>>, vector<1x1x7x64xbf16>
    %207 = vector.shape_cast %206 : vector<1x1x7x64xbf16> to vector<7x64xbf16>
    %208 = vector.shape_cast %205 : vector<7x64xbf16> to vector<1x1x7x64xbf16>
    tpu.vector_store %arg5[%c0_152, %c2_153, %c0_154, %c0_155], %208 {strides = array<i32>} : memref<1x7x7x64xbf16, #tpu.memory_space<vmem>>, vector<1x1x7x64xbf16>,
    %c7_i32_156 = arith.constant 7 : i32
    %209 = arith.muli %arg1, %c7_i32_156 : i32
    %c3_i32 = arith.constant 3 : i32
    %210 = arith.addi %209, %c3_i32 : i32
    %c2_i32_157 = arith.constant 2 : i32
    %211 = arith.muli %c2_i32_157, %210 : i32
    %c0_i32_158 = arith.constant 0 : i32
    %212 = arith.addi %211, %c0_i32_158 : i32
    %c0_159 = arith.constant 0 : index
    %213 = arith.index_cast %212 : i32 to index
    %c0_160 = arith.constant 0 : index
    %c0_161 = arith.constant 0 : index
    %214 = vector.load %arg2[%c0_159, %213, %c0_160, %c0_161] : memref<1x15x15x32xbf16, #tpu.memory_space<vmem>>, vector<1x1x14x32xbf16>
    %215 = vector.shape_cast %214 : vector<1x1x14x32xbf16> to vector<14x32xbf16>
    %cst_162 = arith.constant dense<0.000000e+00> : vector<14x64xf32>
    %216 = tpu.matmul %215, %1, %cst_162 {dimension_numbers = #tpu.dot_dimension_numbers<[1], [0], [0], [1], [0, 0, 1, 1], [], []>} : vector<14x32xbf16>, vector<32x64xbf16>, vector<14x64xf32> -> vector<14x64xf32>
    %c0_i32_163 = arith.constant 0 : i32
    %217 = arith.addi %211, %c0_i32_163 : i32
    %c0_164 = arith.constant 0 : index
    %218 = arith.index_cast %217 : i32 to index
    %c1_165 = arith.constant 1 : index
    %c0_166 = arith.constant 0 : index
    %219 = vector.load %arg2[%c0_164, %218, %c1_165, %c0_166] : memref<1x15x15x32xbf16, #tpu.memory_space<vmem>>, vector<1x1x14x32xbf16>
    %220 = vector.shape_cast %219 : vector<1x1x14x32xbf16> to vector<14x32xbf16>
    %cst_167 = arith.constant dense<0.000000e+00> : vector<14x64xf32>
    %221 = tpu.matmul %220, %3, %cst_167 {dimension_numbers = #tpu.dot_dimension_numbers<[1], [0], [0], [1], [0, 0, 1, 1], [], []>} : vector<14x32xbf16>, vector<32x64xbf16>, vector<14x64xf32> -> vector<14x64xf32>
    %222 = arith.addf %216, %221 : vector<14x64xf32>
    %c1_i32_168 = arith.constant 1 : i32
    %223 = arith.addi %211, %c1_i32_168 : i32
    %c0_169 = arith.constant 0 : index
    %224 = arith.index_cast %223 : i32 to index
    %c0_170 = arith.constant 0 : index
    %c0_171 = arith.constant 0 : index
    %225 = vector.load %arg2[%c0_169, %224, %c0_170, %c0_171] : memref<1x15x15x32xbf16, #tpu.memory_space<vmem>>, vector<1x1x14x32xbf16>
    %226 = vector.shape_cast %225 : vector<1x1x14x32xbf16> to vector<14x32xbf16>
    %cst_172 = arith.constant dense<0.000000e+00> : vector<14x64xf32>
    %227 = tpu.matmul %226, %5, %cst_172 {dimension_numbers = #tpu.dot_dimension_numbers<[1], [0], [0], [1], [0, 0, 1, 1], [], []>} : vector<14x32xbf16>, vector<32x64xbf16>, vector<14x64xf32> -> vector<14x64xf32>
    %228 = arith.addf %222, %227 : vector<14x64xf32>
    %c1_i32_173 = arith.constant 1 : i32
    %229 = arith.addi %211, %c1_i32_173 : i32
    %c0_174 = arith.constant 0 : index
    %230 = arith.index_cast %229 : i32 to index
    %c1_175 = arith.constant 1 : index
    %c0_176 = arith.constant 0 : index
    %231 = vector.load %arg2[%c0_174, %230, %c1_175, %c0_176] : memref<1x15x15x32xbf16, #tpu.memory_space<vmem>>, vector<1x1x14x32xbf16>
    %232 = vector.shape_cast %231 : vector<1x1x14x32xbf16> to vector<14x32xbf16>
    %cst_177 = arith.constant dense<0.000000e+00> : vector<14x64xf32>
    %233 = tpu.matmul %232, %7, %cst_177 {dimension_numbers = #tpu.dot_dimension_numbers<[1], [0], [0], [1], [0, 0, 1, 1], [], []>} : vector<14x32xbf16>, vector<32x64xbf16>, vector<14x64xf32> -> vector<14x64xf32>
    %234 = arith.addf %228, %233 : vector<14x64xf32>
    %c1_i32_178 = arith.constant 1 : i32
    %235 = arith.addi %211, %c1_i32_178 : i32
    %c0_i32_179 = arith.constant 0 : i32
    %236 = arith.addi %235, %c0_i32_179 : i32
    %c0_180 = arith.constant 0 : index
    %237 = arith.index_cast %236 : i32 to index
    %c0_181 = arith.constant 0 : index
    %c0_182 = arith.constant 0 : index
    %238 = vector.load %arg2[%c0_180, %237, %c0_181, %c0_182] : memref<1x15x15x32xbf16, #tpu.memory_space<vmem>>, vector<1x1x14x32xbf16>
    %239 = vector.shape_cast %238 : vector<1x1x14x32xbf16> to vector<14x32xbf16>
    %cst_183 = arith.constant dense<0.000000e+00> : vector<14x64xf32>
    %240 = tpu.matmul %239, %1, %cst_183 {dimension_numbers = #tpu.dot_dimension_numbers<[1], [0], [0], [1], [0, 0, 1, 1], [], []>} : vector<14x32xbf16>, vector<32x64xbf16>, vector<14x64xf32> -> vector<14x64xf32>
    %c0_i32_184 = arith.constant 0 : i32
    %241 = arith.addi %235, %c0_i32_184 : i32
    %c0_185 = arith.constant 0 : index
    %242 = arith.index_cast %241 : i32 to index
    %c1_186 = arith.constant 1 : index
    %c0_187 = arith.constant 0 : index
    %243 = vector.load %arg2[%c0_185, %242, %c1_186, %c0_187] : memref<1x15x15x32xbf16, #tpu.memory_space<vmem>>, vector<1x1x14x32xbf16>
    %244 = vector.shape_cast %243 : vector<1x1x14x32xbf16> to vector<14x32xbf16>
    %cst_188 = arith.constant dense<0.000000e+00> : vector<14x64xf32>
    %245 = tpu.matmul %244, %3, %cst_188 {dimension_numbers = #tpu.dot_dimension_numbers<[1], [0], [0], [1], [0, 0, 1, 1], [], []>} : vector<14x32xbf16>, vector<32x64xbf16>, vector<14x64xf32> -> vector<14x64xf32>
    %246 = arith.addf %240, %245 : vector<14x64xf32>
    %c1_i32_189 = arith.constant 1 : i32
    %247 = arith.addi %235, %c1_i32_189 : i32
    %c0_190 = arith.constant 0 : index
    %248 = arith.index_cast %247 : i32 to index
    %c0_191 = arith.constant 0 : index
    %c0_192 = arith.constant 0 : index
    %249 = vector.load %arg2[%c0_190, %248, %c0_191, %c0_192] : memref<1x15x15x32xbf16, #tpu.memory_space<vmem>>, vector<1x1x14x32xbf16>
    %250 = vector.shape_cast %249 : vector<1x1x14x32xbf16> to vector<14x32xbf16>
    %cst_193 = arith.constant dense<0.000000e+00> : vector<14x64xf32>
    %251 = tpu.matmul %250, %5, %cst_193 {dimension_numbers = #tpu.dot_dimension_numbers<[1], [0], [0], [1], [0, 0, 1, 1], [], []>} : vector<14x32xbf16>, vector<32x64xbf16>, vector<14x64xf32> -> vector<14x64xf32>
    %252 = arith.addf %246, %251 : vector<14x64xf32>
    %c1_i32_194 = arith.constant 1 : i32
    %253 = arith.addi %235, %c1_i32_194 : i32
    %c0_195 = arith.constant 0 : index
    %254 = arith.index_cast %253 : i32 to index
    %c1_196 = arith.constant 1 : index
    %c0_197 = arith.constant 0 : index
    %255 = vector.load %arg2[%c0_195, %254, %c1_196, %c0_197] : memref<1x15x15x32xbf16, #tpu.memory_space<vmem>>, vector<1x1x14x32xbf16>
    %256 = vector.shape_cast %255 : vector<1x1x14x32xbf16> to vector<14x32xbf16>
    %cst_198 = arith.constant dense<0.000000e+00> : vector<14x64xf32>
    %257 = tpu.matmul %256, %7, %cst_198 {dimension_numbers = #tpu.dot_dimension_numbers<[1], [0], [0], [1], [0, 0, 1, 1], [], []>} : vector<14x32xbf16>, vector<32x64xbf16>, vector<14x64xf32> -> vector<14x64xf32>
    %258 = arith.addf %252, %257 : vector<14x64xf32>
    %259 = arith.maximumf %234, %258 : vector<14x64xf32>
    %260 = vector.extract_strided_slice %259 {offsets = [0, 0], sizes = [13, 64], strides = [1, 1]} : vector<14x64xf32> to vector<13x64xf32>
    %261 = vector.extract_strided_slice %259 {offsets = [1, 0], sizes = [13, 64], strides = [1, 1]} : vector<14x64xf32> to vector<13x64xf32>
    %262 = arith.maximumf %260, %261 : vector<13x64xf32>
    %263 = vector.broadcast %8 : vector<1x64xf32> to vector<13x64xf32>
    %264 = arith.addf %262, %263 : vector<13x64xf32>
    %cst_199 = arith.constant 0.000000e+00 : f32
    %265 = vector.broadcast %cst_199 : f32 to vector<13x64xf32>
    %266 = arith.maximumf %264, %265 : vector<13x64xf32>
    %267 = arith.truncf %266 : vector<13x64xf32> to vector<13x64xbf16>
    %cst_200 = arith.constant dense<0.000000e+00> : vector<7x64xf32>
    %268 = tpu.matmul %16, %267, %cst_200 {dimension_numbers = #tpu.dot_dimension_numbers<[1], [0], [0], [1], [0, 0, 1, 1], [], []>} : vector<7x13xbf16>, vector<13x64xbf16>, vector<7x64xf32> -> vector<7x64xf32>
    %269 = arith.truncf %268 : vector<7x64xf32> to vector<7x64xbf16>
    %c0_201 = arith.constant 0 : index
    %c3_202 = arith.constant 3 : index
    %c0_203 = arith.constant 0 : index
    %c0_204 = arith.constant 0 : index
    %270 = vector.load %arg5[%c0_201, %c3_202, %c0_203, %c0_204] : memref<1x7x7x64xbf16, #tpu.memory_space<vmem>>, vector<1x1x7x64xbf16>
    %271 = vector.shape_cast %270 : vector<1x1x7x64xbf16> to vector<7x64xbf16>
    %272 = vector.shape_cast %269 : vector<7x64xbf16> to vector<1x1x7x64xbf16>
    tpu.vector_store %arg5[%c0_201, %c3_202, %c0_203, %c0_204], %272 {strides = array<i32>} : memref<1x7x7x64xbf16, #tpu.memory_space<vmem>>, vector<1x1x7x64xbf16>,
    %c7_i32_205 = arith.constant 7 : i32
    %273 = arith.muli %arg1, %c7_i32_205 : i32
    %c4_i32 = arith.constant 4 : i32
    %274 = arith.addi %273, %c4_i32 : i32
    %c2_i32_206 = arith.constant 2 : i32
    %275 = arith.muli %c2_i32_206, %274 : i32
    %c0_i32_207 = arith.constant 0 : i32
    %276 = arith.addi %275, %c0_i32_207 : i32
    %c0_208 = arith.constant 0 : index
    %277 = arith.index_cast %276 : i32 to index
    %c0_209 = arith.constant 0 : index
    %c0_210 = arith.constant 0 : index
    %278 = vector.load %arg2[%c0_208, %277, %c0_209, %c0_210] : memref<1x15x15x32xbf16, #tpu.memory_space<vmem>>, vector<1x1x14x32xbf16>
    %279 = vector.shape_cast %278 : vector<1x1x14x32xbf16> to vector<14x32xbf16>
    %cst_211 = arith.constant dense<0.000000e+00> : vector<14x64xf32>
    %280 = tpu.matmul %279, %1, %cst_211 {dimension_numbers = #tpu.dot_dimension_numbers<[1], [0], [0], [1], [0, 0, 1, 1], [], []>} : vector<14x32xbf16>, vector<32x64xbf16>, vector<14x64xf32> -> vector<14x64xf32>
    %c0_i32_212 = arith.constant 0 : i32
    %281 = arith.addi %275, %c0_i32_212 : i32
    %c0_213 = arith.constant 0 : index
    %282 = arith.index_cast %281 : i32 to index
    %c1_214 = arith.constant 1 : index
    %c0_215 = arith.constant 0 : index
    %283 = vector.load %arg2[%c0_213, %282, %c1_214, %c0_215] : memref<1x15x15x32xbf16, #tpu.memory_space<vmem>>, vector<1x1x14x32xbf16>
    %284 = vector.shape_cast %283 : vector<1x1x14x32xbf16> to vector<14x32xbf16>
    %cst_216 = arith.constant dense<0.000000e+00> : vector<14x64xf32>
    %285 = tpu.matmul %284, %3, %cst_216 {dimension_numbers = #tpu.dot_dimension_numbers<[1], [0], [0], [1], [0, 0, 1, 1], [], []>} : vector<14x32xbf16>, vector<32x64xbf16>, vector<14x64xf32> -> vector<14x64xf32>
    %286 = arith.addf %280, %285 : vector<14x64xf32>
    %c1_i32_217 = arith.constant 1 : i32
    %287 = arith.addi %275, %c1_i32_217 : i32
    %c0_218 = arith.constant 0 : index
    %288 = arith.index_cast %287 : i32 to index
    %c0_219 = arith.constant 0 : index
    %c0_220 = arith.constant 0 : index
    %289 = vector.load %arg2[%c0_218, %288, %c0_219, %c0_220] : memref<1x15x15x32xbf16, #tpu.memory_space<vmem>>, vector<1x1x14x32xbf16>
    %290 = vector.shape_cast %289 : vector<1x1x14x32xbf16> to vector<14x32xbf16>
    %cst_221 = arith.constant dense<0.000000e+00> : vector<14x64xf32>
    %291 = tpu.matmul %290, %5, %cst_221 {dimension_numbers = #tpu.dot_dimension_numbers<[1], [0], [0], [1], [0, 0, 1, 1], [], []>} : vector<14x32xbf16>, vector<32x64xbf16>, vector<14x64xf32> -> vector<14x64xf32>
    %292 = arith.addf %286, %291 : vector<14x64xf32>
    %c1_i32_222 = arith.constant 1 : i32
    %293 = arith.addi %275, %c1_i32_222 : i32
    %c0_223 = arith.constant 0 : index
    %294 = arith.index_cast %293 : i32 to index
    %c1_224 = arith.constant 1 : index
    %c0_225 = arith.constant 0 : index
    %295 = vector.load %arg2[%c0_223, %294, %c1_224, %c0_225] : memref<1x15x15x32xbf16, #tpu.memory_space<vmem>>, vector<1x1x14x32xbf16>
    %296 = vector.shape_cast %295 : vector<1x1x14x32xbf16> to vector<14x32xbf16>
    %cst_226 = arith.constant dense<0.000000e+00> : vector<14x64xf32>
    %297 = tpu.matmul %296, %7, %cst_226 {dimension_numbers = #tpu.dot_dimension_numbers<[1], [0], [0], [1], [0, 0, 1, 1], [], []>} : vector<14x32xbf16>, vector<32x64xbf16>, vector<14x64xf32> -> vector<14x64xf32>
    %298 = arith.addf %292, %297 : vector<14x64xf32>
    %c1_i32_227 = arith.constant 1 : i32
    %299 = arith.addi %275, %c1_i32_227 : i32
    %c0_i32_228 = arith.constant 0 : i32
    %300 = arith.addi %299, %c0_i32_228 : i32
    %c0_229 = arith.constant 0 : index
    %301 = arith.index_cast %300 : i32 to index
    %c0_230 = arith.constant 0 : index
    %c0_231 = arith.constant 0 : index
    %302 = vector.load %arg2[%c0_229, %301, %c0_230, %c0_231] : memref<1x15x15x32xbf16, #tpu.memory_space<vmem>>, vector<1x1x14x32xbf16>
    %303 = vector.shape_cast %302 : vector<1x1x14x32xbf16> to vector<14x32xbf16>
    %cst_232 = arith.constant dense<0.000000e+00> : vector<14x64xf32>
    %304 = tpu.matmul %303, %1, %cst_232 {dimension_numbers = #tpu.dot_dimension_numbers<[1], [0], [0], [1], [0, 0, 1, 1], [], []>} : vector<14x32xbf16>, vector<32x64xbf16>, vector<14x64xf32> -> vector<14x64xf32>
    %c0_i32_233 = arith.constant 0 : i32
    %305 = arith.addi %299, %c0_i32_233 : i32
    %c0_234 = arith.constant 0 : index
    %306 = arith.index_cast %305 : i32 to index
    %c1_235 = arith.constant 1 : index
    %c0_236 = arith.constant 0 : index
    %307 = vector.load %arg2[%c0_234, %306, %c1_235, %c0_236] : memref<1x15x15x32xbf16, #tpu.memory_space<vmem>>, vector<1x1x14x32xbf16>
    %308 = vector.shape_cast %307 : vector<1x1x14x32xbf16> to vector<14x32xbf16>
    %cst_237 = arith.constant dense<0.000000e+00> : vector<14x64xf32>
    %309 = tpu.matmul %308, %3, %cst_237 {dimension_numbers = #tpu.dot_dimension_numbers<[1], [0], [0], [1], [0, 0, 1, 1], [], []>} : vector<14x32xbf16>, vector<32x64xbf16>, vector<14x64xf32> -> vector<14x64xf32>
    %310 = arith.addf %304, %309 : vector<14x64xf32>
    %c1_i32_238 = arith.constant 1 : i32
    %311 = arith.addi %299, %c1_i32_238 : i32
    %c0_239 = arith.constant 0 : index
    %312 = arith.index_cast %311 : i32 to index
    %c0_240 = arith.constant 0 : index
    %c0_241 = arith.constant 0 : index
    %313 = vector.load %arg2[%c0_239, %312, %c0_240, %c0_241] : memref<1x15x15x32xbf16, #tpu.memory_space<vmem>>, vector<1x1x14x32xbf16>
    %314 = vector.shape_cast %313 : vector<1x1x14x32xbf16> to vector<14x32xbf16>
    %cst_242 = arith.constant dense<0.000000e+00> : vector<14x64xf32>
    %315 = tpu.matmul %314, %5, %cst_242 {dimension_numbers = #tpu.dot_dimension_numbers<[1], [0], [0], [1], [0, 0, 1, 1], [], []>} : vector<14x32xbf16>, vector<32x64xbf16>, vector<14x64xf32> -> vector<14x64xf32>
    %316 = arith.addf %310, %315 : vector<14x64xf32>
    %c1_i32_243 = arith.constant 1 : i32
    %317 = arith.addi %299, %c1_i32_243 : i32
    %c0_244 = arith.constant 0 : index
    %318 = arith.index_cast %317 : i32 to index
    %c1_245 = arith.constant 1 : index
    %c0_246 = arith.constant 0 : index
    %319 = vector.load %arg2[%c0_244, %318, %c1_245, %c0_246] : memref<1x15x15x32xbf16, #tpu.memory_space<vmem>>, vector<1x1x14x32xbf16>
    %320 = vector.shape_cast %319 : vector<1x1x14x32xbf16> to vector<14x32xbf16>
    %cst_247 = arith.constant dense<0.000000e+00> : vector<14x64xf32>
    %321 = tpu.matmul %320, %7, %cst_247 {dimension_numbers = #tpu.dot_dimension_numbers<[1], [0], [0], [1], [0, 0, 1, 1], [], []>} : vector<14x32xbf16>, vector<32x64xbf16>, vector<14x64xf32> -> vector<14x64xf32>
    %322 = arith.addf %316, %321 : vector<14x64xf32>
    %323 = arith.maximumf %298, %322 : vector<14x64xf32>
    %324 = vector.extract_strided_slice %323 {offsets = [0, 0], sizes = [13, 64], strides = [1, 1]} : vector<14x64xf32> to vector<13x64xf32>
    %325 = vector.extract_strided_slice %323 {offsets = [1, 0], sizes = [13, 64], strides = [1, 1]} : vector<14x64xf32> to vector<13x64xf32>
    %326 = arith.maximumf %324, %325 : vector<13x64xf32>
    %327 = vector.broadcast %8 : vector<1x64xf32> to vector<13x64xf32>
    %328 = arith.addf %326, %327 : vector<13x64xf32>
    %cst_248 = arith.constant 0.000000e+00 : f32
    %329 = vector.broadcast %cst_248 : f32 to vector<13x64xf32>
    %330 = arith.maximumf %328, %329 : vector<13x64xf32>
    %331 = arith.truncf %330 : vector<13x64xf32> to vector<13x64xbf16>
    %cst_249 = arith.constant dense<0.000000e+00> : vector<7x64xf32>
    %332 = tpu.matmul %16, %331, %cst_249 {dimension_numbers = #tpu.dot_dimension_numbers<[1], [0], [0], [1], [0, 0, 1, 1], [], []>} : vector<7x13xbf16>, vector<13x64xbf16>, vector<7x64xf32> -> vector<7x64xf32>
    %333 = arith.truncf %332 : vector<7x64xf32> to vector<7x64xbf16>
    %c0_250 = arith.constant 0 : index
    %c4 = arith.constant 4 : index
    %c0_251 = arith.constant 0 : index
    %c0_252 = arith.constant 0 : index
    %334 = vector.load %arg5[%c0_250, %c4, %c0_251, %c0_252] : memref<1x7x7x64xbf16, #tpu.memory_space<vmem>>, vector<1x1x7x64xbf16>
    %335 = vector.shape_cast %334 : vector<1x1x7x64xbf16> to vector<7x64xbf16>
    %336 = vector.shape_cast %333 : vector<7x64xbf16> to vector<1x1x7x64xbf16>
    tpu.vector_store %arg5[%c0_250, %c4, %c0_251, %c0_252], %336 {strides = array<i32>} : memref<1x7x7x64xbf16, #tpu.memory_space<vmem>>, vector<1x1x7x64xbf16>,
    %c7_i32_253 = arith.constant 7 : i32
    %337 = arith.muli %arg1, %c7_i32_253 : i32
    %c5_i32 = arith.constant 5 : i32
    %338 = arith.addi %337, %c5_i32 : i32
    %c2_i32_254 = arith.constant 2 : i32
    %339 = arith.muli %c2_i32_254, %338 : i32
    %c0_i32_255 = arith.constant 0 : i32
    %340 = arith.addi %339, %c0_i32_255 : i32
    %c0_256 = arith.constant 0 : index
    %341 = arith.index_cast %340 : i32 to index
    %c0_257 = arith.constant 0 : index
    %c0_258 = arith.constant 0 : index
    %342 = vector.load %arg2[%c0_256, %341, %c0_257, %c0_258] : memref<1x15x15x32xbf16, #tpu.memory_space<vmem>>, vector<1x1x14x32xbf16>
    %343 = vector.shape_cast %342 : vector<1x1x14x32xbf16> to vector<14x32xbf16>
    %cst_259 = arith.constant dense<0.000000e+00> : vector<14x64xf32>
    %344 = tpu.matmul %343, %1, %cst_259 {dimension_numbers = #tpu.dot_dimension_numbers<[1], [0], [0], [1], [0, 0, 1, 1], [], []>} : vector<14x32xbf16>, vector<32x64xbf16>, vector<14x64xf32> -> vector<14x64xf32>
    %c0_i32_260 = arith.constant 0 : i32
    %345 = arith.addi %339, %c0_i32_260 : i32
    %c0_261 = arith.constant 0 : index
    %346 = arith.index_cast %345 : i32 to index
    %c1_262 = arith.constant 1 : index
    %c0_263 = arith.constant 0 : index
    %347 = vector.load %arg2[%c0_261, %346, %c1_262, %c0_263] : memref<1x15x15x32xbf16, #tpu.memory_space<vmem>>, vector<1x1x14x32xbf16>
    %348 = vector.shape_cast %347 : vector<1x1x14x32xbf16> to vector<14x32xbf16>
    %cst_264 = arith.constant dense<0.000000e+00> : vector<14x64xf32>
    %349 = tpu.matmul %348, %3, %cst_264 {dimension_numbers = #tpu.dot_dimension_numbers<[1], [0], [0], [1], [0, 0, 1, 1], [], []>} : vector<14x32xbf16>, vector<32x64xbf16>, vector<14x64xf32> -> vector<14x64xf32>
    %350 = arith.addf %344, %349 : vector<14x64xf32>
    %c1_i32_265 = arith.constant 1 : i32
    %351 = arith.addi %339, %c1_i32_265 : i32
    %c0_266 = arith.constant 0 : index
    %352 = arith.index_cast %351 : i32 to index
    %c0_267 = arith.constant 0 : index
    %c0_268 = arith.constant 0 : index
    %353 = vector.load %arg2[%c0_266, %352, %c0_267, %c0_268] : memref<1x15x15x32xbf16, #tpu.memory_space<vmem>>, vector<1x1x14x32xbf16>
    %354 = vector.shape_cast %353 : vector<1x1x14x32xbf16> to vector<14x32xbf16>
    %cst_269 = arith.constant dense<0.000000e+00> : vector<14x64xf32>
    %355 = tpu.matmul %354, %5, %cst_269 {dimension_numbers = #tpu.dot_dimension_numbers<[1], [0], [0], [1], [0, 0, 1, 1], [], []>} : vector<14x32xbf16>, vector<32x64xbf16>, vector<14x64xf32> -> vector<14x64xf32>
    %356 = arith.addf %350, %355 : vector<14x64xf32>
    %c1_i32_270 = arith.constant 1 : i32
    %357 = arith.addi %339, %c1_i32_270 : i32
    %c0_271 = arith.constant 0 : index
    %358 = arith.index_cast %357 : i32 to index
    %c1_272 = arith.constant 1 : index
    %c0_273 = arith.constant 0 : index
    %359 = vector.load %arg2[%c0_271, %358, %c1_272, %c0_273] : memref<1x15x15x32xbf16, #tpu.memory_space<vmem>>, vector<1x1x14x32xbf16>
    %360 = vector.shape_cast %359 : vector<1x1x14x32xbf16> to vector<14x32xbf16>
    %cst_274 = arith.constant dense<0.000000e+00> : vector<14x64xf32>
    %361 = tpu.matmul %360, %7, %cst_274 {dimension_numbers = #tpu.dot_dimension_numbers<[1], [0], [0], [1], [0, 0, 1, 1], [], []>} : vector<14x32xbf16>, vector<32x64xbf16>, vector<14x64xf32> -> vector<14x64xf32>
    %362 = arith.addf %356, %361 : vector<14x64xf32>
    %c1_i32_275 = arith.constant 1 : i32
    %363 = arith.addi %339, %c1_i32_275 : i32
    %c0_i32_276 = arith.constant 0 : i32
    %364 = arith.addi %363, %c0_i32_276 : i32
    %c0_277 = arith.constant 0 : index
    %365 = arith.index_cast %364 : i32 to index
    %c0_278 = arith.constant 0 : index
    %c0_279 = arith.constant 0 : index
    %366 = vector.load %arg2[%c0_277, %365, %c0_278, %c0_279] : memref<1x15x15x32xbf16, #tpu.memory_space<vmem>>, vector<1x1x14x32xbf16>
    %367 = vector.shape_cast %366 : vector<1x1x14x32xbf16> to vector<14x32xbf16>
    %cst_280 = arith.constant dense<0.000000e+00> : vector<14x64xf32>
    %368 = tpu.matmul %367, %1, %cst_280 {dimension_numbers = #tpu.dot_dimension_numbers<[1], [0], [0], [1], [0, 0, 1, 1], [], []>} : vector<14x32xbf16>, vector<32x64xbf16>, vector<14x64xf32> -> vector<14x64xf32>
    %c0_i32_281 = arith.constant 0 : i32
    %369 = arith.addi %363, %c0_i32_281 : i32
    %c0_282 = arith.constant 0 : index
    %370 = arith.index_cast %369 : i32 to index
    %c1_283 = arith.constant 1 : index
    %c0_284 = arith.constant 0 : index
    %371 = vector.load %arg2[%c0_282, %370, %c1_283, %c0_284] : memref<1x15x15x32xbf16, #tpu.memory_space<vmem>>, vector<1x1x14x32xbf16>
    %372 = vector.shape_cast %371 : vector<1x1x14x32xbf16> to vector<14x32xbf16>
    %cst_285 = arith.constant dense<0.000000e+00> : vector<14x64xf32>
    %373 = tpu.matmul %372, %3, %cst_285 {dimension_numbers = #tpu.dot_dimension_numbers<[1], [0], [0], [1], [0, 0, 1, 1], [], []>} : vector<14x32xbf16>, vector<32x64xbf16>, vector<14x64xf32> -> vector<14x64xf32>
    %374 = arith.addf %368, %373 : vector<14x64xf32>
    %c1_i32_286 = arith.constant 1 : i32
    %375 = arith.addi %363, %c1_i32_286 : i32
    %c0_287 = arith.constant 0 : index
    %376 = arith.index_cast %375 : i32 to index
    %c0_288 = arith.constant 0 : index
    %c0_289 = arith.constant 0 : index
    %377 = vector.load %arg2[%c0_287, %376, %c0_288, %c0_289] : memref<1x15x15x32xbf16, #tpu.memory_space<vmem>>, vector<1x1x14x32xbf16>
    %378 = vector.shape_cast %377 : vector<1x1x14x32xbf16> to vector<14x32xbf16>
    %cst_290 = arith.constant dense<0.000000e+00> : vector<14x64xf32>
    %379 = tpu.matmul %378, %5, %cst_290 {dimension_numbers = #tpu.dot_dimension_numbers<[1], [0], [0], [1], [0, 0, 1, 1], [], []>} : vector<14x32xbf16>, vector<32x64xbf16>, vector<14x64xf32> -> vector<14x64xf32>
    %380 = arith.addf %374, %379 : vector<14x64xf32>
    %c1_i32_291 = arith.constant 1 : i32
    %381 = arith.addi %363, %c1_i32_291 : i32
    %c0_292 = arith.constant 0 : index
    %382 = arith.index_cast %381 : i32 to index
    %c1_293 = arith.constant 1 : index
    %c0_294 = arith.constant 0 : index
    %383 = vector.load %arg2[%c0_292, %382, %c1_293, %c0_294] : memref<1x15x15x32xbf16, #tpu.memory_space<vmem>>, vector<1x1x14x32xbf16>
    %384 = vector.shape_cast %383 : vector<1x1x14x32xbf16> to vector<14x32xbf16>
    %cst_295 = arith.constant dense<0.000000e+00> : vector<14x64xf32>
    %385 = tpu.matmul %384, %7, %cst_295 {dimension_numbers = #tpu.dot_dimension_numbers<[1], [0], [0], [1], [0, 0, 1, 1], [], []>} : vector<14x32xbf16>, vector<32x64xbf16>, vector<14x64xf32> -> vector<14x64xf32>
    %386 = arith.addf %380, %385 : vector<14x64xf32>
    %387 = arith.maximumf %362, %386 : vector<14x64xf32>
    %388 = vector.extract_strided_slice %387 {offsets = [0, 0], sizes = [13, 64], strides = [1, 1]} : vector<14x64xf32> to vector<13x64xf32>
    %389 = vector.extract_strided_slice %387 {offsets = [1, 0], sizes = [13, 64], strides = [1, 1]} : vector<14x64xf32> to vector<13x64xf32>
    %390 = arith.maximumf %388, %389 : vector<13x64xf32>
    %391 = vector.broadcast %8 : vector<1x64xf32> to vector<13x64xf32>
    %392 = arith.addf %390, %391 : vector<13x64xf32>
    %cst_296 = arith.constant 0.000000e+00 : f32
    %393 = vector.broadcast %cst_296 : f32 to vector<13x64xf32>
    %394 = arith.maximumf %392, %393 : vector<13x64xf32>
    %395 = arith.truncf %394 : vector<13x64xf32> to vector<13x64xbf16>
    %cst_297 = arith.constant dense<0.000000e+00> : vector<7x64xf32>
    %396 = tpu.matmul %16, %395, %cst_297 {dimension_numbers = #tpu.dot_dimension_numbers<[1], [0], [0], [1], [0, 0, 1, 1], [], []>} : vector<7x13xbf16>, vector<13x64xbf16>, vector<7x64xf32> -> vector<7x64xf32>
    %397 = arith.truncf %396 : vector<7x64xf32> to vector<7x64xbf16>
    %c0_298 = arith.constant 0 : index
    %c5 = arith.constant 5 : index
    %c0_299 = arith.constant 0 : index
    %c0_300 = arith.constant 0 : index
    %398 = vector.load %arg5[%c0_298, %c5, %c0_299, %c0_300] : memref<1x7x7x64xbf16, #tpu.memory_space<vmem>>, vector<1x1x7x64xbf16>
    %399 = vector.shape_cast %398 : vector<1x1x7x64xbf16> to vector<7x64xbf16>
    %400 = vector.shape_cast %397 : vector<7x64xbf16> to vector<1x1x7x64xbf16>
    tpu.vector_store %arg5[%c0_298, %c5, %c0_299, %c0_300], %400 {strides = array<i32>} : memref<1x7x7x64xbf16, #tpu.memory_space<vmem>>, vector<1x1x7x64xbf16>,
    %c7_i32_301 = arith.constant 7 : i32
    %401 = arith.muli %arg1, %c7_i32_301 : i32
    %c6_i32 = arith.constant 6 : i32
    %402 = arith.addi %401, %c6_i32 : i32
    %c2_i32_302 = arith.constant 2 : i32
    %403 = arith.muli %c2_i32_302, %402 : i32
    %c0_i32_303 = arith.constant 0 : i32
    %404 = arith.addi %403, %c0_i32_303 : i32
    %c0_304 = arith.constant 0 : index
    %405 = arith.index_cast %404 : i32 to index
    %c0_305 = arith.constant 0 : index
    %c0_306 = arith.constant 0 : index
    %406 = vector.load %arg2[%c0_304, %405, %c0_305, %c0_306] : memref<1x15x15x32xbf16, #tpu.memory_space<vmem>>, vector<1x1x14x32xbf16>
    %407 = vector.shape_cast %406 : vector<1x1x14x32xbf16> to vector<14x32xbf16>
    %cst_307 = arith.constant dense<0.000000e+00> : vector<14x64xf32>
    %408 = tpu.matmul %407, %1, %cst_307 {dimension_numbers = #tpu.dot_dimension_numbers<[1], [0], [0], [1], [0, 0, 1, 1], [], []>} : vector<14x32xbf16>, vector<32x64xbf16>, vector<14x64xf32> -> vector<14x64xf32>
    %c0_i32_308 = arith.constant 0 : i32
    %409 = arith.addi %403, %c0_i32_308 : i32
    %c0_309 = arith.constant 0 : index
    %410 = arith.index_cast %409 : i32 to index
    %c1_310 = arith.constant 1 : index
    %c0_311 = arith.constant 0 : index
    %411 = vector.load %arg2[%c0_309, %410, %c1_310, %c0_311] : memref<1x15x15x32xbf16, #tpu.memory_space<vmem>>, vector<1x1x14x32xbf16>
    %412 = vector.shape_cast %411 : vector<1x1x14x32xbf16> to vector<14x32xbf16>
    %cst_312 = arith.constant dense<0.000000e+00> : vector<14x64xf32>
    %413 = tpu.matmul %412, %3, %cst_312 {dimension_numbers = #tpu.dot_dimension_numbers<[1], [0], [0], [1], [0, 0, 1, 1], [], []>} : vector<14x32xbf16>, vector<32x64xbf16>, vector<14x64xf32> -> vector<14x64xf32>
    %414 = arith.addf %408, %413 : vector<14x64xf32>
    %c1_i32_313 = arith.constant 1 : i32
    %415 = arith.addi %403, %c1_i32_313 : i32
    %c0_314 = arith.constant 0 : index
    %416 = arith.index_cast %415 : i32 to index
    %c0_315 = arith.constant 0 : index
    %c0_316 = arith.constant 0 : index
    %417 = vector.load %arg2[%c0_314, %416, %c0_315, %c0_316] : memref<1x15x15x32xbf16, #tpu.memory_space<vmem>>, vector<1x1x14x32xbf16>
    %418 = vector.shape_cast %417 : vector<1x1x14x32xbf16> to vector<14x32xbf16>
    %cst_317 = arith.constant dense<0.000000e+00> : vector<14x64xf32>
    %419 = tpu.matmul %418, %5, %cst_317 {dimension_numbers = #tpu.dot_dimension_numbers<[1], [0], [0], [1], [0, 0, 1, 1], [], []>} : vector<14x32xbf16>, vector<32x64xbf16>, vector<14x64xf32> -> vector<14x64xf32>
    %420 = arith.addf %414, %419 : vector<14x64xf32>
    %c1_i32_318 = arith.constant 1 : i32
    %421 = arith.addi %403, %c1_i32_318 : i32
    %c0_319 = arith.constant 0 : index
    %422 = arith.index_cast %421 : i32 to index
    %c1_320 = arith.constant 1 : index
    %c0_321 = arith.constant 0 : index
    %423 = vector.load %arg2[%c0_319, %422, %c1_320, %c0_321] : memref<1x15x15x32xbf16, #tpu.memory_space<vmem>>, vector<1x1x14x32xbf16>
    %424 = vector.shape_cast %423 : vector<1x1x14x32xbf16> to vector<14x32xbf16>
    %cst_322 = arith.constant dense<0.000000e+00> : vector<14x64xf32>
    %425 = tpu.matmul %424, %7, %cst_322 {dimension_numbers = #tpu.dot_dimension_numbers<[1], [0], [0], [1], [0, 0, 1, 1], [], []>} : vector<14x32xbf16>, vector<32x64xbf16>, vector<14x64xf32> -> vector<14x64xf32>
    %426 = arith.addf %420, %425 : vector<14x64xf32>
    %c1_i32_323 = arith.constant 1 : i32
    %427 = arith.addi %403, %c1_i32_323 : i32
    %c0_i32_324 = arith.constant 0 : i32
    %428 = arith.addi %427, %c0_i32_324 : i32
    %c0_325 = arith.constant 0 : index
    %429 = arith.index_cast %428 : i32 to index
    %c0_326 = arith.constant 0 : index
    %c0_327 = arith.constant 0 : index
    %430 = vector.load %arg2[%c0_325, %429, %c0_326, %c0_327] : memref<1x15x15x32xbf16, #tpu.memory_space<vmem>>, vector<1x1x14x32xbf16>
    %431 = vector.shape_cast %430 : vector<1x1x14x32xbf16> to vector<14x32xbf16>
    %cst_328 = arith.constant dense<0.000000e+00> : vector<14x64xf32>
    %432 = tpu.matmul %431, %1, %cst_328 {dimension_numbers = #tpu.dot_dimension_numbers<[1], [0], [0], [1], [0, 0, 1, 1], [], []>} : vector<14x32xbf16>, vector<32x64xbf16>, vector<14x64xf32> -> vector<14x64xf32>
    %c0_i32_329 = arith.constant 0 : i32
    %433 = arith.addi %427, %c0_i32_329 : i32
    %c0_330 = arith.constant 0 : index
    %434 = arith.index_cast %433 : i32 to index
    %c1_331 = arith.constant 1 : index
    %c0_332 = arith.constant 0 : index
    %435 = vector.load %arg2[%c0_330, %434, %c1_331, %c0_332] : memref<1x15x15x32xbf16, #tpu.memory_space<vmem>>, vector<1x1x14x32xbf16>
    %436 = vector.shape_cast %435 : vector<1x1x14x32xbf16> to vector<14x32xbf16>
    %cst_333 = arith.constant dense<0.000000e+00> : vector<14x64xf32>
    %437 = tpu.matmul %436, %3, %cst_333 {dimension_numbers = #tpu.dot_dimension_numbers<[1], [0], [0], [1], [0, 0, 1, 1], [], []>} : vector<14x32xbf16>, vector<32x64xbf16>, vector<14x64xf32> -> vector<14x64xf32>
    %438 = arith.addf %432, %437 : vector<14x64xf32>
    %c1_i32_334 = arith.constant 1 : i32
    %439 = arith.addi %427, %c1_i32_334 : i32
    %c0_335 = arith.constant 0 : index
    %440 = arith.index_cast %439 : i32 to index
    %c0_336 = arith.constant 0 : index
    %c0_337 = arith.constant 0 : index
    %441 = vector.load %arg2[%c0_335, %440, %c0_336, %c0_337] : memref<1x15x15x32xbf16, #tpu.memory_space<vmem>>, vector<1x1x14x32xbf16>
    %442 = vector.shape_cast %441 : vector<1x1x14x32xbf16> to vector<14x32xbf16>
    %cst_338 = arith.constant dense<0.000000e+00> : vector<14x64xf32>
    %443 = tpu.matmul %442, %5, %cst_338 {dimension_numbers = #tpu.dot_dimension_numbers<[1], [0], [0], [1], [0, 0, 1, 1], [], []>} : vector<14x32xbf16>, vector<32x64xbf16>, vector<14x64xf32> -> vector<14x64xf32>
    %444 = arith.addf %438, %443 : vector<14x64xf32>
    %c1_i32_339 = arith.constant 1 : i32
    %445 = arith.addi %427, %c1_i32_339 : i32
    %c0_340 = arith.constant 0 : index
    %446 = arith.index_cast %445 : i32 to index
    %c1_341 = arith.constant 1 : index
    %c0_342 = arith.constant 0 : index
    %447 = vector.load %arg2[%c0_340, %446, %c1_341, %c0_342] : memref<1x15x15x32xbf16, #tpu.memory_space<vmem>>, vector<1x1x14x32xbf16>
    %448 = vector.shape_cast %447 : vector<1x1x14x32xbf16> to vector<14x32xbf16>
    %cst_343 = arith.constant dense<0.000000e+00> : vector<14x64xf32>
    %449 = tpu.matmul %448, %7, %cst_343 {dimension_numbers = #tpu.dot_dimension_numbers<[1], [0], [0], [1], [0, 0, 1, 1], [], []>} : vector<14x32xbf16>, vector<32x64xbf16>, vector<14x64xf32> -> vector<14x64xf32>
    %450 = arith.addf %444, %449 : vector<14x64xf32>
    %451 = arith.maximumf %426, %450 : vector<14x64xf32>
    %452 = vector.extract_strided_slice %451 {offsets = [0, 0], sizes = [13, 64], strides = [1, 1]} : vector<14x64xf32> to vector<13x64xf32>
    %453 = vector.extract_strided_slice %451 {offsets = [1, 0], sizes = [13, 64], strides = [1, 1]} : vector<14x64xf32> to vector<13x64xf32>
    %454 = arith.maximumf %452, %453 : vector<13x64xf32>
    %455 = vector.broadcast %8 : vector<1x64xf32> to vector<13x64xf32>
    %456 = arith.addf %454, %455 : vector<13x64xf32>
    %cst_344 = arith.constant 0.000000e+00 : f32
    %457 = vector.broadcast %cst_344 : f32 to vector<13x64xf32>
    %458 = arith.maximumf %456, %457 : vector<13x64xf32>
    %459 = arith.truncf %458 : vector<13x64xf32> to vector<13x64xbf16>
    %cst_345 = arith.constant dense<0.000000e+00> : vector<7x64xf32>
    %460 = tpu.matmul %16, %459, %cst_345 {dimension_numbers = #tpu.dot_dimension_numbers<[1], [0], [0], [1], [0, 0, 1, 1], [], []>} : vector<7x13xbf16>, vector<13x64xbf16>, vector<7x64xf32> -> vector<7x64xf32>
    %461 = arith.truncf %460 : vector<7x64xf32> to vector<7x64xbf16>
    %c0_346 = arith.constant 0 : index
    %c6 = arith.constant 6 : index
    %c0_347 = arith.constant 0 : index
    %c0_348 = arith.constant 0 : index
    %462 = vector.load %arg5[%c0_346, %c6, %c0_347, %c0_348] : memref<1x7x7x64xbf16, #tpu.memory_space<vmem>>, vector<1x1x7x64xbf16>
    %463 = vector.shape_cast %462 : vector<1x1x7x64xbf16> to vector<7x64xbf16>
    %464 = vector.shape_cast %461 : vector<7x64xbf16> to vector<1x1x7x64xbf16>
    tpu.vector_store %arg5[%c0_346, %c6, %c0_347, %c0_348], %464 {strides = array<i32>} : memref<1x7x7x64xbf16, #tpu.memory_space<vmem>>, vector<1x1x7x64xbf16>,
    return
  }
  func.func @transform_0(%arg0: i32, %arg1: i32) -> (i32, i32, i32, i32) {
    %c0_i32 = arith.constant 0 : i32
    %c0_i32_0 = arith.constant 0 : i32
    %c0_i32_1 = arith.constant 0 : i32
    %c0_i32_2 = arith.constant 0 : i32
    return %arg0, %c0_i32, %c0_i32_0, %c0_i32_1 : i32, i32, i32, i32
  }
  func.func @transform_1(%arg0: i32, %arg1: i32) -> (i32, i32, i32) {
    %c0_i32 = arith.constant 0 : i32
    %c0_i32_0 = arith.constant 0 : i32
    %c0_i32_1 = arith.constant 0 : i32
    %c0_i32_2 = arith.constant 0 : i32
    return %c0_i32, %c0_i32_0, %c0_i32_1 : i32, i32, i32
  }
  func.func @transform_2(%arg0: i32, %arg1: i32) -> (i32, i32) {
    %c0_i32 = arith.constant 0 : i32
    %c0_i32_0 = arith.constant 0 : i32
    %c0_i32_1 = arith.constant 0 : i32
    return %c0_i32, %c0_i32_0 : i32, i32
  }
  func.func @transform_3(%arg0: i32, %arg1: i32) -> (i32, i32, i32, i32) {
    %c0_i32 = arith.constant 0 : i32
    %c0_i32_0 = arith.constant 0 : i32
    %c0_i32_1 = arith.constant 0 : i32
    return %arg0, %arg1, %c0_i32, %c0_i32_0 : i32, i32, i32, i32
  }
}

module attributes {stable_mosaic.version = 11 : i64} {
  func.func @_matmul_bias_kernel(%arg0: i32, %arg1: i32, %arg2: i32, %arg3: memref<8x1024xbf16, #tpu.memory_space<vmem>>, %arg4: memref<1024x384xbf16, #tpu.memory_space<vmem>>, %arg5: memref<1x384xf32, #tpu.memory_space<vmem>>, %arg6: memref<8x384xbf16, #tpu.memory_space<vmem>>, %arg7: memref<8x384xf32, #tpu.memory_space<vmem>>) attributes {dimension_semantics = [#tpu.dimension_semantics<parallel>, #tpu.dimension_semantics<parallel>, #tpu.dimension_semantics<arbitrary>], iteration_bounds = array<i64: 1, 1, 4>, scalar_prefetch = 0 : i64, scratch_operands = 1 : i64, tpu.core_type = #tpu.core_type<tc>, window_params = [{transform_indices = @transform_0, window_bounds = array<i64: 8, 1024>}, {transform_indices = @transform_1, window_bounds = array<i64: 1024, 384>}, {transform_indices = @transform_2, window_bounds = array<i64: 1, 384>}, {transform_indices = @transform_3, window_bounds = array<i64: 8, 384>}]} {
    %c0_i32 = arith.constant 0 : i32
    %0 = arith.cmpi eq, %arg2, %c0_i32 : i32
    %1 = arith.extui %0 : i1 to i32
    %c0_i32_0 = arith.constant 0 : i32
    %2 = arith.cmpi ne, %1, %c0_i32_0 : i32
    scf.if %2 {
      %cst_9 = arith.constant 0.000000e+00 : f32
      %12 = vector.broadcast %cst_9 : f32 to vector<8x384xf32>
      %c0_10 = arith.constant 0 : index
      %c0_11 = arith.constant 0 : index
      %13 = vector.load %arg7[%c0_10, %c0_11] : memref<8x384xf32, #tpu.memory_space<vmem>>, vector<8x384xf32>
      tpu.vector_store %arg7[%c0_10, %c0_11], %12 {strides = array<i32>} : memref<8x384xf32, #tpu.memory_space<vmem>>, vector<8x384xf32>,
    } else {
    }
    %c0 = arith.constant 0 : index
    %c0_1 = arith.constant 0 : index
    %3 = vector.load %arg7[%c0, %c0_1] : memref<8x384xf32, #tpu.memory_space<vmem>>, vector<8x384xf32>
    %c0_2 = arith.constant 0 : index
    %c0_3 = arith.constant 0 : index
    %4 = vector.load %arg3[%c0_2, %c0_3] : memref<8x1024xbf16, #tpu.memory_space<vmem>>, vector<8x1024xbf16>
    %c0_4 = arith.constant 0 : index
    %c0_5 = arith.constant 0 : index
    %5 = vector.load %arg4[%c0_4, %c0_5] : memref<1024x384xbf16, #tpu.memory_space<vmem>>, vector<1024x384xbf16>
    %cst = arith.constant dense<0.000000e+00> : vector<8x384xf32>
    %6 = tpu.matmul %4, %5, %cst {dimension_numbers = #tpu.dot_dimension_numbers<[1], [0], [0], [1], [0, 0, 1, 1], [], []>} : vector<8x1024xbf16>, vector<1024x384xbf16>, vector<8x384xf32> -> vector<8x384xf32>
    %7 = arith.addf %3, %6 : vector<8x384xf32>
    %c0_6 = arith.constant 0 : index
    %c0_7 = arith.constant 0 : index
    %8 = vector.load %arg7[%c0_6, %c0_7] : memref<8x384xf32, #tpu.memory_space<vmem>>, vector<8x384xf32>
    tpu.vector_store %arg7[%c0_6, %c0_7], %7 {strides = array<i32>} : memref<8x384xf32, #tpu.memory_space<vmem>>, vector<8x384xf32>,
    %c3_i32 = arith.constant 3 : i32
    %9 = arith.cmpi eq, %arg2, %c3_i32 : i32
    %10 = arith.extui %9 : i1 to i32
    %c0_i32_8 = arith.constant 0 : i32
    %11 = arith.cmpi ne, %10, %c0_i32_8 : i32
    scf.if %11 {
      %c0_9 = arith.constant 0 : index
      %c0_10 = arith.constant 0 : index
      %12 = vector.load %arg7[%c0_9, %c0_10] : memref<8x384xf32, #tpu.memory_space<vmem>>, vector<8x384xf32>
      %c0_11 = arith.constant 0 : index
      %c0_12 = arith.constant 0 : index
      %13 = vector.load %arg5[%c0_11, %c0_12] : memref<1x384xf32, #tpu.memory_space<vmem>>, vector<1x384xf32>
      %14 = vector.broadcast %13 : vector<1x384xf32> to vector<8x384xf32>
      %15 = arith.addf %12, %14 : vector<8x384xf32>
      %cst_13 = arith.constant 0.000000e+00 : f32
      %16 = vector.broadcast %cst_13 : f32 to vector<8x384xf32>
      %17 = arith.maximumf %15, %16 : vector<8x384xf32>
      %18 = arith.truncf %17 : vector<8x384xf32> to vector<8x384xbf16>
      %c0_14 = arith.constant 0 : index
      %c0_15 = arith.constant 0 : index
      %19 = vector.load %arg6[%c0_14, %c0_15] : memref<8x384xbf16, #tpu.memory_space<vmem>>, vector<8x384xbf16>
      tpu.vector_store %arg6[%c0_14, %c0_15], %18 {strides = array<i32>} : memref<8x384xbf16, #tpu.memory_space<vmem>>, vector<8x384xbf16>,
    } else {
    }
    return
  }
  func.func @transform_0(%arg0: i32, %arg1: i32, %arg2: i32) -> (i32, i32) {
    %c0_i32 = arith.constant 0 : i32
    return %arg0, %arg2 : i32, i32
  }
  func.func @transform_1(%arg0: i32, %arg1: i32, %arg2: i32) -> (i32, i32) {
    %c0_i32 = arith.constant 0 : i32
    return %arg2, %arg1 : i32, i32
  }
  func.func @transform_2(%arg0: i32, %arg1: i32, %arg2: i32) -> (i32, i32) {
    %c0_i32 = arith.constant 0 : i32
    %c0_i32_0 = arith.constant 0 : i32
    return %c0_i32, %arg1 : i32, i32
  }
  func.func @transform_3(%arg0: i32, %arg1: i32, %arg2: i32) -> (i32, i32) {
    %c0_i32 = arith.constant 0 : i32
    return %arg0, %arg1 : i32, i32
  }
}

module attributes {stable_mosaic.version = 11 : i64} {
  func.func @_matmul_bias_kernel(%arg0: i32, %arg1: i32, %arg2: i32, %arg3: memref<8x384xbf16, #tpu.memory_space<vmem>>, %arg4: memref<384x128xbf16, #tpu.memory_space<vmem>>, %arg5: memref<1x128xf32, #tpu.memory_space<vmem>>, %arg6: memref<8x128xbf16, #tpu.memory_space<vmem>>, %arg7: memref<8x128xf32, #tpu.memory_space<vmem>>) attributes {dimension_semantics = [#tpu.dimension_semantics<parallel>, #tpu.dimension_semantics<parallel>, #tpu.dimension_semantics<arbitrary>], iteration_bounds = array<i64: 1, 1, 1>, scalar_prefetch = 0 : i64, scratch_operands = 1 : i64, tpu.core_type = #tpu.core_type<tc>, window_params = [{transform_indices = @transform_0, window_bounds = array<i64: 8, 384>}, {transform_indices = @transform_1, window_bounds = array<i64: 384, 128>}, {transform_indices = @transform_2, window_bounds = array<i64: 1, 128>}, {transform_indices = @transform_3, window_bounds = array<i64: 8, 128>}]} {
    %c0_i32 = arith.constant 0 : i32
    %0 = arith.cmpi eq, %arg2, %c0_i32 : i32
    %1 = arith.extui %0 : i1 to i32
    %c0_i32_0 = arith.constant 0 : i32
    %2 = arith.cmpi ne, %1, %c0_i32_0 : i32
    scf.if %2 {
      %cst_10 = arith.constant 0.000000e+00 : f32
      %12 = vector.broadcast %cst_10 : f32 to vector<8x128xf32>
      %c0_11 = arith.constant 0 : index
      %c0_12 = arith.constant 0 : index
      %13 = vector.load %arg7[%c0_11, %c0_12] : memref<8x128xf32, #tpu.memory_space<vmem>>, vector<8x128xf32>
      tpu.vector_store %arg7[%c0_11, %c0_12], %12 {strides = array<i32>} : memref<8x128xf32, #tpu.memory_space<vmem>>, vector<8x128xf32>,
    } else {
    }
    %c0 = arith.constant 0 : index
    %c0_1 = arith.constant 0 : index
    %3 = vector.load %arg7[%c0, %c0_1] : memref<8x128xf32, #tpu.memory_space<vmem>>, vector<8x128xf32>
    %c0_2 = arith.constant 0 : index
    %c0_3 = arith.constant 0 : index
    %4 = vector.load %arg3[%c0_2, %c0_3] : memref<8x384xbf16, #tpu.memory_space<vmem>>, vector<8x384xbf16>
    %c0_4 = arith.constant 0 : index
    %c0_5 = arith.constant 0 : index
    %5 = vector.load %arg4[%c0_4, %c0_5] : memref<384x128xbf16, #tpu.memory_space<vmem>>, vector<384x128xbf16>
    %cst = arith.constant dense<0.000000e+00> : vector<8x128xf32>
    %6 = tpu.matmul %4, %5, %cst {dimension_numbers = #tpu.dot_dimension_numbers<[1], [0], [0], [1], [0, 0, 1, 1], [], []>} : vector<8x384xbf16>, vector<384x128xbf16>, vector<8x128xf32> -> vector<8x128xf32>
    %7 = arith.addf %3, %6 : vector<8x128xf32>
    %c0_6 = arith.constant 0 : index
    %c0_7 = arith.constant 0 : index
    %8 = vector.load %arg7[%c0_6, %c0_7] : memref<8x128xf32, #tpu.memory_space<vmem>>, vector<8x128xf32>
    tpu.vector_store %arg7[%c0_6, %c0_7], %7 {strides = array<i32>} : memref<8x128xf32, #tpu.memory_space<vmem>>, vector<8x128xf32>,
    %c0_i32_8 = arith.constant 0 : i32
    %9 = arith.cmpi eq, %arg2, %c0_i32_8 : i32
    %10 = arith.extui %9 : i1 to i32
    %c0_i32_9 = arith.constant 0 : i32
    %11 = arith.cmpi ne, %10, %c0_i32_9 : i32
    scf.if %11 {
      %c0_10 = arith.constant 0 : index
      %c0_11 = arith.constant 0 : index
      %12 = vector.load %arg7[%c0_10, %c0_11] : memref<8x128xf32, #tpu.memory_space<vmem>>, vector<8x128xf32>
      %c0_12 = arith.constant 0 : index
      %c0_13 = arith.constant 0 : index
      %13 = vector.load %arg5[%c0_12, %c0_13] : memref<1x128xf32, #tpu.memory_space<vmem>>, vector<1x128xf32>
      %14 = vector.broadcast %13 : vector<1x128xf32> to vector<8x128xf32>
      %15 = arith.addf %12, %14 : vector<8x128xf32>
      %cst_14 = arith.constant 0.000000e+00 : f32
      %16 = vector.broadcast %cst_14 : f32 to vector<8x128xf32>
      %17 = arith.maximumf %15, %16 : vector<8x128xf32>
      %18 = arith.truncf %17 : vector<8x128xf32> to vector<8x128xbf16>
      %c0_15 = arith.constant 0 : index
      %c0_16 = arith.constant 0 : index
      %19 = vector.load %arg6[%c0_15, %c0_16] : memref<8x128xbf16, #tpu.memory_space<vmem>>, vector<8x128xbf16>
      tpu.vector_store %arg6[%c0_15, %c0_16], %18 {strides = array<i32>} : memref<8x128xbf16, #tpu.memory_space<vmem>>, vector<8x128xbf16>,
    } else {
    }
    return
  }
  func.func @transform_0(%arg0: i32, %arg1: i32, %arg2: i32) -> (i32, i32) {
    %c0_i32 = arith.constant 0 : i32
    return %arg0, %arg2 : i32, i32
  }
  func.func @transform_1(%arg0: i32, %arg1: i32, %arg2: i32) -> (i32, i32) {
    %c0_i32 = arith.constant 0 : i32
    return %arg2, %arg1 : i32, i32
  }
  func.func @transform_2(%arg0: i32, %arg1: i32, %arg2: i32) -> (i32, i32) {
    %c0_i32 = arith.constant 0 : i32
    %c0_i32_0 = arith.constant 0 : i32
    return %c0_i32, %arg1 : i32, i32
  }
  func.func @transform_3(%arg0: i32, %arg1: i32, %arg2: i32) -> (i32, i32) {
    %c0_i32 = arith.constant 0 : i32
    return %arg0, %arg1 : i32, i32
  }
}

module attributes {stable_mosaic.version = 11 : i64} {
  func.func @_matmul_bias_kernel(%arg0: i32, %arg1: i32, %arg2: i32, %arg3: memref<8x128xbf16, #tpu.memory_space<vmem>>, %arg4: memref<128x128xbf16, #tpu.memory_space<vmem>>, %arg5: memref<1x128xf32, #tpu.memory_space<vmem>>, %arg6: memref<8x128xf32, #tpu.memory_space<vmem>>, %arg7: memref<8x128xf32, #tpu.memory_space<vmem>>) attributes {dimension_semantics = [#tpu.dimension_semantics<parallel>, #tpu.dimension_semantics<parallel>, #tpu.dimension_semantics<arbitrary>], iteration_bounds = array<i64: 1, 1, 1>, scalar_prefetch = 0 : i64, scratch_operands = 1 : i64, tpu.core_type = #tpu.core_type<tc>, window_params = [{transform_indices = @transform_0, window_bounds = array<i64: 8, 128>}, {transform_indices = @transform_1, window_bounds = array<i64: 128, 128>}, {transform_indices = @transform_2, window_bounds = array<i64: 1, 128>}, {transform_indices = @transform_3, window_bounds = array<i64: 8, 128>}]} {
    %c0_i32 = arith.constant 0 : i32
    %0 = arith.cmpi eq, %arg2, %c0_i32 : i32
    %1 = arith.extui %0 : i1 to i32
    %c0_i32_0 = arith.constant 0 : i32
    %2 = arith.cmpi ne, %1, %c0_i32_0 : i32
    scf.if %2 {
      %cst_10 = arith.constant 0.000000e+00 : f32
      %12 = vector.broadcast %cst_10 : f32 to vector<8x128xf32>
      %c0_11 = arith.constant 0 : index
      %c0_12 = arith.constant 0 : index
      %13 = vector.load %arg7[%c0_11, %c0_12] : memref<8x128xf32, #tpu.memory_space<vmem>>, vector<8x128xf32>
      tpu.vector_store %arg7[%c0_11, %c0_12], %12 {strides = array<i32>} : memref<8x128xf32, #tpu.memory_space<vmem>>, vector<8x128xf32>,
    } else {
    }
    %c0 = arith.constant 0 : index
    %c0_1 = arith.constant 0 : index
    %3 = vector.load %arg7[%c0, %c0_1] : memref<8x128xf32, #tpu.memory_space<vmem>>, vector<8x128xf32>
    %c0_2 = arith.constant 0 : index
    %c0_3 = arith.constant 0 : index
    %4 = vector.load %arg3[%c0_2, %c0_3] : memref<8x128xbf16, #tpu.memory_space<vmem>>, vector<8x128xbf16>
    %c0_4 = arith.constant 0 : index
    %c0_5 = arith.constant 0 : index
    %5 = vector.load %arg4[%c0_4, %c0_5] : memref<128x128xbf16, #tpu.memory_space<vmem>>, vector<128x128xbf16>
    %cst = arith.constant dense<0.000000e+00> : vector<8x128xf32>
    %6 = tpu.matmul %4, %5, %cst {dimension_numbers = #tpu.dot_dimension_numbers<[1], [0], [0], [1], [0, 0, 1, 1], [], []>} : vector<8x128xbf16>, vector<128x128xbf16>, vector<8x128xf32> -> vector<8x128xf32>
    %7 = arith.addf %3, %6 : vector<8x128xf32>
    %c0_6 = arith.constant 0 : index
    %c0_7 = arith.constant 0 : index
    %8 = vector.load %arg7[%c0_6, %c0_7] : memref<8x128xf32, #tpu.memory_space<vmem>>, vector<8x128xf32>
    tpu.vector_store %arg7[%c0_6, %c0_7], %7 {strides = array<i32>} : memref<8x128xf32, #tpu.memory_space<vmem>>, vector<8x128xf32>,
    %c0_i32_8 = arith.constant 0 : i32
    %9 = arith.cmpi eq, %arg2, %c0_i32_8 : i32
    %10 = arith.extui %9 : i1 to i32
    %c0_i32_9 = arith.constant 0 : i32
    %11 = arith.cmpi ne, %10, %c0_i32_9 : i32
    scf.if %11 {
      %c0_10 = arith.constant 0 : index
      %c0_11 = arith.constant 0 : index
      %12 = vector.load %arg7[%c0_10, %c0_11] : memref<8x128xf32, #tpu.memory_space<vmem>>, vector<8x128xf32>
      %c0_12 = arith.constant 0 : index
      %c0_13 = arith.constant 0 : index
      %13 = vector.load %arg5[%c0_12, %c0_13] : memref<1x128xf32, #tpu.memory_space<vmem>>, vector<1x128xf32>
      %14 = vector.broadcast %13 : vector<1x128xf32> to vector<8x128xf32>
      %15 = arith.addf %12, %14 : vector<8x128xf32>
      %c0_14 = arith.constant 0 : index
      %c0_15 = arith.constant 0 : index
      %16 = vector.load %arg6[%c0_14, %c0_15] : memref<8x128xf32, #tpu.memory_space<vmem>>, vector<8x128xf32>
      tpu.vector_store %arg6[%c0_14, %c0_15], %15 {strides = array<i32>} : memref<8x128xf32, #tpu.memory_space<vmem>>, vector<8x128xf32>,
    } else {
    }
    return
  }
  func.func @transform_0(%arg0: i32, %arg1: i32, %arg2: i32) -> (i32, i32) {
    %c0_i32 = arith.constant 0 : i32
    return %arg0, %arg2 : i32, i32
  }
  func.func @transform_1(%arg0: i32, %arg1: i32, %arg2: i32) -> (i32, i32) {
    %c0_i32 = arith.constant 0 : i32
    return %arg2, %arg1 : i32, i32
  }
  func.func @transform_2(%arg0: i32, %arg1: i32, %arg2: i32) -> (i32, i32) {
    %c0_i32 = arith.constant 0 : i32
    %c0_i32_0 = arith.constant 0 : i32
    return %c0_i32, %arg1 : i32, i32
  }
  func.func @transform_3(%arg0: i32, %arg1: i32, %arg2: i32) -> (i32, i32) {
    %c0_i32 = arith.constant 0 : i32
    return %arg0, %arg1 : i32, i32
  }
}

</mosaic_0001>

<bundles_post_ra>
// kernel: lego_forward.8
= control target key start
LH: loop header
LB: loop body
LE: loop exit
PB: predicated region body
PF: predicated region fallthrough
CT: control target
= control target key end

     0   :  { %v435_v1 = vmov 0.0   ;;  %vm436_vm0 = vmmov 0   ;;  %s541_s1 = inlined_call_operand.vmem [shape: bf16[384,128], index: 1, kind: input, shape index: {}]   ;;  %s542_s0 = inlined_call_operand.vmem [shape: bf16[8,384], index: 0, kind: input, shape index: {}]   ;;  %s543_s2 = inlined_call_operand.vmem [shape: f32[1,128], index: 2, kind: input, shape index: {}]   ;;  %s544_s3 = inlined_call_operand.vmem [shape: bf16[8,128], index: 3, kind: output, shape index: {}]  }
   0x1   :  { %v408_v0 = vld [vmem:[%s541_s1 + $0x40] sm:$0xff]   ;;  %386 = vmatprep.subr.bf16.mxu1 %v435_v1  ;;  %402 = vmatprep.mubr.msk.bf16.mxu1 %vm436_vm0, %v435_v1  ;;  %v411_v4 = vld [vmem:[%s541_s1 + $0x48] sm:$0xff]   ;;  %v414_v7 = vld [vmem:[%s541_s1 + $0x50] sm:$0xff]  }
   0x2   :  { %v409_v2 = vld [vmem:[%s541_s1] sm:$0xff]   ;;  %355 = vmatprep.subr.bf16.mxu0 %v408_v0  ;;  %v412_v5 = vld [vmem:[%s541_s1 + $0x8] sm:$0xff]   ;;  %v415_v8 = vld [vmem:[%s541_s1 + $0x10] sm:$0xff]  }
   0x3   :  { %v410_v3 = vld [vmem:[%s541_s1 + $0x80] sm:$0xff]   ;;  %356 = vmatpush3.bf16.msra.mxu0 %v409_v2  ;;  %v413_v6 = vld [vmem:[%s541_s1 + $0x88] sm:$0xff]   ;;  %v416_v9 = vld [vmem:[%s541_s1 + $0x90] sm:$0xff]  }
   0x4   :  { %387 = vmatpush3.bf16.msra.mxu1 %v410_v3  ;;  %357 = vmatprep.subr.bf16.mxu0 %v411_v4  ;;  %v417_v10 = vld [vmem:[%s541_s1 + $0x58] sm:$0xff]   ;;  %v420_v13 = vld [vmem:[%s541_s1 + $0x60] sm:$0xff]   ;;  %v423_v16 = vld [vmem:[%s541_s1 + $0x68] sm:$0xff]  }
   0x5   :  { %388 = vmatprep.subr.bf16.mxu1 %v435_v1  ;;  %v418_v11 = vld [vmem:[%s541_s1 + $0x18] sm:$0xff]   ;;  %v421_v14 = vld [vmem:[%s541_s1 + $0x20] sm:$0xff]   ;;  %v424_v17 = vld [vmem:[%s541_s1 + $0x28] sm:$0xff]  }
   0x6   :  { %v419_v12 = vld [vmem:[%s541_s1 + $0x98] sm:$0xff]   ;;  %v422_v15 = vld [vmem:[%s541_s1 + $0xa0] sm:$0xff]   ;;  %v425_v18 = vld [vmem:[%s541_s1 + $0xa8] sm:$0xff]  }
   0x7   :  { %358 = vmatpush3.bf16.msra.mxu0 %v412_v5  ;;  %v426_v19 = vld [vmem:[%s541_s1 + $0x70] sm:$0xff]   ;;  %v429_v22 = vld [vmem:[%s541_s1 + $0x78] sm:$0xff]   ;;  %v21_v23 = vld [vmem:[%s542_s0] sm:$0xff] }
   0x8   :  { %389 = vmatpush3.bf16.msra.mxu1 %v413_v6  ;;  %359 = vmatprep.subr.bf16.mxu0 %v414_v7  ;;  %v427_v20 = vld [vmem:[%s541_s1 + $0x30] sm:$0xff]   ;;  %v328_v24 = vcombine.high %v21_v23, %v21_v23  ;;  %v430_v25 = vld [vmem:[%s541_s1 + $0x38] sm:$0xff]   ;;  %v327_v27 = vcombine.low %v21_v23, %v21_v23  ;;  %v434_v28 = vld [vmem:[%s542_s0 + $0x8] ss:$0 sps:$4 sm:$0xff]  }
   0x9   :  { %390 = vmatprep.subr.bf16.mxu1 %v435_v1  ;;  %v428_v21 = vld [vmem:[%s541_s1 + $0xb0] sm:$0xff]   ;;  %v431_v26 = vld [vmem:[%s541_s1 + $0xb8] sm:$0xff]   ;;  %v354_v35 = vld [vmem:[%s543_s2] ss:$0 sm:$0xff] }
   0xa   :  { %258 = vmatprep.mubr.bf16.mxu0 %v328_v24 }
   0xb   :  { %360 = vmatpush3.bf16.msra.mxu0 %v415_v8 }
   0xc   :  { %391 = vmatpush3.bf16.msra.mxu1 %v416_v9  ;;  %361 = vmatprep.subr.bf16.mxu0 %v417_v10 }
   0xd   :  { %392 = vmatprep.subr.bf16.mxu1 %v435_v1 }
   0xf   :  { %362 = vmatpush3.bf16.msra.mxu0 %v418_v11 }
  0x10   :  { %393 = vmatpush3.bf16.msra.mxu1 %v419_v12  ;;  %363 = vmatprep.subr.bf16.mxu0 %v420_v13 }
  0x11   :  { %394 = vmatprep.subr.bf16.mxu1 %v435_v1 }
  0x13   :  { %364 = vmatpush3.bf16.msra.mxu0 %v421_v14 }
  0x14   :  { %395 = vmatpush3.bf16.msra.mxu1 %v422_v15  ;;  %365 = vmatprep.subr.bf16.mxu0 %v423_v16 }
  0x15   :  { %396 = vmatprep.subr.bf16.mxu1 %v435_v1 }
  0x17   :  { %366 = vmatpush3.bf16.msra.mxu0 %v424_v17 }
  0x18   :  { %397 = vmatpush3.bf16.msra.mxu1 %v425_v18  ;;  %367 = vmatprep.subr.bf16.mxu0 %v426_v19 }
  0x19   :  { %398 = vmatprep.subr.bf16.mxu1 %v435_v1 }
  0x1b   :  { %368 = vmatpush3.bf16.msra.mxu0 %v427_v20 }
  0x1c   :  { %399 = vmatpush3.bf16.msra.mxu1 %v428_v21  ;;  %369 = vmatprep.subr.bf16.mxu0 %v429_v22 }
  0x1d   :  { %400 = vmatprep.subr.bf16.mxu1 %v435_v1 }
  0x1f   :  { %370 = vmatpush3.bf16.msra.mxu0 %v430_v25 }
  0x20   :  { %401 = vmatpush3.bf16.msra.mxu1 %v431_v26 }
  0x22   :  { %259 = vmatmul.mubr.bf16.vlgmr.msra.gmra.mrb[0].mxu0 %v327_v27 }
  0x23   :  { %403 = vmatmul.mubr.bf16.vlgmr.msra.gmra.mrb[0].mxu1 %v434_v28 }
  0xf5   :  { %v371_v29 = vpop.f32.mrb[0].mxu0 }
  0xf6   :  { %v300_v30 = vpop.f32.mrb[0].mxu1  ;;  %v372_v31 = vpop.f32.mrb[1].mxu0 }
  0xf7   :  { %v373_v32 = vadd.f32 %v372_v31, %v371_v29  ;;  %v404_v33 = vpop.f32.mrb[1].mxu1  ;;  %v374_v34 = vpop.f32.mrb[2].mxu0 }
  0xf8   :  { %v303_v36 = vpop.f32.mrb[2].mxu1  ;;  %v375_v37 = vpop.f32.mrb[3].mxu0 }
  0xf9   :  { %v301_v38 = vadd.f32 %v373_v32, %v300_v30  ;;  %v405_v39 = vpop.f32.mrb[3].mxu1 }
  0xfb   :  { %v319_v40 = vadd.f32 %v354_v35, %v301_v38 }
  0xfd   :  { %v320_v41 = vmax.f32 %v319_v40, 0.0 }
  0xff   :  { %v321_v42 = vpack.c.bf16 %v320_v41, %v320_v41 }
 0x101   :  { %322 = vst [vmem:[%s544_s3] sm:$0xf] %v321_v42 }

// kernel: lego_forward.5
= control target key start
LH: loop header
LB: loop body
LE: loop exit
PB: predicated region body
PF: predicated region fallthrough
CT: control target
= control target key end

     0   :  { %8 = vsyncpa [#allocation3], 0  ;;  %s4536_s12 = smov 0   ;;  %s4538_s13 = smov 0   ;;  %s5036_s0 = inlined_call_operand.vmem [shape: bf16[2,32,32,3], index: 0, kind: input, shape index: {}]   ;;  %s5037_s1 = inlined_call_operand.vmem [shape: bf16[4,3,32], index: 1, kind: input, shape index: {}]   ;;  %s5038_s2 = inlined_call_operand.hbm [shape: f32[1,32], index: 2, kind: input, shape index: {}]   ;;  %s5039_s3 = inlined_call_operand.vmem [shape: bf16[2,15,15,32], index: 3, kind: output, shape index: {}]  }
   0x1   :  { %s4540_s14 = smov 0   ;;  %s4542_s15 = smov 0  }
   0x2   :  { %s4544_s16 = smov 0  }
   0x3 LB: > { %s3572_s17 = sadd.s32 4294967295, %s4510_s16   ;;  %s23_s18 = sadd.s32 1, %s4502_s14  ;;  %s4510_s16 = sphi %s4544_s16, %s14_s16   ;;  %s4506_s15 = sphi %s4542_s15, %s5053_s15   ;;  %s4502_s14 = sphi %s4540_s14, %s5052_s14   ;;  %s4498_s13 = sphi %s4538_s13, %s5051_s13   ;;  %s4494_s12 = sphi %s4536_s12, %s5050_s12  }
   0x4   : > { %p24_p0 = scmp.ge.s32.totalorder %s23_s18, 3  ;;  %s26_s19 = sadd.s32 1, %s4506_s15 }
   0x5   : > { %p3574_p1 = scmp.ge.s32.totalorder %s4510_s16, 1  ;;  %p127_p2 = scmp.lt.s32.totalorder %s4510_s16, 7 }
   0x6   : > { %s5055_s18 = smov (%p24_p0, %s23_s18), 0  ;;  %s5057_s19 = smov (!%p24_p0, %s26_s19), %s4506_s15 }
   0x7   : > { %p4569_p3 = pnand %p3574_p1, %p127_p2  ;;  %p28_p4 = scmp.ge.s32.totalorder %s5057_s19, 2 }
   0x8   : > { %p4573_p5 = scmp.eq.s32.totalorder %s3572_s17, 0  ;;  %s4512_s22 = smov [#allocation2]  }
   0x9   : > { %s5043_s20 = scalar_select %p4569_p3, 1, 0 }
   0xa   : > { %s5044_s21 = scalar_select %p4573_p5, 1, 0 }
   0xb   : > { %p4360_p6 = pneg %p4569_p3  ;;  %s5059_s19 = smov (%p28_p4, %s5057_s19), 0 }
   0xc   : > { %s143_s23 = sshll.u32 %s4512_s22, 4  ;;  %s4440_s27 = scalar_lea.hbm %s5038_s2, 16  ;;  %s144_s23 = int_to_ptr.vmem [resolvable:$true] %s143_s23 }
   0xd   : > { %p4583_p7 = pnand %p4573_p5, %p4360_p6  ;;  %p4441_p8 = scmp.ne.s32.totalorder %s5038_s2, %s4440_s27 }
   0xe   : > { %p4447_p12 = scmp.lt.u32.totalorder %s4440_s27, %s5038_s2 }
   0xf   : > { %p4442_p9 = pneg %p4583_p7 }
  0x11   : > { %p4443_p10 = pnand %p4442_p9, %p4441_p8 }
  0x13   : > { %p4444_p11 = pneg %p4443_p10 }
  0x15   : > { %p4449_p13 = pnand %p4447_p12, %p4444_p11 }
  0x17   : > { %4452 = shalt.err (!%p4449_p13)
}
  0x18   : > { %s4453_s5 = scalar_lea.vmem %s144_s23, 16  ;;  %s4460_s6 = scalar_lea.vmem %s144_s23, 32 }
  0x19   : > { %p4454_p0 = scmp.ne.s32.totalorder %s144_s23, %s4453_s5  ;;  %p4461_p4 = scmp.lt.s32.totalorder %s144_s23, %s144_s23 }
  0x1a   : > { %p4462_p6 = scmp.lt.s32.totalorder %s4460_s6, %s4453_s5 }
  0x1b   : > { %p4456_p1 = pnand %p4454_p0, %p4442_p9 }
  0x1c   : > { %p4463_p5 = por %p4462_p6, %p4461_p4 }
  0x1d   : > { %p4457_p2 = pneg %p4456_p1 }
  0x1f   : > { %p4464_p3 = pnand %p4463_p5, %p4457_p2 }
  0x21   : > { %4467 = shalt.err (!%p4464_p3)
}
  0x22   : > { %4363 = dma.hbm_to_vmem [thread:$0]  (!%p4583_p7), %s5038_s2, 16, %s144_s23, [#allocation3]  }
  0x23   : > { %p5046_p8 = scmp.ne.s32.totalorder %s5043_s20, 0 }
  0x24   : > { %p5047_p10 = scmp.ne.s32.totalorder (!%p5046_p8), %s5044_s21, 0 }
  0x25   : > { %164 = sbr.rel (%p5046_p8) target bundleno = 1667 (0x683), region = 32 }
  0x2c   : > { %4489 = dma.done.wait (%p5047_p10), [#allocation3], 16  }
  0x2d   : > { %4491 = vsyncadd (%p5047_p10), [#allocation3], 4294967280  ;;  %vm273_vm0 = vcmask 1040384   ;;  %p193_p3 = scmp.lt.s32.totalorder %s4498_s13, 1  ;;  %s3809_s9 = smul.u32 160, %s4494_s12  ;;  %vm274_vm1 = vcmask 1041408  }
  0x2e   : > { %v4513_v0 = vmov 65535   ;;  %vm250_vm2 = vsmask.f32 7424  ;;  %v3583_v3 = vld [vmem:[%s5037_s1 + $0x2] sm:$0x3]  ;;  %vm266_vm3 = vcmask 23552  }
  0x2f   : > { %v275_v1 = vsel %vm273_vm0, 4294967295, %v4513_v0  ;;  %s5061_s13 = smov (!%p193_p3, %s4498_s13), 1  ;;  %v210_v13 = vld [vmem:[%s5037_s1] sm:$0x3]  ;;  %v3584_v16 = vld [vmem:[%s5037_s1 + $0x4] sm:$0x3] }
  0x30   : > { %s3808_s10 = sshll.u32 %s5061_s13, 9  ;;  %v276_v2 = vsel %vm274_vm1, %v275_v1, 0  ;;  %v3585_v33 = vld [vmem:[%s5037_s1 + $0x6] sm:$0x3]  ;;  %v4514_v57 = vmov 0.0   ;;  %vm4515_vm4 = vmmov 0  }
  0x31   : > { %s197_s20 = scalar_lea.vmem %s5036_s0, %s3808_s10  ;;  %v4623_v4 = vand.u32 %v3583_v3, %v276_v2  ;;  %v4636_v15 = vand.u32 %v276_v2, %v210_v13  ;;  %v4644_v27 = vand.u32 %v3584_v16, %v276_v2  ;;  %v4661_v34 = vand.u32 %v3585_v33, %v276_v2  ;;  %s198_s30 = smul.u32 5, %s4494_s12 }
  0x32   : > { %s4618_s21 = scalar_lea.vmem %s197_s20, %s3809_s9  ;;  %vm795_vm5 = vcmask 1046528   ;;  %vm827_vm8 = vcmask 244736   ;;  %s4355_s4 = smul.u32 30, %s5061_s13  ;;  %vm883_vm9 = vcmask 257024   ;;  %vm886_vm10 = vsmask.f32 3328 }
  0x33   : > { %v4410_v5 = vld [vmem:[%s4618_s21] sm:$0xff]   ;;  %v4411_v6 = vld [vmem:[%s4618_s21 + $0x8] sm:$0xff]   ;;  %3955 = vmatprep.subr.bf16.mxu0 %v4623_v4  ;;  %3979 = vmatprep.subr.bf16.mxu1 %v4623_v4  ;;  %v4412_v11 = vld [vmem:[%s4618_s21 + $0x10] sm:$0xff]   ;;  %p201_p5 = scmp.lt.s32.totalorder %s198_s30, 14 }
  0x34   : > { %v252_v7 = vshrl.u32 %v4410_v5, 16  ;;  %v254_v8 = vshll.u32 %v4410_v5, 16  ;;  %3956 = vmatpush3.bf16.msra.mxu0 %v4623_v4  ;;  %3980 = vmatpush3.bf16.msra.mxu1 %v4623_v4  ;;  %v259_v9 = vshll.u32 %v4411_v6, 16  ;;  %v263_v10 = vshrl.u32 %v4411_v6, 16  ;;  %v4413_v12 = vld [vmem:[%s4618_s21 + $0x18] sm:$0xff]   ;;  %v4414_v31 = vld [vmem:[%s4618_s21 + $0x20] sm:$0xff]   ;;  %vm4807_vm11 = vmand %vm883_vm9, %vm886_vm10 }
  0x35   : > { %v465_v18 = vshrl.u32 %v4412_v11, 16  ;;  %v467_v19 = vshll.u32 %v4412_v11, 16  ;;  %v471_v20 = vshll.u32 %v4413_v12, 16  ;;  %v475_v22 = vshrl.u32 %v4413_v12, 16  ;;  %3961 = vmatprep.subr.bf16.mxu0 %v4636_v15  ;;  %3985 = vmatprep.subr.bf16.mxu1 %v4636_v15  ;;  %v4415_v35 = vld [vmem:[%s4618_s21 + $0x28] sm:$0xff]   ;;  %v4416_v41 = vld [vmem:[%s4618_s21 + $0x20] sm:$0xff]  }
  0x36   : > { %v256_v14 = vrot.slane %v254_v8, 1  ;;  %v261_v17 = vrot.slane %v259_v9, 1  ;;  %v717_v32 = vshll.u32 %v4414_v31, 16  ;;  %v715_v36 = vshrl.u32 %v4414_v31, 16  ;;  %v4417_v43 = vld [vmem:[%s4618_s21 + $0x28] sm:$0xff]   ;;  %v4696_v55 = vld [vmem:[%s4618_s21 + $0x30] sm:$0xff]  }
  0x37   : > { %v469_v24 = vrot.slane %v467_v19, 1  ;;  %v473_v25 = vrot.slane %v471_v20, 1  ;;  %v721_v38 = vshll.u32 %v4415_v35, 16  ;;  %v914_v44 = vshll.u32 %v4416_v41, 16  ;;  %v4699_v56 = vld [vmem:[%s4618_s21 + $0x38] sm:$0xff]   ;;  %s5063_s30 = smov (!%p201_p5, %s198_s30), 14 }
  0x38   : > { %v257_v21 = vor.u32 %v256_v14, %v252_v7  ;;  %v265_v23 = vor.u32 %v263_v10, %v261_v17  ;;  %v719_v37 = vrot.slane %v717_v32, 1  ;;  %v912_v45 = vshrl.u32 %v4416_v41, 16  ;;  %s3581_s5 = sshll.u32 %s5063_s30, 1 }
  0x39   : > { %v470_v28 = vor.u32 %v469_v24, %v465_v18  ;;  %v477_v29 = vor.u32 %v475_v22, %v473_v25  ;;  %v723_v40 = vrot.slane %v721_v38, 1  ;;  %v916_v46 = vrot.slane %v914_v44, 1  ;;  %v4719_v22 = vld [vmem:[#allocation2] ss:$0 sm:$0xff]  ;;  %s205_s6 = sadd.s32 %s4355_s4, %s3581_s5 }
  0x3a   : > { %v262_v26 = vsel %vm250_vm2, %v257_v21, %v261_v17  ;;  %v720_v39 = vor.u32 %v719_v37, %v715_v36  ;;  %v919_v47 = vshll.u32 %v4417_v43, 16  ;;  %v725_v48 = vshrl.u32 %v4415_v35, 16  ;;  %s3582_s7 = sshll.u32 %s205_s6, 2 }
  0x3b   : > { %3957 = vmatprep.mubr.msk.bf16.mxu0 %vm266_vm3, %v262_v26  ;;  %v474_v30 = vsel %vm250_vm2, %v470_v28, %v473_v25  ;;  %v917_v49 = vor.u32 %v916_v46, %v912_v45  ;;  %v923_v53 = vshrl.u32 %v4417_v43, 16  ;;  %v1113_v58 = vshll.u32 %v4696_v55, 16  ;;  %s4804_s10 = scalar_lea.vmem %s5039_s3, %s3582_s7 }
  0x3c   : > { %3958 = vmatmul.mubr.msk.bf16.vlgmr.msra.gmra.mrb[0].mxu0 %vm266_vm3, %v265_v23  ;;  %3981 = vmatprep.mubr.msk.bf16.mxu1 %vm266_vm3, %v474_v30  ;;  %v724_v42 = vsel %vm250_vm2, %v720_v39, %v723_v40  ;;  %v921_v50 = vrot.slane %v919_v47, 1  ;;  %v727_v51 = vor.u32 %v725_v48, %v723_v40  ;;  %v1111_v59 = vshrl.u32 %v4696_v55, 16 }
  0x3d   : > { %3962 = vmatpush3.bf16.msra.mxu0 %v4636_v15  ;;  %3963 = vmatprep.mubr.msk.bf16.mxu0 %vm266_vm3, %v4410_v5  ;;  %v1117_v60 = vshll.u32 %v4699_v56, 16  ;;  %v1115_v61 = vrot.slane %v1113_v58, 1  ;;  %v1121_v63 = vshrl.u32 %v4699_v56, 16 }
  0x3e   : > { %3967 = vmatprep.subr.bf16.mxu0 %v4644_v27  ;;  %3982 = vmatmul.mubr.msk.bf16.vlgmr.msra.gmra.mrb[0].mxu1 %vm266_vm3, %v477_v29  ;;  %v922_v52 = vsel %vm250_vm2, %v917_v49, %v921_v50  ;;  %v925_v54 = vor.u32 %v923_v53, %v921_v50  ;;  %v4421_v53 = vld [vmem:[%s4618_s21 + $0x48] sm:$0xff]  }
  0x3f   : > { %3986 = vmatpush3.bf16.msra.mxu1 %v4636_v15  ;;  %3987 = vmatprep.mubr.msk.bf16.mxu1 %vm266_vm3, %v4412_v11  ;;  %v1119_v62 = vrot.slane %v1117_v60, 1  ;;  %v1116_v0 = vor.u32 %v1115_v61, %v1111_v59  ;;  %v1364_v59 = vshll.u32 %v4421_v53, 16 }
  0x40   : > { %3991 = vmatprep.subr.bf16.mxu1 %v4644_v27 }
  0x41   : > { %v1123_v1 = vor.u32 %v1121_v63, %v1119_v62  ;;  %v1120_v2 = vsel %vm250_vm2, %v1116_v0, %v1119_v62  ;;  %v1366_v60 = vrot.slane %v1364_v59, 1  ;;  %v4422_v0 = vld [vmem:[%s4618_s21 + $0x40] sm:$0xff]  }
  0x48   : > { %3964 = vmatmul.mubr.msk.bf16.vlgmr.msra.gmra.mrb[0].mxu0 %vm266_vm3, %v4411_v6  ;;  %v218_v6 = vlaneseq }
  0x49   : > { %3968 = vmatpush3.bf16.msra.mxu0 %v4644_v27  ;;  %3969 = vmatprep.mubr.msk.bf16.mxu0 %vm266_vm3, %v4412_v11 }
  0x4a   : > { %3973 = vmatprep.subr.bf16.mxu0 %v4661_v34  ;;  %3988 = vmatmul.mubr.msk.bf16.vlgmr.msra.gmra.mrb[0].mxu1 %vm266_vm3, %v4413_v12  ;;  %v219_v14 = vshrl.u32 %v218_v6, 7  ;;  %v222_v36 = vand.u32 127, %v218_v6  ;;  %v1542_v6 = vshll.u32 %v4422_v0, 16 }
  0x4b   : > { %3992 = vmatpush3.bf16.msra.mxu1 %v4644_v27  ;;  %3993 = vmatprep.mubr.msk.bf16.mxu1 %vm266_vm3, %v4414_v31 }
  0x4c   : > { %3997 = vmatprep.subr.bf16.mxu1 %v4661_v34  ;;  %v220_v24 = vadd.s32 8, %v219_v14  ;;  %v223_v37 = vmul.u32 2, %v219_v14 }
  0x4e   : > { %v224_v38 = vmul.u32 2, %v220_v24  ;;  %vm225_vm6 = vcmp.eq.s32.totalorder %v222_v36, %v223_v37 }
  0x4f   : > { %v3586_v47 = vsel %vm225_vm6, 1.0, %v4514_v57 }
  0x50   : > { %vm226_vm7 = vcmp.eq.s32.totalorder %v222_v36, %v224_v38 }
  0x51   : > { %v3587_v48 = vsel %vm226_vm7, 1.0, %v4514_v57 }
  0x52   : > { %v4732_v50 = vpack.c.bf16 %v3587_v48, %v3586_v47 }
  0x54   : > { %3970 = vmatmul.mubr.msk.bf16.vlgmr.msra.gmra.mrb[0].mxu0 %vm266_vm3, %v4413_v12 }
  0x55   : > { %3974 = vmatpush3.bf16.msra.mxu0 %v4661_v34  ;;  %3975 = vmatprep.mubr.msk.bf16.mxu0 %vm266_vm3, %v474_v30 }
  0x56   : > { %3994 = vmatmul.mubr.msk.bf16.vlgmr.msra.gmra.mrb[0].mxu1 %vm266_vm3, %v4415_v35  ;;  %4003 = vmatprep.subr.bf16.mxu0 %v4514_v57 }
  0x57   : > { %3998 = vmatpush3.bf16.msra.mxu1 %v4661_v34  ;;  %3999 = vmatprep.mubr.msk.bf16.mxu1 %vm266_vm3, %v724_v42 }
  0x58   : > { %4011 = vmatprep.subr.bf16.mxu1 %v4623_v4 }
  0x60   : > { %3976 = vmatmul.mubr.msk.bf16.vlgmr.msra.gmra.mrb[0].mxu0 %vm266_vm3, %v477_v29 }
  0x61   : > { %4007 = vmatprep.mubr.msk.bf16.mxu0 %vm4515_vm4, %v4514_v57 }
  0x62   : > { %4000 = vmatmul.mubr.msk.bf16.vlgmr.msra.gmra.mrb[0].mxu1 %vm266_vm3, %v727_v51  ;;  %v4420_v51 = vld [vmem:[%s4618_s21 + $0x40] sm:$0xff]  }
  0x63   : > { %4012 = vmatpush3.bf16.msra.mxu1 %v4623_v4  ;;  %4013 = vmatprep.mubr.msk.bf16.mxu1 %vm266_vm3, %v922_v52  ;;  %v1360_v52 = vshll.u32 %v4420_v51, 16 }
  0x64   : > { %4017 = vmatprep.subr.bf16.mxu1 %v4636_v15 }
  0x65   : > { %v1362_v58 = vrot.slane %v1360_v52, 1 }
  0x6a   : > { %4014 = vmatmul.mubr.msk.bf16.vlgmr.msra.gmra.mrb[4].mxu1 %vm266_vm3, %v925_v54  ;;  %v1358_v54 = vshrl.u32 %v4420_v51, 16 }
  0x6b   : > { %4018 = vmatpush3.bf16.msra.mxu1 %v4636_v15  ;;  %4019 = vmatprep.mubr.msk.bf16.mxu1 %vm266_vm3, %v4416_v41 }
  0x6c   : > { %4023 = vmatprep.subr.bf16.mxu1 %v4644_v27 }
  0x76   : > { %4020 = vmatmul.mubr.msk.bf16.vlgmr.msra.gmra.mrb[4].mxu1 %vm266_vm3, %v4417_v43 }
  0x77   : > { %4024 = vmatpush3.bf16.msra.mxu1 %v4644_v27  ;;  %4025 = vmatprep.mubr.msk.bf16.mxu1 %vm266_vm3, %v4696_v55 }
  0x78   : > { %4029 = vmatprep.subr.bf16.mxu1 %v4661_v34 }
  0x82   : > { %4026 = vmatmul.mubr.msk.bf16.vlgmr.msra.gmra.mrb[4].mxu1 %vm266_vm3, %v4699_v56 }
  0x83   : > { %4030 = vmatpush3.bf16.msra.mxu1 %v4661_v34  ;;  %4031 = vmatprep.mubr.msk.bf16.mxu1 %vm266_vm3, %v1120_v2 }
  0x84   : > { %4059 = vmatprep.subr.bf16.mxu1 %v4514_v57 }
  0x8e   : > { %4032 = vmatmul.mubr.msk.bf16.vlgmr.msra.gmra.mrb[4].mxu1 %vm266_vm3, %v1123_v1 }
  0x8f   : > { %4063 = vmatprep.mubr.msk.bf16.mxu1 %vm4515_vm4, %v4514_v57 }
 0x133   : > { %v3977_v3 = vpop.f32.mrb[0].mxu0 }
 0x134   : > { %v521_v5 = vpop.f32.mrb[1].mxu0 }
 0x135   : > { %v3978_v7 = vpop.f32.mrb[2].mxu0  ;;  %v4001_v8 = vpop.f32.mrb[0].mxu1 }
 0x136   : > { %v524_v9 = vpop.f32.mrb[3].mxu0  ;;  %v789_v10 = vmax.f32 %v3977_v3, %v4001_v8  ;;  %v768_v11 = vpop.f32.mrb[1].mxu1 }
 0x137   : > { %v787_v12 = vmax.f32 %v521_v5, %v768_v11  ;;  %v4002_v13 = vpop.f32.mrb[2].mxu1  ;;  %v1540_v5 = vshrl.u32 %v4422_v0, 16 }
 0x138   : > { %v790_v16 = vmax.f32 %v3978_v7, %v4002_v13  ;;  %v771_v17 = vpop.f32.mrb[3].mxu1  ;;  %v799_v19 = vrot.slane %v789_v10, 1 }
 0x139   : > { %v788_v18 = vmax.f32 %v524_v9, %v771_v17  ;;  %v796_v21 = vrot.slane %v787_v12, 1  ;;  %v4779_v17 = vld [vmem:[%s4618_s21 + $0x58] sm:$0xff]  }
 0x13a   : > { %v801_v20 = vrot.slane %v790_v16, 1 }
 0x13b   : > { %v797_v23 = vrot.slane %v788_v18, 1 }
 0x13c   : > { %v802_v25 = vsel %vm795_vm5, %v799_v19, %v801_v20  ;;  %v810_v26 = vmax.f32 %v790_v16, %v801_v20  ;;  %v4776_v16 = vld [vmem:[%s4618_s21 + $0x50] sm:$0xff]  }
 0x13d   : > { %v809_v28 = vmax.f32 %v789_v10, %v802_v25  ;;  %v798_v29 = vsel %vm795_vm5, %v796_v21, %v797_v23  ;;  %v800_v30 = vsel %vm795_vm5, %v797_v23, %v799_v19  ;;  %v1544_v10 = vrot.slane %v1542_v6, 1 }
 0x13e   : > { %v820_v31 = vadd.f32 %v4719_v22, %v810_v26  ;;  %v807_v32 = vmax.f32 %v787_v12, %v798_v29  ;;  %v808_v33 = vmax.f32 %v788_v18, %v800_v30  ;;  %v1741_v18 = vshll.u32 %v4776_v16, 16 }
 0x13f   : > { %v819_v35 = vadd.f32 %v4719_v22, %v809_v28  ;;  %v1545_v12 = vor.u32 %v1544_v10, %v1540_v5  ;;  %v1739_v19 = vshrl.u32 %v4776_v16, 16  ;;  %v1745_v21 = vshll.u32 %v4779_v17, 16  ;;  %v4427_v10 = vld [vmem:[%s4618_s21 + $0x68] sm:$0xff]  }
 0x140   : > { %v824_v39 = vmax.f32 %v820_v31, 0.0  ;;  %v817_v40 = vadd.f32 %v4719_v22, %v807_v32  ;;  %v818_v41 = vadd.f32 %v4719_v22, %v808_v33  ;;  %v1743_v20 = vrot.slane %v1741_v18, 1 }
 0x141   : > { %v823_v42 = vmax.f32 %v819_v35, 0.0  ;;  %v1747_v24 = vrot.slane %v1745_v21, 1  ;;  %v1749_v25 = vshrl.u32 %v4779_v17, 16  ;;  %v888_v35 = vld [vmem:[%s4804_s10 + $0x4] sm:$0xf] }
 0x142   : > { %v821_v43 = vmax.f32 %v817_v40, 0.0  ;;  %v822_v44 = vmax.f32 %v818_v41, 0.0  ;;  %v1744_v23 = vor.u32 %v1743_v20, %v1739_v19 }
 0x143   : > { %v826_v45 = vpack.c.bf16 %v824_v39, %v823_v42  ;;  %v4792_v28 = vor.u32 %v1749_v25, %v1747_v24 }
 0x144   : > { %v825_v46 = vpack.c.bf16 %v822_v44, %v821_v43  ;;  %v1748_v26 = vsel %vm250_vm2, %v1744_v23, %v1747_v24  ;;  %v4428_v23 = vld [vmem:[%s4618_s21 + $0x60] sm:$0xff]   ;;  %v4429_v24 = vld [vmem:[%s4618_s21 + $0x68] sm:$0xff]  }
 0x145   : > { %v832_v49 = vsel %vm795_vm5, %v826_v45, 0 }
 0x146   : > { %4004 = vmatpush3.bf16.msra.mxu0 %v825_v46 }
 0x147   : > { %4005 = vmatprep.subr.bf16.mxu0 %v4514_v57 }
 0x14a   : > { %4006 = vmatpush3.bf16.msra.mxu0 %v832_v49 }
 0x14b   : > { %4035 = vmatprep.subr.bf16.mxu0 %v4623_v4 }
 0x14d   : > { %4008 = vmatmul.mubr.msk.bf16.vlgmr.msra.gmra.mrb[4].mxu0 %vm827_vm8, %v4732_v50 }
 0x14e   : > { %4036 = vmatpush3.bf16.msra.mxu0 %v4623_v4  ;;  %4037 = vmatprep.mubr.msk.bf16.mxu0 %vm266_vm3, %v1120_v2 }
 0x14f   : > { %4041 = vmatprep.subr.bf16.mxu0 %v4636_v15 }
 0x155   : > { %4038 = vmatmul.mubr.msk.bf16.vlgmr.msra.gmra.mrb[8].mxu0 %vm266_vm3, %v1123_v1  ;;  %v4423_v1 = vld [vmem:[%s4618_s21 + $0x48] sm:$0xff]  }
 0x156   : > { %4042 = vmatpush3.bf16.msra.mxu0 %v4636_v15  ;;  %4043 = vmatprep.mubr.msk.bf16.mxu0 %vm266_vm3, %v4696_v55  ;;  %v1363_v55 = vor.u32 %v1362_v58, %v1358_v54  ;;  %v1547_v7 = vshll.u32 %v4423_v1, 16  ;;  %v1551_v8 = vshrl.u32 %v4423_v1, 16 }
 0x157   : > { %4047 = vmatprep.subr.bf16.mxu0 %v4644_v27 }
 0x158   : > { %v1367_v61 = vsel %vm250_vm2, %v1363_v55, %v1366_v60  ;;  %v1549_v11 = vrot.slane %v1547_v7, 1 }
 0x15a   : > { %v1553_v13 = vor.u32 %v1551_v8, %v1549_v11  ;;  %v1550_v14 = vsel %vm250_vm2, %v1545_v12, %v1549_v11  ;;  %v4426_v8 = vld [vmem:[%s4618_s21 + $0x60] sm:$0xff]  }
 0x15b   : > { %v1986_v11 = vshrl.u32 %v4426_v8, 16 }
 0x161   : > { %4044 = vmatmul.mubr.msk.bf16.vlgmr.msra.gmra.mrb[8].mxu0 %vm266_vm3, %v4699_v56  ;;  %v1368_v56 = vshrl.u32 %v4421_v53, 16  ;;  %v4760_v63 = vpop.f32.mrb[4].mxu1 }
 0x162   : > { %4048 = vmatpush3.bf16.msra.mxu0 %v4644_v27  ;;  %4049 = vmatprep.mubr.msk.bf16.mxu0 %vm266_vm3, %v4420_v51  ;;  %v1164_v2 = vpop.f32.mrb[5].mxu1 }
 0x163   : > { %4053 = vmatprep.subr.bf16.mxu0 %v4661_v34  ;;  %v1370_v62 = vor.u32 %v1368_v56, %v1366_v60  ;;  %v4764_v3 = vpop.f32.mrb[6].mxu1 }
 0x164   : > { %v1167_v9 = vpop.f32.mrb[7].mxu1 }
 0x16d   : > { %4050 = vmatmul.mubr.msk.bf16.vlgmr.msra.gmra.mrb[8].mxu0 %vm266_vm3, %v4421_v53 }
 0x16e   : > { %4054 = vmatpush3.bf16.msra.mxu0 %v4661_v34  ;;  %4055 = vmatprep.mubr.msk.bf16.mxu0 %vm266_vm3, %v1367_v61 }
 0x16f   : > { %4067 = vmatprep.subr.bf16.mxu0 %v4623_v4 }
 0x179   : > { %4056 = vmatmul.mubr.msk.bf16.vlgmr.msra.gmra.mrb[8].mxu0 %vm266_vm3, %v1370_v62 }
 0x17a   : > { %4068 = vmatpush3.bf16.msra.mxu0 %v4623_v4  ;;  %4069 = vmatprep.mubr.msk.bf16.mxu0 %vm266_vm3, %v1550_v14 }
 0x17b   : > { %4073 = vmatprep.subr.bf16.mxu0 %v4636_v15 }
 0x181   : > { %4070 = vmatmul.mubr.msk.bf16.vlgmr.msra.gmra.mrb[12].mxu0 %vm266_vm3, %v1553_v13  ;;  %v1992_v13 = vshll.u32 %v4427_v10, 16 }
 0x182   : > { %4074 = vmatpush3.bf16.msra.mxu0 %v4636_v15  ;;  %4075 = vmatprep.mubr.msk.bf16.mxu0 %vm266_vm3, %v4422_v0 }
 0x183   : > { %4079 = vmatprep.subr.bf16.mxu0 %v4644_v27 }
 0x18d   : > { %4076 = vmatmul.mubr.msk.bf16.vlgmr.msra.gmra.mrb[12].mxu0 %vm266_vm3, %v4423_v1 }
 0x18e   : > { %4080 = vmatpush3.bf16.msra.mxu0 %v4644_v27  ;;  %4081 = vmatprep.mubr.msk.bf16.mxu0 %vm266_vm3, %v4776_v16 }
 0x18f   : > { %4085 = vmatprep.subr.bf16.mxu0 %v4661_v34 }
 0x199   : > { %4082 = vmatmul.mubr.msk.bf16.vlgmr.msra.gmra.mrb[12].mxu0 %vm266_vm3, %v4779_v17 }
 0x19a   : > { %4086 = vmatpush3.bf16.msra.mxu0 %v4661_v34  ;;  %4087 = vmatprep.mubr.msk.bf16.mxu0 %vm266_vm3, %v1748_v26 }
 0x19b   : > { %4115 = vmatprep.subr.bf16.mxu0 %v4514_v57 }
 0x1a5   : > { %4088 = vmatmul.mubr.msk.bf16.vlgmr.msra.gmra.mrb[12].mxu0 %vm266_vm3, %v4792_v28 }
 0x1a6   : > { %4119 = vmatprep.mubr.msk.bf16.mxu0 %vm4515_vm4, %v4514_v57 }
 0x220   : > { %v868_v29 = vpop.f32.mrb[4].mxu0 }
 0x221   : > { %v3810_v30 = vpack.c.bf16 %v868_v29, %v868_v29  ;;  %v4009_v31 = vpop.f32.mrb[5].mxu0  ;;  %v2170_v29 = vshll.u32 %v4428_v23, 16 }
 0x222   : > { %v871_v32 = vpop.f32.mrb[6].mxu0  ;;  %v2179_v31 = vshrl.u32 %v4429_v24, 16 }
 0x223   : > { %884 = vst.msk [vmem:[%s4804_s10] sm:$0xf] %vm883_vm9, %v3810_v30  ;;  %v3811_v36 = vpack.c.bf16 %v871_v32, %v871_v32  ;;  %v4010_v37 = vpop.f32.mrb[7].mxu0  ;;  %v2175_v30 = vshll.u32 %v4429_v24, 16  ;;  %v2172_v32 = vrot.slane %v2170_v29, 1 }
 0x225   : > { %v889_v38 = vsel %vm4807_vm11, %v3811_v36, %v888_v35  ;;  %v2177_v35 = vrot.slane %v2175_v30, 1  ;;  %v4432_v30 = vld [vmem:[%s4618_s21 + $0x80] sm:$0xff]  }
 0x226   : > { %890 = vst [vmem:[%s4804_s10 + $0x4] sm:$0xf] %v889_v38 }
 0x227   : > { %v2181_v37 = vor.u32 %v2179_v31, %v2177_v35  ;;  %v2616_v31 = vshll.u32 %v4432_v30, 16 }
 0x24c   : > { %v4057_v39 = vpop.f32.mrb[8].mxu0 }
 0x24d   : > { %v1432_v40 = vmax.f32 %v4760_v63, %v4057_v39  ;;  %v1411_v41 = vpop.f32.mrb[9].mxu0  ;;  %v4867_v39 = vld [vmem:[%s4618_s21 + $0x70] sm:$0xff]  }
 0x24e   : > { %v1430_v42 = vmax.f32 %v1164_v2, %v1411_v41  ;;  %v4058_v43 = vpop.f32.mrb[10].mxu0  ;;  %v2369_v41 = vshll.u32 %v4867_v39, 16 }
 0x24f   : > { %v1433_v44 = vmax.f32 %v4764_v3, %v4058_v43  ;;  %v1414_v45 = vpop.f32.mrb[11].mxu0  ;;  %v1441_v47 = vrot.slane %v1432_v40, 1 }
 0x250   : > { %v1431_v46 = vmax.f32 %v1167_v9, %v1414_v45  ;;  %v1438_v49 = vrot.slane %v1430_v42, 1  ;;  %v1988_v9 = vshll.u32 %v4426_v8, 16  ;;  %v2371_v43 = vrot.slane %v2369_v41, 1 }
 0x251   : > { %v1443_v48 = vrot.slane %v1433_v44, 1 }
 0x252   : > { %v1439_v51 = vrot.slane %v1431_v46, 1  ;;  %v1990_v12 = vrot.slane %v1988_v9, 1 }
 0x253   : > { %v1444_v52 = vsel %vm795_vm5, %v1441_v47, %v1443_v48  ;;  %v1452_v53 = vmax.f32 %v1433_v44, %v1443_v48 }
 0x254   : > { %v1451_v54 = vmax.f32 %v1432_v40, %v1444_v52  ;;  %v1440_v58 = vsel %vm795_vm5, %v1438_v49, %v1439_v51  ;;  %v1442_v59 = vsel %vm795_vm5, %v1439_v51, %v1441_v47  ;;  %v1991_v14 = vor.u32 %v1990_v12, %v1986_v11  ;;  %v4870_v40 = vld [vmem:[%s4618_s21 + $0x78] sm:$0xff]  }
 0x255   : > { %v1456_v55 = vadd.f32 %v4719_v22, %v1452_v53  ;;  %v1449_v60 = vmax.f32 %v1430_v42, %v1440_v58  ;;  %v1450_v61 = vmax.f32 %v1431_v46, %v1442_v59  ;;  %v2367_v42 = vshrl.u32 %v4867_v39, 16  ;;  %v3669_v58 = vld [vmem:[%s4804_s10 + $0xc] sm:$0xf] }
 0x256   : > { %v1455_v56 = vadd.f32 %v4719_v22, %v1451_v54  ;;  %v2373_v44 = vshll.u32 %v4870_v40, 16  ;;  %v2377_v47 = vshrl.u32 %v4870_v40, 16 }
 0x257   : > { %v1460_v62 = vmax.f32 %v1456_v55, 0.0  ;;  %v1453_v63 = vadd.f32 %v4719_v22, %v1449_v60  ;;  %v1454_v0 = vadd.f32 %v4719_v22, %v1450_v61  ;;  %v2372_v45 = vor.u32 %v2371_v43, %v2367_v42 }
 0x258   : > { %v1459_v1 = vmax.f32 %v1455_v56, 0.0  ;;  %v2375_v46 = vrot.slane %v2373_v44, 1 }
 0x259   : > { %v1457_v2 = vmax.f32 %v1453_v63, 0.0  ;;  %v1458_v3 = vmax.f32 %v1454_v0, 0.0 }
 0x25a   : > { %v1462_v5 = vpack.c.bf16 %v1460_v62, %v1459_v1  ;;  %v2376_v48 = vsel %vm250_vm2, %v2372_v45, %v2375_v46  ;;  %v2379_v49 = vor.u32 %v2377_v47, %v2375_v46  ;;  %v4434_v45 = vld [vmem:[%s4618_s21 + $0x80] sm:$0xff]   ;;  %v4435_v46 = vld [vmem:[%s4618_s21 + $0x88] sm:$0xff]  }
 0x25b   : > { %v1461_v6 = vpack.c.bf16 %v1458_v3, %v1457_v2 }
 0x25c   : > { %v1464_v7 = vsel %vm795_vm5, %v1462_v5, 0 }
 0x25d   : > { %4060 = vmatpush3.bf16.msra.mxu1 %v1461_v6 }
 0x25e   : > { %4061 = vmatprep.subr.bf16.mxu1 %v4514_v57 }
 0x261   : > { %4062 = vmatpush3.bf16.msra.mxu1 %v1464_v7 }
 0x262   : > { %4091 = vmatprep.subr.bf16.mxu1 %v4623_v4 }
 0x264   : > { %4064 = vmatmul.mubr.msk.bf16.vlgmr.msra.gmra.mrb[8].mxu1 %vm827_vm8, %v4732_v50 }
 0x265   : > { %4092 = vmatpush3.bf16.msra.mxu1 %v4623_v4  ;;  %4093 = vmatprep.mubr.msk.bf16.mxu1 %vm266_vm3, %v1748_v26 }
 0x266   : > { %4097 = vmatprep.subr.bf16.mxu1 %v4636_v15 }
 0x26c   : > { %4094 = vmatmul.mubr.msk.bf16.vlgmr.msra.gmra.mrb[12].mxu1 %vm266_vm3, %v4792_v28  ;;  %v2168_v28 = vshrl.u32 %v4428_v23, 16 }
 0x26d   : > { %4098 = vmatpush3.bf16.msra.mxu1 %v4636_v15  ;;  %4099 = vmatprep.mubr.msk.bf16.mxu1 %vm266_vm3, %v4776_v16  ;;  %v1994_v16 = vrot.slane %v1992_v13, 1 }
 0x26e   : > { %4103 = vmatprep.subr.bf16.mxu1 %v4644_v27  ;;  %v2173_v36 = vor.u32 %v2172_v32, %v2168_v28  ;;  %v4433_v32 = vld [vmem:[%s4618_s21 + $0x88] sm:$0xff]  }
 0x26f   : > { %v1995_v18 = vsel %vm250_vm2, %v1991_v14, %v1994_v16 }
 0x270   : > { %v2178_v38 = vsel %vm250_vm2, %v2173_v36, %v2177_v35  ;;  %v2614_v35 = vshrl.u32 %v4432_v30, 16  ;;  %v2618_v36 = vrot.slane %v2616_v31, 1 }
 0x278   : > { %4100 = vmatmul.mubr.msk.bf16.vlgmr.msra.gmra.mrb[12].mxu1 %vm266_vm3, %v4779_v17  ;;  %v1996_v17 = vshrl.u32 %v4427_v10, 16  ;;  %v4089_v20 = vpop.f32.mrb[12].mxu0 }
 0x279   : > { %4104 = vmatpush3.bf16.msra.mxu1 %v4644_v27  ;;  %4105 = vmatprep.mubr.msk.bf16.mxu1 %vm266_vm3, %v4426_v8  ;;  %v1792_v21 = vpop.f32.mrb[13].mxu0 }
 0x27a   : > { %4109 = vmatprep.subr.bf16.mxu1 %v4661_v34  ;;  %v1998_v19 = vor.u32 %v1996_v17, %v1994_v16  ;;  %v4090_v25 = vpop.f32.mrb[14].mxu0 }
 0x27b   : > { %v1795_v26 = vpop.f32.mrb[15].mxu0 }
 0x284   : > { %4106 = vmatmul.mubr.msk.bf16.vlgmr.msra.gmra.mrb[12].mxu1 %vm266_vm3, %v4427_v10 }
 0x285   : > { %4110 = vmatpush3.bf16.msra.mxu1 %v4661_v34  ;;  %4111 = vmatprep.mubr.msk.bf16.mxu1 %vm266_vm3, %v1995_v18 }
 0x286   : > { %4123 = vmatprep.subr.bf16.mxu1 %v4623_v4 }
 0x290   : > { %4112 = vmatmul.mubr.msk.bf16.vlgmr.msra.gmra.mrb[12].mxu1 %vm266_vm3, %v1998_v19 }
 0x291   : > { %4124 = vmatpush3.bf16.msra.mxu1 %v4623_v4  ;;  %4125 = vmatprep.mubr.msk.bf16.mxu1 %vm266_vm3, %v2178_v38  ;;  %v2619_v38 = vor.u32 %v2618_v36, %v2614_v35 }
 0x292   : > { %4129 = vmatprep.subr.bf16.mxu1 %v4636_v15 }
 0x298   : > { %4126 = vmatmul.mubr.msk.bf16.vlgmr.msra.gmra.mrb[16].mxu1 %vm266_vm3, %v2181_v37  ;;  %v2620_v37 = vshll.u32 %v4433_v32, 16 }
 0x299   : > { %4130 = vmatpush3.bf16.msra.mxu1 %v4636_v15  ;;  %4131 = vmatprep.mubr.msk.bf16.mxu1 %vm266_vm3, %v4428_v23 }
 0x29a   : > { %4135 = vmatprep.subr.bf16.mxu1 %v4644_v27 }
 0x2a4   : > { %4132 = vmatmul.mubr.msk.bf16.vlgmr.msra.gmra.mrb[16].mxu1 %vm266_vm3, %v4429_v24 }
 0x2a5   : > { %4136 = vmatpush3.bf16.msra.mxu1 %v4644_v27  ;;  %4137 = vmatprep.mubr.msk.bf16.mxu1 %vm266_vm3, %v4867_v39 }
 0x2a6   : > { %4141 = vmatprep.subr.bf16.mxu1 %v4661_v34 }
 0x2b0   : > { %4138 = vmatmul.mubr.msk.bf16.vlgmr.msra.gmra.mrb[16].mxu1 %vm266_vm3, %v4870_v40 }
 0x2b1   : > { %4142 = vmatpush3.bf16.msra.mxu1 %v4661_v34  ;;  %4143 = vmatprep.mubr.msk.bf16.mxu1 %vm266_vm3, %v2376_v48 }
 0x2b2   : > { %4171 = vmatprep.subr.bf16.mxu1 %v4514_v57 }
 0x2bc   : > { %4144 = vmatmul.mubr.msk.bf16.vlgmr.msra.gmra.mrb[16].mxu1 %vm266_vm3, %v2379_v49 }
 0x2bd   : > { %4175 = vmatprep.mubr.msk.bf16.mxu1 %vm4515_vm4, %v4514_v57 }
 0x337   : > { %v1500_v51 = vpop.f32.mrb[8].mxu1 }
 0x338   : > { %v3812_v52 = vpack.c.bf16 %v1500_v51, %v1500_v51  ;;  %v4065_v53 = vpop.f32.mrb[9].mxu1  ;;  %v2798_v51 = vshll.u32 %v4434_v45, 16 }
 0x339   : > { %v1503_v54 = vpop.f32.mrb[10].mxu1  ;;  %v2807_v53 = vshrl.u32 %v4435_v46, 16 }
 0x33a   : > { %3668 = vst.msk [vmem:[%s4804_s10 + $0x8] sm:$0xf] %vm883_vm9, %v3812_v52  ;;  %v3813_v59 = vpack.c.bf16 %v1503_v54, %v1503_v54  ;;  %v4066_v55 = vpop.f32.mrb[11].mxu1  ;;  %v2803_v52 = vshll.u32 %v4435_v46, 16  ;;  %v2800_v54 = vrot.slane %v2798_v51, 1 }
 0x33c   : > { %v1518_v60 = vsel %vm4807_vm11, %v3813_v59, %v3669_v58  ;;  %v2805_v58 = vrot.slane %v2803_v52, 1  ;;  %v4438_v52 = vld [vmem:[%s4618_s21 + $0xa0] sm:$0xff]  }
 0x33d   : > { %3670 = vst [vmem:[%s4804_s10 + $0xc] sm:$0xf] %v1518_v60 }
 0x33e   : > { %v2809_v55 = vor.u32 %v2807_v53, %v2805_v58  ;;  %v3244_v53 = vshll.u32 %v4438_v52, 16 }
 0x363   : > { %v4113_v61 = vpop.f32.mrb[12].mxu1 }
 0x364   : > { %v2060_v56 = vmax.f32 %v4089_v20, %v4113_v61  ;;  %v2039_v62 = vpop.f32.mrb[13].mxu1  ;;  %v4940_v61 = vld [vmem:[%s4618_s21 + $0x90] sm:$0xff]  }
 0x365   : > { %v2058_v63 = vmax.f32 %v1792_v21, %v2039_v62  ;;  %v4114_v0 = vpop.f32.mrb[14].mxu1  ;;  %v2997_v62 = vshll.u32 %v4940_v61, 16 }
 0x366   : > { %v2061_v1 = vmax.f32 %v4090_v25, %v4114_v0  ;;  %v2042_v2 = vpop.f32.mrb[15].mxu1  ;;  %v2069_v5 = vrot.slane %v2060_v56, 1 }
 0x367   : > { %v2059_v3 = vmax.f32 %v1795_v26, %v2042_v2  ;;  %v2066_v7 = vrot.slane %v2058_v63, 1  ;;  %v2999_v0 = vrot.slane %v2997_v62, 1 }
 0x368   : > { %v2071_v6 = vrot.slane %v2061_v1, 1 }
 0x369   : > { %v2067_v8 = vrot.slane %v2059_v3, 1 }
 0x36a   : > { %v2072_v9 = vsel %vm795_vm5, %v2069_v5, %v2071_v6  ;;  %v2080_v10 = vmax.f32 %v2061_v1, %v2071_v6 }
 0x36b   : > { %v2079_v11 = vmax.f32 %v2060_v56, %v2072_v9  ;;  %v2068_v12 = vsel %vm795_vm5, %v2066_v7, %v2067_v8  ;;  %v2070_v13 = vsel %vm795_vm5, %v2067_v8, %v2069_v5  ;;  %v4943_v56 = vld [vmem:[%s4618_s21 + $0x98] sm:$0xff]  }
 0x36c   : > { %v2084_v14 = vadd.f32 %v4719_v22, %v2080_v10  ;;  %v2077_v16 = vmax.f32 %v2058_v63, %v2068_v12  ;;  %v2078_v18 = vmax.f32 %v2059_v3, %v2070_v13  ;;  %v2995_v63 = vshrl.u32 %v4940_v61, 16  ;;  %v3714_v12 = vld [vmem:[%s4804_s10 + $0x14] sm:$0xf] }
 0x36d   : > { %v2083_v17 = vadd.f32 %v4719_v22, %v2079_v11  ;;  %v3001_v1 = vshll.u32 %v4943_v56, 16  ;;  %v3005_v5 = vshrl.u32 %v4943_v56, 16 }
 0x36e   : > { %v2088_v19 = vmax.f32 %v2084_v14, 0.0  ;;  %v2081_v20 = vadd.f32 %v4719_v22, %v2077_v16  ;;  %v2082_v21 = vadd.f32 %v4719_v22, %v2078_v18  ;;  %v3000_v2 = vor.u32 %v2999_v0, %v2995_v63 }
 0x36f   : > { %v2087_v23 = vmax.f32 %v2083_v17, 0.0  ;;  %v3003_v3 = vrot.slane %v3001_v1, 1 }
 0x370   : > { %v2085_v24 = vmax.f32 %v2081_v20, 0.0  ;;  %v2086_v25 = vmax.f32 %v2082_v21, 0.0 }
 0x371   : > { %v2090_v26 = vpack.c.bf16 %v2088_v19, %v2087_v23  ;;  %v3004_v6 = vsel %vm250_vm2, %v3000_v2, %v3003_v3  ;;  %v3007_v7 = vor.u32 %v3005_v5, %v3003_v3 }
 0x372   : > { %v2089_v28 = vpack.c.bf16 %v2086_v25, %v2085_v24 }
 0x373   : > { %v2092_v29 = vsel %vm795_vm5, %v2090_v26, 0 }
 0x374   : > { %4116 = vmatpush3.bf16.msra.mxu0 %v2089_v28 }
 0x375   : > { %4117 = vmatprep.subr.bf16.mxu0 %v4514_v57 }
 0x378   : > { %4118 = vmatpush3.bf16.msra.mxu0 %v2092_v29 }
 0x379   : > { %4147 = vmatprep.subr.bf16.mxu0 %v4623_v4 }
 0x37b   : > { %4120 = vmatmul.mubr.msk.bf16.vlgmr.msra.gmra.mrb[16].mxu0 %vm827_vm8, %v4732_v50 }
 0x37c   : > { %4148 = vmatpush3.bf16.msra.mxu0 %v4623_v4  ;;  %4149 = vmatprep.mubr.msk.bf16.mxu0 %vm266_vm3, %v2376_v48 }
 0x37d   : > { %4153 = vmatprep.subr.bf16.mxu0 %v4636_v15 }
 0x383   : > { %4150 = vmatmul.mubr.msk.bf16.vlgmr.msra.gmra.mrb[20].mxu0 %vm266_vm3, %v2379_v49  ;;  %v2796_v49 = vshrl.u32 %v4434_v45, 16 }
 0x384   : > { %4154 = vmatpush3.bf16.msra.mxu0 %v4636_v15  ;;  %4155 = vmatprep.mubr.msk.bf16.mxu0 %vm266_vm3, %v4867_v39  ;;  %v2622_v39 = vrot.slane %v2620_v37, 1 }
 0x385   : > { %4159 = vmatprep.subr.bf16.mxu0 %v4644_v27  ;;  %v2801_v59 = vor.u32 %v2800_v54, %v2796_v49  ;;  %v4439_v54 = vld [vmem:[%s4618_s21 + $0xa8] sm:$0xff]  }
 0x386   : > { %v2623_v41 = vsel %vm250_vm2, %v2619_v38, %v2622_v39 }
 0x387   : > { %v2806_v60 = vsel %vm250_vm2, %v2801_v59, %v2805_v58  ;;  %v3246_v58 = vrot.slane %v3244_v53, 1 }
 0x38f   : > { %4156 = vmatmul.mubr.msk.bf16.vlgmr.msra.gmra.mrb[20].mxu0 %vm266_vm3, %v4870_v40  ;;  %v2624_v40 = vshrl.u32 %v4433_v32, 16  ;;  %v4145_v43 = vpop.f32.mrb[16].mxu1 }
 0x390   : > { %4160 = vmatpush3.bf16.msra.mxu0 %v4644_v27  ;;  %4161 = vmatprep.mubr.msk.bf16.mxu0 %vm266_vm3, %v4432_v30  ;;  %v2420_v44 = vpop.f32.mrb[17].mxu1 }
 0x391   : > { %4165 = vmatprep.subr.bf16.mxu0 %v4661_v34  ;;  %v2626_v42 = vor.u32 %v2624_v40, %v2622_v39  ;;  %v4146_v47 = vpop.f32.mrb[18].mxu1 }
 0x392   : > { %v2423_v48 = vpop.f32.mrb[19].mxu1 }
 0x39b   : > { %4162 = vmatmul.mubr.msk.bf16.vlgmr.msra.gmra.mrb[20].mxu0 %vm266_vm3, %v4433_v32 }
 0x39c   : > { %4166 = vmatpush3.bf16.msra.mxu0 %v4661_v34  ;;  %4167 = vmatprep.mubr.msk.bf16.mxu0 %vm266_vm3, %v2623_v41 }
 0x39d   : > { %4179 = vmatprep.subr.bf16.mxu0 %v4623_v4 }
 0x3a7   : > { %4168 = vmatmul.mubr.msk.bf16.vlgmr.msra.gmra.mrb[20].mxu0 %vm266_vm3, %v2626_v42 }
 0x3a8   : > { %4180 = vmatpush3.bf16.msra.mxu0 %v4623_v4  ;;  %4181 = vmatprep.mubr.msk.bf16.mxu0 %vm266_vm3, %v2806_v60 }
 0x3a9   : > { %4185 = vmatprep.subr.bf16.mxu0 %v4636_v15 }
 0x3af   : > { %4182 = vmatmul.mubr.msk.bf16.vlgmr.msra.gmra.mrb[24].mxu0 %vm266_vm3, %v2809_v55 }
 0x3b0   : > { %4186 = vmatpush3.bf16.msra.mxu0 %v4636_v15  ;;  %4187 = vmatprep.mubr.msk.bf16.mxu0 %vm266_vm3, %v4434_v45 }
 0x3b1   : > { %4191 = vmatprep.subr.bf16.mxu0 %v4644_v27 }
 0x3bb   : > { %4188 = vmatmul.mubr.msk.bf16.vlgmr.msra.gmra.mrb[24].mxu0 %vm266_vm3, %v4435_v46 }
 0x3bc   : > { %4192 = vmatpush3.bf16.msra.mxu0 %v4644_v27  ;;  %4193 = vmatprep.mubr.msk.bf16.mxu0 %vm266_vm3, %v4940_v61 }
 0x3bd   : > { %4197 = vmatprep.subr.bf16.mxu0 %v4661_v34 }
 0x3c7   : > { %4194 = vmatmul.mubr.msk.bf16.vlgmr.msra.gmra.mrb[24].mxu0 %vm266_vm3, %v4943_v56 }
 0x3c8   : > { %4198 = vmatpush3.bf16.msra.mxu0 %v4661_v34  ;;  %4199 = vmatprep.mubr.msk.bf16.mxu0 %vm266_vm3, %v3004_v6 }
 0x3c9   : > { %4227 = vmatprep.subr.bf16.mxu0 %v4514_v57 }
 0x3d3   : > { %4200 = vmatmul.mubr.msk.bf16.vlgmr.msra.gmra.mrb[24].mxu0 %vm266_vm3, %v3007_v7 }
 0x3d4   : > { %4231 = vmatprep.mubr.msk.bf16.mxu0 %vm4515_vm4, %v4514_v57 }
 0x44e   : > { %v2128_v8 = vpop.f32.mrb[16].mxu0 }
 0x44f   : > { %v3814_v9 = vpack.c.bf16 %v2128_v8, %v2128_v8  ;;  %v4121_v10 = vpop.f32.mrb[17].mxu0 }
 0x450   : > { %v2131_v11 = vpop.f32.mrb[18].mxu0 }
 0x451   : > { %3713 = vst.msk [vmem:[%s4804_s10 + $0x10] sm:$0xf] %vm883_vm9, %v3814_v9  ;;  %v3815_v13 = vpack.c.bf16 %v2131_v11, %v2131_v11  ;;  %v4122_v14 = vpop.f32.mrb[19].mxu0 }
 0x453   : > { %v2146_v16 = vsel %vm4807_vm11, %v3815_v13, %v3714_v12 }
 0x454   : > { %3715 = vst [vmem:[%s4804_s10 + $0x14] sm:$0xf] %v2146_v16 }
 0x47a   : > { %v4169_v18 = vpop.f32.mrb[20].mxu0 }
 0x47b   : > { %v2688_v17 = vmax.f32 %v4145_v43, %v4169_v18  ;;  %v2667_v19 = vpop.f32.mrb[21].mxu0 }
 0x47c   : > { %v2686_v20 = vmax.f32 %v2420_v44, %v2667_v19  ;;  %v4170_v21 = vpop.f32.mrb[22].mxu0 }
 0x47d   : > { %v2689_v23 = vmax.f32 %v4146_v47, %v4170_v21  ;;  %v2670_v24 = vpop.f32.mrb[23].mxu0  ;;  %v2697_v26 = vrot.slane %v2688_v17, 1 }
 0x47e   : > { %v2687_v25 = vmax.f32 %v2423_v48, %v2670_v24  ;;  %v2694_v29 = vrot.slane %v2686_v20, 1 }
 0x47f   : > { %v2699_v28 = vrot.slane %v2689_v23, 1 }
 0x480   : > { %v2695_v30 = vrot.slane %v2687_v25, 1 }
 0x481   : > { %v2700_v31 = vsel %vm795_vm5, %v2697_v26, %v2699_v28  ;;  %v2708_v32 = vmax.f32 %v2689_v23, %v2699_v28 }
 0x482   : > { %v2707_v35 = vmax.f32 %v2688_v17, %v2700_v31  ;;  %v2696_v36 = vsel %vm795_vm5, %v2694_v29, %v2695_v30  ;;  %v2698_v37 = vsel %vm795_vm5, %v2695_v30, %v2697_v26 }
 0x483   : > { %v2712_v38 = vadd.f32 %v4719_v22, %v2708_v32  ;;  %v2705_v39 = vmax.f32 %v2686_v20, %v2696_v36  ;;  %v2706_v41 = vmax.f32 %v2687_v25, %v2698_v37 }
 0x484   : > { %v2711_v40 = vadd.f32 %v4719_v22, %v2707_v35 }
 0x485   : > { %v2716_v42 = vmax.f32 %v2712_v38, 0.0  ;;  %v2709_v43 = vadd.f32 %v4719_v22, %v2705_v39  ;;  %v2710_v44 = vadd.f32 %v4719_v22, %v2706_v41 }
 0x486   : > { %v2715_v45 = vmax.f32 %v2711_v40, 0.0 }
 0x487   : > { %v2713_v46 = vmax.f32 %v2709_v43, 0.0  ;;  %v2714_v47 = vmax.f32 %v2710_v44, 0.0 }
 0x488   : > { %v2718_v48 = vpack.c.bf16 %v2716_v42, %v2715_v45 }
 0x489   : > { %v2717_v49 = vpack.c.bf16 %v2714_v47, %v2713_v46  ;;  %v3804_v47 = vld [vmem:[%s4804_s10 + $0x24] sm:$0xf] }
 0x48a   : > { %v2720_v51 = vsel %vm795_vm5, %v2718_v48, 0 }
 0x48b   : > { %4172 = vmatpush3.bf16.msra.mxu1 %v2717_v49 }
 0x48c   : > { %4173 = vmatprep.subr.bf16.mxu1 %v4514_v57 }
 0x48f   : > { %4174 = vmatpush3.bf16.msra.mxu1 %v2720_v51 }
 0x490   : > { %4203 = vmatprep.subr.bf16.mxu1 %v4623_v4 }
 0x492   : > { %4176 = vmatmul.mubr.msk.bf16.vlgmr.msra.gmra.mrb[20].mxu1 %vm827_vm8, %v4732_v50 }
 0x493   : > { %4204 = vmatpush3.bf16.msra.mxu1 %v4623_v4  ;;  %4205 = vmatprep.mubr.msk.bf16.mxu1 %vm266_vm3, %v3004_v6  ;;  %v3242_v4 = vshrl.u32 %v4438_v52, 16  ;;  %v3759_v6 = vld [vmem:[%s4804_s10 + $0x1c] sm:$0xf] }
 0x494   : > { %4209 = vmatprep.subr.bf16.mxu1 %v4636_v15 }
 0x495   : > { %v3247_v59 = vor.u32 %v3246_v58, %v3242_v4 }
 0x49a   : > { %4206 = vmatmul.mubr.msk.bf16.vlgmr.msra.gmra.mrb[24].mxu1 %vm266_vm3, %v3007_v7 }
 0x49b   : > { %4210 = vmatpush3.bf16.msra.mxu1 %v4636_v15  ;;  %4211 = vmatprep.mubr.msk.bf16.mxu1 %vm266_vm3, %v4940_v61  ;;  %v3248_v15 = vshll.u32 %v4439_v54, 16 }
 0x49c   : > { %4215 = vmatprep.subr.bf16.mxu1 %v4644_v27 }
 0x49d   : > { %v3250_v55 = vrot.slane %v3248_v15, 1 }
 0x49f   : > { %v3251_v60 = vsel %vm250_vm2, %v3247_v59, %v3250_v55 }
 0x4a6   : > { %4212 = vmatmul.mubr.msk.bf16.vlgmr.msra.gmra.mrb[24].mxu1 %vm266_vm3, %v4943_v56  ;;  %v4201_v56 = vpop.f32.mrb[24].mxu0 }
 0x4a7   : > { %4216 = vmatpush3.bf16.msra.mxu1 %v4644_v27  ;;  %4217 = vmatprep.mubr.msk.bf16.mxu1 %vm266_vm3, %v4438_v52  ;;  %v3252_v27 = vshrl.u32 %v4439_v54, 16  ;;  %v3048_v62 = vpop.f32.mrb[25].mxu0 }
 0x4a8   : > { %4221 = vmatprep.subr.bf16.mxu1 %v4661_v34  ;;  %v4202_v63 = vpop.f32.mrb[26].mxu0 }
 0x4a9   : > { %v3254_v61 = vor.u32 %v3252_v27, %v3250_v55  ;;  %v3051_v0 = vpop.f32.mrb[27].mxu0 }
 0x4b2   : > { %4218 = vmatmul.mubr.msk.bf16.vlgmr.msra.gmra.mrb[24].mxu1 %vm266_vm3, %v4439_v54 }
 0x4b3   : > { %4222 = vmatpush3.bf16.msra.mxu1 %v4661_v34  ;;  %4223 = vmatprep.mubr.msk.bf16.mxu1 %vm266_vm3, %v3251_v60 }
 0x4be   : > { %4224 = vmatmul.mubr.msk.bf16.vlgmr.msra.gmra.mrb[24].mxu1 %vm266_vm3, %v3254_v61 }
 0x565   : > { %v2756_v1 = vpop.f32.mrb[20].mxu1 }
 0x566   : > { %v3816_v2 = vpack.c.bf16 %v2756_v1, %v2756_v1  ;;  %v4177_v3 = vpop.f32.mrb[21].mxu1 }
 0x567   : > { %v2759_v5 = vpop.f32.mrb[22].mxu1 }
 0x568   : > { %3758 = vst.msk [vmem:[%s4804_s10 + $0x18] sm:$0xf] %vm883_vm9, %v3816_v2  ;;  %v3817_v7 = vpack.c.bf16 %v2759_v5, %v2759_v5  ;;  %v4178_v34 = vpop.f32.mrb[23].mxu1 }
 0x56a   : > { %v2774_v8 = vsel %vm4807_vm11, %v3817_v7, %v3759_v6 }
 0x56b   : > { %3760 = vst [vmem:[%s4804_s10 + $0x1c] sm:$0xf] %v2774_v8 }
 0x591   : > { %v4225_v9 = vpop.f32.mrb[24].mxu1 }
 0x592   : > { %v3316_v10 = vmax.f32 %v4201_v56, %v4225_v9  ;;  %v3295_v11 = vpop.f32.mrb[25].mxu1 }
 0x593   : > { %v3314_v12 = vmax.f32 %v3048_v62, %v3295_v11  ;;  %v4226_v13 = vpop.f32.mrb[26].mxu1 }
 0x594   : > { %v3317_v14 = vmax.f32 %v4202_v63, %v4226_v13  ;;  %v3298_v16 = vpop.f32.mrb[27].mxu1  ;;  %v3325_v17 = vrot.slane %v3316_v10, 1 }
 0x595   : > { %v3315_v18 = vmax.f32 %v3051_v0, %v3298_v16  ;;  %v3322_v20 = vrot.slane %v3314_v12, 1 }
 0x596   : > { %v3327_v19 = vrot.slane %v3317_v14, 1 }
 0x597   : > { %v3323_v21 = vrot.slane %v3315_v18, 1 }
 0x598   : > { %v3328_v23 = vsel %vm795_vm5, %v3325_v17, %v3327_v19  ;;  %v3336_v24 = vmax.f32 %v3317_v14, %v3327_v19 }
 0x599   : > { %v3335_v25 = vmax.f32 %v3316_v10, %v3328_v23  ;;  %v3324_v26 = vsel %vm795_vm5, %v3322_v20, %v3323_v21  ;;  %v3326_v28 = vsel %vm795_vm5, %v3323_v21, %v3325_v17 }
 0x59a   : > { %v3340_v29 = vadd.f32 %v4719_v22, %v3336_v24  ;;  %v3333_v30 = vmax.f32 %v3314_v12, %v3324_v26  ;;  %v3334_v31 = vmax.f32 %v3315_v18, %v3326_v28 }
 0x59b   : > { %v3339_v32 = vadd.f32 %v4719_v22, %v3335_v25 }
 0x59c   : > { %v3344_v35 = vmax.f32 %v3340_v29, 0.0  ;;  %v3337_v36 = vadd.f32 %v4719_v22, %v3333_v30  ;;  %v3338_v37 = vadd.f32 %v4719_v22, %v3334_v31 }
 0x59d   : > { %v3343_v38 = vmax.f32 %v3339_v32, 0.0 }
 0x59e   : > { %v3341_v39 = vmax.f32 %v3337_v36, 0.0  ;;  %v3342_v41 = vmax.f32 %v3338_v37, 0.0 }
 0x59f   : > { %v3346_v40 = vpack.c.bf16 %v3344_v35, %v3343_v38 }
 0x5a0   : > { %v3345_v42 = vpack.c.bf16 %v3342_v41, %v3341_v39 }
 0x5a1   : > { %v3348_v43 = vsel %vm795_vm5, %v3346_v40, 0 }
 0x5a2   : > { %4228 = vmatpush3.bf16.msra.mxu0 %v3345_v42 }
 0x5a3   : > { %4229 = vmatprep.subr.bf16.mxu0 %v4514_v57 }
 0x5a6   : > { %4230 = vmatpush3.bf16.msra.mxu0 %v3348_v43 }
 0x5a9   : > { %4232 = vmatmul.mubr.msk.bf16.vlgmr.msra.gmra.mrb[28].mxu0 %vm827_vm8, %v4732_v50 }
 0x67c   : > { %v3384_v44 = vpop.f32.mrb[28].mxu0 }
 0x67d   : > { %v3818_v45 = vpack.c.bf16 %v3384_v44, %v3384_v44  ;;  %v4233_v46 = vpop.f32.mrb[29].mxu0 }
 0x67e   : > { %v3387_v22 = vpop.f32.mrb[30].mxu0 }
 0x67f   : > { %3803 = vst.msk [vmem:[%s4804_s10 + $0x20] sm:$0xf] %vm883_vm9, %v3818_v45  ;;  %v3819_v48 = vpack.c.bf16 %v3387_v22, %v3387_v22  ;;  %v4234_v49 = vpop.f32.mrb[31].mxu0 }
 0x681   : > { %v3402_v51 = vsel %vm4807_vm11, %v3819_v48, %v3804_v47 }
 0x682   : > { %3805 = vst [vmem:[%s4804_s10 + $0x24] sm:$0xf] %v3402_v51 }
 0x683 PF: > { %s14_s16 = sadd.s32 1, %s4510_s16   ;;  %s5050_s12 = smov %s4502_s14 }
 0x684   : > { %p11_p7 = scmp.ge.s32.totalorder %s14_s16, 8   ;;  %s5051_s13 = smov %s4506_s15 }
 0x685   : > { %s5052_s14 = smov %s5055_s18  ;;  %s5053_s15 = smov %s5059_s19 }
 0x686   :  { %13 = sbr.rel (!%p11_p7) target bundleno = 3 (0x3), region = 89 }
 0x68d   :  { %3436 = vsyncpa [#allocation3], 1 }
 0x68e   :  { %3438 = vsyncpa [#allocation3 + $0x1], 1 }

// kernel: lego_forward.6
= control target key start
LH: loop header
LB: loop body
LE: loop exit
PB: predicated region body
PF: predicated region fallthrough
CT: control target
= control target key end

     0   :  { %8 = vsyncpa [#allocation3], 0  ;;  %s5893_s0 = inlined_call_operand.vmem [shape: bf16[2,15,15,32], index: 0, kind: input, shape index: {}]   ;;  %s5894_s1 = inlined_call_operand.hbm [shape: bf16[4,32,64], index: 1, kind: input, shape index: {}]   ;;  %s5895_s2 = inlined_call_operand.hbm [shape: f32[1,64], index: 2, kind: input, shape index: {}]   ;;  %s5896_s3 = inlined_call_operand.vmem [shape: bf16[2,7,7,64], index: 3, kind: output, shape index: {}]  }
   0x1   :  { %9 = vsyncpa [#allocation5], 0  ;;  %s5175_s12 = smov 0   ;;  %s5177_s13 = smov 0  }
   0x2   :  { %s5179_s14 = smov 0  }
   0x3 LB: > { %s3909_s15 = sadd.s32 4294967295, %s5146_s14   ;;  %s27_s16 = sadd.s32 1, %s5142_s13  ;;  %s5146_s14 = sphi %s5179_s14, %s15_s14   ;;  %s5142_s13 = sphi %s5177_s13, %s5908_s13   ;;  %s5138_s12 = sphi %s5175_s12, %s5907_s12  }
   0x4   : > { %p29_p0 = scmp.ge.s32.totalorder %s27_s16, 2  ;;  %p3911_p1 = scmp.ge.s32.totalorder %s5146_s14, 1 }
   0x5   : > { %p128_p2 = scmp.lt.s32.totalorder %s5146_s14, 3  ;;  %p5200_p4 = scmp.eq.s32.totalorder %s3909_s15, 0 }
   0x6   : > { %s5910_s16 = smov (%p29_p0, %s27_s16), 0  ;;  %s5148_s19 = smov [#allocation2]  }
   0x7   : > { %p5196_p3 = pnand %p3911_p1, %p128_p2  ;;  %s140_s20 = sshll.u32 %s5148_s19, 4  ;;  %s141_s20 = int_to_ptr.vmem [resolvable:$true] %s140_s20 }
   0x8   : > { %s5901_s18 = scalar_select %p5200_p4, 1, 0 }
   0x9   : > { %s5900_s17 = scalar_select %p5196_p3, 1, 0 }
   0xa   : > { %p4959_p5 = pneg %p5196_p3  ;;  %s5149_s22 = smov [#allocation4]  }
   0xb   : > { %s154_s23 = sshll.u32 %s5149_s22, 4  ;;  %s5060_s26 = scalar_lea.hbm %s5894_s1, 1024  ;;  %s5212_s23 = int_to_ptr.vmem [resolvable:$true] %s154_s23 }
   0xc   : > { %p5208_p6 = pnand %p5200_p4, %p4959_p5  ;;  %p5061_p7 = scmp.ne.s32.totalorder %s5894_s1, %s5060_s26 }
   0xd   : > { %p5067_p11 = scmp.lt.u32.totalorder %s5060_s26, %s5894_s1 }
   0xe   : > { %p5062_p8 = pneg %p5208_p6 }
  0x10   : > { %p5063_p9 = pnand %p5062_p8, %p5061_p7 }
  0x12   : > { %p5064_p10 = pneg %p5063_p9 }
  0x14   : > { %p5069_p12 = pnand %p5067_p11, %p5064_p10 }
  0x16   : > { %5072 = shalt.err (!%p5069_p12)
}
  0x17   : > { %s5073_s4 = scalar_lea.vmem %s141_s20, 1024  ;;  %p5081_p2 = scmp.lt.s32.totalorder %s141_s20, %s141_s20 }
  0x18   : > { %p5074_p13 = scmp.ne.s32.totalorder %s141_s20, %s5073_s4  ;;  %p5082_p5 = scmp.lt.s32.totalorder %s5073_s4, %s5073_s4 }
  0x1a   : > { %p5076_p0 = pnand %p5074_p13, %p5062_p8  ;;  %p5083_p4 = por %p5082_p5, %p5081_p2 }
  0x1c   : > { %p5077_p1 = pneg %p5076_p0 }
  0x1e   : > { %p5084_p3 = pnand %p5083_p4, %p5077_p1 }
  0x20   : > { %5087 = shalt.err (!%p5084_p3)
}
  0x21   : > { %s5150_s5 = smov 64   ;;  %s5151_s6 = smov 4  }
  0x22   : > { %4962 = dma.hbm_to_vmem [thread:$0]  (!%p5208_p6), %s5894_s1, 1024, %s141_s20, [#allocation3], %s5150_s5, %s5150_s5, %s5151_s6  }
  0x23   : > { %s5088_s11 = scalar_lea.hbm %s5895_s2, 16 }
  0x24   : > { %p5089_p7 = scmp.ne.s32.totalorder %s5895_s2, %s5088_s11  ;;  %p5095_p9 = scmp.lt.u32.totalorder %s5088_s11, %s5895_s2 }
  0x26   : > { %p5091_p3 = pnand %p5089_p7, %p5062_p8 }
  0x28   : > { %p5092_p4 = pneg %p5091_p3 }
  0x2a   : > { %p5097_p10 = pnand %p5095_p9, %p5092_p4 }
  0x2c   : > { %5100 = shalt.err (!%p5097_p10)
}
  0x2d   : > { %s5101_s20 = scalar_lea.vmem %s5212_s23, 16  ;;  %s5108_s25 = scalar_lea.vmem %s5212_s23, 32 }
  0x2e   : > { %p5102_p11 = scmp.ne.s32.totalorder %s5212_s23, %s5101_s20  ;;  %p5109_p0 = scmp.lt.s32.totalorder %s5212_s23, %s5212_s23 }
  0x2f   : > { %p5110_p1 = scmp.lt.s32.totalorder %s5108_s25, %s5101_s20 }
  0x30   : > { %p5104_p12 = pnand %p5102_p11, %p5062_p8 }
  0x31   : > { %p5111_p2 = por %p5110_p1, %p5109_p0 }
  0x32   : > { %p5105_p13 = pneg %p5104_p12 }
  0x34   : > { %p5112_p5 = pnand %p5111_p2, %p5105_p13 }
  0x36   : > { %5115 = shalt.err (!%p5112_p5)
}
  0x37   : > { %4965 = dma.hbm_to_vmem [thread:$0]  (!%p5208_p6), %s5895_s2, 16, %s5212_s23, [#allocation5]  }
  0x38   : > { %p5903_p7 = scmp.ne.s32.totalorder %s5900_s17, 0 }
  0x39   : > { %p5904_p8 = scmp.ne.s32.totalorder (!%p5903_p7), %s5901_s18, 0 }
  0x3a   : > { %175 = sbr.rel (%p5903_p7) target bundleno = 2224 (0x8b0), region = 32 }
  0x41   : > { %5129 = dma.done.wait (%p5904_p8), [#allocation3], 1024  }
  0x42   : > { %5131 = vsyncadd (%p5904_p8), [#allocation3], 4294966272 }
  0x43   : > { %5133 = dma.done.wait (%p5904_p8), [#allocation5], 16  }
  0x44   : > { %5135 = vsyncadd (%p5904_p8), [#allocation5], 4294967280  ;;  %p207_p3 = scmp.lt.s32.totalorder %s5138_s12, 1  ;;  %v5152_v0 = vmov 0.0   ;;  %vm5153_vm0 = vmmov 0   ;;  %v5288_v1 = vld [vmem:[#allocation2 + $0x10] sm:$0xff]   ;;  %v243_v55 = vlaneseq }
  0x45   : > { %4291 = vmatprep.subr.bf16.mxu0 %v5152_v0  ;;  %4323 = vmatprep.subr.bf16.mxu1 %v5152_v0  ;;  %v5290_v2 = vld [vmem:[#allocation2 + $0x18] sm:$0xff]   ;;  %vm283_vm1 = vcmask 261120   ;;  %v5304_v15 = vld [vmem:[#allocation2] sm:$0xff]   ;;  %v5309_v18 = vld [vmem:[#allocation2 + $0x8] sm:$0xff]   ;;  %vm725_vm2 = vcmask 1046528   ;;  %vm748_vm3 = vcmask 1045504  }
  0x46   : > { %4295 = vmatprep.mubr.msk.bf16.mxu0 %vm5153_vm0, %v5152_v0  ;;  %4327 = vmatprep.mubr.msk.bf16.mxu1 %vm5153_vm0, %v5152_v0  ;;  %s5912_s12 = smov (!%p207_p3, %s5138_s12), 1  ;;  %v5324_v23 = vld [vmem:[#allocation2 + $0x20] sm:$0xff]   ;;  %v5329_v24 = vld [vmem:[#allocation2 + $0x28] sm:$0xff]   ;;  %v5345_v30 = vld [vmem:[#allocation2 + $0x30] sm:$0xff]   ;;  %vm744_vm5 = vcmask 105472   ;;  %vm795_vm6 = vcmask 519168  }
  0x47   : > { %s4949_s17 = smul.u32 120, %s5912_s12  ;;  %4292 = vmatpush3.bf16.msra.mxu0 %v5288_v1  ;;  %4324 = vmatpush3.bf16.msra.mxu1 %v5288_v1  ;;  %v5350_v31 = vld [vmem:[#allocation2 + $0x38] sm:$0xff]   ;;  %vm796_vm7 = vsmask.f32 3328 }
  0x48   : > { %4293 = vmatprep.subr.bf16.mxu0 %v5152_v0  ;;  %4325 = vmatprep.subr.bf16.mxu1 %v5152_v0  ;;  %s4950_s28 = smul.u32 28, %s5912_s12  ;;  %vm5495_vm8 = vmand %vm795_vm6, %vm796_vm7 }
  0x49   : > { %s5286_s23 = scalar_lea.vmem %s5893_s0, %s4949_s17 }
  0x4a   : > { %v256_v3 = vld [vmem:[%s5286_s23] sm:$0xf]  ;;  %v258_v4 = vld [vmem:[%s5286_s23 + $0x4] sm:$0xf]  ;;  %v3929_v5 = vld [vmem:[%s5286_s23 + $0x8] sm:$0xf]  ;;  %s5493_s4 = scalar_lea.vmem %s5896_s3, %s4950_s28 }
  0x4b   : > { %v3921_v6 = vcombine.low %v256_v3, %v258_v4  ;;  %v3935_v7 = vld [vmem:[%s5286_s23 + $0xc] sm:$0xf]  ;;  %4294 = vmatpush3.bf16.msra.mxu0 %v5290_v2  ;;  %4326 = vmatpush3.bf16.msra.mxu1 %v5290_v2  ;;  %v257_v19 = vld [vmem:[%s5286_s23 + $0x4] sm:$0x7]  ;;  %v3942_v25 = vld [vmem:[%s5286_s23 + $0x10] sm:$0xf] }
  0x4c   : > { %v3936_v8 = vcombine.low %v3929_v5, %v3935_v7  ;;  %4299 = vmatprep.subr.bf16.mxu0 %v5152_v0  ;;  %4331 = vmatprep.subr.bf16.mxu1 %v5152_v0  ;;  %v3930_v20 = vld [vmem:[%s5286_s23 + $0xc] sm:$0x7]  ;;  %v3925_v21 = vcombine.low %v256_v3, %v257_v19  ;;  %v3943_v26 = vld [vmem:[%s5286_s23 + $0x14] sm:$0x7]  ;;  %v3951_v33 = vld [vmem:[%s5286_s23 + $0x10] sm:$0xf] }
  0x4d   : > { %v265_v9 = vshrl.u32 %v3921_v6, 16  ;;  %v267_v10 = vshll.u32 %v3921_v6, 16  ;;  %v3931_v22 = vcombine.low %v3929_v5, %v3930_v20  ;;  %v3946_v27 = vld [vmem:[%s5286_s23 + $0x14] sm:$0xf]  ;;  %v3944_v28 = vcombine.low %v3942_v25, %v3943_v26  ;;  %v3958_v45 = vld [vmem:[%s5286_s23 + $0x18] sm:$0xf] }
  0x4e   : > { %v461_v11 = vshrl.u32 %v3936_v8, 16  ;;  %v463_v12 = vshll.u32 %v3936_v8, 16  ;;  %v3947_v29 = vcombine.low %v3942_v25, %v3946_v27  ;;  %v3953_v34 = vld [vmem:[%s5286_s23 + $0x14] sm:$0xf]  ;;  %v3959_v46 = vld [vmem:[%s5286_s23 + $0x1c] sm:$0x7] }
  0x4f   : > { %v269_v13 = vrot.slane %v267_v10, 1  ;;  %v3954_v37 = vcombine.low %v3951_v33, %v3953_v34  ;;  %v3952_v43 = vld [vmem:[%s5286_s23 + $0x14] sm:$0x7]  ;;  %v5392_v47 = vcombine.low %v3958_v45, %v3959_v46  ;;  %v3962_v48 = vld [vmem:[%s5286_s23 + $0x1c] sm:$0xf]  ;;  %v244_v4 = vshrl.u32 %v243_v55, 7 }
  0x50   : > { %v465_v14 = vrot.slane %v463_v12, 1  ;;  %v671_v32 = vshll.u32 %v3947_v29, 16  ;;  %v669_v35 = vshrl.u32 %v3947_v29, 16  ;;  %v3956_v44 = vcombine.low %v3951_v33, %v3952_v43  ;;  %v5406_v7 = vld [vmem:[#allocation4] ss:$0 sm:$0xff] }
  0x51   : > { %v270_v16 = vor.u32 %v269_v13, %v265_v9  ;;  %v818_v39 = vshll.u32 %v3954_v37, 16  ;;  %v816_v40 = vshrl.u32 %v3954_v37, 16  ;;  %v3963_v49 = vcombine.low %v3958_v45, %v3962_v48  ;;  %v3968_v29 = vld [vmem:[%s5286_s23 + $0x24] sm:$0x7] }
  0x52   : > { %v466_v17 = vor.u32 %v465_v14, %v461_v11  ;;  %v673_v36 = vrot.slane %v671_v32, 1  ;;  %v246_v10 = vand.u32 127, %v243_v55  ;;  %v247_v11 = vmul.u32 2, %v244_v4  ;;  %v3971_v32 = vld [vmem:[%s5286_s23 + $0x24] sm:$0xf] }
  0x53   : > { %4296 = vmatmul.mubr.msk.bf16.vlgmr.msra.gmra.mrb[0].mxu0 %vm283_vm1, %v270_v16  ;;  %v820_v41 = vrot.slane %v818_v39, 1  ;;  %v977_v50 = vshll.u32 %v3963_v49, 16  ;;  %v975_v51 = vshrl.u32 %v3963_v49, 16  ;;  %v5154_v16 = vmov 65535   ;;  %v3977_v39 = vld [vmem:[%s5286_s23 + $0x20] sm:$0xf] }
  0x54   : > { %4328 = vmatmul.mubr.msk.bf16.vlgmr.msra.gmra.mrb[0].mxu1 %vm283_vm1, %v466_v17  ;;  %4300 = vmatpush3.bf16.msra.mxu0 %v5304_v15  ;;  %v674_v38 = vor.u32 %v673_v36, %v669_v35  ;;  %vm248_vm4 = vcmp.eq.s32.totalorder %v246_v10, %v247_v11  ;;  %v3988_v55 = vld [vmem:[%s5286_s23 + $0x2c] sm:$0xf] }
  0x55   : > { %4332 = vmatpush3.bf16.msra.mxu1 %v5304_v15  ;;  %4301 = vmatprep.subr.bf16.mxu0 %v5152_v0  ;;  %v821_v42 = vor.u32 %v820_v41, %v816_v40  ;;  %v979_v52 = vrot.slane %v977_v50, 1  ;;  %v3920_v25 = vsel %vm248_vm4, 1.0, %v5152_v0  ;;  %v3979_v40 = vld [vmem:[%s5286_s23 + $0x24] sm:$0xf] }
  0x56   : > { %4333 = vmatprep.subr.bf16.mxu1 %v5152_v0  ;;  %4303 = vmatprep.mubr.msk.bf16.mxu0 %vm5153_vm0, %v5152_v0  ;;  %v5416_v27 = vpack.c.bf16 %v3920_v25, %v3920_v25  ;;  %v3978_v50 = vld [vmem:[%s5286_s23 + $0x24] sm:$0x7] }
  0x57   : > { %4335 = vmatprep.mubr.msk.bf16.mxu1 %vm5153_vm0, %v5152_v0  ;;  %v980_v53 = vor.u32 %v979_v52, %v975_v51  ;;  %v3982_v51 = vcombine.low %v3977_v39, %v3978_v50  ;;  %v3984_v52 = vld [vmem:[%s5286_s23 + $0x28] sm:$0xf] }
  0x58   : > { %4302 = vmatpush3.bf16.msra.mxu0 %v5309_v18 }
  0x59   : > { %4334 = vmatpush3.bf16.msra.mxu1 %v5309_v18  ;;  %4307 = vmatprep.subr.bf16.mxu0 %v5152_v0 }
  0x5a   : > { %4339 = vmatprep.subr.bf16.mxu1 %v5152_v0 }
  0x5f   : > { %4304 = vmatmul.mubr.msk.bf16.vlgmr.msra.gmra.mrb[0].mxu0 %vm283_vm1, %v3925_v21 }
  0x60   : > { %4336 = vmatmul.mubr.msk.bf16.vlgmr.msra.gmra.mrb[0].mxu1 %vm283_vm1, %v3931_v22  ;;  %4308 = vmatpush3.bf16.msra.mxu0 %v5324_v23 }
  0x61   : > { %4340 = vmatpush3.bf16.msra.mxu1 %v5324_v23  ;;  %4309 = vmatprep.subr.bf16.mxu0 %v5152_v0 }
  0x62   : > { %4341 = vmatprep.subr.bf16.mxu1 %v5152_v0  ;;  %4311 = vmatprep.mubr.msk.bf16.mxu0 %vm5153_vm0, %v5152_v0 }
  0x63   : > { %4343 = vmatprep.mubr.msk.bf16.mxu1 %vm5153_vm0, %v5152_v0 }
  0x64   : > { %4310 = vmatpush3.bf16.msra.mxu0 %v5329_v24 }
  0x65   : > { %4342 = vmatpush3.bf16.msra.mxu1 %v5329_v24  ;;  %4315 = vmatprep.subr.bf16.mxu0 %v5152_v0 }
  0x66   : > { %4347 = vmatprep.subr.bf16.mxu1 %v5152_v0 }
  0x6b   : > { %4312 = vmatmul.mubr.msk.bf16.vlgmr.msra.gmra.mrb[0].mxu0 %vm283_vm1, %v3931_v22 }
  0x6c   : > { %4344 = vmatmul.mubr.msk.bf16.vlgmr.msra.gmra.mrb[0].mxu1 %vm283_vm1, %v3944_v28  ;;  %4316 = vmatpush3.bf16.msra.mxu0 %v5345_v30  ;;  %v3967_v28 = vld [vmem:[%s5286_s23 + $0x20] sm:$0xf] }
  0x6d   : > { %4348 = vmatpush3.bf16.msra.mxu1 %v5345_v30  ;;  %4317 = vmatprep.subr.bf16.mxu0 %v5152_v0  ;;  %v3969_v33 = vcombine.low %v3967_v28, %v3968_v29  ;;  %v3972_v34 = vcombine.low %v3967_v28, %v3971_v32 }
  0x6e   : > { %4349 = vmatprep.subr.bf16.mxu1 %v5152_v0  ;;  %4319 = vmatprep.mubr.msk.bf16.mxu0 %vm5153_vm0, %v5152_v0 }
  0x6f   : > { %4351 = vmatprep.mubr.msk.bf16.mxu1 %vm5153_vm0, %v5152_v0  ;;  %v1173_v35 = vshll.u32 %v3972_v34, 16  ;;  %v1171_v36 = vshrl.u32 %v3972_v34, 16  ;;  %v3993_v34 = vld [vmem:[%s5286_s23 + $0x30] sm:$0xf] }
  0x70   : > { %4318 = vmatpush3.bf16.msra.mxu0 %v5350_v31 }
  0x71   : > { %4350 = vmatpush3.bf16.msra.mxu1 %v5350_v31  ;;  %4355 = vmatprep.subr.bf16.mxu0 %v5152_v0  ;;  %v1175_v37 = vrot.slane %v1173_v35, 1  ;;  %v3994_v35 = vld [vmem:[%s5286_s23 + $0x34] sm:$0x7] }
  0x72   : > { %4361 = vmatprep.subr.bf16.mxu1 %v5152_v0 }
  0x77   : > { %4320 = vmatmul.mubr.msk.bf16.vlgmr.msra.gmra.mrb[0].mxu0 %vm283_vm1, %v466_v17  ;;  %v749_v17 = vsel %vm748_vm3, 4294967295, %v5154_v16 }
  0x78   : > { %4352 = vmatmul.mubr.msk.bf16.vlgmr.msra.gmra.mrb[0].mxu1 %vm283_vm1, %v674_v38  ;;  %4357 = vmatprep.mubr.msk.bf16.mxu0 %vm5153_vm0, %v5152_v0  ;;  %v5412_v21 = vsel %vm725_vm2, %v749_v17, 0  ;;  %v1176_v38 = vor.u32 %v1175_v37, %v1171_v36  ;;  %v3997_v36 = vld [vmem:[%s5286_s23 + $0x34] sm:$0xf]  ;;  %v3995_v37 = vcombine.low %v3993_v34, %v3994_v35 }
  0x79   : > { %4362 = vmatpush3.bf16.msra.mxu1 %v5288_v1  ;;  %4365 = vmatprep.mubr.msk.bf16.mxu1 %vm5153_vm0, %v5152_v0 }
  0x7a   : > { %4363 = vmatprep.subr.bf16.mxu1 %v5152_v0 }
  0x7d   : > { %4364 = vmatpush3.bf16.msra.mxu1 %v5290_v2 }
  0x7e   : > { %4369 = vmatprep.subr.bf16.mxu1 %v5152_v0 }
  0x80   : > { %4366 = vmatmul.mubr.msk.bf16.vlgmr.msra.gmra.mrb[4].mxu1 %vm283_vm1, %v821_v42  ;;  %v3980_v42 = vcombine.low %v3977_v39, %v3979_v40 }
  0x81   : > { %4370 = vmatpush3.bf16.msra.mxu1 %v5304_v15  ;;  %4373 = vmatprep.mubr.msk.bf16.mxu1 %vm5153_vm0, %v5152_v0 }
  0x82   : > { %4371 = vmatprep.subr.bf16.mxu1 %v5152_v0  ;;  %v1301_v45 = vshrl.u32 %v3980_v42, 16  ;;  %v1303_v46 = vshll.u32 %v3980_v42, 16 }
  0x84   : > { %v1305_v48 = vrot.slane %v1303_v46, 1 }
  0x85   : > { %4372 = vmatpush3.bf16.msra.mxu1 %v5309_v18 }
  0x86   : > { %4377 = vmatprep.subr.bf16.mxu1 %v5152_v0  ;;  %v1306_v49 = vor.u32 %v1305_v48, %v1301_v45 }
  0x8c   : > { %4374 = vmatmul.mubr.msk.bf16.vlgmr.msra.gmra.mrb[4].mxu1 %vm283_vm1, %v3956_v44 }
  0x8d   : > { %4378 = vmatpush3.bf16.msra.mxu1 %v5324_v23  ;;  %4381 = vmatprep.mubr.msk.bf16.mxu1 %vm5153_vm0, %v5152_v0 }
  0x8e   : > { %4379 = vmatprep.subr.bf16.mxu1 %v5152_v0 }
  0x91   : > { %4380 = vmatpush3.bf16.msra.mxu1 %v5329_v24 }
  0x92   : > { %4385 = vmatprep.subr.bf16.mxu1 %v5152_v0 }
  0x98   : > { %4382 = vmatmul.mubr.msk.bf16.vlgmr.msra.gmra.mrb[4].mxu1 %vm283_vm1, %v5392_v47 }
  0x99   : > { %4386 = vmatpush3.bf16.msra.mxu1 %v5345_v30  ;;  %4389 = vmatprep.mubr.msk.bf16.mxu1 %vm5153_vm0, %v5152_v0 }
  0x9a   : > { %4387 = vmatprep.subr.bf16.mxu1 %v5152_v0 }
  0x9d   : > { %4388 = vmatpush3.bf16.msra.mxu1 %v5350_v31 }
  0x9e   : > { %4425 = vmatprep.subr.bf16.mxu1 %v5152_v0 }
  0xa4   : > { %4390 = vmatmul.mubr.msk.bf16.vlgmr.msra.gmra.mrb[4].mxu1 %vm283_vm1, %v980_v53 }
  0xa5   : > { %4427 = vmatprep.mubr.msk.bf16.mxu1 %vm5153_vm0, %v5152_v0 }
 0x14a   : > { %v516_v54 = vpop.f32.mrb[0].mxu0 }
 0x14b   : > { %v712_v56 = vpop.f32.mrb[0].mxu1  ;;  %v4321_v57 = vpop.f32.mrb[1].mxu0 }
 0x14c   : > { %v721_v58 = vmax.f32 %v516_v54, %v712_v56  ;;  %v4353_v59 = vpop.f32.mrb[1].mxu1  ;;  %v519_v60 = vpop.f32.mrb[2].mxu0  ;;  %v3989_v56 = vcombine.low %v3984_v52, %v3988_v55 }
 0x14d   : > { %v715_v61 = vpop.f32.mrb[2].mxu1  ;;  %v4322_v62 = vpop.f32.mrb[3].mxu0 }
 0x14e   : > { %v722_v63 = vmax.f32 %v519_v60, %v715_v61  ;;  %v4354_v3 = vpop.f32.mrb[3].mxu1  ;;  %v726_v5 = vrot.slane %v721_v58, 1  ;;  %v1462_v57 = vshll.u32 %v3989_v56, 16 }
 0x150   : > { %v727_v6 = vrot.slane %v722_v63, 1  ;;  %v1464_v59 = vrot.slane %v1462_v57, 1  ;;  %v4011_v57 = vld [vmem:[%s5286_s23 + $0x3c] sm:$0x7] }
 0x152   : > { %v728_v8 = vsel %vm725_vm2, %v726_v5, %v727_v6  ;;  %v732_v9 = vmax.f32 %v722_v63, %v727_v6  ;;  %v798_v63 = vld [vmem:[%s5493_s4] sm:$0xf] }
 0x153   : > { %v731_v12 = vmax.f32 %v721_v58, %v728_v8  ;;  %v1460_v58 = vshrl.u32 %v3989_v56, 16  ;;  %v4010_v56 = vld [vmem:[%s5286_s23 + $0x38] sm:$0xf] }
 0x154   : > { %v740_v13 = vadd.f32 %v5406_v7, %v732_v9 }
 0x155   : > { %v739_v14 = vadd.f32 %v5406_v7, %v731_v12  ;;  %v1465_v60 = vor.u32 %v1464_v59, %v1460_v58  ;;  %v4012_v58 = vcombine.low %v4010_v56, %v4011_v57  ;;  %v4014_v59 = vld [vmem:[%s5286_s23 + $0x3c] sm:$0xf] }
 0x156   : > { %v742_v19 = vmax.f32 %v740_v13, 0.0 }
 0x157   : > { %v741_v20 = vmax.f32 %v739_v14, 0.0 }
 0x159   : > { %v743_v22 = vpack.c.bf16 %v742_v19, %v741_v20 }
 0x15b   : > { %v752_v26 = vand.u32 %v5412_v21, %v743_v22 }
 0x15d   : > { %4356 = vmatpush3.bf16.msra.mxu0 %v752_v26 }
 0x15e   : > { %4393 = vmatprep.subr.bf16.mxu0 %v5152_v0 }
 0x160   : > { %4358 = vmatmul.mubr.msk.bf16.vlgmr.msra.gmra.mrb[4].mxu0 %vm744_vm5, %v5416_v27 }
 0x161   : > { %4394 = vmatpush3.bf16.msra.mxu0 %v5288_v1  ;;  %4397 = vmatprep.mubr.msk.bf16.mxu0 %vm5153_vm0, %v5152_v0 }
 0x162   : > { %4395 = vmatprep.subr.bf16.mxu0 %v5152_v0 }
 0x165   : > { %4396 = vmatpush3.bf16.msra.mxu0 %v5290_v2 }
 0x166   : > { %4401 = vmatprep.subr.bf16.mxu0 %v5152_v0 }
 0x168   : > { %4398 = vmatmul.mubr.msk.bf16.vlgmr.msra.gmra.mrb[8].mxu0 %vm283_vm1, %v980_v53  ;;  %v3985_v53 = vld [vmem:[%s5286_s23 + $0x2c] sm:$0x7] }
 0x169   : > { %4402 = vmatpush3.bf16.msra.mxu0 %v5304_v15  ;;  %4405 = vmatprep.mubr.msk.bf16.mxu0 %vm5153_vm0, %v5152_v0  ;;  %v3986_v54 = vcombine.low %v3984_v52, %v3985_v53 }
 0x16a   : > { %4403 = vmatprep.subr.bf16.mxu0 %v5152_v0 }
 0x16d   : > { %4404 = vmatpush3.bf16.msra.mxu0 %v5309_v18 }
 0x16e   : > { %4409 = vmatprep.subr.bf16.mxu0 %v5152_v0 }
 0x174   : > { %4406 = vmatmul.mubr.msk.bf16.vlgmr.msra.gmra.mrb[8].mxu0 %vm283_vm1, %v5392_v47 }
 0x175   : > { %4410 = vmatpush3.bf16.msra.mxu0 %v5324_v23  ;;  %4413 = vmatprep.mubr.msk.bf16.mxu0 %vm5153_vm0, %v5152_v0 }
 0x176   : > { %4411 = vmatprep.subr.bf16.mxu0 %v5152_v0 }
 0x177   : > { %v1018_v41 = vpop.f32.mrb[4].mxu1 }
 0x178   : > { %v4391_v43 = vpop.f32.mrb[5].mxu1 }
 0x179   : > { %4412 = vmatpush3.bf16.msra.mxu0 %v5329_v24  ;;  %v1021_v44 = vpop.f32.mrb[6].mxu1  ;;  %v4003_v43 = vld [vmem:[%s5286_s23 + $0x30] sm:$0xf] }
 0x17a   : > { %4417 = vmatprep.subr.bf16.mxu0 %v5152_v0  ;;  %v4392_v47 = vpop.f32.mrb[7].mxu1 }
 0x180   : > { %4414 = vmatmul.mubr.msk.bf16.vlgmr.msra.gmra.mrb[8].mxu0 %vm283_vm1, %v3969_v33 }
 0x181   : > { %4418 = vmatpush3.bf16.msra.mxu0 %v5345_v30  ;;  %4421 = vmatprep.mubr.msk.bf16.mxu0 %vm5153_vm0, %v5152_v0 }
 0x182   : > { %4419 = vmatprep.subr.bf16.mxu0 %v5152_v0 }
 0x185   : > { %4420 = vmatpush3.bf16.msra.mxu0 %v5350_v31 }
 0x186   : > { %4431 = vmatprep.subr.bf16.mxu0 %v5152_v0 }
 0x18c   : > { %4422 = vmatmul.mubr.msk.bf16.vlgmr.msra.gmra.mrb[8].mxu0 %vm283_vm1, %v1176_v38  ;;  %v3998_v38 = vcombine.low %v3993_v34, %v3997_v36 }
 0x18d   : > { %4432 = vmatpush3.bf16.msra.mxu0 %v5288_v1  ;;  %4435 = vmatprep.mubr.msk.bf16.mxu0 %vm5153_vm0, %v5152_v0 }
 0x18e   : > { %4433 = vmatprep.subr.bf16.mxu0 %v5152_v0  ;;  %v1658_v39 = vshll.u32 %v3998_v38, 16  ;;  %v1656_v40 = vshrl.u32 %v3998_v38, 16  ;;  %v4019_v38 = vld [vmem:[%s5286_s23 + $0x40] sm:$0xf] }
 0x191   : > { %4434 = vmatpush3.bf16.msra.mxu0 %v5290_v2 }
 0x192   : > { %4439 = vmatprep.subr.bf16.mxu0 %v5152_v0 }
 0x194   : > { %4436 = vmatmul.mubr.msk.bf16.vlgmr.msra.gmra.mrb[12].mxu0 %vm283_vm1, %v1306_v49 }
 0x195   : > { %4440 = vmatpush3.bf16.msra.mxu0 %v5304_v15  ;;  %4443 = vmatprep.mubr.msk.bf16.mxu0 %vm5153_vm0, %v5152_v0 }
 0x196   : > { %4441 = vmatprep.subr.bf16.mxu0 %v5152_v0 }
 0x199   : > { %4442 = vmatpush3.bf16.msra.mxu0 %v5309_v18 }
 0x19a   : > { %4447 = vmatprep.subr.bf16.mxu0 %v5152_v0 }
 0x1a0   : > { %4444 = vmatmul.mubr.msk.bf16.vlgmr.msra.gmra.mrb[12].mxu0 %vm283_vm1, %v3982_v51 }
 0x1a1   : > { %4448 = vmatpush3.bf16.msra.mxu0 %v5324_v23  ;;  %4451 = vmatprep.mubr.msk.bf16.mxu0 %vm5153_vm0, %v5152_v0 }
 0x1a2   : > { %4449 = vmatprep.subr.bf16.mxu0 %v5152_v0 }
 0x1a5   : > { %4450 = vmatpush3.bf16.msra.mxu0 %v5329_v24 }
 0x1a6   : > { %4455 = vmatprep.subr.bf16.mxu0 %v5152_v0 }
 0x1ac   : > { %4452 = vmatmul.mubr.msk.bf16.vlgmr.msra.gmra.mrb[12].mxu0 %vm283_vm1, %v3986_v54 }
 0x1ad   : > { %4456 = vmatpush3.bf16.msra.mxu0 %v5345_v30  ;;  %4459 = vmatprep.mubr.msk.bf16.mxu0 %vm5153_vm0, %v5152_v0 }
 0x1ae   : > { %4457 = vmatprep.subr.bf16.mxu0 %v5152_v0 }
 0x1b1   : > { %4458 = vmatpush3.bf16.msra.mxu0 %v5350_v31 }
 0x1b2   : > { %4495 = vmatprep.subr.bf16.mxu0 %v5152_v0 }
 0x1b8   : > { %4460 = vmatmul.mubr.msk.bf16.vlgmr.msra.gmra.mrb[12].mxu0 %vm283_vm1, %v1465_v60 }
 0x1b9   : > { %4497 = vmatprep.mubr.msk.bf16.mxu0 %vm5153_vm0, %v5152_v0 }
 0x233   : > { %v788_v61 = vpop.f32.mrb[4].mxu0 }
 0x234   : > { %v794_v3 = vpack.c.bf16 %v788_v61, %v788_v61  ;;  %v4359_v4 = vpop.f32.mrb[5].mxu0 }
 0x235   : > { %v791_v5 = vpop.f32.mrb[6].mxu0 }
 0x236   : > { %v799_v6 = vsel %vm5495_vm8, %v794_v3, %v798_v63  ;;  %v4360_v8 = vpop.f32.mrb[7].mxu0 }
 0x237   : > { %800 = vst [vmem:[%s5493_s4] sm:$0xf] %v799_v6  ;;  %v3975_v6 = vld [vmem:[%s5493_s4 + $0x4] sm:$0xf] }
 0x25f   : > { %v1214_v9 = vpop.f32.mrb[8].mxu0 }
 0x260   : > { %v1223_v10 = vmax.f32 %v1018_v41, %v1214_v9  ;;  %v4423_v11 = vpop.f32.mrb[9].mxu0  ;;  %v1660_v41 = vrot.slane %v1658_v39, 1  ;;  %v4020_v39 = vld [vmem:[%s5286_s23 + $0x44] sm:$0x7] }
 0x261   : > { %v1217_v12 = vpop.f32.mrb[10].mxu0 }
 0x262   : > { %v1224_v13 = vmax.f32 %v1021_v44, %v1217_v12  ;;  %v4424_v14 = vpop.f32.mrb[11].mxu0  ;;  %v1227_v16 = vrot.slane %v1223_v10, 1  ;;  %v1661_v42 = vor.u32 %v1660_v41, %v1656_v40  ;;  %v4005_v44 = vld [vmem:[%s5286_s23 + $0x34] sm:$0xf]  ;;  %v4023_v40 = vld [vmem:[%s5286_s23 + $0x44] sm:$0xf]  ;;  %v4021_v41 = vcombine.low %v4019_v38, %v4020_v39 }
 0x263   : > { %v4006_v46 = vcombine.low %v4003_v43, %v4005_v44 }
 0x264   : > { %v1228_v17 = vrot.slane %v1224_v13, 1 }
 0x265   : > { %v1786_v49 = vshrl.u32 %v4006_v46, 16  ;;  %v1788_v50 = vshll.u32 %v4006_v46, 16 }
 0x266   : > { %v1229_v19 = vsel %vm725_vm2, %v1227_v16, %v1228_v17  ;;  %v1233_v20 = vmax.f32 %v1224_v13, %v1228_v17 }
 0x267   : > { %v1232_v22 = vmax.f32 %v1223_v10, %v1229_v19  ;;  %v1790_v52 = vrot.slane %v1788_v50, 1 }
 0x268   : > { %v1235_v25 = vadd.f32 %v5406_v7, %v1233_v20 }
 0x269   : > { %v1234_v26 = vadd.f32 %v5406_v7, %v1232_v22  ;;  %v1791_v53 = vor.u32 %v1790_v52, %v1786_v49 }
 0x26a   : > { %v1237_v28 = vmax.f32 %v1235_v25, 0.0 }
 0x26b   : > { %v1236_v29 = vmax.f32 %v1234_v26, 0.0 }
 0x26d   : > { %v1238_v32 = vpack.c.bf16 %v1237_v28, %v1236_v29 }
 0x26f   : > { %v1240_v33 = vand.u32 %v1238_v32, %v5412_v21 }
 0x271   : > { %4426 = vmatpush3.bf16.msra.mxu1 %v1240_v33 }
 0x272   : > { %4463 = vmatprep.subr.bf16.mxu1 %v5152_v0 }
 0x274   : > { %4428 = vmatmul.mubr.msk.bf16.vlgmr.msra.gmra.mrb[8].mxu1 %vm744_vm5, %v5416_v27 }
 0x275   : > { %4464 = vmatpush3.bf16.msra.mxu1 %v5288_v1  ;;  %4467 = vmatprep.mubr.msk.bf16.mxu1 %vm5153_vm0, %v5152_v0 }
 0x276   : > { %4465 = vmatprep.subr.bf16.mxu1 %v5152_v0 }
 0x279   : > { %4466 = vmatpush3.bf16.msra.mxu1 %v5290_v2 }
 0x27a   : > { %4471 = vmatprep.subr.bf16.mxu1 %v5152_v0 }
 0x27c   : > { %4468 = vmatmul.mubr.msk.bf16.vlgmr.msra.gmra.mrb[12].mxu1 %vm283_vm1, %v1465_v60  ;;  %v4015_v60 = vcombine.low %v4010_v56, %v4014_v59 }
 0x27d   : > { %4472 = vmatpush3.bf16.msra.mxu1 %v5304_v15  ;;  %4475 = vmatprep.mubr.msk.bf16.mxu1 %vm5153_vm0, %v5152_v0 }
 0x27e   : > { %4473 = vmatprep.subr.bf16.mxu1 %v5152_v0  ;;  %v1947_v61 = vshll.u32 %v4015_v60, 16  ;;  %v1945_v63 = vshrl.u32 %v4015_v60, 16  ;;  %v4036_v60 = vld [vmem:[%s5286_s23 + $0x48] sm:$0xf] }
 0x280   : > { %v1949_v3 = vrot.slane %v1947_v61, 1  ;;  %v4037_v61 = vld [vmem:[%s5286_s23 + $0x4c] sm:$0x7] }
 0x281   : > { %4474 = vmatpush3.bf16.msra.mxu1 %v5309_v18 }
 0x282   : > { %4479 = vmatprep.subr.bf16.mxu1 %v5152_v0  ;;  %v1950_v4 = vor.u32 %v1949_v3, %v1945_v63  ;;  %v4038_v63 = vcombine.low %v4036_v60, %v4037_v61  ;;  %v4040_v3 = vld [vmem:[%s5286_s23 + $0x4c] sm:$0xf] }
 0x283   : > { %v5716_v61 = vld [vmem:[#allocation2 + $0x8] sm:$0xff]  }
 0x288   : > { %4476 = vmatmul.mubr.msk.bf16.vlgmr.msra.gmra.mrb[12].mxu1 %vm283_vm1, %v3986_v54  ;;  %v4004_v54 = vld [vmem:[%s5286_s23 + $0x34] sm:$0x7] }
 0x289   : > { %4480 = vmatpush3.bf16.msra.mxu1 %v5324_v23  ;;  %4483 = vmatprep.mubr.msk.bf16.mxu1 %vm5153_vm0, %v5152_v0  ;;  %v4008_v55 = vcombine.low %v4003_v43, %v4004_v54 }
 0x28a   : > { %4481 = vmatprep.subr.bf16.mxu1 %v5152_v0 }
 0x28b   : > { %v1503_v45 = vpop.f32.mrb[12].mxu0 }
 0x28c   : > { %v4461_v47 = vpop.f32.mrb[13].mxu0 }
 0x28d   : > { %4482 = vmatpush3.bf16.msra.mxu1 %v5329_v24  ;;  %v1506_v48 = vpop.f32.mrb[14].mxu0  ;;  %v4029_v47 = vld [vmem:[%s5286_s23 + $0x40] sm:$0xf] }
 0x28e   : > { %4487 = vmatprep.subr.bf16.mxu1 %v5152_v0  ;;  %v4462_v51 = vpop.f32.mrb[15].mxu0 }
 0x294   : > { %4484 = vmatmul.mubr.msk.bf16.vlgmr.msra.gmra.mrb[12].mxu1 %vm283_vm1, %v3995_v37 }
 0x295   : > { %4488 = vmatpush3.bf16.msra.mxu1 %v5345_v30  ;;  %4491 = vmatprep.mubr.msk.bf16.mxu1 %vm5153_vm0, %v5152_v0 }
 0x296   : > { %4489 = vmatprep.subr.bf16.mxu1 %v5152_v0 }
 0x299   : > { %4490 = vmatpush3.bf16.msra.mxu1 %v5350_v31 }
 0x29a   : > { %4501 = vmatprep.subr.bf16.mxu1 %v5152_v0 }
 0x2a0   : > { %4492 = vmatmul.mubr.msk.bf16.vlgmr.msra.gmra.mrb[12].mxu1 %vm283_vm1, %v1661_v42  ;;  %v4024_v42 = vcombine.low %v4019_v38, %v4023_v40 }
 0x2a1   : > { %4502 = vmatpush3.bf16.msra.mxu1 %v5288_v1  ;;  %4505 = vmatprep.mubr.msk.bf16.mxu1 %vm5153_vm0, %v5152_v0 }
 0x2a2   : > { %4503 = vmatprep.subr.bf16.mxu1 %v5152_v0  ;;  %v2143_v43 = vshll.u32 %v4024_v42, 16  ;;  %v2141_v44 = vshrl.u32 %v4024_v42, 16 }
 0x2a5   : > { %4504 = vmatpush3.bf16.msra.mxu1 %v5290_v2 }
 0x2a6   : > { %4509 = vmatprep.subr.bf16.mxu1 %v5152_v0 }
 0x2a8   : > { %4506 = vmatmul.mubr.msk.bf16.vlgmr.msra.gmra.mrb[16].mxu1 %vm283_vm1, %v1791_v53 }
 0x2a9   : > { %4510 = vmatpush3.bf16.msra.mxu1 %v5304_v15  ;;  %4513 = vmatprep.mubr.msk.bf16.mxu1 %vm5153_vm0, %v5152_v0 }
 0x2aa   : > { %4511 = vmatprep.subr.bf16.mxu1 %v5152_v0 }
 0x2ad   : > { %4512 = vmatpush3.bf16.msra.mxu1 %v5309_v18 }
 0x2ae   : > { %4517 = vmatprep.subr.bf16.mxu1 %v5152_v0 }
 0x2b4   : > { %4514 = vmatmul.mubr.msk.bf16.vlgmr.msra.gmra.mrb[16].mxu1 %vm283_vm1, %v4008_v55 }
 0x2b5   : > { %4518 = vmatpush3.bf16.msra.mxu1 %v5324_v23  ;;  %4521 = vmatprep.mubr.msk.bf16.mxu1 %vm5153_vm0, %v5152_v0 }
 0x2b6   : > { %4519 = vmatprep.subr.bf16.mxu1 %v5152_v0 }
 0x2b9   : > { %4520 = vmatpush3.bf16.msra.mxu1 %v5329_v24 }
 0x2ba   : > { %4525 = vmatprep.subr.bf16.mxu1 %v5152_v0 }
 0x2c0   : > { %4522 = vmatmul.mubr.msk.bf16.vlgmr.msra.gmra.mrb[16].mxu1 %vm283_vm1, %v4012_v58 }
 0x2c1   : > { %4526 = vmatpush3.bf16.msra.mxu1 %v5345_v30  ;;  %4529 = vmatprep.mubr.msk.bf16.mxu1 %vm5153_vm0, %v5152_v0 }
 0x2c2   : > { %4527 = vmatprep.subr.bf16.mxu1 %v5152_v0 }
 0x2c5   : > { %4528 = vmatpush3.bf16.msra.mxu1 %v5350_v31 }
 0x2c6   : > { %4565 = vmatprep.subr.bf16.mxu1 %v5152_v0 }
 0x2cc   : > { %4530 = vmatmul.mubr.msk.bf16.vlgmr.msra.gmra.mrb[16].mxu1 %vm283_vm1, %v1950_v4 }
 0x2cd   : > { %4567 = vmatprep.mubr.msk.bf16.mxu1 %vm5153_vm0, %v5152_v0 }
 0x347   : > { %v1276_v5 = vpop.f32.mrb[8].mxu1 }
 0x348   : > { %v1282_v8 = vpack.c.bf16 %v1276_v5, %v1276_v5  ;;  %v4429_v9 = vpop.f32.mrb[9].mxu1 }
 0x349   : > { %v1279_v10 = vpop.f32.mrb[10].mxu1 }
 0x34a   : > { %v1285_v11 = vsel %vm5495_vm8, %v1282_v8, %v3975_v6  ;;  %v4430_v12 = vpop.f32.mrb[11].mxu1 }
 0x34b   : > { %3976 = vst [vmem:[%s5493_s4 + $0x4] sm:$0xf] %v1285_v11  ;;  %v4001_v11 = vld [vmem:[%s5493_s4 + $0x8] sm:$0xf] }
 0x373   : > { %v1699_v13 = vpop.f32.mrb[12].mxu1 }
 0x374   : > { %v1708_v14 = vmax.f32 %v1503_v45, %v1699_v13  ;;  %v4493_v16 = vpop.f32.mrb[13].mxu1  ;;  %v2145_v45 = vrot.slane %v2143_v43, 1 }
 0x375   : > { %v1702_v17 = vpop.f32.mrb[14].mxu1 }
 0x376   : > { %v1709_v19 = vmax.f32 %v1506_v48, %v1702_v17  ;;  %v4494_v20 = vpop.f32.mrb[15].mxu1  ;;  %v1712_v22 = vrot.slane %v1708_v14, 1  ;;  %v2146_v46 = vor.u32 %v2145_v45, %v2141_v44  ;;  %v4031_v48 = vld [vmem:[%s5286_s23 + $0x44] sm:$0xf] }
 0x377   : > { %v4032_v50 = vcombine.low %v4029_v47, %v4031_v48  ;;  %v5703_v48 = vld [vmem:[#allocation2 + $0x18] sm:$0xff]  }
 0x378   : > { %v1713_v25 = vrot.slane %v1709_v19, 1 }
 0x379   : > { %v2271_v53 = vshrl.u32 %v4032_v50, 16  ;;  %v2273_v54 = vshll.u32 %v4032_v50, 16  ;;  %v4057_v50 = vld [vmem:[%s5286_s23 + $0x54] sm:$0xf] }
 0x37a   : > { %v1714_v26 = vsel %vm725_vm2, %v1712_v22, %v1713_v25  ;;  %v1718_v28 = vmax.f32 %v1709_v19, %v1713_v25 }
 0x37b   : > { %v1717_v29 = vmax.f32 %v1708_v14, %v1714_v26  ;;  %v2275_v56 = vrot.slane %v2273_v54, 1 }
 0x37c   : > { %v1720_v32 = vadd.f32 %v5406_v7, %v1718_v28 }
 0x37d   : > { %v1719_v33 = vadd.f32 %v5406_v7, %v1717_v29  ;;  %v2276_v57 = vor.u32 %v2275_v56, %v2271_v53 }
 0x37e   : > { %v1722_v34 = vmax.f32 %v1720_v32, 0.0 }
 0x37f   : > { %v1721_v35 = vmax.f32 %v1719_v33, 0.0 }
 0x381   : > { %v1723_v36 = vpack.c.bf16 %v1722_v34, %v1721_v35 }
 0x383   : > { %v1725_v37 = vand.u32 %v1723_v36, %v5412_v21 }
 0x385   : > { %4496 = vmatpush3.bf16.msra.mxu0 %v1725_v37 }
 0x386   : > { %4533 = vmatprep.subr.bf16.mxu0 %v5152_v0 }
 0x388   : > { %4498 = vmatmul.mubr.msk.bf16.vlgmr.msra.gmra.mrb[16].mxu0 %vm744_vm5, %v5416_v27 }
 0x389   : > { %4534 = vmatpush3.bf16.msra.mxu0 %v5288_v1  ;;  %4537 = vmatprep.mubr.msk.bf16.mxu0 %vm5153_vm0, %v5152_v0 }
 0x38a   : > { %4535 = vmatprep.subr.bf16.mxu0 %v5152_v0 }
 0x38d   : > { %4536 = vmatpush3.bf16.msra.mxu0 %v5290_v2 }
 0x38e   : > { %4541 = vmatprep.subr.bf16.mxu0 %v5152_v0 }
 0x390   : > { %4538 = vmatmul.mubr.msk.bf16.vlgmr.msra.gmra.mrb[20].mxu0 %vm283_vm1, %v1950_v4  ;;  %v4041_v4 = vcombine.low %v4036_v60, %v4040_v3  ;;  %v5710_v60 = vld [vmem:[#allocation2] sm:$0xff]  }
 0x391   : > { %4542 = vmatpush3.bf16.msra.mxu0 %v5304_v15  ;;  %4545 = vmatprep.mubr.msk.bf16.mxu0 %vm5153_vm0, %v5152_v0 }
 0x392   : > { %4543 = vmatprep.subr.bf16.mxu0 %v5152_v0  ;;  %v2432_v5 = vshll.u32 %v4041_v4, 16  ;;  %v2430_v6 = vshrl.u32 %v4041_v4, 16  ;;  %v4062_v4 = vld [vmem:[%s5286_s23 + $0x58] sm:$0xf] }
 0x394   : > { %v2434_v8 = vrot.slane %v2432_v5, 1  ;;  %v4063_v5 = vld [vmem:[%s5286_s23 + $0x5c] sm:$0x7] }
 0x395   : > { %4544 = vmatpush3.bf16.msra.mxu0 %v5309_v18 }
 0x396   : > { %4549 = vmatprep.subr.bf16.mxu0 %v5152_v0  ;;  %v2435_v9 = vor.u32 %v2434_v8, %v2430_v6  ;;  %v4064_v6 = vcombine.low %v4062_v4, %v4063_v5  ;;  %v4066_v8 = vld [vmem:[%s5286_s23 + $0x5c] sm:$0xf]  ;;  %v4082_v5 = vld [vmem:[%s5286_s23 + $0x64] sm:$0x7] }
 0x39c   : > { %4546 = vmatmul.mubr.msk.bf16.vlgmr.msra.gmra.mrb[20].mxu0 %vm283_vm1, %v4012_v58  ;;  %v4030_v58 = vld [vmem:[%s5286_s23 + $0x44] sm:$0x7] }
 0x39d   : > { %4550 = vmatpush3.bf16.msra.mxu0 %v5324_v23  ;;  %4553 = vmatprep.mubr.msk.bf16.mxu0 %vm5153_vm0, %v5152_v0  ;;  %v4034_v59 = vcombine.low %v4029_v47, %v4030_v58  ;;  %v5697_v47 = vld [vmem:[#allocation2 + $0x10] sm:$0xff]  }
 0x39e   : > { %4551 = vmatprep.subr.bf16.mxu0 %v5152_v0 }
 0x39f   : > { %v1988_v49 = vpop.f32.mrb[16].mxu1 }
 0x3a0   : > { %v4531_v51 = vpop.f32.mrb[17].mxu1 }
 0x3a1   : > { %4552 = vmatpush3.bf16.msra.mxu0 %v5329_v24  ;;  %v1991_v52 = vpop.f32.mrb[18].mxu1 }
 0x3a2   : > { %4557 = vmatprep.subr.bf16.mxu0 %v5152_v0  ;;  %v4532_v55 = vpop.f32.mrb[19].mxu1 }
 0x3a8   : > { %4554 = vmatmul.mubr.msk.bf16.vlgmr.msra.gmra.mrb[20].mxu0 %vm283_vm1, %v4021_v41 }
 0x3a9   : > { %4558 = vmatpush3.bf16.msra.mxu0 %v5345_v30  ;;  %4561 = vmatprep.mubr.msk.bf16.mxu0 %vm5153_vm0, %v5152_v0 }
 0x3aa   : > { %4559 = vmatprep.subr.bf16.mxu0 %v5152_v0 }
 0x3ad   : > { %4560 = vmatpush3.bf16.msra.mxu0 %v5350_v31 }
 0x3ae   : > { %4571 = vmatprep.subr.bf16.mxu0 %v5152_v0 }
 0x3b4   : > { %4562 = vmatmul.mubr.msk.bf16.vlgmr.msra.gmra.mrb[20].mxu0 %vm283_vm1, %v2146_v46 }
 0x3b5   : > { %4572 = vmatpush3.bf16.msra.mxu0 %v5288_v1  ;;  %4575 = vmatprep.mubr.msk.bf16.mxu0 %vm5153_vm0, %v5152_v0 }
 0x3b6   : > { %4573 = vmatprep.subr.bf16.mxu0 %v5152_v0 }
 0x3b9   : > { %4574 = vmatpush3.bf16.msra.mxu0 %v5290_v2 }
 0x3ba   : > { %4579 = vmatprep.subr.bf16.mxu0 %v5152_v0 }
 0x3bc   : > { %4576 = vmatmul.mubr.msk.bf16.vlgmr.msra.gmra.mrb[24].mxu0 %vm283_vm1, %v2276_v57 }
 0x3bd   : > { %4580 = vmatpush3.bf16.msra.mxu0 %v5304_v15  ;;  %4583 = vmatprep.mubr.msk.bf16.mxu0 %vm5153_vm0, %v5152_v0 }
 0x3be   : > { %4581 = vmatprep.subr.bf16.mxu0 %v5152_v0 }
 0x3c1   : > { %4582 = vmatpush3.bf16.msra.mxu0 %v5309_v18 }
 0x3c2   : > { %4587 = vmatprep.subr.bf16.mxu0 %v5152_v0 }
 0x3c8   : > { %4584 = vmatmul.mubr.msk.bf16.vlgmr.msra.gmra.mrb[24].mxu0 %vm283_vm1, %v4034_v59 }
 0x3c9   : > { %4588 = vmatpush3.bf16.msra.mxu0 %v5324_v23  ;;  %4591 = vmatprep.mubr.msk.bf16.mxu0 %vm5153_vm0, %v5152_v0 }
 0x3ca   : > { %4589 = vmatprep.subr.bf16.mxu0 %v5152_v0 }
 0x3cd   : > { %4590 = vmatpush3.bf16.msra.mxu0 %v5329_v24 }
 0x3ce   : > { %4595 = vmatprep.subr.bf16.mxu0 %v5152_v0 }
 0x3d4   : > { %4592 = vmatmul.mubr.msk.bf16.vlgmr.msra.gmra.mrb[24].mxu0 %vm283_vm1, %v4038_v63 }
 0x3d5   : > { %4596 = vmatpush3.bf16.msra.mxu0 %v5345_v30  ;;  %4599 = vmatprep.mubr.msk.bf16.mxu0 %vm5153_vm0, %v5152_v0 }
 0x3d6   : > { %4597 = vmatprep.subr.bf16.mxu0 %v5152_v0 }
 0x3d9   : > { %4598 = vmatpush3.bf16.msra.mxu0 %v5350_v31 }
 0x3da   : > { %4635 = vmatprep.subr.bf16.mxu0 %v5152_v0 }
 0x3e0   : > { %4600 = vmatmul.mubr.msk.bf16.vlgmr.msra.gmra.mrb[24].mxu0 %vm283_vm1, %v2435_v9 }
 0x3e1   : > { %4637 = vmatprep.mubr.msk.bf16.mxu0 %vm5153_vm0, %v5152_v0 }
 0x45b   : > { %v1761_v10 = vpop.f32.mrb[16].mxu0 }
 0x45c   : > { %v1767_v12 = vpack.c.bf16 %v1761_v10, %v1761_v10  ;;  %v4499_v13 = vpop.f32.mrb[17].mxu0 }
 0x45d   : > { %v1764_v14 = vpop.f32.mrb[18].mxu0 }
 0x45e   : > { %v1770_v16 = vsel %vm5495_vm8, %v1767_v12, %v4001_v11  ;;  %v4500_v17 = vpop.f32.mrb[19].mxu0  ;;  %v4027_v12 = vld [vmem:[%s5493_s4 + $0xc] sm:$0xf] }
 0x45f   : > { %4002 = vst [vmem:[%s5493_s4 + $0x8] sm:$0xf] %v1770_v16 }
 0x487   : > { %v2184_v19 = vpop.f32.mrb[20].mxu0 }
 0x488   : > { %v2193_v20 = vmax.f32 %v1988_v49, %v2184_v19  ;;  %v4563_v22 = vpop.f32.mrb[21].mxu0  ;;  %v4055_v49 = vld [vmem:[%s5286_s23 + $0x50] sm:$0xf] }
 0x489   : > { %v2187_v25 = vpop.f32.mrb[22].mxu0 }
 0x48a   : > { %v2194_v26 = vmax.f32 %v1991_v52, %v2187_v25  ;;  %v4564_v28 = vpop.f32.mrb[23].mxu0  ;;  %v2197_v29 = vrot.slane %v2193_v20, 1  ;;  %v4058_v52 = vcombine.low %v4055_v49, %v4057_v50  ;;  %v5786_v50 = vld [vmem:[#allocation2 + $0x38] sm:$0xff]  }
 0x48c   : > { %v2198_v32 = vrot.slane %v2194_v26, 1  ;;  %v2756_v55 = vshrl.u32 %v4058_v52, 16  ;;  %v2758_v56 = vshll.u32 %v4058_v52, 16  ;;  %v4081_v52 = vld [vmem:[%s5286_s23 + $0x60] sm:$0xf] }
 0x48e   : > { %v2199_v33 = vsel %vm725_vm2, %v2197_v29, %v2198_v32  ;;  %v2203_v34 = vmax.f32 %v2194_v26, %v2198_v32  ;;  %v2760_v58 = vrot.slane %v2758_v56, 1 }
 0x48f   : > { %v2202_v35 = vmax.f32 %v2193_v20, %v2199_v33 }
 0x490   : > { %v2205_v36 = vadd.f32 %v5406_v7, %v2203_v34  ;;  %v2761_v59 = vor.u32 %v2760_v58, %v2756_v55 }
 0x491   : > { %v2204_v37 = vadd.f32 %v5406_v7, %v2202_v35 }
 0x492   : > { %v2207_v38 = vmax.f32 %v2205_v36, 0.0 }
 0x493   : > { %v2206_v39 = vmax.f32 %v2204_v37, 0.0 }
 0x495   : > { %v2208_v40 = vpack.c.bf16 %v2207_v38, %v2206_v39 }
 0x497   : > { %v2210_v41 = vand.u32 %v2208_v40, %v5412_v21 }
 0x499   : > { %4566 = vmatpush3.bf16.msra.mxu1 %v2210_v41 }
 0x49a   : > { %4603 = vmatprep.subr.bf16.mxu1 %v5152_v0 }
 0x49c   : > { %4568 = vmatmul.mubr.msk.bf16.vlgmr.msra.gmra.mrb[20].mxu1 %vm744_vm5, %v5416_v27 }
 0x49d   : > { %4604 = vmatpush3.bf16.msra.mxu1 %v5288_v1  ;;  %4607 = vmatprep.mubr.msk.bf16.mxu1 %vm5153_vm0, %v5152_v0  ;;  %v4045_v1 = vld [vmem:[%s5286_s23 + $0x50] sm:$0xf] }
 0x49e   : > { %4605 = vmatprep.subr.bf16.mxu1 %v5152_v0 }
 0x4a1   : > { %4606 = vmatpush3.bf16.msra.mxu1 %v5290_v2  ;;  %v4046_v2 = vld [vmem:[%s5286_s23 + $0x54] sm:$0x7] }
 0x4a2   : > { %4611 = vmatprep.subr.bf16.mxu1 %v5152_v0  ;;  %v4047_v42 = vcombine.low %v4045_v1, %v4046_v2  ;;  %v4071_v2 = vld [vmem:[%s5286_s23 + $0x60] sm:$0xf] }
 0x4a4   : > { %4608 = vmatmul.mubr.msk.bf16.vlgmr.msra.gmra.mrb[24].mxu1 %vm283_vm1, %v2435_v9 }
 0x4a5   : > { %4612 = vmatpush3.bf16.msra.mxu1 %v5304_v15  ;;  %4615 = vmatprep.mubr.msk.bf16.mxu1 %vm5153_vm0, %v5152_v0  ;;  %v4049_v15 = vld [vmem:[%s5286_s23 + $0x54] sm:$0xf] }
 0x4a6   : > { %4613 = vmatprep.subr.bf16.mxu1 %v5152_v0 }
 0x4a9   : > { %4614 = vmatpush3.bf16.msra.mxu1 %v5309_v18  ;;  %v4050_v18 = vcombine.low %v4045_v1, %v4049_v15  ;;  %v5772_v1 = vld [vmem:[#allocation2 + $0x28] sm:$0xff]   ;;  %v4072_v15 = vld [vmem:[%s5286_s23 + $0x64] sm:$0x7] }
 0x4aa   : > { %4619 = vmatprep.subr.bf16.mxu1 %v5152_v0 }
 0x4ab   : > { %v2628_v43 = vshll.u32 %v4050_v18, 16  ;;  %v2626_v44 = vshrl.u32 %v4050_v18, 16  ;;  %v4073_v18 = vcombine.low %v4071_v2, %v4072_v15 }
 0x4ad   : > { %v2630_v45 = vrot.slane %v2628_v43, 1 }
 0x4af   : > { %v2631_v46 = vor.u32 %v2630_v45, %v2626_v44  ;;  %v5780_v45 = vld [vmem:[#allocation2 + $0x30] sm:$0xff]  }
 0x4b0   : > { %4616 = vmatmul.mubr.msk.bf16.vlgmr.msra.gmra.mrb[24].mxu1 %vm283_vm1, %v4038_v63  ;;  %v4056_v63 = vld [vmem:[%s5286_s23 + $0x54] sm:$0x7] }
 0x4b1   : > { %4620 = vmatpush3.bf16.msra.mxu1 %v5324_v23  ;;  %4623 = vmatprep.mubr.msk.bf16.mxu1 %vm5153_vm0, %v5152_v0  ;;  %v4060_v3 = vcombine.low %v4055_v49, %v4056_v63 }
 0x4b2   : > { %4621 = vmatprep.subr.bf16.mxu1 %v5152_v0 }
 0x4b3   : > { %v2473_v51 = vpop.f32.mrb[24].mxu0 }
 0x4b4   : > { %v4601_v53 = vpop.f32.mrb[25].mxu0 }
 0x4b5   : > { %4622 = vmatpush3.bf16.msra.mxu1 %v5329_v24  ;;  %v2476_v54 = vpop.f32.mrb[26].mxu0  ;;  %v4083_v53 = vld [vmem:[%s5286_s23 + $0x64] sm:$0xf] }
 0x4b6   : > { %4627 = vmatprep.subr.bf16.mxu1 %v5152_v0  ;;  %v4602_v57 = vpop.f32.mrb[27].mxu0  ;;  %v4084_v55 = vcombine.low %v4081_v52, %v4083_v53 }
 0x4b8   : > { %v3241_v58 = vshrl.u32 %v4084_v55, 16 }
 0x4bc   : > { %4624 = vmatmul.mubr.msk.bf16.vlgmr.msra.gmra.mrb[24].mxu1 %vm283_vm1, %v4047_v42  ;;  %v4075_v42 = vld [vmem:[%s5286_s23 + $0x64] sm:$0xf] }
 0x4bd   : > { %4628 = vmatpush3.bf16.msra.mxu1 %v5345_v30  ;;  %4631 = vmatprep.mubr.msk.bf16.mxu1 %vm5153_vm0, %v5152_v0  ;;  %v4076_v43 = vcombine.low %v4071_v2, %v4075_v42 }
 0x4be   : > { %4629 = vmatprep.subr.bf16.mxu1 %v5152_v0 }
 0x4bf   : > { %v3113_v44 = vshll.u32 %v4076_v43, 16 }
 0x4c1   : > { %4630 = vmatpush3.bf16.msra.mxu1 %v5350_v31  ;;  %v3115_v49 = vrot.slane %v3113_v44, 1 }
 0x4c2   : > { %4641 = vmatprep.subr.bf16.mxu1 %v5152_v0 }
 0x4c8   : > { %4632 = vmatmul.mubr.msk.bf16.vlgmr.msra.gmra.mrb[24].mxu1 %vm283_vm1, %v2631_v46  ;;  %v3111_v46 = vshrl.u32 %v4076_v43, 16 }
 0x4c9   : > { %4642 = vmatpush3.bf16.msra.mxu1 %v5697_v47  ;;  %4645 = vmatprep.mubr.msk.bf16.mxu1 %vm5153_vm0, %v5152_v0 }
 0x4ca   : > { %4643 = vmatprep.subr.bf16.mxu1 %v5152_v0 }
 0x4cd   : > { %4644 = vmatpush3.bf16.msra.mxu1 %v5703_v48 }
 0x4ce   : > { %4649 = vmatprep.subr.bf16.mxu1 %v5152_v0 }
 0x4d0   : > { %4646 = vmatmul.mubr.msk.bf16.vlgmr.msra.gmra.mrb[28].mxu1 %vm283_vm1, %v2761_v59  ;;  %v3243_v59 = vshll.u32 %v4084_v55, 16  ;;  %v4079_v55 = vld [vmem:[%s5493_s4 + $0x14] sm:$0xf] }
 0x4d1   : > { %4650 = vmatpush3.bf16.msra.mxu1 %v5710_v60  ;;  %4653 = vmatprep.mubr.msk.bf16.mxu1 %vm5153_vm0, %v5152_v0 }
 0x4d2   : > { %4651 = vmatprep.subr.bf16.mxu1 %v5152_v0 }
 0x4d5   : > { %4652 = vmatpush3.bf16.msra.mxu1 %v5716_v61 }
 0x4d6   : > { %4657 = vmatprep.subr.bf16.mxu1 %v5152_v0 }
 0x4dc   : > { %4654 = vmatmul.mubr.msk.bf16.vlgmr.msra.gmra.mrb[28].mxu1 %vm283_vm1, %v4060_v3  ;;  %v3245_v3 = vrot.slane %v3243_v59, 1 }
 0x4dd   : > { %4658 = vmatpush3.bf16.msra.mxu1 %v5324_v23  ;;  %4661 = vmatprep.mubr.msk.bf16.mxu1 %vm5153_vm0, %v5152_v0  ;;  %v4067_v23 = vcombine.low %v4062_v4, %v4066_v8  ;;  %v4088_v8 = vld [vmem:[%s5286_s23 + $0x68] sm:$0xf] }
 0x4de   : > { %4659 = vmatprep.subr.bf16.mxu1 %v5152_v0  ;;  %v3246_v4 = vor.u32 %v3245_v3, %v3241_v58 }
 0x4df   : > { %v2915_v9 = vshrl.u32 %v4067_v23, 16 }
 0x4e1   : > { %4660 = vmatpush3.bf16.msra.mxu1 %v5329_v24  ;;  %v2917_v24 = vshll.u32 %v4067_v23, 16  ;;  %v4089_v23 = vld [vmem:[%s5286_s23 + $0x6c] sm:$0x7] }
 0x4e2   : > { %4665 = vmatprep.subr.bf16.mxu1 %v5152_v0 }
 0x4e3   : > { %v2919_v10 = vrot.slane %v2917_v24, 1  ;;  %v4090_v24 = vcombine.low %v4088_v8, %v4089_v23 }
 0x4e5   : > { %v2920_v11 = vor.u32 %v2919_v10, %v2915_v9  ;;  %v4092_v9 = vld [vmem:[%s5286_s23 + $0x6c] sm:$0xf] }
 0x4e6   : > { %v4093_v10 = vcombine.low %v4088_v8, %v4092_v9 }
 0x4e8   : > { %4662 = vmatmul.mubr.msk.bf16.vlgmr.msra.gmra.mrb[28].mxu1 %vm283_vm1, %v4064_v6 }
 0x4e9   : > { %4666 = vmatpush3.bf16.msra.mxu1 %v5345_v30  ;;  %4669 = vmatprep.mubr.msk.bf16.mxu1 %vm5153_vm0, %v5152_v0 }
 0x4ea   : > { %4667 = vmatprep.subr.bf16.mxu1 %v5152_v0 }
 0x4ed   : > { %4668 = vmatpush3.bf16.msra.mxu1 %v5350_v31 }
 0x4ee   : > { %4705 = vmatprep.subr.bf16.mxu1 %v5152_v0 }
 0x4f4   : > { %4670 = vmatmul.mubr.msk.bf16.vlgmr.msra.gmra.mrb[28].mxu1 %vm283_vm1, %v2920_v11 }
 0x4f5   : > { %4707 = vmatprep.mubr.msk.bf16.mxu1 %vm5153_vm0, %v5152_v0 }
 0x56f   : > { %v2246_v30 = vpop.f32.mrb[20].mxu1 }
 0x570   : > { %v2252_v13 = vpack.c.bf16 %v2246_v30, %v2246_v30  ;;  %v4569_v14 = vpop.f32.mrb[21].mxu1  ;;  %v3400_v30 = vshrl.u32 %v4093_v10, 16 }
 0x571   : > { %v2249_v16 = vpop.f32.mrb[22].mxu1 }
 0x572   : > { %v2255_v17 = vsel %vm5495_vm8, %v2252_v13, %v4027_v12  ;;  %v4570_v31 = vpop.f32.mrb[23].mxu1  ;;  %v4053_v16 = vld [vmem:[%s5493_s4 + $0x10] sm:$0xf] }
 0x573   : > { %4028 = vst [vmem:[%s5493_s4 + $0xc] sm:$0xf] %v2255_v17 }
 0x59b   : > { %v2669_v19 = vpop.f32.mrb[24].mxu1 }
 0x59c   : > { %v2678_v20 = vmax.f32 %v2473_v51, %v2669_v19  ;;  %v4633_v22 = vpop.f32.mrb[25].mxu1  ;;  %v3116_v51 = vor.u32 %v3115_v49, %v3111_v46 }
 0x59d   : > { %v2672_v25 = vpop.f32.mrb[26].mxu1 }
 0x59e   : > { %v2679_v26 = vmax.f32 %v2476_v54, %v2672_v25  ;;  %v4634_v28 = vpop.f32.mrb[27].mxu1  ;;  %v2682_v29 = vrot.slane %v2678_v20, 1 }
 0x5a0   : > { %v2683_v32 = vrot.slane %v2679_v26, 1 }
 0x5a2   : > { %v2684_v33 = vsel %vm725_vm2, %v2682_v29, %v2683_v32  ;;  %v2688_v34 = vmax.f32 %v2679_v26, %v2683_v32 }
 0x5a3   : > { %v2687_v35 = vmax.f32 %v2678_v20, %v2684_v33 }
 0x5a4   : > { %v2690_v36 = vadd.f32 %v5406_v7, %v2688_v34 }
 0x5a5   : > { %v2689_v37 = vadd.f32 %v5406_v7, %v2687_v35  ;;  %v5766_v7 = vld [vmem:[#allocation2 + $0x20] sm:$0xff]  }
 0x5a6   : > { %v2692_v38 = vmax.f32 %v2690_v36, 0.0 }
 0x5a7   : > { %v2691_v39 = vmax.f32 %v2689_v37, 0.0 }
 0x5a9   : > { %v2693_v40 = vpack.c.bf16 %v2692_v38, %v2691_v39  ;;  %v5832_v39 = vld [vmem:[#allocation4] ss:$0 sm:$0xff] }
 0x5ab   : > { %v2695_v41 = vand.u32 %v2693_v40, %v5412_v21 }
 0x5ad   : > { %4636 = vmatpush3.bf16.msra.mxu0 %v2695_v41 }
 0x5ae   : > { %4673 = vmatprep.subr.bf16.mxu0 %v5152_v0 }
 0x5b0   : > { %4638 = vmatmul.mubr.msk.bf16.vlgmr.msra.gmra.mrb[28].mxu0 %vm744_vm5, %v5416_v27 }
 0x5b1   : > { %4674 = vmatpush3.bf16.msra.mxu0 %v5697_v47  ;;  %4677 = vmatprep.mubr.msk.bf16.mxu0 %vm5153_vm0, %v5152_v0 }
 0x5b2   : > { %4675 = vmatprep.subr.bf16.mxu0 %v5152_v0 }
 0x5b5   : > { %4676 = vmatpush3.bf16.msra.mxu0 %v5703_v48 }
 0x5b6   : > { %4681 = vmatprep.subr.bf16.mxu0 %v5152_v0 }
 0x5b8   : > { %4678 = vmatmul.mubr.msk.bf16.vlgmr.msra.gmra.mrb[32].mxu0 %vm283_vm1, %v2920_v11  ;;  %v3402_v11 = vshll.u32 %v4093_v10, 16 }
 0x5b9   : > { %4682 = vmatpush3.bf16.msra.mxu0 %v5710_v60  ;;  %4685 = vmatprep.mubr.msk.bf16.mxu0 %vm5153_vm0, %v5152_v0 }
 0x5ba   : > { %4683 = vmatprep.subr.bf16.mxu0 %v5152_v0  ;;  %v3404_v12 = vrot.slane %v3402_v11, 1 }
 0x5bc   : > { %v3405_v13 = vor.u32 %v3404_v12, %v3400_v30 }
 0x5bd   : > { %4684 = vmatpush3.bf16.msra.mxu0 %v5716_v61 }
 0x5be   : > { %4689 = vmatprep.subr.bf16.mxu0 %v5152_v0 }
 0x5c4   : > { %4686 = vmatmul.mubr.msk.bf16.vlgmr.msra.gmra.mrb[32].mxu0 %vm283_vm1, %v4064_v6  ;;  %v4086_v6 = vcombine.low %v4081_v52, %v4082_v5 }
 0x5c5   : > { %4690 = vmatpush3.bf16.msra.mxu0 %v5766_v7  ;;  %4693 = vmatprep.mubr.msk.bf16.mxu0 %vm5153_vm0, %v5152_v0 }
 0x5c6   : > { %4691 = vmatprep.subr.bf16.mxu0 %v5152_v0 }
 0x5c7   : > { %v2958_v54 = vpop.f32.mrb[28].mxu1 }
 0x5c8   : > { %v4671_v56 = vpop.f32.mrb[29].mxu1 }
 0x5c9   : > { %4692 = vmatpush3.bf16.msra.mxu0 %v5772_v1  ;;  %v2961_v57 = vpop.f32.mrb[30].mxu1 }
 0x5ca   : > { %4697 = vmatprep.subr.bf16.mxu0 %v5152_v0  ;;  %v4672_v63 = vpop.f32.mrb[31].mxu1 }
 0x5d0   : > { %4694 = vmatmul.mubr.msk.bf16.vlgmr.msra.gmra.mrb[32].mxu0 %vm283_vm1, %v4073_v18 }
 0x5d1   : > { %4698 = vmatpush3.bf16.msra.mxu0 %v5780_v45  ;;  %4701 = vmatprep.mubr.msk.bf16.mxu0 %vm5153_vm0, %v5152_v0 }
 0x5d2   : > { %4699 = vmatprep.subr.bf16.mxu0 %v5152_v0 }
 0x5d5   : > { %4700 = vmatpush3.bf16.msra.mxu0 %v5786_v50 }
 0x5d6   : > { %4711 = vmatprep.subr.bf16.mxu0 %v5152_v0 }
 0x5dc   : > { %4702 = vmatmul.mubr.msk.bf16.vlgmr.msra.gmra.mrb[32].mxu0 %vm283_vm1, %v3116_v51 }
 0x5dd   : > { %4712 = vmatpush3.bf16.msra.mxu0 %v5697_v47  ;;  %4715 = vmatprep.mubr.msk.bf16.mxu0 %vm5153_vm0, %v5152_v0 }
 0x5de   : > { %4713 = vmatprep.subr.bf16.mxu0 %v5152_v0 }
 0x5e1   : > { %4714 = vmatpush3.bf16.msra.mxu0 %v5703_v48 }
 0x5e2   : > { %4719 = vmatprep.subr.bf16.mxu0 %v5152_v0 }
 0x5e4   : > { %4716 = vmatmul.mubr.msk.bf16.vlgmr.msra.gmra.mrb[36].mxu0 %vm283_vm1, %v3246_v4 }
 0x5e5   : > { %4720 = vmatpush3.bf16.msra.mxu0 %v5710_v60  ;;  %4723 = vmatprep.mubr.msk.bf16.mxu0 %vm5153_vm0, %v5152_v0 }
 0x5e6   : > { %4721 = vmatprep.subr.bf16.mxu0 %v5152_v0 }
 0x5e9   : > { %4722 = vmatpush3.bf16.msra.mxu0 %v5716_v61 }
 0x5ea   : > { %4727 = vmatprep.subr.bf16.mxu0 %v5152_v0 }
 0x5f0   : > { %4724 = vmatmul.mubr.msk.bf16.vlgmr.msra.gmra.mrb[36].mxu0 %vm283_vm1, %v4086_v6 }
 0x5f1   : > { %4728 = vmatpush3.bf16.msra.mxu0 %v5766_v7  ;;  %4731 = vmatprep.mubr.msk.bf16.mxu0 %vm5153_vm0, %v5152_v0 }
 0x5f2   : > { %4729 = vmatprep.subr.bf16.mxu0 %v5152_v0 }
 0x5f5   : > { %4730 = vmatpush3.bf16.msra.mxu0 %v5772_v1 }
 0x5f6   : > { %4735 = vmatprep.subr.bf16.mxu0 %v5152_v0 }
 0x5fc   : > { %4732 = vmatmul.mubr.msk.bf16.vlgmr.msra.gmra.mrb[36].mxu0 %vm283_vm1, %v4090_v24 }
 0x5fd   : > { %4736 = vmatpush3.bf16.msra.mxu0 %v5780_v45  ;;  %4739 = vmatprep.mubr.msk.bf16.mxu0 %vm5153_vm0, %v5152_v0 }
 0x5fe   : > { %4737 = vmatprep.subr.bf16.mxu0 %v5152_v0 }
 0x601   : > { %4738 = vmatpush3.bf16.msra.mxu0 %v5786_v50 }
 0x602   : > { %4775 = vmatprep.subr.bf16.mxu0 %v5152_v0 }
 0x608   : > { %4740 = vmatmul.mubr.msk.bf16.vlgmr.msra.gmra.mrb[36].mxu0 %vm283_vm1, %v3405_v13 }
 0x609   : > { %4777 = vmatprep.mubr.msk.bf16.mxu0 %vm5153_vm0, %v5152_v0 }
 0x683   : > { %v2731_v14 = vpop.f32.mrb[28].mxu0 }
 0x684   : > { %v2737_v17 = vpack.c.bf16 %v2731_v14, %v2731_v14  ;;  %v4639_v31 = vpop.f32.mrb[29].mxu0 }
 0x685   : > { %v2734_v19 = vpop.f32.mrb[30].mxu0 }
 0x686   : > { %v2740_v20 = vsel %vm5495_vm8, %v2737_v17, %v4053_v16  ;;  %v4640_v22 = vpop.f32.mrb[31].mxu0  ;;  %v4105_v17 = vld [vmem:[%s5493_s4 + $0x18] sm:$0xf] }
 0x687   : > { %4054 = vst [vmem:[%s5493_s4 + $0x10] sm:$0xf] %v2740_v20 }
 0x6af   : > { %v3154_v25 = vpop.f32.mrb[32].mxu0 }
 0x6b0   : > { %v3163_v26 = vmax.f32 %v2958_v54, %v3154_v25  ;;  %v4703_v28 = vpop.f32.mrb[33].mxu0 }
 0x6b1   : > { %v3157_v29 = vpop.f32.mrb[34].mxu0 }
 0x6b2   : > { %v3164_v32 = vmax.f32 %v2961_v57, %v3157_v29  ;;  %v4704_v33 = vpop.f32.mrb[35].mxu0  ;;  %v3167_v34 = vrot.slane %v3163_v26, 1 }
 0x6b4   : > { %v3168_v35 = vrot.slane %v3164_v32, 1 }
 0x6b6   : > { %v3169_v36 = vsel %vm725_vm2, %v3167_v34, %v3168_v35  ;;  %v3173_v37 = vmax.f32 %v3164_v32, %v3168_v35 }
 0x6b7   : > { %v3172_v38 = vmax.f32 %v3163_v26, %v3169_v36 }
 0x6b8   : > { %v3175_v40 = vadd.f32 %v5832_v39, %v3173_v37 }
 0x6b9   : > { %v3174_v41 = vadd.f32 %v5832_v39, %v3172_v38 }
 0x6ba   : > { %v3177_v2 = vmax.f32 %v3175_v40, 0.0 }
 0x6bb   : > { %v3176_v15 = vmax.f32 %v3174_v41, 0.0 }
 0x6bd   : > { %v3178_v42 = vpack.c.bf16 %v3177_v2, %v3176_v15 }
 0x6bf   : > { %v3180_v18 = vand.u32 %v3178_v42, %v5412_v21 }
 0x6c1   : > { %4706 = vmatpush3.bf16.msra.mxu1 %v3180_v18 }
 0x6c2   : > { %4743 = vmatprep.subr.bf16.mxu1 %v5152_v0 }
 0x6c4   : > { %4708 = vmatmul.mubr.msk.bf16.vlgmr.msra.gmra.mrb[32].mxu1 %vm744_vm5, %v5416_v27 }
 0x6c5   : > { %4744 = vmatpush3.bf16.msra.mxu1 %v5697_v47  ;;  %4747 = vmatprep.mubr.msk.bf16.mxu1 %vm5153_vm0, %v5152_v0  ;;  %v4097_v47 = vld [vmem:[%s5286_s23 + $0x70] sm:$0xf] }
 0x6c6   : > { %4745 = vmatprep.subr.bf16.mxu1 %v5152_v0 }
 0x6c9   : > { %4746 = vmatpush3.bf16.msra.mxu1 %v5703_v48  ;;  %v4098_v48 = vld [vmem:[%s5286_s23 + $0x74] sm:$0x7] }
 0x6ca   : > { %4751 = vmatprep.subr.bf16.mxu1 %v5152_v0  ;;  %v4099_v43 = vcombine.low %v4097_v47, %v4098_v48 }
 0x6cc   : > { %4748 = vmatmul.mubr.msk.bf16.vlgmr.msra.gmra.mrb[36].mxu1 %vm283_vm1, %v3405_v13 }
 0x6cd   : > { %4752 = vmatpush3.bf16.msra.mxu1 %v5710_v60  ;;  %4755 = vmatprep.mubr.msk.bf16.mxu1 %vm5153_vm0, %v5152_v0  ;;  %v4101_v60 = vld [vmem:[%s5286_s23 + $0x74] sm:$0xf] }
 0x6ce   : > { %4753 = vmatprep.subr.bf16.mxu1 %v5152_v0 }
 0x6d1   : > { %4754 = vmatpush3.bf16.msra.mxu1 %v5716_v61  ;;  %v4102_v61 = vcombine.low %v4097_v47, %v4101_v60 }
 0x6d2   : > { %4759 = vmatprep.subr.bf16.mxu1 %v5152_v0 }
 0x6d3   : > { %v3598_v44 = vshll.u32 %v4102_v61, 16 }
 0x6d8   : > { %4756 = vmatmul.mubr.msk.bf16.vlgmr.msra.gmra.mrb[36].mxu1 %vm283_vm1, %v4090_v24 }
 0x6d9   : > { %4760 = vmatpush3.bf16.msra.mxu1 %v5766_v7  ;;  %4763 = vmatprep.mubr.msk.bf16.mxu1 %vm5153_vm0, %v5152_v0  ;;  %v3596_v7 = vshrl.u32 %v4102_v61, 16 }
 0x6da   : > { %4761 = vmatprep.subr.bf16.mxu1 %v5152_v0 }
 0x6db   : > { %v3443_v49 = vpop.f32.mrb[36].mxu0 }
 0x6dc   : > { %v4741_v51 = vpop.f32.mrb[37].mxu0 }
 0x6dd   : > { %4762 = vmatpush3.bf16.msra.mxu1 %v5772_v1  ;;  %v3600_v1 = vrot.slane %v3598_v44, 1  ;;  %v3446_v52 = vpop.f32.mrb[38].mxu0 }
 0x6de   : > { %4767 = vmatprep.subr.bf16.mxu1 %v5152_v0  ;;  %v4742_v53 = vpop.f32.mrb[39].mxu0 }
 0x6df   : > { %v3601_v46 = vor.u32 %v3600_v1, %v3596_v7 }
 0x6e4   : > { %4764 = vmatmul.mubr.msk.bf16.vlgmr.msra.gmra.mrb[36].mxu1 %vm283_vm1, %v4099_v43 }
 0x6e5   : > { %4768 = vmatpush3.bf16.msra.mxu1 %v5780_v45  ;;  %4771 = vmatprep.mubr.msk.bf16.mxu1 %vm5153_vm0, %v5152_v0 }
 0x6e6   : > { %4769 = vmatprep.subr.bf16.mxu1 %v5152_v0 }
 0x6e9   : > { %4770 = vmatpush3.bf16.msra.mxu1 %v5786_v50 }
 0x6f0   : > { %4772 = vmatmul.mubr.msk.bf16.vlgmr.msra.gmra.mrb[36].mxu1 %vm283_vm1, %v3601_v46 }
 0x797   : > { %v3216_v54 = vpop.f32.mrb[32].mxu1 }
 0x798   : > { %v3222_v45 = vpack.c.bf16 %v3216_v54, %v3216_v54  ;;  %v4709_v56 = vpop.f32.mrb[33].mxu1 }
 0x799   : > { %v3219_v57 = vpop.f32.mrb[34].mxu1 }
 0x79a   : > { %v3225_v0 = vsel %vm5495_vm8, %v3222_v45, %v4079_v55  ;;  %v4710_v58 = vpop.f32.mrb[35].mxu1 }
 0x79b   : > { %4080 = vst [vmem:[%s5493_s4 + $0x14] sm:$0xf] %v3225_v0 }
 0x7c3   : > { %v3639_v59 = vpop.f32.mrb[36].mxu1 }
 0x7c4   : > { %v3648_v63 = vmax.f32 %v3443_v49, %v3639_v59  ;;  %v4773_v50 = vpop.f32.mrb[37].mxu1 }
 0x7c5   : > { %v3642_v3 = vpop.f32.mrb[38].mxu1 }
 0x7c6   : > { %v3649_v4 = vmax.f32 %v3446_v52, %v3642_v3  ;;  %v4774_v5 = vpop.f32.mrb[39].mxu1  ;;  %v3652_v6 = vrot.slane %v3648_v63, 1 }
 0x7c8   : > { %v3653_v8 = vrot.slane %v3649_v4, 1 }
 0x7ca   : > { %v3654_v23 = vsel %vm725_vm2, %v3652_v6, %v3653_v8  ;;  %v3658_v24 = vmax.f32 %v3649_v4, %v3653_v8 }
 0x7cb   : > { %v3657_v9 = vmax.f32 %v3648_v63, %v3654_v23 }
 0x7cc   : > { %v3660_v10 = vadd.f32 %v5832_v39, %v3658_v24 }
 0x7cd   : > { %v3659_v11 = vadd.f32 %v5832_v39, %v3657_v9 }
 0x7ce   : > { %v3662_v30 = vmax.f32 %v3660_v10, 0.0 }
 0x7cf   : > { %v3661_v12 = vmax.f32 %v3659_v11, 0.0 }
 0x7d1   : > { %v3663_v13 = vpack.c.bf16 %v3662_v30, %v3661_v12 }
 0x7d3   : > { %v3665_v14 = vand.u32 %v3663_v13, %v5412_v21 }
 0x7d5   : > { %4776 = vmatpush3.bf16.msra.mxu0 %v3665_v14 }
 0x7d8   : > { %4778 = vmatmul.mubr.msk.bf16.vlgmr.msra.gmra.mrb[40].mxu0 %vm744_vm5, %v5416_v27 }
 0x8ab   : > { %v3701_v16 = vpop.f32.mrb[40].mxu0 }
 0x8ac   : > { %v3707_v31 = vpack.c.bf16 %v3701_v16, %v3701_v16  ;;  %v4779_v19 = vpop.f32.mrb[41].mxu0 }
 0x8ad   : > { %v3704_v20 = vpop.f32.mrb[42].mxu0 }
 0x8ae   : > { %v3710_v22 = vsel %vm5495_vm8, %v3707_v31, %v4105_v17  ;;  %v4780_v25 = vpop.f32.mrb[43].mxu0 }
 0x8af   : > { %4106 = vst [vmem:[%s5493_s4 + $0x18] sm:$0xf] %v3710_v22 }
 0x8b0 PF: > { %s15_s14 = sadd.s32 1, %s5146_s14   ;;  %s5907_s12 = smov %s5142_s13 }
 0x8b1   : > { %p12_p6 = scmp.ge.s32.totalorder %s15_s14, 4   ;;  %s5908_s13 = smov %s5910_s16 }
 0x8b3   :  { %14 = sbr.rel (!%p12_p6) target bundleno = 3 (0x3), region = 101 }
 0x8ba   :  { %3742 = vsyncpa [#allocation3], 1 }
 0x8bb   :  { %3744 = vsyncpa [#allocation3 + $0x1], 1 }
 0x8bc   :  { %3745 = vsyncpa [#allocation5], 1 }

// kernel: lego_forward.7
= control target key start
LH: loop header
LB: loop body
LE: loop exit
PB: predicated region body
PF: predicated region fallthrough
CT: control target
= control target key end

     0   :  { %8 = vsyncpa [#allocation4], 0  ;;  %s3314_s0 = inlined_call_operand.vmem [shape: bf16[8,4096], index: 0, kind: input, shape index: {}]   ;;  %s3315_s1 = inlined_call_operand.hbm [shape: bf16[4096,384], index: 1, kind: input, shape index: {}]   ;;  %s3316_s2 = inlined_call_operand.hbm [shape: f32[1,384], index: 2, kind: input, shape index: {}]   ;;  %s3317_s3 = inlined_call_operand.vmem [shape: bf16[8,384], index: 3, kind: output, shape index: {}]  }
   0x1   :  { %10 = vsyncpa [#allocation4 + $0x1], 0 }
   0x2   :  { %11 = vsyncpa [#allocation6], 0  ;;  %s2893_s12 = smov 0   ;;  %s2895_s13 = smov 0  }
   0x3   :  { %s2897_s14 = smov 0   ;;  %s2899_s15 = smov 0  }
   0x4   :  { %s2901_s16 = smov 0   ;;  %s2903_s17 = smov 0  }
   0x5 LB: > { %s2109_s18 = sadd.s32 4294967295, %s2866_s17   ;;  %s73_s19 = sadd.s32 1, %s2854_s14  ;;  %s2866_s17 = sphi %s2903_s17, %s17_s17   ;;  %s2862_s16 = sphi %s2901_s16, %s3338_s16   ;;  %s2858_s15 = sphi %s2899_s15, %s3337_s15   ;;  %s2854_s14 = sphi %s2897_s14, %s3336_s14   ;;  %s2850_s13 = sphi %s2895_s13, %s3335_s13   ;;  %s2846_s12 = sphi %s2893_s12, %s3334_s12  }
   0x6   : > { %p80_p0 = scmp.ne.s32.totalorder %s2854_s14, %s2850_s13  ;;  %p81_p1 = scmp.eq.s32.totalorder %s2866_s17, 0 }
   0x7   : > { %p86_p2 = scmp.ne.s32.totalorder %s2850_s13, %s2846_s12  ;;  %p2927_p3 = scmp.eq.s32.totalorder %s2109_s18, 0 }
   0x8   : > { %p82_p4 = por %p81_p1, %p80_p0  ;;  %p2110_p5 = scmp.ge.s32.totalorder %s2866_s17, 1 }
   0x9   : > { %s3323_s20 = scalar_select %p2927_p3, 1, 0 }
   0xa   : > { %p2934_p6 = por %p2927_p3, %p86_p2  ;;  %p151_p7 = scmp.lt.s32.totalorder %s2866_s17, 5 }
   0xb   : > { %s2868_s23 = smov [#allocation5]   ;;  %p2436_p10 = scmp.lt.s32.totalorder %s2866_s17, 4 }
   0xc   : > { %s3324_s21 = scalar_select %p2934_p6, 1, 0 }
   0xd   : > { %p2939_p8 = pnand %p2110_p5, %p151_p7  ;;  %s167_s24 = sshll.u32 %s2868_s23, 4  ;;  %s168_s24 = int_to_ptr.vmem [resolvable:$true] %s167_s24 }
   0xe   : > { %s191_s25 = sand.u32 1, %s2854_s14   ;;  %p2953_p12 = pnand %p2436_p10, %p82_p4 }
   0xf   : > { %s3325_s22 = scalar_select %p2939_p8, 1, 0 }
  0x10   : > { %p2427_p9 = pneg %p2939_p8  ;;  %s2754_s30 = scalar_lea.hbm %s3316_s2, 48 }
  0x11   : > { %s3327_s27 = scalar_select %p2953_p12, 1, 0 }
  0x12   : > { %p2949_p11 = pnand %p2427_p9, %p2927_p3  ;;  %p2755_p13 = scmp.ne.s32.totalorder %s3316_s2, %s2754_s30 }
  0x13   : > { %p2761_p5 = scmp.lt.u32.totalorder %s2754_s30, %s3316_s2 }
  0x14   : > { %p2756_p0 = pneg %p2949_p11 }
  0x16   : > { %p2757_p1 = pnand %p2756_p0, %p2755_p13 }
  0x18   : > { %p2758_p2 = pneg %p2757_p1 }
  0x1a   : > { %p2763_p4 = pnand %p2761_p5, %p2758_p2 }
  0x1c   : > { %2766 = shalt.err (!%p2763_p4)
}
  0x1d   : > { %s2767_s8 = scalar_lea.vmem %s168_s24, 48  ;;  %s2774_s9 = scalar_lea.vmem %s168_s24, 64 }
  0x1e   : > { %p2768_p7 = scmp.ne.s32.totalorder %s168_s24, %s2767_s8  ;;  %p2775_p3 = scmp.lt.s32.totalorder %s168_s24, %s168_s24 }
  0x1f   : > { %p2776_p6 = scmp.lt.s32.totalorder %s2774_s9, %s2767_s8 }
  0x20   : > { %p2770_p9 = pnand %p2768_p7, %p2756_p0 }
  0x21   : > { %p2777_p8 = por %p2776_p6, %p2775_p3 }
  0x22   : > { %p2771_p10 = pneg %p2770_p9 }
  0x24   : > { %p2778_p12 = pnand %p2777_p8, %p2771_p10 }
  0x26   : > { %2781 = shalt.err (!%p2778_p12)
}
  0x27   : > { %2430 = dma.hbm_to_vmem [thread:$0]  (!%p2949_p11), %s3316_s2, 48, %s168_s24, [#allocation6]  }
  0x28   : > { %s29_s12 = sadd.s32 1, %s2862_s16  ;;  %s2418_s18 = smul.u32 1536, %s191_s25 }
  0x29   : > { %p30_p13 = scmp.ge.s32.totalorder %s29_s12, 4  ;;  %s2419_s23 = smul.u32 24576, %s2862_s16 }
  0x2a   : > { %s195_s30 = scalar_lea.vmem [#allocation3], %s2418_s18  ;;  %s2994_s6 = scalar_lea.sflag [#allocation4], %s191_s25 }
  0x2b   : > { %s3340_s12 = smov (%p30_p13, %s29_s12), 0  ;;  %s2982_s29 = scalar_lea.hbm %s3315_s1, %s2419_s23 }
  0x2c   : > { %s205_s24 = sshll.u32 %s195_s30, 4  ;;  %s68_s4 = ssub.s32 %s2862_s16, %s3340_s12  ;;  %s2986_s24 = int_to_ptr.vmem [resolvable:$true] %s205_s24 }
  0x2d   : > { %p2988_p3 = scmp.eq.s32.totalorder %s68_s4, 0  ;;  %s2782_s7 = scalar_lea.hbm %s2982_s29, 24576 }
  0x2e   : > { %p2783_p6 = scmp.ne.s32.totalorder %s2982_s29, %s2782_s7  ;;  %p3329_p8 = scmp.ne.s32.totalorder %s3327_s27, 0 }
  0x2f   : > { %s2787_s10 = scalar_lea.hbm %s3315_s1, 98304  ;;  %p2788_p1 = scmp.lt.u32.totalorder %s2982_s29, %s3315_s1 }
  0x30   : > { %p2784_p11 = pneg %p3329_p8  ;;  %p2789_p2 = scmp.lt.u32.totalorder %s2787_s10, %s2782_s7 }
  0x31   : > { %p2791_p4 = scmp.lt.u32.totalorder %s2782_s7, %s2982_s29 }
  0x32   : > { %p2785_p12 = pnand %p2784_p11, %p2783_p6  ;;  %p2790_p5 = por %p2789_p2, %p2788_p1 }
  0x34   : > { %p2786_p0 = pneg %p2785_p12  ;;  %p2792_p7 = por %p2791_p4, %p2790_p5 }
  0x36   : > { %p2793_p9 = pnand %p2792_p7, %p2786_p0 }
  0x38   : > { %2796 = shalt.err (!%p2793_p9)
}
  0x39   : > { %s2797_s25 = scalar_lea.vmem %s2986_s24, 24576  ;;  %s2869_s23 = smov [#allocation3]  }
  0x3a   : > { %p2798_p10 = scmp.ne.s32.totalorder %s2986_s24, %s2797_s25  ;;  %s2802_s28 = sshll.u32 %s2869_s23, 4  ;;  %s2803_s28 = int_to_ptr.vmem [resolvable:$false] %s2802_s28 }
  0x3b   : > { %s2804_s26 = scalar_lea.vmem %s2803_s28, 49152  ;;  %p2805_p12 = scmp.lt.s32.totalorder %s2986_s24, %s2803_s28 }
  0x3c   : > { %p2800_p13 = pnand %p2798_p10, %p2784_p11  ;;  %p2806_p1 = scmp.lt.s32.totalorder %s2804_s26, %s2797_s25 }
  0x3e   : > { %p2801_p6 = pneg %p2800_p13  ;;  %p2807_p2 = por %p2806_p1, %p2805_p12 }
  0x40   : > { %p2808_p5 = pnand %p2807_p2, %p2801_p6 }
  0x42   : > { %2811 = shalt.err (!%p2808_p5)
}
  0x43   : > { %s2870_s30 = smov 192   ;;  %s2871_s4 = smov 12  }
  0x44   : > { %2434 = dma.hbm_to_vmem [thread:$0]  (!%p3329_p8), %s2982_s29, 24576, %s2986_s24, %s2994_s6, %s2870_s30, %s2870_s30, %s2871_s4  }
  0x45   : > { %s3027_s7 = scalar_select %p2988_p3, %s2854_s14, %s73_s19  }
  0x46   : > { %p3330_p11 = scmp.ne.s32.totalorder %s3325_s22, 0 }
  0x47   : > { %s219_s8 = sand.u32 (!%p3330_p11), 1, %s2850_s13   ;;  %p3331_p0 = scmp.ne.s32.totalorder (!%p3330_p11), %s3324_s21, 0 }
  0x48   : > { %217 = sbr.rel (%p3330_p11) target bundleno = 521 (0x209), region = 32  ;;  %s220_s10 = scalar_lea.sflag (!%p3330_p11), [#allocation4], %s219_s8 }
  0x49   : > { %s2420_s9 = smul.u32 (!%p3330_p11), 1536, %s219_s8 }
  0x4b   : > { %s3032_s11 = scalar_lea.vmem (!%p3330_p11), [#allocation3], %s2420_s9 }
  0x4f   : > { %2837 = dma.done.wait (%p3331_p0), %s220_s10, 24576  }
  0x50   : > { %2839 = vsyncadd (%p3331_p0), %s220_s10, 4294942720  ;;  %p3332_p8 = scmp.ne.s32.totalorder %s3323_s20, 0 }
  0x52   : > { %2841 = dma.done.wait (%p3332_p8), [#allocation6], 48  }
  0x53   : > { %2843 = vsyncadd (%p3332_p8), [#allocation6], 4294967248  ;;  %s2118_s19 = sshll.u32 %s2858_s15, 3  ;;  %p2120_p4 = scmp.ne.s32.totalorder %s2858_s15, 0 }
  0x54   : > { %p266_p3 = scmp.lt.s32.totalorder %s2118_s19, 31  ;;  %v2872_v0 = vmov (!%p2120_p4), 0.0  }
  0x55   : > { %290 = sbr.rel (%p2120_p4) target bundleno = 92 (0x5c), region = 44  ;;  %291 = vst [vmem:[#allocation2] sm:$0xff] (!%p2120_p4), %v2872_v0  ;;  %292 = vst [vmem:[#allocation2 + $0x8] sm:$0xff] (!%p2120_p4), %v2872_v0 }
  0x56   : > { %s3342_s19 = smov (!%p266_p3, %s2118_s19), 31  ;;  %293 = vst [vmem:[#allocation2 + $0x10] sm:$0xff] (!%p2120_p4), %v2872_v0 }
  0x57   : > { %s2119_s22 = sshll.u32 %s3342_s19, 2 }
  0x58   : > { %s3046_s24 = scalar_lea.vmem %s3314_s0, %s2119_s22 }
  0x5c PF: > { %v2490_v1 = vld [vmem:[%s3032_s11 + $0x4] ss:$12 sps:$4 sm:$0xff]   ;;  %v2494_v3 = vld [vmem:[%s3032_s11] ss:$12 sps:$4 sm:$0xff]   ;;  %v2496_v5 = vld [vmem:[%s3032_s11 + $0x1c] ss:$12 sps:$4 sm:$0xff]  }
  0x5d   : > { %v2492_v2 = vld [vmem:[%s3032_s11 + $0x184] ss:$12 sps:$4 sm:$0xff]   ;;  %1609 = vmatprep.subr.bf16.mxu0 %v2490_v1  ;;  %v2495_v4 = vld [vmem:[%s3032_s11 + $0x180] ss:$12 sps:$4 sm:$0xff]   ;;  %v2498_v6 = vld [vmem:[%s3032_s11 + $0x19c] ss:$12 sps:$4 sm:$0xff]  }
  0x5e   : > { %1650 = vmatprep.subr.bf16.mxu1 %v2492_v2  ;;  %1610 = vmatpush1.bf16.msra.mxu0 %v2494_v3  ;;  %v2500_v7 = vld [vmem:[%s3032_s11 + $0x18] ss:$12 sps:$4 sm:$0xff]   ;;  %v2502_v9 = vld [vmem:[%s3032_s11 + $0x34] ss:$12 sps:$4 sm:$0xff]   ;;  %v2506_v11 = vld [vmem:[%s3032_s11 + $0x30] ss:$12 sps:$4 sm:$0xff]  }
  0x5f   : > { %1651 = vmatpush1.bf16.msra.mxu1 %v2495_v4  ;;  %1611 = vmatprep.subr.bf16.mxu0 %v2496_v5  ;;  %v2501_v8 = vld [vmem:[%s3032_s11 + $0x198] ss:$12 sps:$4 sm:$0xff]   ;;  %v2504_v10 = vld [vmem:[%s3032_s11 + $0x1b4] ss:$12 sps:$4 sm:$0xff]   ;;  %v2507_v12 = vld [vmem:[%s3032_s11 + $0x1b0] ss:$12 sps:$4 sm:$0xff]  }
  0x60   : > { %1652 = vmatprep.subr.bf16.mxu1 %v2498_v6  ;;  %v2508_v13 = vld [vmem:[%s3032_s11 + $0x4c] ss:$12 sps:$4 sm:$0xff]   ;;  %v2512_v15 = vld [vmem:[%s3032_s11 + $0x48] ss:$12 sps:$4 sm:$0xff]   ;;  %v2514_v17 = vld [vmem:[%s3032_s11 + $0x64] ss:$12 sps:$4 sm:$0xff]  }
  0x61   : > { %v2510_v14 = vld [vmem:[%s3032_s11 + $0x1cc] ss:$12 sps:$4 sm:$0xff]   ;;  %v2513_v16 = vld [vmem:[%s3032_s11 + $0x1c8] ss:$12 sps:$4 sm:$0xff]   ;;  %v2516_v18 = vld [vmem:[%s3032_s11 + $0x1e4] ss:$12 sps:$4 sm:$0xff]  }
  0x62   : > { %1612 = vmatpush1.bf16.msra.mxu0 %v2500_v7  ;;  %v2518_v19 = vld [vmem:[%s3032_s11 + $0x60] ss:$12 sps:$4 sm:$0xff]   ;;  %v2520_v21 = vld [vmem:[%s3032_s11 + $0x7c] ss:$12 sps:$4 sm:$0xff]   ;;  %v2524_v23 = vld [vmem:[%s3032_s11 + $0x78] ss:$12 sps:$4 sm:$0xff]  }
  0x63   : > { %1653 = vmatpush1.bf16.msra.mxu1 %v2501_v8  ;;  %1613 = vmatprep.subr.bf16.mxu0 %v2502_v9  ;;  %v2519_v20 = vld [vmem:[%s3032_s11 + $0x1e0] ss:$12 sps:$4 sm:$0xff]   ;;  %v2522_v22 = vld [vmem:[%s3032_s11 + $0x1fc] ss:$12 sps:$4 sm:$0xff]   ;;  %v2525_v24 = vld [vmem:[%s3032_s11 + $0x1f8] ss:$12 sps:$4 sm:$0xff]  }
  0x64   : > { %1654 = vmatprep.subr.bf16.mxu1 %v2504_v10  ;;  %v2526_v25 = vld [vmem:[%s3032_s11 + $0x94] ss:$12 sps:$4 sm:$0xff]   ;;  %v2530_v27 = vld [vmem:[%s3032_s11 + $0x90] ss:$12 sps:$4 sm:$0xff]   ;;  %v2532_v29 = vld [vmem:[%s3032_s11 + $0xac] ss:$12 sps:$4 sm:$0xff]  }
  0x65   : > { %v2528_v26 = vld [vmem:[%s3032_s11 + $0x214] ss:$12 sps:$4 sm:$0xff]   ;;  %v2531_v28 = vld [vmem:[%s3032_s11 + $0x210] ss:$12 sps:$4 sm:$0xff]   ;;  %v2534_v30 = vld [vmem:[%s3032_s11 + $0x22c] ss:$12 sps:$4 sm:$0xff]  }
  0x66   : > { %1614 = vmatpush1.bf16.msra.mxu0 %v2506_v11  ;;  %v2536_v31 = vld [vmem:[%s3032_s11 + $0xa8] ss:$12 sps:$4 sm:$0xff]   ;;  %v2538_v33 = vld [vmem:[%s3032_s11 + $0xc4] ss:$12 sps:$4 sm:$0xff]   ;;  %v2542_v35 = vld [vmem:[%s3032_s11 + $0xc0] ss:$12 sps:$4 sm:$0xff]  }
  0x67   : > { %1655 = vmatpush1.bf16.msra.mxu1 %v2507_v12  ;;  %1615 = vmatprep.subr.bf16.mxu0 %v2508_v13  ;;  %v2537_v32 = vld [vmem:[%s3032_s11 + $0x228] ss:$12 sps:$4 sm:$0xff]   ;;  %v2540_v34 = vld [vmem:[%s3032_s11 + $0x244] ss:$12 sps:$4 sm:$0xff]   ;;  %v2543_v36 = vld [vmem:[%s3032_s11 + $0x240] ss:$12 sps:$4 sm:$0xff]  }
  0x68   : > { %1656 = vmatprep.subr.bf16.mxu1 %v2510_v14  ;;  %v2544_v37 = vld [vmem:[%s3032_s11 + $0xdc] ss:$12 sps:$4 sm:$0xff]   ;;  %v2548_v39 = vld [vmem:[%s3032_s11 + $0xd8] ss:$12 sps:$4 sm:$0xff]   ;;  %v2550_v41 = vld [vmem:[%s3032_s11 + $0xf4] ss:$12 sps:$4 sm:$0xff]  }
  0x69   : > { %v2546_v38 = vld [vmem:[%s3032_s11 + $0x25c] ss:$12 sps:$4 sm:$0xff]   ;;  %v2549_v40 = vld [vmem:[%s3032_s11 + $0x258] ss:$12 sps:$4 sm:$0xff]   ;;  %v2552_v42 = vld [vmem:[%s3032_s11 + $0x274] ss:$12 sps:$4 sm:$0xff]  }
  0x6a   : > { %1616 = vmatpush1.bf16.msra.mxu0 %v2512_v15  ;;  %v2554_v43 = vld [vmem:[%s3032_s11 + $0xf0] ss:$12 sps:$4 sm:$0xff]   ;;  %v2556_v45 = vld [vmem:[%s3032_s11 + $0x10c] ss:$12 sps:$4 sm:$0xff]   ;;  %v2560_v50 = vld [vmem:[%s3032_s11 + $0x108] ss:$12 sps:$4 sm:$0xff]  }
  0x6b   : > { %1657 = vmatpush1.bf16.msra.mxu1 %v2513_v16  ;;  %1617 = vmatprep.subr.bf16.mxu0 %v2514_v17  ;;  %v2555_v44 = vld [vmem:[%s3032_s11 + $0x270] ss:$12 sps:$4 sm:$0xff]   ;;  %v2558_v46 = vld [vmem:[%s3032_s11 + $0x28c] ss:$12 sps:$4 sm:$0xff]   ;;  %v2561_v51 = vld [vmem:[%s3032_s11 + $0x288] ss:$12 sps:$4 sm:$0xff]  }
  0x6c   : > { %1658 = vmatprep.subr.bf16.mxu1 %v2516_v18  ;;  %v297_v47 = vld [vmem:[%s3046_s24] sm:$0xff]  ;;  %v298_v49 = vld [vmem:[%s3046_s24 + $0x8] sm:$0xff]  ;;  %v2572_v59 = vld [vmem:[%s3032_s11 + $0x138] ss:$12 sps:$4 sm:$0xff]   ;;  %p2321_p7 = scmp.ne.s32.totalorder %s2858_s15, 3 }
  0x6d   : > { %v3096_v48 = vcombine.high %v297_v47, %v297_v47  ;;  %v3101_v52 = vcombine.high %v298_v49, %v298_v49  ;;  %v2562_v53 = vld [vmem:[%s3032_s11 + $0x124] ss:$12 sps:$4 sm:$0xff]   ;;  %v2566_v55 = vld [vmem:[%s3032_s11 + $0x120] ss:$12 sps:$4 sm:$0xff]   ;;  %v2568_v57 = vld [vmem:[%s3032_s11 + $0x13c] ss:$12 sps:$4 sm:$0xff]   ;;  %v3123_v7 = vcombine.low %v297_v47, %v297_v47  ;;  %v3125_v8 = vcombine.low %v298_v49, %v298_v49 }
  0x6e   : > { %1618 = vmatpush1.bf16.msra.mxu0 %v2518_v19  ;;  %v2564_v54 = vld [vmem:[%s3032_s11 + $0x2a4] ss:$12 sps:$4 sm:$0xff]   ;;  %v2567_v56 = vld [vmem:[%s3032_s11 + $0x2a0] ss:$12 sps:$4 sm:$0xff]   ;;  %v2570_v58 = vld [vmem:[%s3032_s11 + $0x2bc] ss:$12 sps:$4 sm:$0xff]  }
  0x6f   : > { %1659 = vmatpush1.bf16.msra.mxu1 %v2519_v20  ;;  %1619 = vmatprep.subr.bf16.mxu0 %v2520_v21  ;;  %v2573_v60 = vld [vmem:[%s3032_s11 + $0x2b8] ss:$12 sps:$4 sm:$0xff]   ;;  %v2574_v61 = vld [vmem:[%s3032_s11 + $0x154] ss:$12 sps:$4 sm:$0xff]   ;;  %v2578_v63 = vld [vmem:[%s3032_s11 + $0x150] ss:$12 sps:$4 sm:$0xff]  }
  0x70   : > { %1660 = vmatprep.subr.bf16.mxu1 %v2522_v22  ;;  %1641 = vmatprep.mubr.bf16.mxu0 %v3096_v48  ;;  %v2576_v62 = vld [vmem:[%s3032_s11 + $0x2d4] ss:$12 sps:$4 sm:$0xff]   ;;  %v2579_v0 = vld [vmem:[%s3032_s11 + $0x2d0] ss:$12 sps:$4 sm:$0xff]   ;;  %v2580_v1 = vld [vmem:[%s3032_s11 + $0x16c] ss:$12 sps:$4 sm:$0xff]  }
  0x71   : > { %1682 = vmatprep.mubr.bf16.mxu1 %v3101_v52  ;;  %v2582_v2 = vld [vmem:[%s3032_s11 + $0x2ec] ss:$12 sps:$4 sm:$0xff]   ;;  %v2584_v3 = vld [vmem:[%s3032_s11 + $0x168] ss:$12 sps:$4 sm:$0xff]   ;;  %v2592_v5 = vld [vmem:[%s3032_s11 + $0x304] ss:$12 sps:$4 sm:$0xff]  }
  0x72   : > { %1620 = vmatpush1.bf16.msra.mxu0 %v2524_v23  ;;  %v2585_v4 = vld [vmem:[%s3032_s11 + $0x2e8] ss:$12 sps:$4 sm:$0xff]   ;;  %v2595_v6 = vld [vmem:[%s3032_s11 + $0x484] ss:$12 sps:$4 sm:$0xff]   ;;  %v2590_v9 = vld [vmem:[%s3032_s11 + $0x300] ss:$12 sps:$4 sm:$0xff]  }
  0x73   : > { %1661 = vmatpush1.bf16.msra.mxu1 %v2525_v24  ;;  %1621 = vmatprep.subr.bf16.mxu0 %v2526_v25  ;;  %v2593_v10 = vld [vmem:[%s3032_s11 + $0x480] ss:$12 sps:$4 sm:$0xff]   ;;  %v2598_v11 = vld [vmem:[%s3032_s11 + $0x31c] ss:$12 sps:$4 sm:$0xff]   ;;  %v2596_v13 = vld [vmem:[%s3032_s11 + $0x318] ss:$12 sps:$4 sm:$0xff]  }
  0x74   : > { %1662 = vmatprep.subr.bf16.mxu1 %v2528_v26  ;;  %v2601_v12 = vld [vmem:[%s3032_s11 + $0x49c] ss:$12 sps:$4 sm:$0xff]   ;;  %v2599_v14 = vld [vmem:[%s3032_s11 + $0x498] ss:$12 sps:$4 sm:$0xff]   ;;  %v2604_v15 = vld [vmem:[%s3032_s11 + $0x334] ss:$12 sps:$4 sm:$0xff]  }
  0x75   : > { %v2607_v16 = vld [vmem:[%s3032_s11 + $0x4b4] ss:$12 sps:$4 sm:$0xff]   ;;  %v2602_v17 = vld [vmem:[%s3032_s11 + $0x330] ss:$12 sps:$4 sm:$0xff]   ;;  %v2610_v19 = vld [vmem:[%s3032_s11 + $0x34c] ss:$12 sps:$4 sm:$0xff]  }
  0x76   : > { %1622 = vmatpush1.bf16.msra.mxu0 %v2530_v27  ;;  %v2605_v18 = vld [vmem:[%s3032_s11 + $0x4b0] ss:$12 sps:$4 sm:$0xff]   ;;  %v2613_v20 = vld [vmem:[%s3032_s11 + $0x4cc] ss:$12 sps:$4 sm:$0xff]   ;;  %v2608_v21 = vld [vmem:[%s3032_s11 + $0x348] ss:$12 sps:$4 sm:$0xff]  }
  0x77   : > { %1663 = vmatpush1.bf16.msra.mxu1 %v2531_v28  ;;  %1623 = vmatprep.subr.bf16.mxu0 %v2532_v29  ;;  %v2611_v22 = vld [vmem:[%s3032_s11 + $0x4c8] ss:$12 sps:$4 sm:$0xff]   ;;  %v2616_v23 = vld [vmem:[%s3032_s11 + $0x364] ss:$12 sps:$4 sm:$0xff]   ;;  %v2614_v25 = vld [vmem:[%s3032_s11 + $0x360] ss:$12 sps:$4 sm:$0xff]  }
  0x78   : > { %1664 = vmatprep.subr.bf16.mxu1 %v2534_v30  ;;  %v2619_v24 = vld [vmem:[%s3032_s11 + $0x4e4] ss:$12 sps:$4 sm:$0xff]   ;;  %v2617_v26 = vld [vmem:[%s3032_s11 + $0x4e0] ss:$12 sps:$4 sm:$0xff]   ;;  %v2622_v27 = vld [vmem:[%s3032_s11 + $0x37c] ss:$12 sps:$4 sm:$0xff]  }
  0x79   : > { %v2625_v28 = vld [vmem:[%s3032_s11 + $0x4fc] ss:$12 sps:$4 sm:$0xff]   ;;  %v2620_v29 = vld [vmem:[%s3032_s11 + $0x378] ss:$12 sps:$4 sm:$0xff]  }
  0x7a   : > { %1624 = vmatpush1.bf16.msra.mxu0 %v2536_v31  ;;  %v2623_v30 = vld [vmem:[%s3032_s11 + $0x4f8] ss:$12 sps:$4 sm:$0xff]   ;;  %v2628_v31 = vld [vmem:[%s3032_s11 + $0x394] ss:$12 sps:$4 sm:$0xff]   ;;  %v2646_v47 = vld [vmem:[%s3032_s11 + $0x3dc] ss:$12 sps:$4 sm:$0xff]  }
  0x7b   : > { %1665 = vmatpush1.bf16.msra.mxu1 %v2537_v32  ;;  %1625 = vmatprep.subr.bf16.mxu0 %v2538_v33  ;;  %v2631_v32 = vld [vmem:[%s3032_s11 + $0x514] ss:$12 sps:$4 sm:$0xff]   ;;  %v2626_v33 = vld [vmem:[%s3032_s11 + $0x390] ss:$12 sps:$4 sm:$0xff]  }
  0x7c   : > { %1666 = vmatprep.subr.bf16.mxu1 %v2540_v34  ;;  %v3155_v34 = vld [vmem:[%s3046_s24 + $0x10] sm:$0xff] }
  0x7d   : > { %v2649_v49 = vld [vmem:[%s3032_s11 + $0x55c] ss:$12 sps:$4 sm:$0xff]  }
  0x7e   : > { %1626 = vmatpush1.bf16.msra.mxu0 %v2542_v35  ;;  %v3158_v35 = vld [vmem:[%s3046_s24 + $0x18] sm:$0xff] }
  0x7f   : > { %1667 = vmatpush1.bf16.msra.mxu1 %v2543_v36  ;;  %1627 = vmatprep.subr.bf16.mxu0 %v2544_v37  ;;  %v2629_v36 = vld [vmem:[%s3032_s11 + $0x510] ss:$12 sps:$4 sm:$0xff]   ;;  %v3163_v37 = vcombine.high %v3155_v34, %v3155_v34 }
  0x80   : > { %1668 = vmatprep.subr.bf16.mxu1 %v2546_v38  ;;  %v3167_v38 = vcombine.high %v3158_v35, %v3158_v35 }
  0x82   : > { %1628 = vmatpush1.bf16.msra.mxu0 %v2548_v39  ;;  %v2634_v39 = vld [vmem:[%s3032_s11 + $0x3ac] ss:$12 sps:$4 sm:$0xff]  }
  0x83   : > { %1669 = vmatpush1.bf16.msra.mxu1 %v2549_v40  ;;  %1629 = vmatprep.subr.bf16.mxu0 %v2550_v41  ;;  %v2637_v40 = vld [vmem:[%s3032_s11 + $0x52c] ss:$12 sps:$4 sm:$0xff]   ;;  %v2632_v41 = vld [vmem:[%s3032_s11 + $0x3a8] ss:$12 sps:$4 sm:$0xff]  }
  0x84   : > { %1670 = vmatprep.subr.bf16.mxu1 %v2552_v42  ;;  %v2635_v42 = vld [vmem:[%s3032_s11 + $0x528] ss:$12 sps:$4 sm:$0xff]  }
  0x86   : > { %1630 = vmatpush1.bf16.msra.mxu0 %v2554_v43  ;;  %v2640_v43 = vld [vmem:[%s3032_s11 + $0x3c4] ss:$12 sps:$4 sm:$0xff]  }
  0x87   : > { %1671 = vmatpush1.bf16.msra.mxu1 %v2555_v44  ;;  %1631 = vmatprep.subr.bf16.mxu0 %v2556_v45  ;;  %v2643_v44 = vld [vmem:[%s3032_s11 + $0x544] ss:$12 sps:$4 sm:$0xff]   ;;  %v2638_v45 = vld [vmem:[%s3032_s11 + $0x3c0] ss:$12 sps:$4 sm:$0xff]  }
  0x88   : > { %1672 = vmatprep.subr.bf16.mxu1 %v2558_v46  ;;  %v2641_v46 = vld [vmem:[%s3032_s11 + $0x540] ss:$12 sps:$4 sm:$0xff]  }
  0x8a   : > { %1632 = vmatpush1.bf16.msra.mxu0 %v2560_v50  ;;  %v2644_v50 = vld [vmem:[%s3032_s11 + $0x3d8] ss:$12 sps:$4 sm:$0xff]  }
  0x8b   : > { %1673 = vmatpush1.bf16.msra.mxu1 %v2561_v51  ;;  %1633 = vmatprep.subr.bf16.mxu0 %v2562_v53  ;;  %v2647_v51 = vld [vmem:[%s3032_s11 + $0x558] ss:$12 sps:$4 sm:$0xff]   ;;  %v2652_v53 = vld [vmem:[%s3032_s11 + $0x3f4] ss:$12 sps:$4 sm:$0xff]  }
  0x8c   : > { %1674 = vmatprep.subr.bf16.mxu1 %v2564_v54  ;;  %v2655_v54 = vld [vmem:[%s3032_s11 + $0x574] ss:$12 sps:$4 sm:$0xff]  }
  0x8e   : > { %1634 = vmatpush1.bf16.msra.mxu0 %v2566_v55  ;;  %v2650_v55 = vld [vmem:[%s3032_s11 + $0x3f0] ss:$12 sps:$4 sm:$0xff]  }
  0x8f   : > { %1675 = vmatpush1.bf16.msra.mxu1 %v2567_v56  ;;  %1635 = vmatprep.subr.bf16.mxu0 %v2568_v57  ;;  %v2653_v56 = vld [vmem:[%s3032_s11 + $0x570] ss:$12 sps:$4 sm:$0xff]   ;;  %v2658_v57 = vld [vmem:[%s3032_s11 + $0x40c] ss:$12 sps:$4 sm:$0xff]  }
  0x90   : > { %1676 = vmatprep.subr.bf16.mxu1 %v2570_v58  ;;  %v2661_v58 = vld [vmem:[%s3032_s11 + $0x58c] ss:$12 sps:$4 sm:$0xff]  }
  0x92   : > { %1636 = vmatpush1.bf16.msra.mxu0 %v2572_v59  ;;  %v2656_v59 = vld [vmem:[%s3032_s11 + $0x408] ss:$12 sps:$4 sm:$0xff]  }
  0x93   : > { %1677 = vmatpush1.bf16.msra.mxu1 %v2573_v60  ;;  %1637 = vmatprep.subr.bf16.mxu0 %v2574_v61  ;;  %v2659_v60 = vld [vmem:[%s3032_s11 + $0x588] ss:$12 sps:$4 sm:$0xff]   ;;  %v2664_v61 = vld [vmem:[%s3032_s11 + $0x424] ss:$12 sps:$4 sm:$0xff]  }
  0x94   : > { %1678 = vmatprep.subr.bf16.mxu1 %v2576_v62  ;;  %v2667_v62 = vld [vmem:[%s3032_s11 + $0x5a4] ss:$12 sps:$4 sm:$0xff]  }
  0x96   : > { %1638 = vmatpush1.bf16.msra.mxu0 %v2578_v63  ;;  %v2662_v63 = vld [vmem:[%s3032_s11 + $0x420] ss:$12 sps:$4 sm:$0xff]  }
  0x97   : > { %1679 = vmatpush1.bf16.msra.mxu1 %v2579_v0  ;;  %1639 = vmatprep.subr.bf16.mxu0 %v2580_v1  ;;  %v2665_v0 = vld [vmem:[%s3032_s11 + $0x5a0] ss:$12 sps:$4 sm:$0xff]   ;;  %v2670_v1 = vld [vmem:[%s3032_s11 + $0x43c] ss:$12 sps:$4 sm:$0xff]  }
  0x98   : > { %1680 = vmatprep.subr.bf16.mxu1 %v2582_v2  ;;  %v2673_v2 = vld [vmem:[%s3032_s11 + $0x5bc] ss:$12 sps:$4 sm:$0xff]  }
  0x9a   : > { %1640 = vmatpush1.bf16.msra.mxu0 %v2584_v3  ;;  %v2668_v3 = vld [vmem:[%s3032_s11 + $0x438] ss:$12 sps:$4 sm:$0xff]  }
  0x9b   : > { %1681 = vmatpush1.bf16.msra.mxu1 %v2585_v4  ;;  %1691 = vmatprep.subr.bf16.mxu0 %v2592_v5  ;;  %v2671_v4 = vld [vmem:[%s3032_s11 + $0x5b8] ss:$12 sps:$4 sm:$0xff]   ;;  %v2676_v5 = vld [vmem:[%s3032_s11 + $0x454] ss:$12 sps:$4 sm:$0xff]  }
  0x9c   : > { %1732 = vmatprep.subr.bf16.mxu1 %v2595_v6  ;;  %v2679_v6 = vld [vmem:[%s3032_s11 + $0x5d4] ss:$12 sps:$4 sm:$0xff]  }
  0x9d   : > { %1642 = vmatmul.mubr.bf16.vlgmr.msra.gmra.mrb[0].mxu0 %v3123_v7 }
  0x9e   : > { %1683 = vmatmul.mubr.bf16.vlgmr.msra.gmra.mrb[0].mxu1 %v3125_v8  ;;  %1692 = vmatpush1.bf16.msra.mxu0 %v2590_v9  ;;  %v2674_v9 = vld [vmem:[%s3032_s11 + $0x450] ss:$12 sps:$4 sm:$0xff]  }
  0x9f   : > { %1733 = vmatpush1.bf16.msra.mxu1 %v2593_v10  ;;  %1693 = vmatprep.subr.bf16.mxu0 %v2598_v11  ;;  %v2677_v10 = vld [vmem:[%s3032_s11 + $0x5d0] ss:$12 sps:$4 sm:$0xff]   ;;  %v2682_v11 = vld [vmem:[%s3032_s11 + $0x46c] ss:$12 sps:$4 sm:$0xff]  }
  0xa0   : > { %1734 = vmatprep.subr.bf16.mxu1 %v2601_v12  ;;  %1723 = vmatprep.mubr.bf16.mxu0 %v3163_v37  ;;  %v2685_v12 = vld [vmem:[%s3032_s11 + $0x5ec] ss:$12 sps:$4 sm:$0xff]  }
  0xa1   : > { %1764 = vmatprep.mubr.bf16.mxu1 %v3167_v38 }
  0xa2   : > { %1694 = vmatpush1.bf16.msra.mxu0 %v2596_v13  ;;  %v2680_v13 = vld [vmem:[%s3032_s11 + $0x468] ss:$12 sps:$4 sm:$0xff]  }
  0xa3   : > { %1735 = vmatpush1.bf16.msra.mxu1 %v2599_v14  ;;  %1695 = vmatprep.subr.bf16.mxu0 %v2604_v15  ;;  %v2683_v14 = vld [vmem:[%s3032_s11 + $0x5e8] ss:$12 sps:$4 sm:$0xff]  }
  0xa4   : > { %1736 = vmatprep.subr.bf16.mxu1 %v2607_v16  ;;  %v2690_v15 = vld [vmem:[%s3032_s11 + $0xc8] ss:$12 sps:$4 sm:$0xff]  }
  0xa5   : > { %v2691_v16 = vld [vmem:[%s3032_s11 + $0x248] ss:$12 sps:$4 sm:$0xff]  }
  0xa6   : > { %1696 = vmatpush1.bf16.msra.mxu0 %v2602_v17  ;;  %v2692_v17 = vld [vmem:[%s3032_s11 + $0x8] ss:$12 sps:$4 sm:$0xff]  }
  0xa7   : > { %1737 = vmatpush1.bf16.msra.mxu1 %v2605_v18  ;;  %1697 = vmatprep.subr.bf16.mxu0 %v2610_v19  ;;  %v3212_v18 = vcombine.low %v3155_v34, %v3155_v34  ;;  %v3216_v19 = vcombine.low %v3158_v35, %v3158_v35  ;;  %v2709_v34 = vld [vmem:[%s3032_s11 + $0x1e8] ss:$12 sps:$4 sm:$0xff]   ;;  %v2710_v35 = vld [vmem:[%s3032_s11 + $0x140] ss:$12 sps:$4 sm:$0xff]  }
  0xa8   : > { %1738 = vmatprep.subr.bf16.mxu1 %v2613_v20  ;;  %v2693_v20 = vld [vmem:[%s3032_s11 + $0x188] ss:$12 sps:$4 sm:$0xff]  }
  0xaa   : > { %1698 = vmatpush1.bf16.msra.mxu0 %v2608_v21  ;;  %v2694_v21 = vld [vmem:[%s3032_s11 + $0xe0] ss:$12 sps:$4 sm:$0xff]  }
  0xab   : > { %1739 = vmatpush1.bf16.msra.mxu1 %v2611_v22  ;;  %1699 = vmatprep.subr.bf16.mxu0 %v2616_v23  ;;  %v2695_v22 = vld [vmem:[%s3032_s11 + $0x260] ss:$12 sps:$4 sm:$0xff]  }
  0xac   : > { %1740 = vmatprep.subr.bf16.mxu1 %v2619_v24  ;;  %v2696_v23 = vld [vmem:[%s3032_s11 + $0x20] ss:$12 sps:$4 sm:$0xff]  }
  0xad   : > { %v2697_v24 = vld [vmem:[%s3032_s11 + $0x1a0] ss:$12 sps:$4 sm:$0xff]  }
  0xae   : > { %1700 = vmatpush1.bf16.msra.mxu0 %v2614_v25  ;;  %v2698_v25 = vld [vmem:[%s3032_s11 + $0xf8] ss:$12 sps:$4 sm:$0xff]  }
  0xaf   : > { %1741 = vmatpush1.bf16.msra.mxu1 %v2617_v26  ;;  %1701 = vmatprep.subr.bf16.mxu0 %v2622_v27  ;;  %v2699_v26 = vld [vmem:[%s3032_s11 + $0x278] ss:$12 sps:$4 sm:$0xff]  }
  0xb0   : > { %1742 = vmatprep.subr.bf16.mxu1 %v2625_v28  ;;  %v2700_v27 = vld [vmem:[%s3032_s11 + $0x38] ss:$12 sps:$4 sm:$0xff]  }
  0xb1   : > { %v2701_v28 = vld [vmem:[%s3032_s11 + $0x1b8] ss:$12 sps:$4 sm:$0xff]  }
  0xb2   : > { %1702 = vmatpush1.bf16.msra.mxu0 %v2620_v29  ;;  %v2702_v29 = vld [vmem:[%s3032_s11 + $0x110] ss:$12 sps:$4 sm:$0xff]  }
  0xb3   : > { %1743 = vmatpush1.bf16.msra.mxu1 %v2623_v30  ;;  %1703 = vmatprep.subr.bf16.mxu0 %v2628_v31  ;;  %v2703_v30 = vld [vmem:[%s3032_s11 + $0x290] ss:$12 sps:$4 sm:$0xff]  }
  0xb4   : > { %1744 = vmatprep.subr.bf16.mxu1 %v2631_v32  ;;  %v2704_v31 = vld [vmem:[%s3032_s11 + $0x50] ss:$12 sps:$4 sm:$0xff]  }
  0xb5   : > { %v2705_v32 = vld [vmem:[%s3032_s11 + $0x1d0] ss:$12 sps:$4 sm:$0xff]  }
  0xb6   : > { %1704 = vmatpush1.bf16.msra.mxu0 %v2626_v33  ;;  %v2708_v33 = vld [vmem:[%s3032_s11 + $0x68] ss:$12 sps:$4 sm:$0xff]  }
  0xb7   : > { %1745 = vmatpush1.bf16.msra.mxu1 %v2629_v36  ;;  %1705 = vmatprep.subr.bf16.mxu0 %v2634_v39  ;;  %v2711_v36 = vld [vmem:[%s3032_s11 + $0x2c0] ss:$12 sps:$4 sm:$0xff]  }
  0xb8   : > { %1746 = vmatprep.subr.bf16.mxu1 %v2637_v40  ;;  %v2712_v39 = vld [vmem:[%s3032_s11 + $0x80] ss:$12 sps:$4 sm:$0xff]  }
  0xb9   : > { %v2713_v40 = vld [vmem:[%s3032_s11 + $0x200] ss:$12 sps:$4 sm:$0xff]  }
  0xba   : > { %1706 = vmatpush1.bf16.msra.mxu0 %v2632_v41  ;;  %v2714_v41 = vld [vmem:[%s3032_s11 + $0x158] ss:$12 sps:$4 sm:$0xff]  }
  0xbb   : > { %1747 = vmatpush1.bf16.msra.mxu1 %v2635_v42  ;;  %1707 = vmatprep.subr.bf16.mxu0 %v2640_v43  ;;  %v2715_v42 = vld [vmem:[%s3032_s11 + $0x2d8] ss:$12 sps:$4 sm:$0xff]  }
  0xbc   : > { %1748 = vmatprep.subr.bf16.mxu1 %v2643_v44  ;;  %v2716_v43 = vld [vmem:[%s3032_s11 + $0x98] ss:$12 sps:$4 sm:$0xff]  }
  0xbd   : > { %v2717_v44 = vld [vmem:[%s3032_s11 + $0x218] ss:$12 sps:$4 sm:$0xff]  }
  0xbe   : > { %1708 = vmatpush1.bf16.msra.mxu0 %v2638_v45  ;;  %v2718_v45 = vld [vmem:[%s3032_s11 + $0x170] ss:$12 sps:$4 sm:$0xff]  }
  0xbf   : > { %1749 = vmatpush1.bf16.msra.mxu1 %v2641_v46  ;;  %1709 = vmatprep.subr.bf16.mxu0 %v2646_v47  ;;  %v2719_v46 = vld [vmem:[%s3032_s11 + $0x2f0] ss:$12 sps:$4 sm:$0xff]  }
  0xc0   : > { %1750 = vmatprep.subr.bf16.mxu1 %v2649_v49  ;;  %v2720_v47 = vld [vmem:[%s3032_s11 + $0xb0] ss:$12 sps:$4 sm:$0xff]  }
  0xc1   : > { %v2721_v49 = vld [vmem:[%s3032_s11 + $0x230] ss:$12 sps:$4 sm:$0xff]  }
  0xc2   : > { %1710 = vmatpush1.bf16.msra.mxu0 %v2644_v50  ;;  %v2722_v50 = vld [vmem:[%s3032_s11 + $0x3c8] ss:$12 sps:$4 sm:$0xff]  }
  0xc3   : > { %1751 = vmatpush1.bf16.msra.mxu1 %v2647_v51  ;;  %1711 = vmatprep.subr.bf16.mxu0 %v2652_v53  ;;  %v2723_v51 = vld [vmem:[%s3032_s11 + $0x548] ss:$12 sps:$4 sm:$0xff]  }
  0xc4   : > { %1752 = vmatprep.subr.bf16.mxu1 %v2655_v54  ;;  %v2724_v53 = vld [vmem:[%s3032_s11 + $0x308] ss:$12 sps:$4 sm:$0xff]  }
  0xc5   : > { %v2725_v54 = vld [vmem:[%s3032_s11 + $0x488] ss:$12 sps:$4 sm:$0xff]  }
  0xc6   : > { %1712 = vmatpush1.bf16.msra.mxu0 %v2650_v55  ;;  %v2726_v55 = vld [vmem:[%s3032_s11 + $0x3e0] ss:$12 sps:$4 sm:$0xff]  }
  0xc7   : > { %1753 = vmatpush1.bf16.msra.mxu1 %v2653_v56  ;;  %1713 = vmatprep.subr.bf16.mxu0 %v2658_v57  ;;  %v2727_v56 = vld [vmem:[%s3032_s11 + $0x560] ss:$12 sps:$4 sm:$0xff]  }
  0xc8   : > { %1754 = vmatprep.subr.bf16.mxu1 %v2661_v58  ;;  %v2728_v57 = vld [vmem:[%s3032_s11 + $0x320] ss:$12 sps:$4 sm:$0xff]  }
  0xc9   : > { %v2729_v58 = vld [vmem:[%s3032_s11 + $0x4a0] ss:$12 sps:$4 sm:$0xff]  }
  0xca   : > { %1714 = vmatpush1.bf16.msra.mxu0 %v2656_v59  ;;  %v2730_v59 = vld [vmem:[%s3032_s11 + $0x3f8] ss:$12 sps:$4 sm:$0xff]  }
  0xcb   : > { %1755 = vmatpush1.bf16.msra.mxu1 %v2659_v60  ;;  %1715 = vmatprep.subr.bf16.mxu0 %v2664_v61  ;;  %v2731_v60 = vld [vmem:[%s3032_s11 + $0x578] ss:$12 sps:$4 sm:$0xff]   ;;  %v2734_v61 = vld [vmem:[%s3032_s11 + $0x410] ss:$12 sps:$4 sm:$0xff]  }
  0xcc   : > { %1756 = vmatprep.subr.bf16.mxu1 %v2667_v62  ;;  %v2735_v62 = vld [vmem:[%s3032_s11 + $0x590] ss:$12 sps:$4 sm:$0xff]  }
  0xce   : > { %1716 = vmatpush1.bf16.msra.mxu0 %v2662_v63  ;;  %v2736_v63 = vld [vmem:[%s3032_s11 + $0x350] ss:$12 sps:$4 sm:$0xff]  }
  0xcf   : > { %1757 = vmatpush1.bf16.msra.mxu1 %v2665_v0  ;;  %1717 = vmatprep.subr.bf16.mxu0 %v2670_v1  ;;  %v2739_v0 = vld [vmem:[%s3032_s11 + $0x5a8] ss:$12 sps:$4 sm:$0xff]  }
  0xd0   : > { %1758 = vmatprep.subr.bf16.mxu1 %v2673_v2  ;;  %v2740_v1 = vld [vmem:[%s3032_s11 + $0x368] ss:$12 sps:$4 sm:$0xff]  }
  0xd1   : > { %v2741_v2 = vld [vmem:[%s3032_s11 + $0x4e8] ss:$12 sps:$4 sm:$0xff]  }
  0xd2   : > { %1718 = vmatpush1.bf16.msra.mxu0 %v2668_v3  ;;  %v2742_v3 = vld [vmem:[%s3032_s11 + $0x440] ss:$12 sps:$4 sm:$0xff]  }
  0xd3   : > { %1759 = vmatpush1.bf16.msra.mxu1 %v2671_v4  ;;  %1719 = vmatprep.subr.bf16.mxu0 %v2676_v5  ;;  %v2743_v4 = vld [vmem:[%s3032_s11 + $0x5c0] ss:$12 sps:$4 sm:$0xff]  }
  0xd4   : > { %1760 = vmatprep.subr.bf16.mxu1 %v2679_v6  ;;  %v2744_v5 = vld [vmem:[%s3032_s11 + $0x380] ss:$12 sps:$4 sm:$0xff]  }
  0xd5   : > { %v2745_v6 = vld [vmem:[%s3032_s11 + $0x500] ss:$12 sps:$4 sm:$0xff]  }
  0xd6   : > { %1720 = vmatpush1.bf16.msra.mxu0 %v2674_v9  ;;  %v2746_v9 = vld [vmem:[%s3032_s11 + $0x458] ss:$12 sps:$4 sm:$0xff]  }
  0xd7   : > { %1761 = vmatpush1.bf16.msra.mxu1 %v2677_v10  ;;  %1721 = vmatprep.subr.bf16.mxu0 %v2682_v11  ;;  %v2747_v10 = vld [vmem:[%s3032_s11 + $0x5d8] ss:$12 sps:$4 sm:$0xff]  }
  0xd8   : > { %1762 = vmatprep.subr.bf16.mxu1 %v2685_v12  ;;  %v2748_v11 = vld [vmem:[%s3032_s11 + $0x398] ss:$12 sps:$4 sm:$0xff]  }
  0xd9   : > { %v2749_v12 = vld [vmem:[%s3032_s11 + $0x518] ss:$12 sps:$4 sm:$0xff]  }
  0xda   : > { %1722 = vmatpush1.bf16.msra.mxu0 %v2680_v13  ;;  %v2750_v13 = vld [vmem:[%s3032_s11 + $0x470] ss:$12 sps:$4 sm:$0xff]  }
  0xdb   : > { %1763 = vmatpush1.bf16.msra.mxu1 %v2683_v14  ;;  %2330 = vmatprep.subr.bf16.mxu0 %v2690_v15  ;;  %v2751_v14 = vld [vmem:[%s3032_s11 + $0x5f0] ss:$12 sps:$4 sm:$0xff]  }
  0xdc   : > { %2352 = vmatprep.subr.bf16.mxu1 %v2691_v16  ;;  %v2752_v15 = vld [vmem:[%s3032_s11 + $0x3b0] ss:$12 sps:$4 sm:$0xff]  }
  0xdd   : > { %1724 = vmatmul.mubr.bf16.vlgmr.msra.gmra.mrb[4].mxu0 %v3212_v18  ;;  %v2753_v16 = vld [vmem:[%s3032_s11 + $0x530] ss:$12 sps:$4 sm:$0xff]  }
  0xde   : > { %1765 = vmatmul.mubr.bf16.vlgmr.msra.gmra.mrb[4].mxu1 %v3216_v19  ;;  %2331 = vmatpush3.bf16.msra.mxu0 %v2692_v17 }
  0xdf   : > { %2353 = vmatpush3.bf16.msra.mxu1 %v2693_v20  ;;  %2332 = vmatprep.subr.bf16.mxu0 %v2694_v21 }
  0xe0   : > { %2354 = vmatprep.subr.bf16.mxu1 %v2695_v22  ;;  %1805 = vmatprep.mubr.bf16.mxu0 %v3096_v48  ;;  %v2706_v48 = vld [vmem:[%s3032_s11 + $0x128] ss:$12 sps:$4 sm:$0xff]  }
  0xe1   : > { %1845 = vmatprep.mubr.bf16.mxu1 %v3101_v52  ;;  %v2707_v52 = vld [vmem:[%s3032_s11 + $0x2a8] ss:$12 sps:$4 sm:$0xff]  }
  0xe2   : > { %2333 = vmatpush3.bf16.msra.mxu0 %v2696_v23 }
  0xe3   : > { %2355 = vmatpush3.bf16.msra.mxu1 %v2697_v24  ;;  %2334 = vmatprep.subr.bf16.mxu0 %v2698_v25 }
  0xe4   : > { %2356 = vmatprep.subr.bf16.mxu1 %v2699_v26 }
  0xe6   : > { %2335 = vmatpush3.bf16.msra.mxu0 %v2700_v27 }
  0xe7   : > { %2357 = vmatpush3.bf16.msra.mxu1 %v2701_v28  ;;  %2336 = vmatprep.subr.bf16.mxu0 %v2702_v29 }
  0xe8   : > { %2358 = vmatprep.subr.bf16.mxu1 %v2703_v30 }
  0xea   : > { %2337 = vmatpush3.bf16.msra.mxu0 %v2704_v31 }
  0xeb   : > { %2359 = vmatpush3.bf16.msra.mxu1 %v2705_v32  ;;  %2338 = vmatprep.subr.bf16.mxu0 %v2706_v48 }
  0xec   : > { %2360 = vmatprep.subr.bf16.mxu1 %v2707_v52  ;;  %v294_v52 = vld [vmem:[#allocation2] sm:$0xff] }
  0xee   : > { %2339 = vmatpush3.bf16.msra.mxu0 %v2708_v33 }
  0xef   : > { %2361 = vmatpush3.bf16.msra.mxu1 %v2709_v34  ;;  %2340 = vmatprep.subr.bf16.mxu0 %v2710_v35  ;;  %v295_v35 = vld [vmem:[#allocation2 + $0x8] sm:$0xff] }
  0xf0   : > { %2362 = vmatprep.subr.bf16.mxu1 %v2711_v36 }
  0xf2   : > { %2341 = vmatpush3.bf16.msra.mxu0 %v2712_v39 }
  0xf3   : > { %2363 = vmatpush3.bf16.msra.mxu1 %v2713_v40  ;;  %2342 = vmatprep.subr.bf16.mxu0 %v2714_v41 }
  0xf4   : > { %2364 = vmatprep.subr.bf16.mxu1 %v2715_v42 }
  0xf6   : > { %2343 = vmatpush3.bf16.msra.mxu0 %v2716_v43 }
  0xf7   : > { %2365 = vmatpush3.bf16.msra.mxu1 %v2717_v44  ;;  %2344 = vmatprep.subr.bf16.mxu0 %v2718_v45 }
  0xf8   : > { %2366 = vmatprep.subr.bf16.mxu1 %v2719_v46 }
  0xfa   : > { %2345 = vmatpush3.bf16.msra.mxu0 %v2720_v47 }
  0xfb   : > { %2367 = vmatpush3.bf16.msra.mxu1 %v2721_v49  ;;  %2374 = vmatprep.subr.bf16.mxu0 %v2722_v50 }
  0xfc   : > { %2396 = vmatprep.subr.bf16.mxu1 %v2723_v51 }
  0xfd   : > { %1806 = vmatmul.mubr.bf16.vlgmr.msra.gmra.mrb[8].mxu0 %v3123_v7  ;;  %v2732_v7 = vld [vmem:[%s3032_s11 + $0x338] ss:$12 sps:$4 sm:$0xff]  }
  0xfe   : > { %1846 = vmatmul.mubr.bf16.vlgmr.msra.gmra.mrb[8].mxu1 %v3125_v8  ;;  %2375 = vmatpush3.bf16.msra.mxu0 %v2724_v53  ;;  %v2733_v8 = vld [vmem:[%s3032_s11 + $0x4b8] ss:$12 sps:$4 sm:$0xff]  }
  0xff   : > { %2397 = vmatpush3.bf16.msra.mxu1 %v2725_v54  ;;  %2376 = vmatprep.subr.bf16.mxu0 %v2726_v55 }
 0x100   : > { %2398 = vmatprep.subr.bf16.mxu1 %v2727_v56  ;;  %1885 = vmatprep.mubr.bf16.mxu0 %v3163_v37  ;;  %v2737_v37 = vld [vmem:[%s3032_s11 + $0x4d0] ss:$12 sps:$4 sm:$0xff]  }
 0x101   : > { %1925 = vmatprep.mubr.bf16.mxu1 %v3167_v38  ;;  %v2738_v38 = vld [vmem:[%s3032_s11 + $0x428] ss:$12 sps:$4 sm:$0xff]  }
 0x102   : > { %2377 = vmatpush3.bf16.msra.mxu0 %v2728_v57 }
 0x103   : > { %2399 = vmatpush3.bf16.msra.mxu1 %v2729_v58  ;;  %2378 = vmatprep.subr.bf16.mxu0 %v2730_v59 }
 0x104   : > { %2400 = vmatprep.subr.bf16.mxu1 %v2731_v60 }
 0x106   : > { %2379 = vmatpush3.bf16.msra.mxu0 %v2732_v7 }
 0x107   : > { %2401 = vmatpush3.bf16.msra.mxu1 %v2733_v8  ;;  %2380 = vmatprep.subr.bf16.mxu0 %v2734_v61 }
 0x108   : > { %2402 = vmatprep.subr.bf16.mxu1 %v2735_v62 }
 0x10a   : > { %2381 = vmatpush3.bf16.msra.mxu0 %v2736_v63 }
 0x10b   : > { %2403 = vmatpush3.bf16.msra.mxu1 %v2737_v37  ;;  %2382 = vmatprep.subr.bf16.mxu0 %v2738_v38  ;;  %v296_v38 = vld [vmem:[#allocation2 + $0x10] sm:$0xff] }
 0x10c   : > { %2404 = vmatprep.subr.bf16.mxu1 %v2739_v0 }
 0x10e   : > { %2383 = vmatpush3.bf16.msra.mxu0 %v2740_v1 }
 0x10f   : > { %2405 = vmatpush3.bf16.msra.mxu1 %v2741_v2  ;;  %2384 = vmatprep.subr.bf16.mxu0 %v2742_v3  ;;  %v1948_v2 = vlaneseq (!%p2321_p7) }
 0x110   : > { %2406 = vmatprep.subr.bf16.mxu1 %v2743_v4  ;;  %v1946_v4 = vld [vmem:[#allocation5] sm:$0x7] (!%p2321_p7) }
 0x111   : > { %v1949_v3 = vshrl.u32 (!%p2321_p7), %v1948_v2, 7 }
 0x112   : > { %2385 = vmatpush3.bf16.msra.mxu0 %v2744_v5 }
 0x113   : > { %2407 = vmatpush3.bf16.msra.mxu1 %v2745_v6  ;;  %2386 = vmatprep.subr.bf16.mxu0 %v2746_v9  ;;  %v1950_v5 = vsub.s32 (!%p2321_p7), 0, %v1949_v3  ;;  %v1954_v6 = vsub.s32 (!%p2321_p7), 1, %v1949_v3  ;;  %v1958_v9 = vsub.s32 (!%p2321_p7), 2, %v1949_v3 }
 0x114   : > { %2408 = vmatprep.subr.bf16.mxu1 %v2747_v10 }
 0x116   : > { %2387 = vmatpush3.bf16.msra.mxu0 %v2748_v11 }
 0x117   : > { %2409 = vmatpush3.bf16.msra.mxu1 %v2749_v12  ;;  %2388 = vmatprep.subr.bf16.mxu0 %v2750_v13  ;;  %v1951_v13 = vrot.slane (!%p2321_p7), %v1946_v4, %v1950_v5 }
 0x118   : > { %2410 = vmatprep.subr.bf16.mxu1 %v2751_v14  ;;  %v1955_v14 = vrot.slane (!%p2321_p7), %v1946_v4, %v1954_v6 }
 0x11a   : > { %2389 = vmatpush3.bf16.msra.mxu0 %v2752_v15  ;;  %v1959_v15 = vrot.slane (!%p2321_p7), %v1946_v4, %v1958_v9 }
 0x11b   : > { %2411 = vmatpush3.bf16.msra.mxu1 %v2753_v16 }
 0x11d   : > { %1886 = vmatmul.mubr.bf16.vlgmr.msra.gmra.mrb[12].mxu0 %v3212_v18 }
 0x11e   : > { %1926 = vmatmul.mubr.bf16.vlgmr.msra.gmra.mrb[12].mxu1 %v3216_v19 }
 0x170   : > { %v1643_v17 = vpop.f32.mrb[0].mxu0 }
 0x171   : > { %v1684_v20 = vpop.f32.mrb[0].mxu1  ;;  %v1645_v22 = vpop.f32.mrb[1].mxu0 }
 0x172   : > { %v1685_v21 = vadd.f32 %v1684_v20, %v1643_v17  ;;  %v1686_v23 = vpop.f32.mrb[1].mxu1  ;;  %v1647_v25 = vpop.f32.mrb[2].mxu0 }
 0x173   : > { %v1687_v24 = vadd.f32 %v1686_v23, %v1645_v22  ;;  %v1688_v26 = vpop.f32.mrb[2].mxu1  ;;  %v1648_v27 = vpop.f32.mrb[3].mxu0 }
 0x174   : > { %v1689_v28 = vpop.f32.mrb[3].mxu1 }
 0x1b0   : > { %v1725_v29 = vpop.f32.mrb[4].mxu0 }
 0x1b1   : > { %v1766_v30 = vpop.f32.mrb[4].mxu1  ;;  %v1726_v31 = vadd.f32 %v1725_v29, %v1685_v21  ;;  %v1727_v32 = vpop.f32.mrb[5].mxu0 }
 0x1b2   : > { %v1768_v48 = vpop.f32.mrb[5].mxu1  ;;  %v1728_v33 = vadd.f32 %v1727_v32, %v1687_v24  ;;  %v1729_v18 = vpop.f32.mrb[6].mxu0 }
 0x1b3   : > { %v1770_v34 = vpop.f32.mrb[6].mxu1  ;;  %v1767_v19 = vadd.f32 %v1766_v30, %v1726_v31  ;;  %v1730_v36 = vpop.f32.mrb[7].mxu0 }
 0x1b4   : > { %v1771_v39 = vpop.f32.mrb[7].mxu1  ;;  %v1769_v40 = vadd.f32 %v1768_v48, %v1728_v33 }
 0x1b5   : > { %v1933_v41 = vadd.f32 %v1767_v19, %v294_v52 }
 0x1b6   : > { %v1934_v42 = vadd.f32 %v1769_v40, %v295_v35 }
 0x1b7   : > { %1936 = vst [vmem:[#allocation2] sm:$0xff] %v1933_v41 }
 0x1b8   : > { %1937 = vst [vmem:[#allocation2 + $0x8] sm:$0xff] %v1934_v42 }
 0x1be   : > { %v1943_v10 = vld [vmem:[#allocation2] sm:$0xff] (!%p2321_p7) }
 0x1bf   : > { %v1944_v11 = vld [vmem:[#allocation2 + $0x8] sm:$0xff] (!%p2321_p7)  ;;  %v1963_v16 = vadd.f32 (!%p2321_p7), %v1951_v13, %v1943_v10 }
 0x1c0   : > { %v1964_v17 = vadd.f32 (!%p2321_p7), %v1955_v14, %v1944_v11 }
 0x1c1   : > { %v1966_v21 = vmax.f32 (!%p2321_p7), %v1963_v16, 0.0 }
 0x1c2   : > { %v1967_v22 = vmax.f32 (!%p2321_p7), %v1964_v17, 0.0 }
 0x1c4   : > { %v2328_v24 = vpack.c.bf16 (!%p2321_p7), %v1967_v22, %v1966_v21 }
 0x1c6   : > { %1982 = vst [vmem:[%s3317_s3] sm:$0xff] (!%p2321_p7), %v2328_v24 }
 0x1d0   : > { %v2346_v43 = vpop.f32.mrb[8].mxu0 }
 0x1d1   : > { %v2368_v44 = vpop.f32.mrb[8].mxu1  ;;  %v2347_v45 = vpop.f32.mrb[9].mxu0 }
 0x1d2   : > { %v2369_v46 = vpop.f32.mrb[9].mxu1  ;;  %v2348_v47 = vadd.f32 %v2347_v45, %v2346_v43  ;;  %v2349_v50 = vpop.f32.mrb[10].mxu0 }
 0x1d3   : > { %v2370_v49 = vadd.f32 %v2369_v46, %v2368_v44  ;;  %v2371_v51 = vpop.f32.mrb[10].mxu1  ;;  %v2350_v53 = vpop.f32.mrb[11].mxu0 }
 0x1d4   : > { %v2372_v54 = vpop.f32.mrb[11].mxu1 }
 0x1d5   : > { %v1848_v55 = vadd.f32 %v2370_v49, %v2348_v47 }
 0x1f0   : > { %v2390_v56 = vpop.f32.mrb[12].mxu0 }
 0x1f1   : > { %v2412_v57 = vpop.f32.mrb[12].mxu1  ;;  %v2391_v58 = vpop.f32.mrb[13].mxu0 }
 0x1f2   : > { %v2413_v59 = vpop.f32.mrb[13].mxu1  ;;  %v2392_v60 = vadd.f32 %v2391_v58, %v2390_v56  ;;  %v2393_v8 = vpop.f32.mrb[14].mxu0 }
 0x1f3   : > { %v2414_v7 = vadd.f32 %v2413_v59, %v2412_v57  ;;  %v2415_v61 = vpop.f32.mrb[14].mxu1  ;;  %v2394_v62 = vpop.f32.mrb[15].mxu0 }
 0x1f4   : > { %v2416_v63 = vpop.f32.mrb[15].mxu1  ;;  %v1888_v37 = vadd.f32 %v2392_v60, %v1848_v55  ;;  %1942 = sbr.rel (%p2321_p7) target bundleno = 521 (0x209), region = 48 }
 0x1f6   : > { %v1928_v0 = vadd.f32 %v2414_v7, %v1888_v37 }
 0x1f8   : > { %v1935_v1 = vadd.f32 %v1928_v0, %v296_v38 }
 0x1fa   : > { %1938 = vst [vmem:[#allocation2 + $0x10] sm:$0xff] %v1935_v1 }
 0x201   : > { %v1945_v12 = vld [vmem:[#allocation2 + $0x10] sm:$0xff] }
 0x202   : > { %v1965_v20 = vadd.f32 %v1959_v15, %v1945_v12 }
 0x204   : > { %v1968_v23 = vmax.f32 %v1965_v20, 0.0 }
 0x206   : > { %v2329_v25 = vpack.c.bf16 %v1968_v23, %v1968_v23 }
 0x208   : > { %1983 = vst [vmem:[%s3317_s3 + $0x8] sm:$0xf] %v2329_v25 }
 0x209 PF: > { %s17_s17 = sadd.s32 1, %s2866_s17   ;;  %s3333_s6 = smov %s3340_s12 }
 0x20a   : > { %p14_p9 = scmp.ge.s32.totalorder %s17_s17, 6   ;;  %s3334_s12 = smov %s2850_s13 }
 0x20b   : > { %s3335_s13 = smov %s2854_s14  ;;  %s3336_s14 = smov %s3027_s7 }
 0x20c   : > { %s3337_s15 = smov %s2862_s16  ;;  %s3338_s16 = smov %s3333_s6 }
 0x20d   :  { %16 = sbr.rel (!%p14_p9) target bundleno = 5 (0x5), region = 88 }
 0x214   :  { %2014 = vsyncpa [#allocation4], 1 }
 0x215   :  { %2016 = vsyncpa [#allocation4 + $0x1], 1 }
 0x216   :  { %2017 = vsyncpa [#allocation6], 1 }

// kernel: lego_forward.9
= control target key start
LH: loop header
LB: loop body
LE: loop exit
PB: predicated region body
PF: predicated region fallthrough
CT: control target
= control target key end

     0   :  { %v193_v0 = vmov 0.0   ;;  %vm194_vm0 = vmmov 0   ;;  %s248_s1 = inlined_call_operand.vmem [shape: bf16[128,128], index: 1, kind: input, shape index: {}]   ;;  %s249_s0 = inlined_call_operand.vmem [shape: bf16[8,128], index: 0, kind: input, shape index: {}]   ;;  %s250_s2 = inlined_call_operand.vmem [shape: f32[1,128], index: 2, kind: input, shape index: {}]   ;;  %s251_s3 = inlined_call_operand.vmem [shape: f32[8,128], index: 3, kind: output, shape index: {}]  }
   0x1   :  { %163 = vmatprep.subr.bf16.mxu0 %v193_v0  ;;  %v185_v1 = vld [vmem:[%s248_s1] sm:$0xff]   ;;  %179 = vmatprep.mubr.msk.bf16.mxu0 %vm194_vm0, %v193_v0  ;;  %v186_v2 = vld [vmem:[%s248_s1 + $0x8] sm:$0xff]   ;;  %v187_v3 = vld [vmem:[%s248_s1 + $0x10] sm:$0xff]  }
   0x2   :  { %164 = vmatpush3.bf16.msra.mxu0 %v185_v1  ;;  %v188_v4 = vld [vmem:[%s248_s1 + $0x18] sm:$0xff]   ;;  %v189_v5 = vld [vmem:[%s248_s1 + $0x20] sm:$0xff]   ;;  %v190_v6 = vld [vmem:[%s248_s1 + $0x28] sm:$0xff]  }
   0x3   :  { %165 = vmatprep.subr.bf16.mxu0 %v193_v0  ;;  %v191_v7 = vld [vmem:[%s248_s1 + $0x30] sm:$0xff]   ;;  %v192_v8 = vld [vmem:[%s248_s1 + $0x38] sm:$0xff]   ;;  %v21_v9 = vld [vmem:[%s249_s0] sm:$0xf] }
   0x4   :  { %v153_v10 = vld [vmem:[%s250_s2] ss:$0 sm:$0xff] }
   0x6   :  { %166 = vmatpush3.bf16.msra.mxu0 %v186_v2 }
   0x7   :  { %167 = vmatprep.subr.bf16.mxu0 %v193_v0 }
   0xa   :  { %168 = vmatpush3.bf16.msra.mxu0 %v187_v3 }
   0xb   :  { %169 = vmatprep.subr.bf16.mxu0 %v193_v0 }
   0xe   :  { %170 = vmatpush3.bf16.msra.mxu0 %v188_v4 }
   0xf   :  { %171 = vmatprep.subr.bf16.mxu0 %v193_v0 }
  0x12   :  { %172 = vmatpush3.bf16.msra.mxu0 %v189_v5 }
  0x13   :  { %173 = vmatprep.subr.bf16.mxu0 %v193_v0 }
  0x16   :  { %174 = vmatpush3.bf16.msra.mxu0 %v190_v6 }
  0x17   :  { %175 = vmatprep.subr.bf16.mxu0 %v193_v0 }
  0x1a   :  { %176 = vmatpush3.bf16.msra.mxu0 %v191_v7 }
  0x1b   :  { %177 = vmatprep.subr.bf16.mxu0 %v193_v0 }
  0x1e   :  { %178 = vmatpush3.bf16.msra.mxu0 %v192_v8 }
  0x21   :  { %180 = vmatmul.mubr.bf16.vlgmr.msra.gmra.mrb[0].mxu0 %v21_v9 }
  0xf4   :  { %v120_v11 = vpop.f32.mrb[0].mxu0 }
  0xf5   :  { %v139_v12 = vadd.f32 %v153_v10, %v120_v11  ;;  %v181_v13 = vpop.f32.mrb[1].mxu0 }
  0xf6   :  { %v123_v14 = vpop.f32.mrb[2].mxu0 }
  0xf7   :  { %140 = vst [vmem:[%s251_s3] sm:$0xff] %v139_v12  ;;  %v182_v15 = vpop.f32.mrb[3].mxu0 }

</bundles_post_ra>
